<compile_context>
chip_gen: v6e
topology: v6e:2x2x1
jax: 0.10.0
libtpu: 0.0.40
codegen_flags: <defaults>
</compile_context>

<pallas_src>
import numpy as np
import jax
import jax.numpy as jnp
from jax import lax
from jax.experimental import pallas as pl
from jax.experimental.pallas import tpu as pltpu

jax.config.update("jax_default_matmul_precision", "highest")


def ntm_memory_kernel(ctrl_ref, mem_ref, pww_ref, pwr_ref, wbfc_ref,
                      mem_out_ref, read_out_ref):
    """ctrl: (B,C)  mem: (B,N,W)  prev_w_*: (B,N)
       wbfc: (C+1, 4W+12) fused [fc_write | fc_read] weights, biases in last row.
       Outputs: mem_out (B,N,W), read_out (B,W)."""
    ctrl = ctrl_ref[...]
    mem = mem_ref[...]
    B, N, W = mem.shape
    C = ctrl.shape[1]
    hi = lax.Precision.HIGHEST

    # fused fc_write + fc_read projection: one MXU push, bias row folded into wbfc.
    wbfc = wbfc_ref[...]
    info = (jnp.dot(ctrl, wbfc[0:C, :],
                    preferred_element_type=jnp.float32, precision=hi)
            + wbfc[C:C + 1, :])                                       # (B, 4W+12)

    # +-1 circular shift matrices generated in-kernel (no HBM constants / extra
    # input DMAs):  (w @ m_prev)[i] = w[(i-1) % N],  (w @ m_next)[i] = w[(i+1) % N].
    rows = lax.broadcasted_iota(jnp.int32, (N, N), 0)
    cols = lax.broadcasted_iota(jnp.int32, (N, N), 1)
    m_prev = jnp.where((rows == cols - 1) | ((cols == 0) & (rows == N - 1)),
                       1.0, 0.0).astype(jnp.float32)
    m_next = jnp.where((rows == cols + 1) | ((cols == N - 1) & (rows == 0)),
                       1.0, 0.0).astype(jnp.float32)

    def softmax_lastdim(x):
        m = jnp.max(x, axis=-1, keepdims=True)
        e = jnp.exp(x - m)
        return e / jnp.sum(e, axis=-1, keepdims=True)

    def sigmoid(x):
        return 1.0 / (1.0 + jnp.exp(-x))

    def address(m3, key, beta, g, s, gamma, prev_w):
        # content addressing: cosine similarity sharpened by beta, softmax over slots
        key = jnp.tanh(key)                                           # (B,W)
        beta = jnp.maximum(beta, 0.0)                                 # (B,1)
        dot = jnp.sum(m3 * key[:, None, :], axis=-1)                  # (B,N) lane reduce
        mem_norm = jnp.sqrt(jnp.sum(m3 * m3, axis=-1))                # (B,N)
        key_norm = jnp.sqrt(jnp.sum(key * key, axis=-1, keepdims=True))  # (B,1)
        cos = dot / (jnp.maximum(mem_norm, 1e-8) * jnp.maximum(key_norm, 1e-8))
        w = softmax_lastdim(beta * cos)                               # (B,N)
        # interpolation gate with previous step's weights
        g = sigmoid(g)
        w = g * w + (1.0 - g) * prev_w
        # circular 3-tap shift convolution, vectorized over batch via exact 0/1
        # shift-matrix matmuls (MXU) + a per-batch VPU blend
        s = softmax_lastdim(s)                                        # (B,3)
        w_prev = jnp.dot(w, m_prev, preferred_element_type=jnp.float32, precision=hi)
        w_next = jnp.dot(w, m_next, preferred_element_type=jnp.float32, precision=hi)
        w = s[:, 0:1] * w_prev + s[:, 1:2] * w + s[:, 2:3] * w_next
        # sharpening; normalizing sum is over the whole (B,N) batch (faithful to the
        # PyTorch module).  Clamp guards log(0) -> -inf on exact-zero weights.
        gamma = 1.0 + jnp.maximum(gamma, 0.0)                         # (B,1)
        wg = jnp.exp(gamma * jnp.log(jnp.maximum(w, 1e-30)))
        total = jnp.sum(jnp.sum(wg, axis=1, keepdims=True), axis=0, keepdims=True)
        return wg / total

    # ---------------- write head ----------------
    key_w   = info[:, 0:W]
    erase   = info[:, W:2 * W]
    add     = info[:, 2 * W:3 * W]
    beta_w  = info[:, 3 * W:3 * W + 1]
    g_w     = info[:, 3 * W + 1:3 * W + 2]
    s_w     = info[:, 3 * W + 2:3 * W + 5]
    gamma_w = info[:, 3 * W + 5:3 * W + 6]
    w_w = address(mem, key_w, beta_w, g_w, s_w, gamma_w, pww_ref[...])
    mem_new = (mem * (1.0 - w_w[:, :, None] * erase[:, None, :])
               + w_w[:, :, None] * add[:, None, :])
    mem_out_ref[...] = mem_new

    # ---------------- read head ----------------
    r0 = 3 * W + 6
    key_r   = info[:, r0:r0 + W]
    beta_r  = info[:, r0 + W:r0 + W + 1]
    g_r     = info[:, r0 + W + 1:r0 + W + 2]
    s_r     = info[:, r0 + W + 2:r0 + W + 5]
    gamma_r = info[:, r0 + W + 5:r0 + W + 6]
    w_r = address(mem_new, key_r, beta_r, g_r, s_r, gamma_r, pwr_ref[...])
    # read = w_r @ mem' on the MXU (B tiny mat-vecs) instead of a 64-deep
    # cross-sublane reduce over a (B,N,W) temporary.
    for b in range(B):                                                 # static unroll
        read_out_ref[b:b + 1, :] = jnp.dot(
            w_r[b:b + 1, :], mem_new[b],
            preferred_element_type=jnp.float32, precision=hi)


def prepare_ntm_params(params):
    """One-time parameter prep (hoisted out of the per-step function): fuse
    fc_write + fc_read into a single (C+1, 4W+12) matrix with the biases as the
    last row, so each step ships exactly one parameter array to the kernel."""
    wfc = jnp.concatenate([params["W_write"].T, params["W_read"].T], axis=1)  # (C, 4W+12)
    bfc = jnp.concatenate([params["b_write"], params["b_read"]])[None, :]     # (1, 4W+12)
    return jnp.concatenate([wfc, bfc], axis=0).astype(jnp.float32)            # (C+1, 4W+12)


def ntm_memory_forward(state, wb_fc):
    """state: {'ctrl_hid' (B,C), 'mem' (B,N,W), 'prev_w_write' (B,N), 'prev_w_read' (B,N)}.
       wb_fc: output of prepare_ntm_params.  Returns new state dict with updated
       'mem' and added 'read' (like NtmMemory.forward)."""
    # TODO(synk): for full-sequence rollouts, carry mem/prev_w in VMEM scratch across
    # a T grid axis (and shard a larger B across TCs on v7x); out of scope for the
    # single-step module forward implemented here.
    ctrl = state["ctrl_hid"].astype(jnp.float32)
    mem = state["mem"].astype(jnp.float32)
    pww = state["prev_w_write"].astype(jnp.float32)
    pwr = state["prev_w_read"].astype(jnp.float32)
    B, N, W = mem.shape

    vmem = pl.BlockSpec(memory_space=pltpu.MemorySpace.VMEM)
    mem_new, read = pl.pallas_call(
        ntm_memory_kernel,
        out_shape=(jax.ShapeDtypeStruct((B, N, W), jnp.float32),
                   jax.ShapeDtypeStruct((B, W), jnp.float32)),
        in_specs=[vmem] * 5,
        out_specs=(vmem, vmem),
    )(ctrl, mem, pww, pwr, wb_fc)

    new_state = dict(state)
    new_state["mem"] = mem_new
    new_state["read"] = read
    return new_state


def reference_forward(state, params):
    """Straight pure-JAX translation of NtmMemory.forward (for correctness check)."""
    W = params["W_read"].shape[0] - 6
    ctrl = state["ctrl_hid"]
    mem = state["mem"]
    hi = lax.Precision.HIGHEST

    def address(mem, key, beta, g, s, gamma, prev_w):
        key = jnp.tanh(key)
        beta = jax.nn.relu(beta)
        dot = jnp.sum(mem * key[:, None, :], axis=-1)
        mem_norm = jnp.linalg.norm(mem, axis=-1)
        key_norm = jnp.linalg.norm(key, axis=-1, keepdims=True)
        cos = dot / (jnp.maximum(mem_norm, 1e-8) * jnp.maximum(key_norm, 1e-8))
        w = jax.nn.softmax(beta * cos, axis=1)
        g = jax.nn.sigmoid(g)
        w = g * w + (1.0 - g) * prev_w
        s = jax.nn.softmax(s, axis=1)
        w = (s[:, 0:1] * jnp.roll(w, 1, axis=1)
             + s[:, 1:2] * w
             + s[:, 2:3] * jnp.roll(w, -1, axis=1))
        gamma = 1.0 + jax.nn.relu(gamma)
        wg = w ** gamma
        return wg / jnp.sum(wg)          # batch-global sum, as in the PyTorch module

    write_info = jnp.dot(ctrl, params["W_write"].T, precision=hi) + params["b_write"]
    key, erase, add = write_info[:, :W], write_info[:, W:2 * W], write_info[:, 2 * W:3 * W]
    beta, g = write_info[:, 3 * W:3 * W + 1], write_info[:, 3 * W + 1:3 * W + 2]
    s, gamma = write_info[:, 3 * W + 2:3 * W + 5], write_info[:, 3 * W + 5:3 * W + 6]
    w = address(mem, key, beta, g, s, gamma, state["prev_w_write"])
    mem = (mem * (1.0 - w[:, :, None] * erase[:, None, :])
           + w[:, :, None] * add[:, None, :])

    read_info = jnp.dot(ctrl, params["W_read"].T, precision=hi) + params["b_read"]
    key = read_info[:, :W]
    beta, g = read_info[:, W:W + 1], read_info[:, W + 1:W + 2]
    s, gamma = read_info[:, W + 2:W + 5], read_info[:, W + 5:W + 6]
    w = address(mem, key, beta, g, s, gamma, state["prev_w_read"])
    read = jnp.einsum("bn,bnw->bw", w, mem, precision=hi)
    return mem, read


if __name__ == "__main__":
    ctrl_size, mem_size, word_size = 32, 64, 32
    B = 4

    key = jax.random.PRNGKey(0)
    ks = jax.random.split(key, 8)

    sd_fc = 1.0 / np.sqrt(ctrl_size)
    params = {
        "W_write": jax.random.uniform(ks[0], (3 * word_size + 6, ctrl_size),
                                      jnp.float32, -sd_fc, sd_fc),
        "b_write": jax.random.uniform(ks[1], (3 * word_size + 6,),
                                      jnp.float32, -sd_fc, sd_fc),
        "W_read": jax.random.uniform(ks[2], (word_size + 6, ctrl_size),
                                     jnp.float32, -sd_fc, sd_fc),
        "b_read": jax.random.uniform(ks[3], (word_size + 6,),
                                     jnp.float32, -sd_fc, sd_fc),
    }

    sd_mem = 1.0 / np.sqrt(mem_size + word_size)
    mem_init = jax.random.uniform(ks[4], (mem_size, word_size), jnp.float32,
                                  -sd_mem, sd_mem)
    state = {
        "mem": jnp.tile(mem_init[None], (B, 1, 1)),                 # mem_init repeated per batch
        "ctrl_hid": jax.random.normal(ks[5], (B, ctrl_size), jnp.float32),
        # previous-step attention weights (init_state gives zeros; softmax weights here
        # exercise the interpolation gate as in a mid-sequence step)
        "prev_w_write": jax.nn.softmax(jax.random.normal(ks[6], (B, mem_size)), axis=1),
        "prev_w_read": jax.nn.softmax(jax.random.normal(ks[7], (B, mem_size)), axis=1),
    }

    wb_fc = prepare_ntm_params(params)      # once per parameter set, outside the step jit
    forward = jax.jit(ntm_memory_forward)
    out_state = forward(state, wb_fc)
    mem_new = jax.block_until_ready(out_state["mem"])
    read = jax.block_until_ready(out_state["read"])

    ref_mem, ref_read = reference_forward(state, params)
    assert np.allclose(np.asarray(mem_new), np.asarray(ref_mem), atol=1e-4, rtol=1e-4), \
        "Pallas NtmMemory kernel: mem mismatch vs JAX reference"
    assert np.allclose(np.asarray(read), np.asarray(ref_read), atol=1e-4, rtol=1e-4), \
        "Pallas NtmMemory kernel: read mismatch vs JAX reference"

    print("KERNEL_OK")
</pallas_src>

<mosaic_0001>
module attributes {stable_mosaic.version = 11 : i64} {
  func.func @ntm_memory_kernel(%arg0: memref<4x32xf32, #tpu.memory_space<vmem>>, %arg1: memref<4x64x32xf32, #tpu.memory_space<vmem>>, %arg2: memref<4x64xf32, #tpu.memory_space<vmem>>, %arg3: memref<4x64xf32, #tpu.memory_space<vmem>>, %arg4: memref<33x140xf32, #tpu.memory_space<vmem>>, %arg5: memref<4x64x32xf32, #tpu.memory_space<vmem>>, %arg6: memref<4x32xf32, #tpu.memory_space<vmem>>) attributes {dimension_semantics = [], scalar_prefetch = 0 : i64, scratch_operands = 0 : i64, tpu.core_type = #tpu.core_type<tc>} {
    %c0 = arith.constant 0 : index
    %c0_0 = arith.constant 0 : index
    %0 = vector.load %arg0[%c0, %c0_0] : memref<4x32xf32, #tpu.memory_space<vmem>>, vector<4x32xf32>
    %c0_1 = arith.constant 0 : index
    %c0_2 = arith.constant 0 : index
    %c0_3 = arith.constant 0 : index
    %1 = vector.load %arg1[%c0_1, %c0_2, %c0_3] : memref<4x64x32xf32, #tpu.memory_space<vmem>>, vector<4x64x32xf32>
    %c0_4 = arith.constant 0 : index
    %c0_5 = arith.constant 0 : index
    %2 = vector.load %arg4[%c0_4, %c0_5] : memref<33x140xf32, #tpu.memory_space<vmem>>, vector<33x140xf32>
    %3 = vector.extract_strided_slice %2 {offsets = [0, 0], sizes = [32, 140], strides = [1, 1]} : vector<33x140xf32> to vector<32x140xf32>
    %cst = arith.constant dense<0.000000e+00> : vector<4x140xf32>
    %4 = tpu.matmul %0, %3, %cst {dimension_numbers = #tpu.dot_dimension_numbers<[1], [0], [0], [1], [0, 0, 1, 1], [], []>, precision = #tpu.contract_precision<fp32>} : vector<4x32xf32>, vector<32x140xf32>, vector<4x140xf32> -> vector<4x140xf32>
    %5 = vector.extract_strided_slice %2 {offsets = [32, 0], sizes = [1, 140], strides = [1, 1]} : vector<33x140xf32> to vector<1x140xf32>
    %6 = vector.broadcast %5 : vector<1x140xf32> to vector<4x140xf32>
    %7 = arith.addf %4, %6 : vector<4x140xf32>
    %8 = tpu.iota {dimensions = array<i32: 0>} : vector<64x64xi32>
    %9 = tpu.iota {dimensions = array<i32: 1>} : vector<64x64xi32>
    %c1_i32 = arith.constant 1 : i32
    %10 = vector.broadcast %c1_i32 : i32 to vector<64x64xi32>
    %11 = arith.subi %9, %10 : vector<64x64xi32>
    %12 = arith.cmpi eq, %8, %11 : vector<64x64xi32>
    %c0_i32 = arith.constant 0 : i32
    %13 = vector.broadcast %c0_i32 : i32 to vector<64x64xi32>
    %14 = arith.cmpi eq, %9, %13 : vector<64x64xi32>
    %c63_i32 = arith.constant 63 : i32
    %15 = vector.broadcast %c63_i32 : i32 to vector<64x64xi32>
    %16 = arith.cmpi eq, %8, %15 : vector<64x64xi32>
    %17 = arith.andi %14, %16 : vector<64x64xi1>
    %18 = arith.ori %12, %17 : vector<64x64xi1>
    %cst_6 = arith.constant 1.000000e+00 : f32
    %cst_7 = arith.constant 0.000000e+00 : f32
    %19 = vector.broadcast %cst_6 : f32 to vector<64x64xf32>
    %20 = vector.broadcast %cst_7 : f32 to vector<64x64xf32>
    %21 = arith.select %18, %19, %20 : vector<64x64xi1>, vector<64x64xf32>
    %c1_i32_8 = arith.constant 1 : i32
    %22 = vector.broadcast %c1_i32_8 : i32 to vector<64x64xi32>
    %23 = arith.addi %9, %22 : vector<64x64xi32>
    %24 = arith.cmpi eq, %8, %23 : vector<64x64xi32>
    %c63_i32_9 = arith.constant 63 : i32
    %25 = vector.broadcast %c63_i32_9 : i32 to vector<64x64xi32>
    %26 = arith.cmpi eq, %9, %25 : vector<64x64xi32>
    %c0_i32_10 = arith.constant 0 : i32
    %27 = vector.broadcast %c0_i32_10 : i32 to vector<64x64xi32>
    %28 = arith.cmpi eq, %8, %27 : vector<64x64xi32>
    %29 = arith.andi %26, %28 : vector<64x64xi1>
    %30 = arith.ori %24, %29 : vector<64x64xi1>
    %cst_11 = arith.constant 1.000000e+00 : f32
    %cst_12 = arith.constant 0.000000e+00 : f32
    %31 = vector.broadcast %cst_11 : f32 to vector<64x64xf32>
    %32 = vector.broadcast %cst_12 : f32 to vector<64x64xf32>
    %33 = arith.select %30, %31, %32 : vector<64x64xi1>, vector<64x64xf32>
    %34 = vector.extract_strided_slice %7 {offsets = [0, 0], sizes = [4, 32], strides = [1, 1]} : vector<4x140xf32> to vector<4x32xf32>
    %35 = vector.extract_strided_slice %7 {offsets = [0, 32], sizes = [4, 32], strides = [1, 1]} : vector<4x140xf32> to vector<4x32xf32>
    %36 = vector.extract_strided_slice %7 {offsets = [0, 64], sizes = [4, 32], strides = [1, 1]} : vector<4x140xf32> to vector<4x32xf32>
    %37 = vector.extract_strided_slice %7 {offsets = [0, 96], sizes = [4, 1], strides = [1, 1]} : vector<4x140xf32> to vector<4x1xf32>
    %38 = vector.extract_strided_slice %7 {offsets = [0, 97], sizes = [4, 1], strides = [1, 1]} : vector<4x140xf32> to vector<4x1xf32>
    %39 = vector.extract_strided_slice %7 {offsets = [0, 98], sizes = [4, 3], strides = [1, 1]} : vector<4x140xf32> to vector<4x3xf32>
    %40 = vector.extract_strided_slice %7 {offsets = [0, 101], sizes = [4, 1], strides = [1, 1]} : vector<4x140xf32> to vector<4x1xf32>
    %c0_13 = arith.constant 0 : index
    %c0_14 = arith.constant 0 : index
    %41 = vector.load %arg2[%c0_13, %c0_14] : memref<4x64xf32, #tpu.memory_space<vmem>>, vector<4x64xf32>
    %42 = math.tanh %34 : vector<4x32xf32>
    %cst_15 = arith.constant 0.000000e+00 : f32
    %43 = vector.broadcast %cst_15 : f32 to vector<4x1xf32>
    %44 = arith.maximumf %37, %43 : vector<4x1xf32>
    %45 = vector.shape_cast %42 : vector<4x32xf32> to vector<4x1x32xf32>
    %46 = vector.broadcast %45 : vector<4x1x32xf32> to vector<4x64x32xf32>
    %47 = arith.mulf %1, %46 : vector<4x64x32xf32>
    %cst_16 = arith.constant dense<0.000000e+00> : vector<4x64xf32>
    %48 = vector.multi_reduction <add>, %47, %cst_16 [2] : vector<4x64x32xf32> to vector<4x64xf32>
    %49 = arith.mulf %1, %1 : vector<4x64x32xf32>
    %cst_17 = arith.constant dense<0.000000e+00> : vector<4x64xf32>
    %50 = vector.multi_reduction <add>, %49, %cst_17 [2] : vector<4x64x32xf32> to vector<4x64xf32>
    %51 = math.sqrt %50 : vector<4x64xf32>
    %52 = arith.mulf %42, %42 : vector<4x32xf32>
    %cst_18 = arith.constant dense<0.000000e+00> : vector<4xf32>
    %53 = vector.multi_reduction <add>, %52, %cst_18 [1] : vector<4x32xf32> to vector<4xf32>
    %54 = vector.shape_cast %53 : vector<4xf32> to vector<4x1xf32>
    %55 = math.sqrt %54 : vector<4x1xf32>
    %cst_19 = arith.constant 9.99999993E-9 : f32
    %56 = vector.broadcast %cst_19 : f32 to vector<4x64xf32>
    %57 = arith.maximumf %51, %56 : vector<4x64xf32>
    %cst_20 = arith.constant 9.99999993E-9 : f32
    %58 = vector.broadcast %cst_20 : f32 to vector<4x1xf32>
    %59 = arith.maximumf %55, %58 : vector<4x1xf32>
    %60 = vector.broadcast %59 : vector<4x1xf32> to vector<4x64xf32>
    %61 = arith.mulf %57, %60 : vector<4x64xf32>
    %62 = arith.divf %48, %61 : vector<4x64xf32>
    %63 = vector.broadcast %44 : vector<4x1xf32> to vector<4x64xf32>
    %64 = arith.mulf %63, %62 : vector<4x64xf32>
    %cst_21 = arith.constant dense<0xFF800000> : vector<4xf32>
    %65 = vector.multi_reduction <maximumf>, %64, %cst_21 [1] : vector<4x64xf32> to vector<4xf32>
    %66 = vector.shape_cast %65 : vector<4xf32> to vector<4x1xf32>
    %67 = vector.broadcast %66 : vector<4x1xf32> to vector<4x64xf32>
    %68 = arith.subf %64, %67 : vector<4x64xf32>
    %69 = math.exp %68 : vector<4x64xf32>
    %cst_22 = arith.constant dense<0.000000e+00> : vector<4xf32>
    %70 = vector.multi_reduction <add>, %69, %cst_22 [1] : vector<4x64xf32> to vector<4xf32>
    %71 = vector.shape_cast %70 : vector<4xf32> to vector<4x1xf32>
    %72 = vector.broadcast %71 : vector<4x1xf32> to vector<4x64xf32>
    %73 = arith.divf %69, %72 : vector<4x64xf32>
    %cst_23 = arith.constant 0.000000e+00 : f32
    %74 = vector.broadcast %cst_23 : f32 to vector<4x1xf32>
    %75 = arith.subf %74, %38 : vector<4x1xf32>
    %76 = math.exp %75 : vector<4x1xf32>
    %cst_24 = arith.constant 1.000000e+00 : f32
    %77 = vector.broadcast %cst_24 : f32 to vector<4x1xf32>
    %78 = arith.addf %77, %76 : vector<4x1xf32>
    %cst_25 = arith.constant 1.000000e+00 : f32
    %79 = vector.broadcast %cst_25 : f32 to vector<4x1xf32>
    %80 = arith.divf %79, %78 : vector<4x1xf32>
    %81 = vector.broadcast %80 : vector<4x1xf32> to vector<4x64xf32>
    %82 = arith.mulf %81, %73 : vector<4x64xf32>
    %cst_26 = arith.constant 1.000000e+00 : f32
    %83 = vector.broadcast %cst_26 : f32 to vector<4x1xf32>
    %84 = arith.subf %83, %80 : vector<4x1xf32>
    %85 = vector.broadcast %84 : vector<4x1xf32> to vector<4x64xf32>
    %86 = arith.mulf %85, %41 : vector<4x64xf32>
    %87 = arith.addf %82, %86 : vector<4x64xf32>
    %cst_27 = arith.constant dense<0xFF800000> : vector<4xf32>
    %88 = vector.multi_reduction <maximumf>, %39, %cst_27 [1] : vector<4x3xf32> to vector<4xf32>
    %89 = vector.shape_cast %88 : vector<4xf32> to vector<4x1xf32>
    %90 = vector.broadcast %89 : vector<4x1xf32> to vector<4x3xf32>
    %91 = arith.subf %39, %90 : vector<4x3xf32>
    %92 = math.exp %91 : vector<4x3xf32>
    %cst_28 = arith.constant dense<0.000000e+00> : vector<4xf32>
    %93 = vector.multi_reduction <add>, %92, %cst_28 [1] : vector<4x3xf32> to vector<4xf32>
    %94 = vector.shape_cast %93 : vector<4xf32> to vector<4x1xf32>
    %95 = vector.broadcast %94 : vector<4x1xf32> to vector<4x3xf32>
    %96 = arith.divf %92, %95 : vector<4x3xf32>
    %cst_29 = arith.constant dense<0.000000e+00> : vector<4x64xf32>
    %97 = tpu.matmul %87, %21, %cst_29 {dimension_numbers = #tpu.dot_dimension_numbers<[1], [0], [0], [1], [0, 0, 1, 1], [], []>, precision = #tpu.contract_precision<fp32>} : vector<4x64xf32>, vector<64x64xf32>, vector<4x64xf32> -> vector<4x64xf32>
    %cst_30 = arith.constant dense<0.000000e+00> : vector<4x64xf32>
    %98 = tpu.matmul %87, %33, %cst_30 {dimension_numbers = #tpu.dot_dimension_numbers<[1], [0], [0], [1], [0, 0, 1, 1], [], []>, precision = #tpu.contract_precision<fp32>} : vector<4x64xf32>, vector<64x64xf32>, vector<4x64xf32> -> vector<4x64xf32>
    %99 = vector.extract_strided_slice %96 {offsets = [0, 0], sizes = [4, 1], strides = [1, 1]} : vector<4x3xf32> to vector<4x1xf32>
    %100 = vector.broadcast %99 : vector<4x1xf32> to vector<4x64xf32>
    %101 = arith.mulf %100, %97 : vector<4x64xf32>
    %102 = vector.extract_strided_slice %96 {offsets = [0, 1], sizes = [4, 1], strides = [1, 1]} : vector<4x3xf32> to vector<4x1xf32>
    %103 = vector.broadcast %102 : vector<4x1xf32> to vector<4x64xf32>
    %104 = arith.mulf %103, %87 : vector<4x64xf32>
    %105 = arith.addf %101, %104 : vector<4x64xf32>
    %106 = vector.extract_strided_slice %96 {offsets = [0, 2], sizes = [4, 1], strides = [1, 1]} : vector<4x3xf32> to vector<4x1xf32>
    %107 = vector.broadcast %106 : vector<4x1xf32> to vector<4x64xf32>
    %108 = arith.mulf %107, %98 : vector<4x64xf32>
    %109 = arith.addf %105, %108 : vector<4x64xf32>
    %cst_31 = arith.constant 0.000000e+00 : f32
    %110 = vector.broadcast %cst_31 : f32 to vector<4x1xf32>
    %111 = arith.maximumf %40, %110 : vector<4x1xf32>
    %cst_32 = arith.constant 1.000000e+00 : f32
    %112 = vector.broadcast %cst_32 : f32 to vector<4x1xf32>
    %113 = arith.addf %112, %111 : vector<4x1xf32>
    %cst_33 = arith.constant 1.000000e-30 : f32
    %114 = vector.broadcast %cst_33 : f32 to vector<4x64xf32>
    %115 = arith.maximumf %109, %114 : vector<4x64xf32>
    %116 = math.log %115 : vector<4x64xf32>
    %117 = vector.broadcast %113 : vector<4x1xf32> to vector<4x64xf32>
    %118 = arith.mulf %117, %116 : vector<4x64xf32>
    %119 = math.exp %118 : vector<4x64xf32>
    %cst_34 = arith.constant dense<0.000000e+00> : vector<4xf32>
    %120 = vector.multi_reduction <add>, %119, %cst_34 [1] : vector<4x64xf32> to vector<4xf32>
    %121 = vector.shape_cast %120 : vector<4xf32> to vector<4x1xf32>
    %cst_35 = arith.constant dense<0.000000e+00> : vector<1xf32>
    %122 = vector.multi_reduction <add>, %121, %cst_35 [0] : vector<4x1xf32> to vector<1xf32>
    %123 = vector.shape_cast %122 : vector<1xf32> to vector<1x1xf32>
    %124 = vector.broadcast %123 : vector<1x1xf32> to vector<4x64xf32>
    %125 = arith.divf %119, %124 : vector<4x64xf32>
    %126 = vector.shape_cast %125 : vector<4x64xf32> to vector<4x64x1xf32>
    %127 = vector.shape_cast %35 : vector<4x32xf32> to vector<4x1x32xf32>
    %128 = vector.broadcast %126 : vector<4x64x1xf32> to vector<4x64x32xf32>
    %129 = vector.broadcast %127 : vector<4x1x32xf32> to vector<4x64x32xf32>
    %130 = arith.mulf %128, %129 : vector<4x64x32xf32>
    %cst_36 = arith.constant 1.000000e+00 : f32
    %131 = vector.broadcast %cst_36 : f32 to vector<4x64x32xf32>
    %132 = arith.subf %131, %130 : vector<4x64x32xf32>
    %133 = arith.mulf %1, %132 : vector<4x64x32xf32>
    %134 = vector.shape_cast %125 : vector<4x64xf32> to vector<4x64x1xf32>
    %135 = vector.shape_cast %36 : vector<4x32xf32> to vector<4x1x32xf32>
    %136 = vector.broadcast %134 : vector<4x64x1xf32> to vector<4x64x32xf32>
    %137 = vector.broadcast %135 : vector<4x1x32xf32> to vector<4x64x32xf32>
    %138 = arith.mulf %136, %137 : vector<4x64x32xf32>
    %139 = arith.addf %133, %138 : vector<4x64x32xf32>
    %c0_37 = arith.constant 0 : index
    %c0_38 = arith.constant 0 : index
    %c0_39 = arith.constant 0 : index
    %140 = vector.load %arg5[%c0_37, %c0_38, %c0_39] : memref<4x64x32xf32, #tpu.memory_space<vmem>>, vector<4x64x32xf32>
    tpu.vector_store %arg5[%c0_37, %c0_38, %c0_39], %139 {strides = array<i32>} : memref<4x64x32xf32, #tpu.memory_space<vmem>>, vector<4x64x32xf32>,
    %141 = vector.extract_strided_slice %7 {offsets = [0, 102], sizes = [4, 32], strides = [1, 1]} : vector<4x140xf32> to vector<4x32xf32>
    %142 = vector.extract_strided_slice %7 {offsets = [0, 134], sizes = [4, 1], strides = [1, 1]} : vector<4x140xf32> to vector<4x1xf32>
    %143 = vector.extract_strided_slice %7 {offsets = [0, 135], sizes = [4, 1], strides = [1, 1]} : vector<4x140xf32> to vector<4x1xf32>
    %144 = vector.extract_strided_slice %7 {offsets = [0, 136], sizes = [4, 3], strides = [1, 1]} : vector<4x140xf32> to vector<4x3xf32>
    %145 = vector.extract_strided_slice %7 {offsets = [0, 139], sizes = [4, 1], strides = [1, 1]} : vector<4x140xf32> to vector<4x1xf32>
    %c0_40 = arith.constant 0 : index
    %c0_41 = arith.constant 0 : index
    %146 = vector.load %arg3[%c0_40, %c0_41] : memref<4x64xf32, #tpu.memory_space<vmem>>, vector<4x64xf32>
    %147 = math.tanh %141 : vector<4x32xf32>
    %cst_42 = arith.constant 0.000000e+00 : f32
    %148 = vector.broadcast %cst_42 : f32 to vector<4x1xf32>
    %149 = arith.maximumf %142, %148 : vector<4x1xf32>
    %150 = vector.shape_cast %147 : vector<4x32xf32> to vector<4x1x32xf32>
    %151 = vector.broadcast %150 : vector<4x1x32xf32> to vector<4x64x32xf32>
    %152 = arith.mulf %139, %151 : vector<4x64x32xf32>
    %cst_43 = arith.constant dense<0.000000e+00> : vector<4x64xf32>
    %153 = vector.multi_reduction <add>, %152, %cst_43 [2] : vector<4x64x32xf32> to vector<4x64xf32>
    %154 = arith.mulf %139, %139 : vector<4x64x32xf32>
    %cst_44 = arith.constant dense<0.000000e+00> : vector<4x64xf32>
    %155 = vector.multi_reduction <add>, %154, %cst_44 [2] : vector<4x64x32xf32> to vector<4x64xf32>
    %156 = math.sqrt %155 : vector<4x64xf32>
    %157 = arith.mulf %147, %147 : vector<4x32xf32>
    %cst_45 = arith.constant dense<0.000000e+00> : vector<4xf32>
    %158 = vector.multi_reduction <add>, %157, %cst_45 [1] : vector<4x32xf32> to vector<4xf32>
    %159 = vector.shape_cast %158 : vector<4xf32> to vector<4x1xf32>
    %160 = math.sqrt %159 : vector<4x1xf32>
    %cst_46 = arith.constant 9.99999993E-9 : f32
    %161 = vector.broadcast %cst_46 : f32 to vector<4x64xf32>
    %162 = arith.maximumf %156, %161 : vector<4x64xf32>
    %cst_47 = arith.constant 9.99999993E-9 : f32
    %163 = vector.broadcast %cst_47 : f32 to vector<4x1xf32>
    %164 = arith.maximumf %160, %163 : vector<4x1xf32>
    %165 = vector.broadcast %164 : vector<4x1xf32> to vector<4x64xf32>
    %166 = arith.mulf %162, %165 : vector<4x64xf32>
    %167 = arith.divf %153, %166 : vector<4x64xf32>
    %168 = vector.broadcast %149 : vector<4x1xf32> to vector<4x64xf32>
    %169 = arith.mulf %168, %167 : vector<4x64xf32>
    %cst_48 = arith.constant dense<0xFF800000> : vector<4xf32>
    %170 = vector.multi_reduction <maximumf>, %169, %cst_48 [1] : vector<4x64xf32> to vector<4xf32>
    %171 = vector.shape_cast %170 : vector<4xf32> to vector<4x1xf32>
    %172 = vector.broadcast %171 : vector<4x1xf32> to vector<4x64xf32>
    %173 = arith.subf %169, %172 : vector<4x64xf32>
    %174 = math.exp %173 : vector<4x64xf32>
    %cst_49 = arith.constant dense<0.000000e+00> : vector<4xf32>
    %175 = vector.multi_reduction <add>, %174, %cst_49 [1] : vector<4x64xf32> to vector<4xf32>
    %176 = vector.shape_cast %175 : vector<4xf32> to vector<4x1xf32>
    %177 = vector.broadcast %176 : vector<4x1xf32> to vector<4x64xf32>
    %178 = arith.divf %174, %177 : vector<4x64xf32>
    %cst_50 = arith.constant 0.000000e+00 : f32
    %179 = vector.broadcast %cst_50 : f32 to vector<4x1xf32>
    %180 = arith.subf %179, %143 : vector<4x1xf32>
    %181 = math.exp %180 : vector<4x1xf32>
    %cst_51 = arith.constant 1.000000e+00 : f32
    %182 = vector.broadcast %cst_51 : f32 to vector<4x1xf32>
    %183 = arith.addf %182, %181 : vector<4x1xf32>
    %cst_52 = arith.constant 1.000000e+00 : f32
    %184 = vector.broadcast %cst_52 : f32 to vector<4x1xf32>
    %185 = arith.divf %184, %183 : vector<4x1xf32>
    %186 = vector.broadcast %185 : vector<4x1xf32> to vector<4x64xf32>
    %187 = arith.mulf %186, %178 : vector<4x64xf32>
    %cst_53 = arith.constant 1.000000e+00 : f32
    %188 = vector.broadcast %cst_53 : f32 to vector<4x1xf32>
    %189 = arith.subf %188, %185 : vector<4x1xf32>
    %190 = vector.broadcast %189 : vector<4x1xf32> to vector<4x64xf32>
    %191 = arith.mulf %190, %146 : vector<4x64xf32>
    %192 = arith.addf %187, %191 : vector<4x64xf32>
    %cst_54 = arith.constant dense<0xFF800000> : vector<4xf32>
    %193 = vector.multi_reduction <maximumf>, %144, %cst_54 [1] : vector<4x3xf32> to vector<4xf32>
    %194 = vector.shape_cast %193 : vector<4xf32> to vector<4x1xf32>
    %195 = vector.broadcast %194 : vector<4x1xf32> to vector<4x3xf32>
    %196 = arith.subf %144, %195 : vector<4x3xf32>
    %197 = math.exp %196 : vector<4x3xf32>
    %cst_55 = arith.constant dense<0.000000e+00> : vector<4xf32>
    %198 = vector.multi_reduction <add>, %197, %cst_55 [1] : vector<4x3xf32> to vector<4xf32>
    %199 = vector.shape_cast %198 : vector<4xf32> to vector<4x1xf32>
    %200 = vector.broadcast %199 : vector<4x1xf32> to vector<4x3xf32>
    %201 = arith.divf %197, %200 : vector<4x3xf32>
    %cst_56 = arith.constant dense<0.000000e+00> : vector<4x64xf32>
    %202 = tpu.matmul %192, %21, %cst_56 {dimension_numbers = #tpu.dot_dimension_numbers<[1], [0], [0], [1], [0, 0, 1, 1], [], []>, precision = #tpu.contract_precision<fp32>} : vector<4x64xf32>, vector<64x64xf32>, vector<4x64xf32> -> vector<4x64xf32>
    %cst_57 = arith.constant dense<0.000000e+00> : vector<4x64xf32>
    %203 = tpu.matmul %192, %33, %cst_57 {dimension_numbers = #tpu.dot_dimension_numbers<[1], [0], [0], [1], [0, 0, 1, 1], [], []>, precision = #tpu.contract_precision<fp32>} : vector<4x64xf32>, vector<64x64xf32>, vector<4x64xf32> -> vector<4x64xf32>
    %204 = vector.extract_strided_slice %201 {offsets = [0, 0], sizes = [4, 1], strides = [1, 1]} : vector<4x3xf32> to vector<4x1xf32>
    %205 = vector.broadcast %204 : vector<4x1xf32> to vector<4x64xf32>
    %206 = arith.mulf %205, %202 : vector<4x64xf32>
    %207 = vector.extract_strided_slice %201 {offsets = [0, 1], sizes = [4, 1], strides = [1, 1]} : vector<4x3xf32> to vector<4x1xf32>
    %208 = vector.broadcast %207 : vector<4x1xf32> to vector<4x64xf32>
    %209 = arith.mulf %208, %192 : vector<4x64xf32>
    %210 = arith.addf %206, %209 : vector<4x64xf32>
    %211 = vector.extract_strided_slice %201 {offsets = [0, 2], sizes = [4, 1], strides = [1, 1]} : vector<4x3xf32> to vector<4x1xf32>
    %212 = vector.broadcast %211 : vector<4x1xf32> to vector<4x64xf32>
    %213 = arith.mulf %212, %203 : vector<4x64xf32>
    %214 = arith.addf %210, %213 : vector<4x64xf32>
    %cst_58 = arith.constant 0.000000e+00 : f32
    %215 = vector.broadcast %cst_58 : f32 to vector<4x1xf32>
    %216 = arith.maximumf %145, %215 : vector<4x1xf32>
    %cst_59 = arith.constant 1.000000e+00 : f32
    %217 = vector.broadcast %cst_59 : f32 to vector<4x1xf32>
    %218 = arith.addf %217, %216 : vector<4x1xf32>
    %cst_60 = arith.constant 1.000000e-30 : f32
    %219 = vector.broadcast %cst_60 : f32 to vector<4x64xf32>
    %220 = arith.maximumf %214, %219 : vector<4x64xf32>
    %221 = math.log %220 : vector<4x64xf32>
    %222 = vector.broadcast %218 : vector<4x1xf32> to vector<4x64xf32>
    %223 = arith.mulf %222, %221 : vector<4x64xf32>
    %224 = math.exp %223 : vector<4x64xf32>
    %cst_61 = arith.constant dense<0.000000e+00> : vector<4xf32>
    %225 = vector.multi_reduction <add>, %224, %cst_61 [1] : vector<4x64xf32> to vector<4xf32>
    %226 = vector.shape_cast %225 : vector<4xf32> to vector<4x1xf32>
    %cst_62 = arith.constant dense<0.000000e+00> : vector<1xf32>
    %227 = vector.multi_reduction <add>, %226, %cst_62 [0] : vector<4x1xf32> to vector<1xf32>
    %228 = vector.shape_cast %227 : vector<1xf32> to vector<1x1xf32>
    %229 = vector.broadcast %228 : vector<1x1xf32> to vector<4x64xf32>
    %230 = arith.divf %224, %229 : vector<4x64xf32>
    %231 = vector.extract_strided_slice %230 {offsets = [0, 0], sizes = [1, 64], strides = [1, 1]} : vector<4x64xf32> to vector<1x64xf32>
    %232 = vector.extract_strided_slice %139 {offsets = [0, 0, 0], sizes = [1, 64, 32], strides = [1, 1, 1]} : vector<4x64x32xf32> to vector<1x64x32xf32>
    %233 = vector.shape_cast %232 : vector<1x64x32xf32> to vector<64x32xf32>
    %cst_63 = arith.constant dense<0.000000e+00> : vector<1x32xf32>
    %234 = tpu.matmul %231, %233, %cst_63 {dimension_numbers = #tpu.dot_dimension_numbers<[1], [0], [0], [1], [0, 0, 1, 1], [], []>, precision = #tpu.contract_precision<fp32>} : vector<1x64xf32>, vector<64x32xf32>, vector<1x32xf32> -> vector<1x32xf32>
    %c0_64 = arith.constant 0 : index
    %c0_65 = arith.constant 0 : index
    %235 = vector.load %arg6[%c0_64, %c0_65] : memref<4x32xf32, #tpu.memory_space<vmem>>, vector<1x32xf32>
    tpu.vector_store %arg6[%c0_64, %c0_65], %234 {strides = array<i32>} : memref<4x32xf32, #tpu.memory_space<vmem>>, vector<1x32xf32>,
    %236 = vector.extract_strided_slice %230 {offsets = [1, 0], sizes = [1, 64], strides = [1, 1]} : vector<4x64xf32> to vector<1x64xf32>
    %237 = vector.extract_strided_slice %139 {offsets = [1, 0, 0], sizes = [1, 64, 32], strides = [1, 1, 1]} : vector<4x64x32xf32> to vector<1x64x32xf32>
    %238 = vector.shape_cast %237 : vector<1x64x32xf32> to vector<64x32xf32>
    %cst_66 = arith.constant dense<0.000000e+00> : vector<1x32xf32>
    %239 = tpu.matmul %236, %238, %cst_66 {dimension_numbers = #tpu.dot_dimension_numbers<[1], [0], [0], [1], [0, 0, 1, 1], [], []>, precision = #tpu.contract_precision<fp32>} : vector<1x64xf32>, vector<64x32xf32>, vector<1x32xf32> -> vector<1x32xf32>
    %c1 = arith.constant 1 : index
    %c0_67 = arith.constant 0 : index
    %240 = vector.load %arg6[%c1, %c0_67] : memref<4x32xf32, #tpu.memory_space<vmem>>, vector<1x32xf32>
    tpu.vector_store %arg6[%c1, %c0_67], %239 {strides = array<i32>} : memref<4x32xf32, #tpu.memory_space<vmem>>, vector<1x32xf32>,
    %241 = vector.extract_strided_slice %230 {offsets = [2, 0], sizes = [1, 64], strides = [1, 1]} : vector<4x64xf32> to vector<1x64xf32>
    %242 = vector.extract_strided_slice %139 {offsets = [2, 0, 0], sizes = [1, 64, 32], strides = [1, 1, 1]} : vector<4x64x32xf32> to vector<1x64x32xf32>
    %243 = vector.shape_cast %242 : vector<1x64x32xf32> to vector<64x32xf32>
    %cst_68 = arith.constant dense<0.000000e+00> : vector<1x32xf32>
    %244 = tpu.matmul %241, %243, %cst_68 {dimension_numbers = #tpu.dot_dimension_numbers<[1], [0], [0], [1], [0, 0, 1, 1], [], []>, precision = #tpu.contract_precision<fp32>} : vector<1x64xf32>, vector<64x32xf32>, vector<1x32xf32> -> vector<1x32xf32>
    %c2 = arith.constant 2 : index
    %c0_69 = arith.constant 0 : index
    %245 = vector.load %arg6[%c2, %c0_69] : memref<4x32xf32, #tpu.memory_space<vmem>>, vector<1x32xf32>
    tpu.vector_store %arg6[%c2, %c0_69], %244 {strides = array<i32>} : memref<4x32xf32, #tpu.memory_space<vmem>>, vector<1x32xf32>,
    %246 = vector.extract_strided_slice %230 {offsets = [3, 0], sizes = [1, 64], strides = [1, 1]} : vector<4x64xf32> to vector<1x64xf32>
    %247 = vector.extract_strided_slice %139 {offsets = [3, 0, 0], sizes = [1, 64, 32], strides = [1, 1, 1]} : vector<4x64x32xf32> to vector<1x64x32xf32>
    %248 = vector.shape_cast %247 : vector<1x64x32xf32> to vector<64x32xf32>
    %cst_70 = arith.constant dense<0.000000e+00> : vector<1x32xf32>
    %249 = tpu.matmul %246, %248, %cst_70 {dimension_numbers = #tpu.dot_dimension_numbers<[1], [0], [0], [1], [0, 0, 1, 1], [], []>, precision = #tpu.contract_precision<fp32>} : vector<1x64xf32>, vector<64x32xf32>, vector<1x32xf32> -> vector<1x32xf32>
    %c3 = arith.constant 3 : index
    %c0_71 = arith.constant 0 : index
    %250 = vector.load %arg6[%c3, %c0_71] : memref<4x32xf32, #tpu.memory_space<vmem>>, vector<1x32xf32>
    tpu.vector_store %arg6[%c3, %c0_71], %249 {strides = array<i32>} : memref<4x32xf32, #tpu.memory_space<vmem>>, vector<1x32xf32>,
    return
  }
}

</mosaic_0001>

<bundles_post_ra>
// kernel: ntm_memory_forward.1
= control target key start
LH: loop header
LB: loop body
LE: loop exit
PB: predicated region body
PF: predicated region fallthrough
CT: control target
= control target key end

     0   :  { %vm14284_vm0 = vcmask 261120   ;;  %v14242_v9 = vmov 0.0   ;;  %s14233_s0 = inlined_call_operand.vmem [shape: f32[4,32], index: 0, kind: input, shape index: {}]   ;;  %s14234_s1 = inlined_call_operand.vmem [shape: f32[4,64,32], index: 1, kind: input, shape index: {}]   ;;  %s14235_s2 = inlined_call_operand.vmem [shape: f32[4,64], index: 2, kind: input, shape index: {}]   ;;  %s14236_s3 = inlined_call_operand.vmem [shape: f32[4,64], index: 3, kind: input, shape index: {}]   ;;  %s14237_s4 = inlined_call_operand.vmem [shape: f32[33,140], index: 4, kind: input, shape index: {}]   ;;  %s14238_s5 = inlined_call_operand.vmem [shape: f32[4,64,32], index: 5, kind: output, shape index: {0}]   ;;  %s14239_s6 = inlined_call_operand.hbm [shape: f32[4,32], index: 6, kind: output, shape index: {1}]  }
   0x1   :  { %v63_v0 = vld [vmem:[%s14237_s4 + $0x38] sm:$0xff]  ;;  %v62_v1 = vld [vmem:[%s14237_s4 + $0x30] sm:$0xff]  ;;  %v61_v2 = vld [vmem:[%s14237_s4 + $0x28] sm:$0xff]  ;;  %150 = vmatprep.mubr.f32.mxu0 %v14242_v9  ;;  %266 = vmatprep.mubr.f32.mxu1 %v14242_v9 }
   0x2   :  { %v9580_v3 = vand.u32 4294901760, %v63_v0  ;;  %v9582_v4 = vand.u32 4294901760, %v62_v1  ;;  %v9584_v5 = vand.u32 4294901760, %v61_v2  ;;  %v60_v6 = vld [vmem:[%s14237_s4 + $0x20] sm:$0xff]  ;;  %v59_v7 = vld [vmem:[%s14237_s4 + $0x18] sm:$0xff]  ;;  %v58_v8 = vld [vmem:[%s14237_s4 + $0x10] sm:$0xff] }
   0x3   :  { %v9597_v10 = vand.u32 4294901760, %v60_v6  ;;  %v9599_v11 = vand.u32 4294901760, %v59_v7  ;;  %v9601_v12 = vand.u32 4294901760, %v58_v8  ;;  %v57_v13 = vld [vmem:[%s14237_s4 + $0x8] sm:$0xff]  ;;  %v56_v14 = vld [vmem:[%s14237_s4] sm:$0xff] }
   0x4   :  { %103 = vmatprep.subr.mxu0 %v9580_v3  ;;  %v9610_v15 = vand.u32 4294901760, %v57_v13  ;;  %v9613_v16 = vsub.f32 %v63_v0, %v9580_v3  ;;  %v9615_v17 = vand.u32 4294901760, %v56_v14  ;;  %v9618_v18 = vsub.f32 %v62_v1, %v9582_v4  ;;  %v23_v19 = vld [vmem:[%s14233_s0] sm:$0xf] }
   0x5   :  { %105 = vmatpush1.msra.mxu0 %v9582_v4  ;;  %v9625_v20 = vsub.f32 %v61_v2, %v9584_v5  ;;  %v76_v21 = vsel %vm14284_vm0, %v23_v19, 0  ;;  %v9629_v22 = vsub.f32 %v60_v6, %v9597_v10  ;;  %v9632_v23 = vsub.f32 %v59_v7, %v9599_v11  ;;  %v9674_v40 = vld [vmem:[%s14234_s1] sm:$0xff] }
   0x6   :  { %107 = vmatprep.subr.mxu0 %v9584_v5  ;;  %v188_v24 = vand.u32 4294901760, %v9613_v16  ;;  %v194_v25 = vand.u32 4294901760, %v9618_v18  ;;  %v9637_v26 = vand.u32 4294901760, %v76_v21  ;;  %v9640_v27 = vsub.f32 %v58_v8, %v9601_v12 }
   0x7   :  { %109 = vmatpush1.msra.mxu0 %v9597_v10  ;;  %v200_v28 = vand.u32 4294901760, %v9625_v20  ;;  %v206_v29 = vand.u32 4294901760, %v9629_v22  ;;  %v212_v30 = vand.u32 4294901760, %v9632_v23  ;;  %v9647_v31 = vsub.f32 %v57_v13, %v9610_v15 }
   0x8   :  { %111 = vmatprep.subr.mxu0 %v9599_v11  ;;  %v189_v32 = vsub.f32 %v9613_v16, %v188_v24  ;;  %v195_v33 = vsub.f32 %v9618_v18, %v194_v25  ;;  %v9657_v34 = vsub.f32 %v76_v21, %v9637_v26  ;;  %v218_v35 = vand.u32 4294901760, %v9640_v27 }
   0x9   :  { %113 = vmatpush1.msra.mxu0 %v9601_v12  ;;  %v201_v36 = vsub.f32 %v9625_v20, %v200_v28  ;;  %v207_v37 = vsub.f32 %v9629_v22, %v206_v29  ;;  %v213_v38 = vsub.f32 %v9632_v23, %v212_v30  ;;  %v224_v39 = vand.u32 4294901760, %v9647_v31 }
   0xa   :  { %12 = vsyncpa [#allocation3], 0  ;;  %115 = vmatprep.subr.mxu0 %v9610_v15  ;;  %v190_v41 = vand.u32 4294901760, %v189_v32  ;;  %v196_v42 = vand.u32 4294901760, %v195_v33  ;;  %v153_v43 = vand.u32 4294901760, %v9657_v34  ;;  %v219_v44 = vsub.f32 %v9640_v27, %v218_v35  ;;  %v9712_v59 = vld [vmem:[%s14234_s1 + $0x48] sm:$0xff] }
   0xb   :  { %117 = vmatpush1.msra.mxu0 %v9615_v17  ;;  %v202_v45 = vand.u32 4294901760, %v201_v36  ;;  %v208_v46 = vand.u32 4294901760, %v207_v37  ;;  %v225_v47 = vsub.f32 %v9647_v31, %v224_v39  ;;  %v214_v49 = vand.u32 4294901760, %v213_v38  ;;  %v9720_v60 = vld [vmem:[%s14234_s1 + $0x8] sm:$0xff]  ;;  %v9736_v62 = vld [vmem:[%s14234_s1 + $0x50] sm:$0xff]  ;;  %v9745_v0 = vld [vmem:[%s14234_s1 + $0x40] sm:$0xff] }
   0xc   :  { %191 = vmatprep.subr.mxu1 %v190_v41  ;;  %300 = vmatprep.subr.mxu0 %v9613_v16  ;;  %v154_v48 = vsub.f32 %v9657_v34, %v153_v43  ;;  %v229_v50 = vsub.f32 %v56_v14, %v9615_v17  ;;  %v892_v51 = vmul.f32 %v9674_v40, %v9674_v40  ;;  %v220_v52 = vand.u32 4294901760, %v219_v44  ;;  %v9758_v6 = vld [vmem:[%s14234_s1 + $0x88] sm:$0xff]  ;;  %v9799_v16 = vld [vmem:[%s14234_s1 + $0xc0] sm:$0xff]  ;;  %v9807_v19 = vld [vmem:[%s14234_s1 + $0x18] sm:$0xff]  ;;  %s9526_s10 = smov 64   ;;  %s9527_s11 = smov 96  }
   0xd   :  { %197 = vmatpush1.msra.mxu1 %v196_v42  ;;  %v226_v54 = vand.u32 4294901760, %v225_v47  ;;  %v901_v61 = vmul.f32 %v9712_v59, %v9712_v59  ;;  %v893_v63 = vmul.f32 %v9720_v60, %v9720_v60  ;;  %v902_v2 = vmul.f32 %v9736_v62, %v9736_v62  ;;  %v9851_v37 = vld [vmem:[%s14234_s1 + $0x30] sm:$0xff]  ;;  %v9867_v44 = vld [vmem:[%s14234_s1 + $0xa8] sm:$0xff] }
   0xe   :  { %203 = vmatprep.subr.mxu1 %v202_v45  ;;  %v155_v53 = vand.u32 4294901760, %v154_v48  ;;  %v230_v55 = vand.u32 4294901760, %v229_v50  ;;  %v924_v56 = vsel %vm14284_vm0, %v892_v51, 0.0  ;;  %v900_v7 = vmul.f32 %v9745_v0, %v9745_v0  ;;  %v9860_v42 = vld [vmem:[%s14234_s1 + $0x90] sm:$0xff]  ;;  %v9876_v48 = vld [vmem:[%s14234_s1 + $0xc8] sm:$0xff] }
   0xf   :  { %209 = vmatpush1.msra.mxu1 %v208_v46  ;;  %925 = vadd.xlane.f32.xlu0 %v924_v56  ;;  %v951_v1 = vsel %vm14284_vm0, %v901_v61, 0.0  ;;  %v909_v8 = vmul.f32 %v9758_v6, %v9758_v6  ;;  %v916_v21 = vmul.f32 %v9799_v16, %v9799_v16  ;;  %v913_v46 = vmul.f32 %v9867_v44, %v9867_v44  ;;  %v9899_v56 = vld [vmem:[%s14234_s1 + $0xb0] sm:$0xff] }
  0x10   :  { %156 = vmatmul.mubr.f32.vlgmr.msra.gmra.mxu0 %v155_v53  ;;  %215 = vmatprep.subr.mxu1 %v214_v49  ;;  %v231_v57 = vsub.f32 %v229_v50, %v230_v55  ;;  %v948_v13 = vsel %vm14284_vm0, %v900_v7, 0.0  ;;  %v917_v49 = vmul.f32 %v9876_v48, %v9876_v48  ;;  %v9891_v53 = vld [vmem:[%s14234_s1 + $0x60] sm:$0xff]  ;;  %vm14287_vm1 = vcmask 257024  }
  0x11   :  { %303 = vmatpush1.msra.mxu0 %v9618_v18  ;;  %221 = vmatpush1.msra.mxu1 %v220_v52  ;;  %v975_v14 = vsel %vm14284_vm0, %v909_v8, 0.0  ;;  %v987_v47 = vsel %vm14284_vm0, %v913_v46, 0.0  ;;  %v7675_v46 = vld [vmem:[%s14237_s4 + $0x48] ss:$0 sm:$0xff] }
  0x12   :  { %306 = vmatprep.subr.mxu0 %v9625_v20  ;;  %227 = vmatprep.subr.mxu1 %v226_v54  ;;  %v232_v58 = vand.u32 4294901760, %v231_v57  ;;  %v999_v51 = vsel %vm14284_vm0, %v917_v49, 0.0  ;;  %v914_v57 = vmul.f32 %v9899_v56, %v9899_v56 }
  0x13   :  { %309 = vmatpush1.msra.mxu0 %v9629_v22  ;;  %354 = vmatprep.mubr.f32.mxu0 %v14242_v9  ;;  %v9815_v22 = vld [vmem:[%s14234_s1 + $0x20] sm:$0xff] }
  0x14   :  { %312 = vmatprep.subr.mxu0 %v9632_v23  ;;  %233 = vmatpush1.msra.mxu1 %v232_v58  ;;  %v990_v61 = vsel %vm14284_vm0, %v914_v57, 0.0 }
  0x15   :  { %315 = vmatpush1.msra.mxu0 %v9640_v27  ;;  %268 = vmatmul.mubr.f32.vlgmr.msra.gmra.mxu1 %v9637_v26  ;;  %v9826_v27 = vld [vmem:[%s14234_s1 + $0x98] sm:$0xff] }
  0x16   :  { %318 = vmatprep.subr.mxu0 %v9647_v31  ;;  %388 = vmatprep.subr.mxu1 %v9580_v3  ;;  %v9835_v31 = vld [vmem:[%s14234_s1 + $0x28] sm:$0xff] }
  0x17   :  { %321 = vmatpush1.msra.mxu0 %v229_v50  ;;  %390 = vmatpush1.msra.mxu1 %v9582_v4  ;;  %v897_v33 = vmul.f32 %v9835_v31, %v9835_v31  ;;  %v9883_v50 = vld [vmem:[%s14234_s1 + $0x38] sm:$0xff] }
  0x18   :  { %357 = vmatmul.mubr.f32.vlgmr.msra.gmra.mxu0 %v9657_v34  ;;  %392 = vmatprep.subr.mxu1 %v9584_v5  ;;  %v9843_v34 = vld [vmem:[%s14234_s1 + $0xa0] sm:$0xff]  ;;  %v899_v52 = vmul.f32 %v9883_v50, %v9883_v50 }
  0x19   :  { %472 = vmatprep.subr.mxu0 %v188_v24  ;;  %394 = vmatpush1.msra.mxu1 %v9597_v10  ;;  %v895_v24 = vmul.f32 %v9807_v19, %v9807_v19  ;;  %v912_v36 = vmul.f32 %v9843_v34, %v9843_v34 }
  0x1a   :  { %476 = vmatpush1.msra.mxu0 %v194_v25  ;;  %396 = vmatprep.subr.mxu1 %v9599_v11  ;;  %v996_v25 = vsel %vm14284_vm0, %v916_v21, 0.0  ;;  %v945_v54 = vsel %vm14284_vm0, %v899_v52, 0.0  ;;  %v7674_v52 = vld [vmem:[%s14237_s4 + $0x40] ss:$0 sm:$0xff]  ;;  %s9520_s4 = smov 30  }
  0x1b   :  { %480 = vmatprep.subr.mxu0 %v200_v28  ;;  %398 = vmatpush1.msra.mxu1 %v9601_v12  ;;  %v933_v28 = vsel %vm14284_vm0, %v895_v24, 0.0  ;;  %v984_v38 = vsel %vm14284_vm0, %v912_v36, 0.0 }
  0x1c   :  { %484 = vmatpush1.msra.mxu0 %v206_v29  ;;  %400 = vmatprep.subr.mxu1 %v9610_v15 }
  0x1d   :  { %488 = vmatprep.subr.mxu0 %v212_v30  ;;  %402 = vmatpush1.msra.mxu1 %v9615_v17  ;;  %v911_v30 = vmul.f32 %v9826_v27, %v9826_v27 }
  0x1e   :  { %435 = vmatprep.mubr.f32.mxu1 %v14242_v9  ;;  %492 = vmatpush1.msra.mxu0 %v218_v35  ;;  %v939_v35 = vsel %vm14284_vm0, %v897_v33, 0.0 }
  0x1f   :  { %439 = vmatmul.mubr.f32.vlgmr.msra.gmra.mxu1 %v153_v43  ;;  %496 = vmatprep.subr.mxu0 %v224_v39  ;;  %v981_v32 = vsel %vm14284_vm0, %v911_v30, 0.0  ;;  %v898_v39 = vmul.f32 %v9851_v37, %v9851_v37  ;;  %v910_v43 = vmul.f32 %v9860_v42, %v9860_v42  ;;  %v9964_v30 = vld [vmem:[%s14234_s1 + $0x78] sm:$0xff] }
  0x20   :  { %566 = vmatprep.subr.mxu1 %v9580_v3  ;;  %500 = vmatpush1.msra.mxu0 %v230_v55  ;;  %v927_v3 = vsel %vm14284_vm0, %v893_v63, 0.0  ;;  %v904_v55 = vmul.f32 %v9891_v53, %v9891_v53  ;;  %v9908_v63 = vld [vmem:[%s14234_s1 + $0xd0] sm:$0xff] }
  0x21   :  { %533 = vmatprep.mubr.f32.mxu0 %v14242_v9  ;;  %568 = vmatpush1.msra.mxu1 %v9582_v4  ;;  %v9768_v4 = vld [vmem:[%s14234_s1 + $0x10] sm:$0xff]  ;;  %v942_v41 = vsel %vm14284_vm0, %v898_v39, 0.0  ;;  %v978_v45 = vsel %vm14284_vm0, %v910_v43, 0.0 }
  0x22   :  { %535 = vmatmul.mubr.f32.vlgmr.msra.gmra.mxu0 %v9637_v26  ;;  %570 = vmatprep.subr.mxu1 %v9584_v5  ;;  %v954_v5 = vsel %vm14284_vm0, %v902_v2, 0.0  ;;  %v960_v58 = vsel %vm14284_vm0, %v904_v55, 0.0  ;;  %v9915_v2 = vld [vmem:[%s14234_s1 + $0xb8] sm:$0xff]  ;;  %v9980_v39 = vld [vmem:[%s14234_s1 + $0xf0] sm:$0xff] }
  0x23   :  { %572 = vmatpush1.msra.mxu1 %v9597_v10  ;;  %613 = vmatprep.mubr.f32.mxu1 %v14242_v9  ;;  %v9779_v10 = vld [vmem:[%s14234_s1 + $0x58] sm:$0xff]  ;;  %v915_v7 = vmul.f32 %v9915_v2, %v9915_v2 }
  0x24   :  { %574 = vmatprep.subr.mxu1 %v9599_v11  ;;  %952 = vadd.xlane.f32.xlu0 %v951_v1  ;;  %v894_v11 = vmul.f32 %v9768_v4, %v9768_v4  ;;  %v918_v1 = vmul.f32 %v9908_v63, %v9908_v63 }
  0x25   :  { %576 = vmatpush1.msra.mxu1 %v9601_v12  ;;  %928 = vadd.xlane.f32.xlu1 %v927_v3  ;;  %v9789_v12 = vld [vmem:[%s14234_s1 + $0x80] sm:$0xff]  ;;  %v993_v8 = vsel %vm14284_vm0, %v915_v7, 0.0 }
  0x26   :  { %578 = vmatprep.subr.mxu1 %v9610_v15  ;;  %8205 = vmatprep.subr.mxu0 %v14242_v9  ;;  %v903_v15 = vmul.f32 %v9779_v10, %v9779_v10  ;;  %v908_v18 = vmul.f32 %v9789_v12, %v9789_v12  ;;  %v1002_v3 = vsel %vm14284_vm0, %v918_v1, 0.0 }
  0x27   :  { %580 = vmatpush1.msra.mxu1 %v9615_v17  ;;  %v930_v17 = vsel %vm14284_vm0, %v894_v11, 0.0  ;;  %v9931_v11 = vld [vmem:[%s14234_s1 + $0xf8] sm:$0xff] }
  0x28   :  { %615 = vmatmul.mubr.f32.vlgmr.msra.gmra.mxu1 %v9637_v26  ;;  %955 = vadd.xlane.f32.xlu0 %v954_v5  ;;  %v957_v20 = vsel %vm14284_vm0, %v903_v15, 0.0  ;;  %v972_v23 = vsel %vm14284_vm0, %v908_v18, 0.0  ;;  %v896_v26 = vmul.f32 %v9815_v22, %v9815_v22  ;;  %v9923_v5 = vld [vmem:[%s14234_s1 + $0x68] sm:$0xff]  ;;  %v923_v15 = vmul.f32 %v9931_v11, %v9931_v11 }
  0x29   :  { %949 = vadd.xlane.f32.xlu1 %v948_v13  ;;  %8224 = vmatprep.subr.mxu1 %v14242_v9  ;;  %v905_v13 = vmul.f32 %v9923_v5, %v9923_v5 }
  0x2a   :  { %v936_v29 = vsel %vm14284_vm0, %v896_v26, 0.0  ;;  %v1017_v18 = vsel %vm14284_vm0, %v923_v15, 0.0  ;;  %v9956_v26 = vld [vmem:[%s14234_s1 + $0xe0] sm:$0xff] }
  0x2c   :  { %976 = vadd.xlane.f32.xlu0 %v975_v14  ;;  %v963_v14 = vsel %vm14284_vm0, %v905_v13, 0.0 }
  0x2d   :  { %931 = vadd.xlane.f32.xlu1 %v930_v17  ;;  %v9939_v17 = vld [vmem:[%s14234_s1 + $0xd8] sm:$0xff] }
  0x30   :  { %958 = vadd.xlane.f32.xlu0 %v957_v20  ;;  %v919_v20 = vmul.f32 %v9939_v17, %v9939_v17 }
  0x31   :  { %973 = vadd.xlane.f32.xlu1 %v972_v23  ;;  %v9948_v23 = vld [vmem:[%s14234_s1 + $0x70] sm:$0xff] }
  0x32   :  { %v1005_v21 = vsel %vm14284_vm0, %v919_v20, 0.0  ;;  %v906_v24 = vmul.f32 %v9948_v23, %v9948_v23 }
  0x34   :  { %997 = vadd.xlane.f32.xlu0 %v996_v25  ;;  %v966_v25 = vsel %vm14284_vm0, %v906_v24, 0.0 }
  0x35   :  { %934 = vadd.xlane.f32.xlu1 %v933_v28  ;;  %v920_v28 = vmul.f32 %v9956_v26, %v9956_v26 }
  0x38   :  { %937 = vadd.xlane.f32.xlu0 %v936_v29  ;;  %v1008_v29 = vsel %vm14284_vm0, %v920_v28, 0.0  ;;  %v9514_v28 = vmov 1966171168  }
  0x39   :  { %979 = vadd.xlane.f32.xlu1 %v978_v45 }
  0x3c   :  { %982 = vadd.xlane.f32.xlu0 %v981_v32  ;;  %v907_v32 = vmul.f32 %v9964_v30, %v9964_v30 }
  0x3d   :  { %1000 = vadd.xlane.f32.xlu1 %v999_v51 }
  0x3e   :  { %v969_v33 = vsel %vm14284_vm0, %v907_v32, 0.0 }
  0x40   :  { %940 = vadd.xlane.f32.xlu0 %v939_v35  ;;  %v9972_v35 = vld [vmem:[%s14234_s1 + $0xe8] sm:$0xff] }
  0x41   :  { %961 = vadd.xlane.f32.xlu1 %v960_v58  ;;  %v921_v36 = vmul.f32 %v9972_v35, %v9972_v35 }
  0x44   :  { %985 = vadd.xlane.f32.xlu0 %v984_v38  ;;  %v1011_v38 = vsel %vm14284_vm0, %v921_v36, 0.0 }
  0x45   :  { %1003 = vadd.xlane.f32.xlu1 %v1002_v3 }
  0x48   :  { %943 = vadd.xlane.f32.xlu0 %v942_v41  ;;  %v922_v41 = vmul.f32 %v9980_v39, %v9980_v39 }
  0x49   :  { %964 = vadd.xlane.f32.xlu1 %v963_v14 }
  0x4a   :  { %v1014_v43 = vsel %vm14284_vm0, %v922_v41, 0.0 }
  0x4c   :  { %988 = vadd.xlane.f32.xlu0 %v987_v47 }
  0x4d   :  { %1006 = vadd.xlane.f32.xlu1 %v1005_v21 }
  0x50   :  { %946 = vadd.xlane.f32.xlu0 %v945_v54 }
  0x51   :  { %967 = vadd.xlane.f32.xlu1 %v966_v25  ;;  %v14244_v25 = vlaneseq }
  0x53   :  { %v9995_v32 = vshrl.u32 %v14244_v25, 7 }
  0x54   :  { %991 = vadd.xlane.f32.xlu0 %v990_v61 }
  0x55   :  { %1009 = vadd.xlane.f32.xlu1 %v1008_v29  ;;  %v721_v29 = vunpack.c.l.s4 %v9514_v28  ;;  %14443 = vst [vmem:[#allocation6_spill] sm:$0xff] %v9995_v32 }
  0x58   :  { %994 = vadd.xlane.f32.xlu0 %v993_v8 }
  0x59   :  { %970 = vadd.xlane.f32.xlu1 %v969_v33  ;;  %v722_v33 = vunpack.c.0.s8 %v721_v29 }
  0x5b   :  { %v9998_v36 = vsub.s32 %v722_v33, %v9995_v32 }
  0x5c   :  { %1018 = vadd.xlane.f32.xlu0 %v1017_v18 }
  0x5d   :  { %1012 = vadd.xlane.f32.xlu1 %v1011_v38  ;;  %14444 = vst [vmem:[#allocation7_spill] sm:$0xff] %v9998_v36 }
  0x61   :  { %1015 = vadd.xlane.f32.xlu1 %v1014_v43 }
  0xd0   :  { %v157_v45 = vpop.f32.mrf.mxu0 }
  0xd1   :  { %v158_v58 = vadd.f32 %v7674_v52, %v157_v45  ;;  %v10009_v45 = vsub.s32 0, %v9995_v32 }
  0xd2   :  { %v159_v47 = vpop.f32.mrf.mxu0 }
  0xd3   :  { %v160_v49 = vadd.f32 %v7675_v46, %v159_v47  ;;  %14446 = vst [vmem:[#allocation9_spill] sm:$0xff] %v10009_v45 }
  0xd5   :  { %v269_v51 = vpop.f32.mrf.mxu1 }
  0xd6   :  { %v270_v3 = vadd.f32 %v269_v51, %v158_v58 }
  0xd7   :  { %v271_v54 = vpop.f32.mrf.mxu1 }
  0xd8   :  { %v272_v55 = vadd.f32 %v271_v54, %v160_v49  ;;  %v358_v57 = vpop.f32.mrf.mxu0 }
  0xd9   :  { %v359_v8 = vadd.f32 %v358_v57, %v270_v3 }
  0xda   :  { %v360_v61 = vpop.f32.mrf.mxu0 }
  0xdb   :  { %v361_v1 = vadd.f32 %v360_v61, %v272_v55 }
  0xdf   :  { %v440_v7 = vpop.f32.mrf.mxu1 }
  0xe0   :  { %v441_v15 = vadd.f32 %v440_v7, %v359_v8 }
  0xe1   :  { %v442_v13 = vpop.f32.mrf.mxu1 }
  0xe2   :  { %v443_v14 = vadd.f32 %v442_v13, %v361_v1  ;;  %v536_v18 = vpop.f32.mrf.mxu0 }
  0xe3   :  { %v537_v20 = vadd.f32 %v536_v18, %v441_v15 }
  0xe4   :  { %v538_v57 = vpop.f32.mrf.mxu0 }
  0xe5   :  { %v539_v7 = vadd.f32 %v538_v57, %v443_v14 }
  0xe8   :  { %v616_v21 = vpop.f32.mrf.mxu1 }
  0xe9   :  { %v9991_v24 = vadd.f32 %v616_v21, %v537_v20 }
  0xea   :  { %v618_v8 = vpop.f32.mrf.mxu1 }
  0xeb   :  { %14442 = vst [vmem:[#allocation5_spill] sm:$0xff] %v9991_v24  ;;  %9159 = vtanh.f32 %v9991_v24 }
  0xf8   :  { %v10000_v38 = vpop.eup %9159 }
  0xf9   :  { %v10004_v41 = vmul.f32 %v10000_v38, %v10000_v38  ;;  %v726_v43 = vrot.slane %v10000_v38, %v9998_v36 }
  0xfb   :  { %14445 = vst [vmem:[#allocation8_spill] sm:$0xff] %v10004_v41  ;;  %v1246_v46 = vsel %vm14287_vm1, %v10004_v41, 0.0  ;;  %v734_v47 = vrot.slane %v726_v43, %v9998_v36  ;;  %v727_v49 = vcombine.high %v726_v43, %v726_v43 }
  0xfc   :  { %1247 = vadd.xlane.f32.xlu0 %v1246_v46 }
  0xfd   :  { %v747_v51 = vrot.slane %v734_v47, %v10009_v45  ;;  %v10018_v55 = vrot.slane %v727_v49, %v9998_v36  ;;  %v742_v13 = vcombine.high %v734_v47, %v734_v47 }
  0xff   :  { %v765_v52 = vmul.f32 %v747_v51, %v9720_v60  ;;  %v764_v54 = vmul.f32 %v747_v51, %v9674_v40  ;;  %v768_v1 = vmul.f32 %v747_v51, %v9815_v22  ;;  %v766_v3 = vmul.f32 %v747_v51, %v9768_v4 }
 0x100   :  { %v769_v60 = vmul.f32 %v747_v51, %v9835_v31  ;;  %v767_v18 = vmul.f32 %v747_v51, %v9807_v19  ;;  %v751_v20 = vrot.slane %v10018_v55, %v10009_v45  ;;  %v10030_v22 = vadd.f32 %v618_v8, %v539_v7 }
 0x101   :  { %v799_v58 = vsel %vm14284_vm0, %v765_v52, 0.0  ;;  %v796_v61 = vsel %vm14284_vm0, %v764_v54, 0.0  ;;  %v808_v40 = vsel %vm14284_vm0, %v768_v1, 0.0  ;;  %v802_v15 = vsel %vm14284_vm0, %v766_v3, 0.0 }
 0x102   :  { %800 = vadd.xlane.f32.xlu0 %v799_v58  ;;  %797 = vadd.xlane.f32.xlu1 %v796_v61  ;;  %14447 = vst [vmem:[#allocation10_spill] sm:$0xff] %v10030_v22  ;;  %v770_v4 = vmul.f32 %v747_v51, %v9851_v37  ;;  %v811_v14 = vsel %vm14284_vm0, %v769_v60, 0.0  ;;  %v805_v31 = vsel %vm14284_vm0, %v767_v18, 0.0  ;;  %v772_v21 = vmul.f32 %v751_v20, %v9745_v0 }
 0x103   :  { %v10037_v28 = vrot.slane %v742_v13, %v10009_v45  ;;  %9161 = vtanh.f32 %v10030_v22  ;;  %v771_v33 = vmul.f32 %v747_v51, %v9883_v50  ;;  %v773_v46 = vmul.f32 %v751_v20, %v9712_v59 }
 0x104   :  { %v814_v19 = vsel %vm14284_vm0, %v770_v4, 0.0  ;;  %v820_v29 = vsel %vm14284_vm0, %v772_v21, 0.0  ;;  %v774_v51 = vmul.f32 %v751_v20, %v9736_v62  ;;  %v777_v57 = vmul.f32 %v751_v20, %v9923_v5 }
 0x105   :  { %v780_v37 = vmul.f32 %v10037_v28, %v9789_v12  ;;  %v817_v0 = vsel %vm14284_vm0, %v771_v33, 0.0  ;;  %v782_v47 = vmul.f32 %v10037_v28, %v9860_v42  ;;  %v823_v49 = vsel %vm14284_vm0, %v773_v46, 0.0 }
 0x106   :  { %809 = vadd.xlane.f32.xlu0 %v808_v40  ;;  %803 = vadd.xlane.f32.xlu1 %v802_v15  ;;  %v776_v12 = vmul.f32 %v751_v20, %v9891_v53  ;;  %v781_v59 = vmul.f32 %v10037_v28, %v9758_v6  ;;  %v826_v54 = vsel %vm14284_vm0, %v774_v51, 0.0  ;;  %v743_v58 = vcombine.high %v10018_v55, %v10018_v55  ;;  %v10087_v15 = vpop.xlane.xlu0 %925 }
 0x107   :  { %v844_v43 = vsel %vm14284_vm0, %v780_v37, 0.0  ;;  %v850_v50 = vsel %vm14284_vm0, %v782_v47, 0.0  ;;  %v835_v61 = vsel %vm14284_vm0, %v777_v57, 0.0  ;;  %v775_v6 = vmul.f32 %v751_v20, %v9779_v10 }
 0x108   :  { %v832_v42 = vsel %vm14284_vm0, %v776_v12, 0.0  ;;  %v847_v53 = vsel %vm14284_vm0, %v781_v59, 0.0  ;;  %v778_v1 = vmul.f32 %v751_v20, %v9948_v23  ;;  %v779_v8 = vmul.f32 %v751_v20, %v9964_v30 }
 0x109   :  { %v829_v55 = vsel %vm14284_vm0, %v775_v6, 0.0  ;;  %v759_v10 = vrot.slane %v743_v58, %v10009_v45  ;;  %v785_v4 = vmul.f32 %v10037_v28, %v9867_v44  ;;  %v786_v21 = vmul.f32 %v10037_v28, %v9899_v56 }
 0x10a   :  { %812 = vadd.xlane.f32.xlu0 %v811_v14  ;;  %806 = vadd.xlane.f32.xlu1 %v805_v31  ;;  %v838_v60 = vsel %vm14284_vm0, %v778_v1, 0.0  ;;  %v841_v40 = vsel %vm14284_vm0, %v779_v8, 0.0  ;;  %v10094_v31 = vpop.xlane.xlu1 %928  ;;  %v787_v33 = vmul.f32 %v10037_v28, %v9915_v2  ;;  %9163 = vrsqrt.f32 %v10087_v15 }
 0x10b   :  { %v789_v30 = vmul.f32 %v759_v10, %v9876_v48  ;;  %v790_v14 = vmul.f32 %v759_v10, %v9908_v63  ;;  %v862_v44 = vsel %vm14284_vm0, %v786_v21, 0.0  ;;  %v792_v37 = vmul.f32 %v759_v10, %v9956_v26 }
 0x10c   :  { %v793_v46 = vmul.f32 %v759_v10, %v9972_v35  ;;  %v788_v47 = vmul.f32 %v759_v10, %v9799_v16  ;;  %vm1022_vm2 = vcmp.eq.f32.partialorder %v10087_v15, inf  ;;  %vm1024_vm4 = vcmp.eq.f32.partialorder %v10087_v15, 0.0 }
 0x10d   :  { %v871_v20 = vsel %vm14284_vm0, %v789_v30, 0.0  ;;  %v874_v48 = vsel %vm14284_vm0, %v790_v14, 0.0  ;;  %vm1029_vm9 = vcmp.eq.f32.partialorder %v10094_v31, inf  ;;  %vm1031_vm11 = vcmp.eq.f32.partialorder %v10094_v31, 0.0 }
 0x10e   :  { %815 = vadd.xlane.f32.xlu0 %v814_v19  ;;  %821 = vadd.xlane.f32.xlu1 %v820_v29  ;;  %v791_v19 = vmul.f32 %v759_v10, %v9939_v17  ;;  %v10101_v29 = vpop.xlane.xlu0 %952  ;;  %v865_v17 = vsel %vm14284_vm0, %v787_v33, 0.0  ;;  %v883_v2 = vsel %vm14284_vm0, %v793_v46, 0.0  ;;  %v868_v26 = vsel %vm14284_vm0, %v788_v47, 0.0 }
 0x10f   :  { %9165 = vrsqrt.f32 %v10101_v29  ;;  %vm1085_vm3 = vcmp.eq.f32.partialorder %v10101_v29, inf  ;;  %vm1087_vm5 = vcmp.eq.f32.partialorder %v10101_v29, 0.0  ;;  %v1088_v46 = vand.u32 2147483648, %v10101_v29 }
 0x110   :  { %v10054_v52 = vpop.eup %9161  ;;  %v877_v63 = vsel %vm14284_vm0, %v791_v19, 0.0  ;;  %v1025_v19 = vand.u32 2147483648, %v10087_v15 }
 0x111   :  { %14448 = vst [vmem:[#allocation11_spill] sm:$0xff] %v10054_v52  ;;  %v3396_v62 = vcombine.low %v10000_v38, %v10054_v52  ;;  %v783_v38 = vmul.f32 %v10037_v28, %v9826_v27  ;;  %v784_v27 = vmul.f32 %v10037_v28, %v9843_v34  ;;  %v859_v34 = vsel %vm14284_vm0, %v785_v4, 0.0 }
 0x112   :  { %818 = vadd.xlane.f32.xlu0 %v817_v0  ;;  %845 = vadd.xlane.f32.xlu1 %v844_v43  ;;  %v10108_v0 = vpop.xlane.xlu1 %949  ;;  %v10110_v56 = vpop.xlane.xlu0 %955  ;;  %v880_v43 = vsel %vm14284_vm0, %v792_v37, 0.0  ;;  %v794_v28 = vmul.f32 %v759_v10, %v9980_v39 }
 0x113   :  { %v3403_v3 = vrot.slane %v3396_v62, %v9998_v36  ;;  %v853_v13 = vsel %vm14284_vm0, %v783_v38, 0.0  ;;  %v856_v18 = vsel %vm14284_vm0, %v784_v27, 0.0  ;;  %9167 = vrsqrt.f32 %v10110_v56 }
 0x114   :  { %v886_v35 = vsel %vm14284_vm0, %v794_v28, 0.0  ;;  %9169 = vrsqrt.f32 %v10094_v31  ;;  %vm1092_vm6 = vcmp.eq.f32.partialorder %v10110_v56, inf  ;;  %vm1094_vm7 = vcmp.eq.f32.partialorder %v10110_v56, 0.0 }
 0x115   :  { %v10071_v5 = vrot.slane %v3403_v3, %v9998_v36  ;;  %v3404_v7 = vcombine.high %v3403_v3, %v3403_v3  ;;  %9171 = vrsqrt.f32 %v10108_v0  ;;  %vm1078_vm13 = vcmp.eq.f32.partialorder %v10108_v0, inf }
 0x116   :  { %824 = vadd.xlane.f32.xlu0 %v823_v49  ;;  %851 = vadd.xlane.f32.xlu1 %v850_v50  ;;  %v10116_v49 = vpop.xlane.xlu1 %931  ;;  %v795_v50 = vmul.f32 %v759_v10, %v9931_v11  ;;  %v10122_v51 = vpop.xlane.xlu0 %976  ;;  %vm1080_vm14 = vcmp.eq.f32.partialorder %v10108_v0, 0.0 }
 0x117   :  { %14449 = vst [vmem:[#allocation12_spill] sm:$0xff] %v10071_v5  ;;  %v10080_v23 = vrot.slane %v3404_v7, %v9998_v36  ;;  %9173 = vrsqrt.f32 %v10122_v51  ;;  %vm1141_vm8 = vcmp.eq.f32.partialorder %v10122_v51, inf  ;;  %vm1143_vm12 = vcmp.eq.f32.partialorder %v10122_v51, 0.0 }
 0x118   :  { %v889_v16 = vsel %vm14284_vm0, %v795_v50, 0.0 }
 0x119   :  { %14450 = vst [vmem:[#allocation13_spill] sm:$0xff] %v10080_v23 }
 0x11a   :  { %827 = vadd.xlane.f32.xlu0 %v826_v54  ;;  %833 = vadd.xlane.f32.xlu1 %v832_v42  ;;  %v10126_v12 = vpop.xlane.xlu1 %973  ;;  %v10128_v59 = vpop.xlane.xlu0 %958  ;;  %v14240_v54 = vmov 0  }
 0x11b   :  { %9141 = vset.pattern.permute.xlu0 %v14240_v54  ;;  %9140 = vset.pattern.permute.xlu1 %v14240_v54  ;;  %vm1099_vm10 = vcmp.eq.f32.partialorder %v10128_v59, inf  ;;  %vm1101_vm15 = vcmp.eq.f32.partialorder %v10128_v59, 0.0  ;;  %v1081_v54 = vand.u32 2147483648, %v10108_v0 }
 0x11e   :  { %848 = vadd.xlane.f32.xlu0 %v847_v53  ;;  %836 = vadd.xlane.f32.xlu1 %v835_v61  ;;  %v10132_v11 = vpop.xlane.xlu1 %934  ;;  %v10134_v39 = vpop.xlane.xlu0 %997 }
 0x122   :  { %830 = vadd.xlane.f32.xlu0 %v829_v55  ;;  %839 = vadd.xlane.f32.xlu1 %v838_v60  ;;  %v10136_v42 = vpop.xlane.xlu1 %979  ;;  %v10138_v57 = vpop.xlane.xlu0 %937 }
 0x126   :  { %854 = vadd.xlane.f32.xlu0 %v853_v13  ;;  %842 = vadd.xlane.f32.xlu1 %v841_v40  ;;  %v10140_v62 = vpop.xlane.xlu1 %1000  ;;  %v10142_v53 = vpop.xlane.xlu0 %982 }
 0x12a   :  { %857 = vadd.xlane.f32.xlu0 %v856_v18  ;;  %872 = vadd.xlane.f32.xlu1 %v871_v20  ;;  %v10144_v58 = vpop.xlane.xlu1 %961  ;;  %v10146_v61 = vpop.xlane.xlu0 %940 }
 0x12b   :  { %v9164_v20 = vpop.eup %9163 }
 0x12e   :  { %860 = vadd.xlane.f32.xlu0 %v859_v34  ;;  %875 = vadd.xlane.f32.xlu1 %v874_v48  ;;  %v10148_v6 = vpop.xlane.xlu1 %1003  ;;  %v10150_v1 = vpop.xlane.xlu0 %985  ;;  %v1021_v48 = vmul.f32 %v9164_v20, %v10087_v15 }
 0x12f   :  { %v9166_v34 = vpop.eup %9165 }
 0x130   :  { %v1084_v21 = vmul.f32 %v9166_v34, %v10101_v29  ;;  %v9168_v33 = vpop.eup %9167  ;;  %v1023_v37 = vsel %vm1022_vm2, %v10087_v15, %v1021_v48  ;;  %v10214_v15 = vsub.s32 3, %v9995_v32  ;;  %vm1036_vm2 = vcmp.eq.f32.partialorder %v10116_v49, inf }
 0x131   :  { %v10216_v28 = vsel %vm1024_vm4, %v1025_v19, %v1023_v37  ;;  %v1091_v50 = vmul.f32 %v9168_v33, %v10110_v56  ;;  %v1032_v19 = vand.u32 2147483648, %v10094_v31 }
 0x132   :  { %863 = vadd.xlane.f32.xlu0 %v862_v44  ;;  %878 = vadd.xlane.f32.xlu1 %v877_v63  ;;  %v10152_v3 = vpop.xlane.xlu1 %964  ;;  %v10154_v7 = vpop.xlane.xlu0 %943  ;;  %v1086_v47 = vsel %vm1085_vm3, %v10101_v29, %v1084_v21  ;;  %v1256_v37 = vmax.f32 %v10216_v28, 1e-08 }
 0x133   :  { %v10231_v21 = vsel %vm1087_vm5, %v1088_v46, %v1086_v47  ;;  %v1093_v46 = vsel %vm1092_vm6, %v10110_v56, %v1091_v50  ;;  %vm1038_vm5 = vcmp.eq.f32.partialorder %v10116_v49, 0.0  ;;  %vm1190_vm6 = vcmp.eq.f32.partialorder %v10134_v39, inf }
 0x136   :  { %866 = vadd.xlane.f32.xlu0 %v865_v17  ;;  %881 = vadd.xlane.f32.xlu1 %v880_v43  ;;  %v10156_v38 = vpop.xlane.xlu1 %1006  ;;  %v10158_v8 = vpop.xlane.xlu0 %988  ;;  %v10202_v17 = vsub.s32 1, %v9995_v32 }
 0x137   :  { %v9170_v43 = vpop.eup %9169 }
 0x138   :  { %14451 = vst [vmem:[#allocation14_spill] sm:$0xff] %v10202_v17  ;;  %v1028_v34 = vmul.f32 %v9170_v43, %v10094_v31  ;;  %v9172_v48 = vpop.eup %9171 }
 0x139   :  { %v9174_v33 = vpop.eup %9173  ;;  %v1077_v50 = vmul.f32 %v9172_v48, %v10108_v0 }
 0x13a   :  { %884 = vadd.xlane.f32.xlu1 %v883_v2  ;;  %869 = vadd.xlane.f32.xlu0 %v868_v26  ;;  %v10160_v55 = vpop.xlane.xlu1 %967  ;;  %v10162_v60 = vpop.xlane.xlu0 %946  ;;  %v1095_v2 = vand.u32 2147483648, %v10110_v56  ;;  %v10211_v26 = vsub.s32 2, %v9995_v32  ;;  %v1030_v20 = vsel %vm1029_vm9, %v10094_v31, %v1028_v34  ;;  %v1140_v22 = vmul.f32 %v9174_v33, %v10122_v51 }
 0x13b   :  { %v1033_v33 = vsel %vm1031_vm11, %v1032_v19, %v1030_v20  ;;  %vm1148_vm9 = vcmp.eq.f32.partialorder %v10136_v42, inf  ;;  %vm1136_vm11 = vcmp.eq.f32.partialorder %v10126_v12, 0.0 }
 0x13c   :  { %14452 = vst [vmem:[#allocation15_spill] sm:$0xff] %v10211_v26  ;;  %v10265_v43 = vsel %vm1094_vm7, %v1095_v2, %v1093_v46  ;;  %vm1134_vm7 = vcmp.eq.f32.partialorder %v10126_v12, inf  ;;  %v1257_v19 = vmax.f32 %v1033_v33, 1e-08  ;;  %v1151_v46 = vand.u32 2147483648, %v10136_v42 }
 0x13e   :  { %887 = vadd.xlane.f32.xlu1 %v886_v35  ;;  %890 = vadd.xlane.f32.xlu0 %v889_v16  ;;  %v10164_v10 = vpop.xlane.xlu1 %1009  ;;  %v10166_v13 = vpop.xlane.xlu0 %991 }
 0x142   :  { %v10169_v40 = vpop.xlane.xlu1 %970  ;;  %v10172_v27 = vpop.xlane.xlu0 %994 }
 0x146   :  { %v10175_v30 = vpop.xlane.xlu1 %1012  ;;  %v10178_v18 = vpop.xlane.xlu0 %1018 }
 0x14a   :  { %v10184_v14 = vpop.xlane.xlu1 %1015 }
 0x185   :  { %v10182_v4 = vpop.xlane.xlu0 %1247 }
 0x186   :  { %9175 = vrsqrt.f32 %v10182_v4  ;;  %vm1251_vm3 = vcmp.eq.f32.partialorder %v10182_v4, inf  ;;  %v1254_v36 = vand.u32 2147483648, %v10182_v4  ;;  %vm1253_vm4 = vcmp.eq.f32.partialorder %v10182_v4, 0.0 }
 0x187   :  { %9177 = vrsqrt.f32 %v10128_v59 }
 0x188   :  { %9179 = vrsqrt.f32 %v10136_v42 }
 0x189   :  { %9181 = vrsqrt.f32 %v10116_v49 }
 0x18a   :  { %9183 = vrsqrt.f32 %v10126_v12 }
 0x18b   :  { %v10195_v44 = vpop.xlane.xlu0 %800  ;;  %v10197_v63 = vpop.xlane.xlu1 %797  ;;  %9185 = vrsqrt.f32 %v10134_v39 }
 0x18c   :  { %9187 = vrsqrt.f32 %v10140_v62 }
 0x18d   :  { %9189 = vrsqrt.f32 %v10144_v58 }
 0x18e   :  { %9191 = vrsqrt.f32 %v10132_v11 }
 0x18f   :  { %v10221_v35 = vpop.xlane.xlu0 %809  ;;  %v10223_v16 = vpop.xlane.xlu1 %803  ;;  %9193 = vrsqrt.f32 %v10138_v57 }
 0x190   :  { %9195 = vrsqrt.f32 %v10142_v53 }
 0x191   :  { %9197 = vrsqrt.f32 %v10148_v6 }
 0x192   :  { %9199 = vrsqrt.f32 %v10152_v3 }
 0x193   :  { %v9176_v29 = vpop.eup %9175  ;;  %v10248_v28 = vpop.xlane.xlu0 %812 }
 0x194   :  { %v10250_v9 = vpop.xlane.xlu1 %806  ;;  %v9178_v25 = vpop.eup %9177  ;;  %v1250_v47 = vmul.f32 %v9176_v29, %v10182_v4  ;;  %v1039_v29 = vand.u32 2147483648, %v10116_v49 }
 0x195   :  { %v9180_v41 = vpop.eup %9179  ;;  %v1098_v48 = vmul.f32 %v9178_v25, %v10128_v59  ;;  %v1079_v25 = vsel %vm1078_vm13, %v10108_v0, %v1077_v50  ;;  %v14455_v0 = vand.u32 2147483648, %v10122_v51  ;;  %vm1197_vm13 = vcmp.eq.f32.partialorder %v10140_v62, inf }
 0x196   :  { %v1252_v34 = vsel %vm1251_vm3, %v10182_v4, %v1250_v47  ;;  %v9182_v2 = vpop.eup %9181  ;;  %v1147_v20 = vmul.f32 %v9180_v41, %v10136_v42  ;;  %vm1199_vm3 = vcmp.eq.f32.partialorder %v10140_v62, 0.0 }
 0x197   :  { %v1255_v23 = vsel %vm1253_vm4, %v1254_v36, %v1252_v34  ;;  %v10275_v5 = vpop.xlane.xlu0 %815  ;;  %v1142_v36 = vsel %vm1141_vm8, %v10122_v51, %v1140_v22  ;;  %v1100_v47 = vsel %vm1099_vm10, %v10128_v59, %v1098_v48  ;;  %v1082_v22 = vsel %vm1080_vm14, %v1081_v54, %v1079_v25  ;;  %v9184_v33 = vpop.eup %9183 }
 0x198   :  { %14453 = vst [vmem:[#allocation16_spill] sm:$0xff] %v10275_v5  ;;  %v10277_v56 = vpop.xlane.xlu1 %821  ;;  %v10284_v31 = vmax.f32 %v1255_v23, 1e-08  ;;  %v1035_v50 = vmul.f32 %v9182_v2, %v10116_v49  ;;  %v10318_v54 = vsel %vm1143_vm12, %v14455_v0, %v1142_v36  ;;  %vm1192_vm8 = vcmp.eq.f32.partialorder %v10134_v39, 0.0 }
 0x199   :  { %v1149_v2 = vsel %vm1148_vm9, %v10136_v42, %v1147_v20  ;;  %vm1150_vm10 = vcmp.eq.f32.partialorder %v10136_v42, 0.0  ;;  %v1137_v51 = vand.u32 2147483648, %v10126_v12  ;;  %v1264_v36 = vmax.f32 %v1082_v22, 1e-08 }
 0x19a   :  { %v10297_v23 = vrot.slane %v10284_v31, %v10009_v45  ;;  %v9186_v45 = vpop.eup %9185  ;;  %v10327_v25 = vrot.slane %v10284_v31, %v10202_v17  ;;  %v1037_v42 = vsel %vm1036_vm2, %v10116_v49, %v1035_v50  ;;  %v1133_v20 = vmul.f32 %v9184_v33, %v10126_v12 }
 0x19b   :  { %v10306_v41 = vpop.xlane.xlu0 %818  ;;  %v9188_v17 = vpop.eup %9187  ;;  %v1152_v52 = vsel %vm1150_vm10, %v1151_v46, %v1149_v2  ;;  %vm1043_vm12 = vcmp.eq.f32.partialorder %v10132_v11, inf  ;;  %vm1050_vm14 = vcmp.eq.f32.partialorder %v10138_v57, inf  ;;  %vm1106_vm2 = vcmp.eq.f32.partialorder %v10144_v58, inf }
 0x19c   :  { %14454 = vst [vmem:[#allocation17_spill] sm:$0xff] %v10306_v41  ;;  %v10308_v34 = vpop.xlane.xlu1 %845  ;;  %v1311_v4 = vmul.f32 %v10297_v23, %v1257_v19  ;;  %v1310_v48 = vmul.f32 %v10297_v23, %v1256_v37  ;;  %v14456_v37 = vand.u32 2147483648, %v10128_v59  ;;  %v1318_v22 = vmul.f32 %v10327_v25, %v1264_v36  ;;  %v9190_v50 = vpop.eup %9189 }
 0x19d   :  { %v1135_v2 = vsel %vm1134_vm7, %v10126_v12, %v1133_v20  ;;  %v1196_v36 = vmul.f32 %v9188_v17, %v10140_v62  ;;  %v1105_v17 = vmul.f32 %v9190_v50, %v10144_v58  ;;  %v14458_v50 = vand.u32 2147483648, %v10134_v39 }
 0x19e   :  { %v10333_v19 = vsel %vm1101_vm15, %v14456_v37, %v1100_v47  ;;  %9201 = vrcp.f32 %v1311_v4  ;;  %v1189_v47 = vmul.f32 %v9186_v45, %v10134_v39  ;;  %v10352_v4 = vrot.slane %v10284_v31, %v10211_v26 }
 0x19f   :  { %9203 = vrcp.f32 %v1310_v48  ;;  %v10341_v0 = vpop.xlane.xlu0 %824  ;;  %v1040_v45 = vsel %vm1038_vm5, %v1039_v29, %v1037_v42  ;;  %v9192_v48 = vpop.eup %9191  ;;  %v1274_v37 = vmax.f32 %v1152_v52, 1e-08  ;;  %v14457_v29 = vmax.f32 %v10231_v21, 1e-08 }
 0x1a0   :  { %v10346_v32 = vpop.xlane.xlu1 %851  ;;  %9205 = vrsqrt.f32 %v10146_v61  ;;  %v1191_v49 = vsel %vm1190_vm6, %v10134_v39, %v1189_v47  ;;  %v9194_v20 = vpop.eup %9193  ;;  %v1258_v52 = vmax.f32 %v1040_v45, 1e-08  ;;  %v1138_v47 = vsel %vm1136_vm11, %v1137_v51, %v1135_v2 }
 0x1a1   :  { %9207 = vrsqrt.f32 %v10156_v38  ;;  %v1319_v42 = vmul.f32 %v10327_v25, %v14457_v29  ;;  %v1328_v46 = vmul.f32 %v10352_v4, %v1274_v37  ;;  %v1042_v33 = vmul.f32 %v9192_v48, %v10132_v11  ;;  %v9196_v26 = vpop.eup %9195 }
 0x1a2   :  { %9209 = vrsqrt.f32 %v10150_v1  ;;  %vm1045_vm15 = vcmp.eq.f32.partialorder %v10132_v11, 0.0  ;;  %v1200_v21 = vand.u32 2147483648, %v10140_v62  ;;  %v1312_v12 = vmul.f32 %v10297_v23, %v1258_v52  ;;  %v9198_v37 = vpop.eup %9197 }
 0x1a3   :  { %v10365_v59 = vpop.xlane.xlu0 %827  ;;  %9211 = vrsqrt.f32 %v10160_v55  ;;  %v10398_v45 = vsel %vm1192_vm8, %v14458_v50, %v1191_v49  ;;  %v1046_v48 = vand.u32 2147483648, %v10132_v11  ;;  %v1109_v2 = vand.u32 2147483648, %v10144_v58 }
 0x1a4   :  { %9213 = vrcp.f32 %v1318_v22  ;;  %v10384_v29 = vpop.xlane.xlu1 %833  ;;  %v1198_v22 = vsel %vm1197_vm13, %v10140_v62, %v1196_v36  ;;  %v9200_v36 = vpop.eup %9199  ;;  %v1107_v24 = vsel %vm1106_vm2, %v10144_v58, %v1105_v17  ;;  %vm1108_vm4 = vcmp.eq.f32.partialorder %v10144_v58, 0.0 }
 0x1a5   :  { %9215 = vrsqrt.f32 %v10164_v10  ;;  %v1049_v52 = vmul.f32 %v9194_v20, %v10138_v57  ;;  %v1272_v5 = vmax.f32 %v1138_v47, 1e-08  ;;  %v1044_v39 = vsel %vm1043_vm12, %v10132_v11, %v1042_v33 }
 0x1a6   :  { %9217 = vrcp.f32 %v1319_v42  ;;  %v1201_v49 = vsel %vm1199_vm3, %v1200_v21, %v1198_v22  ;;  %v1203_v42 = vmul.f32 %v9198_v37, %v10148_v6  ;;  %v10414_v41 = vrot.slane %v10284_v31, %v10214_v15 }
 0x1a7   :  { %v10392_v51 = vpop.xlane.xlu0 %848  ;;  %9219 = vrcp.f32 %v1328_v46  ;;  %v14459_v58 = vmax.f32 %v10265_v43, 1e-08  ;;  %v1110_v17 = vsel %vm1108_vm4, %v1109_v2, %v1107_v24  ;;  %vm1204_vm5 = vcmp.eq.f32.partialorder %v10148_v6, inf }
 0x1a8   :  { %9221 = vrcp.f32 %v1312_v12  ;;  %v1112_v33 = vmul.f32 %v9200_v36, %v10152_v3  ;;  %v10422_v47 = vpop.xlane.xlu1 %836  ;;  %vm1052_vm6 = vcmp.eq.f32.partialorder %v10138_v57, 0.0  ;;  %v1281_v31 = vmax.f32 %v1201_v49, 1e-08 }
 0x1a9   :  { %v1320_v46 = vmul.f32 %v10327_v25, %v14459_v58  ;;  %vm1113_vm7 = vcmp.eq.f32.partialorder %v10152_v3, inf  ;;  %9223 = vrsqrt.f32 %v10169_v40  ;;  %vm1155_vm9 = vcmp.eq.f32.partialorder %v10142_v53, inf }
 0x1aa   :  { %vm1206_vm8 = vcmp.eq.f32.partialorder %v10148_v6, 0.0  ;;  %v1116_v22 = vand.u32 2147483648, %v10152_v3  ;;  %v1326_v12 = vmul.f32 %v10352_v4, %v1272_v5  ;;  %v1268_v2 = vmax.f32 %v1110_v17, 1e-08 }
 0x1ab   :  { %v9202_v50 = vpop.eup %9201  ;;  %v10424_v21 = vpop.xlane.xlu0 %830  ;;  %v1205_v36 = vsel %vm1204_vm5, %v10148_v6, %v1203_v42  ;;  %9225 = vrcp.f32 %v1320_v46  ;;  %v1114_v5 = vsel %vm1113_vm7, %v10152_v3, %v1112_v33  ;;  %vm1115_vm10 = vcmp.eq.f32.partialorder %v10152_v3, 0.0 }
 0x1ac   :  { %v9204_v20 = vpop.eup %9203  ;;  %v1345_v62 = vmul.f32 %v9202_v50, %v10195_v44  ;;  %v1207_v44 = vand.u32 2147483648, %v10148_v6  ;;  %v1051_v50 = vsel %vm1050_vm14, %v10138_v57, %v1049_v52  ;;  %9227 = vrsqrt.f32 %v10154_v7  ;;  %v10460_v3 = vpop.xlane.xlu1 %839 }
 0x1ad   :  { %v1343_v43 = vmul.f32 %v9204_v20, %v10197_v63  ;;  %v10430_v24 = vpop.eup %9205  ;;  %v1335_v63 = vmul.f32 %v10414_v41, %v1281_v31  ;;  %v1154_v42 = vmul.f32 %v9196_v26, %v10142_v53  ;;  %v1047_v46 = vsel %vm1045_vm15, %v1046_v48, %v1044_v39 }
 0x1ae   :  { %1447 = vperm.xlu0 %9141, %v1345_v62   ;;  %v9208_v37 = vpop.eup %9207  ;;  %9229 = vrsqrt.f32 %v10175_v30  ;;  %v1322_v20 = vmul.f32 %v10327_v25, %v1268_v2  ;;  %v1208_v52 = vsel %vm1206_vm8, %v1207_v44, %v1205_v36  ;;  %vm1211_vm11 = vcmp.eq.f32.partialorder %v10156_v38, inf }
 0x1af   :  { %1444 = vperm.xlu1 %9140, %v1343_v43   ;;  %v10441_v49 = vpop.eup %9209  ;;  %v1210_v62 = vmul.f32 %v9208_v37, %v10156_v38  ;;  %9231 = vrcp.f32 %v1326_v12  ;;  %v10462_v33 = vpop.xlane.xlu0 %854  ;;  %vm1157_vm12 = vcmp.eq.f32.partialorder %v10142_v53, 0.0  ;;  %v1117_v11 = vsel %vm1115_vm10, %v1116_v22, %v1114_v5 }
 0x1b0   :  { %v9212_v58 = vpop.eup %9211  ;;  %v14460_v48 = vmax.f32 %v10318_v54, 1e-08  ;;  %9233 = vrcp.f32 %v1335_v63  ;;  %vm1057_vm13 = vcmp.eq.f32.partialorder %v10146_v61, inf  ;;  %v1259_v31 = vmax.f32 %v1047_v46, 1e-08 }
 0x1b1   :  { %v9214_v17 = vpop.eup %9213  ;;  %vm1213_vm14 = vcmp.eq.f32.partialorder %v10156_v38, 0.0  ;;  %v1119_v43 = vmul.f32 %v9212_v58, %v10160_v55  ;;  %9235 = vrsqrt.f32 %v10184_v14  ;;  %v1282_v12 = vmax.f32 %v1208_v52, 1e-08 }
 0x1b2   :  { %v1359_v26 = vmul.f32 %v9214_v17, %v10277_v56  ;;  %v1327_v39 = vmul.f32 %v10352_v4, %v14460_v48  ;;  %v9216_v6 = vpop.eup %9215  ;;  %v1214_v22 = vand.u32 2147483648, %v10156_v38  ;;  %vm1120_vm15 = vcmp.eq.f32.partialorder %v10160_v55, inf }
 0x1b3   :  { %v9218_v44 = vpop.eup %9217  ;;  %9237 = vrcp.f32 %v1322_v20  ;;  %v1269_v54 = vmax.f32 %v1117_v11, 1e-08  ;;  %v1212_v37 = vsel %vm1211_vm11, %v10156_v38, %v1210_v62  ;;  %v1123_v2 = vand.u32 2147483648, %v10160_v55 }
 0x1b4   :  { %1468 = vperm.xlu1 %9140, %v1359_v26   ;;  %v9220_v56 = vpop.eup %9219  ;;  %v1313_v36 = vmul.f32 %v10297_v23, %v1259_v31  ;;  %vm1059_vm2 = vcmp.eq.f32.partialorder %v10146_v61, 0.0  ;;  %v1361_v63 = vmul.f32 %v9218_v44, %v10341_v0  ;;  %9239 = vrcp.f32 %v1327_v39  ;;  %v10495_v0 = vpop.xlane.xlu1 %842 }
 0x1b5   :  { %v1379_v5 = vmul.f32 %v9220_v56, %v10346_v32  ;;  %v1336_v58 = vmul.f32 %v10414_v41, %v1282_v12  ;;  %v9222_v46 = vpop.eup %9221  ;;  %v1280_v20 = vmax.f32 %v10398_v45, 1e-08  ;;  %v14461_v17 = vand.u32 2147483648, %v10138_v57  ;;  %v10497_v32 = vpop.xlane.xlu0 %857 }
 0x1b6   :  { %v1121_v62 = vsel %vm1120_vm15, %v10160_v55, %v1119_v43  ;;  %vm1122_vm3 = vcmp.eq.f32.partialorder %v10160_v55, 0.0  ;;  %v1156_v45 = vsel %vm1155_vm9, %v10142_v53, %v1154_v42  ;;  %v1067_v11 = vand.u32 2147483648, %v10154_v7  ;;  %v9224_v26 = vpop.eup %9223 }
 0x1b7   :  { %v10489_v52 = vsel %vm1052_vm6, %v14461_v17, %v1051_v50  ;;  %v1217_v57 = vmul.f32 %v9216_v6, %v10164_v10  ;;  %v1323_v50 = vmul.f32 %v10327_v25, %v1269_v54  ;;  %1498 = vperm.xlu0 %9141, %v1379_v5   ;;  %v1056_v55 = vmul.f32 %v10430_v24, %v10146_v61 }
 0x1b8   :  { %1471 = vperm.xlu1 %9140, %v1361_v63   ;;  %v1215_v48 = vsel %vm1213_vm14, %v1214_v22, %v1212_v37  ;;  %vm1218_vm4 = vcmp.eq.f32.partialorder %v10164_v10, inf  ;;  %9241 = vrcp.f32 %v1313_v36  ;;  %vm1162_vm5 = vcmp.eq.f32.partialorder %v10150_v1, inf  ;;  %v9226_v43 = vpop.eup %9225 }
 0x1b9   :  { %v1124_v42 = vsel %vm1122_vm3, %v1123_v2, %v1121_v62  ;;  %v1347_v39 = vmul.f32 %v9222_v46, %v10223_v16  ;;  %v14462_v6 = vmax.f32 %v10333_v19, 1e-08  ;;  %9243 = vrcp.f32 %v1336_v58  ;;  %v9228_v24 = vpop.eup %9227  ;;  %v873_v2 = vpop.xlane.xlu1 %872 }
 0x1ba   :  { %v1260_v44 = vmax.f32 %v10489_v52, 1e-08  ;;  %9245 = vrsqrt.f32 %v10158_v8  ;;  %vm1220_vm6 = vcmp.eq.f32.partialorder %v10164_v10, 0.0  ;;  %v1221_v38 = vand.u32 2147483648, %v10164_v10  ;;  %v10529_v36 = vpop.xlane.xlu0 %860 }
 0x1bb   :  { %v1321_v31 = vmul.f32 %v10327_v25, %v14462_v6  ;;  %v1283_v12 = vmax.f32 %v1215_v48, 1e-08  ;;  %v1219_v22 = vsel %vm1218_vm4, %v10164_v10, %v1217_v57  ;;  %v1126_v16 = vmul.f32 %v9224_v26, %v10169_v40  ;;  %v9230_v19 = vpop.eup %9229 }
 0x1bc   :  { %9247 = vrcp.f32 %v1323_v50  ;;  %1450 = vperm.xlu1 %9140, %v1347_v39   ;;  %v14463_v56 = vand.u32 2147483648, %v10142_v53  ;;  %v1270_v37 = vmax.f32 %v1124_v42, 1e-08  ;;  %vm1127_vm7 = vcmp.eq.f32.partialorder %v10169_v40, inf  ;;  %v9232_v63 = vpop.eup %9231 }
 0x1bd   :  { %9249 = vrsqrt.f32 %v10162_v60  ;;  %v1058_v5 = vsel %vm1057_vm13, %v10146_v61, %v1056_v55  ;;  %vm1164_vm9 = vcmp.eq.f32.partialorder %v10150_v1, 0.0  ;;  %vm1064_vm8 = vcmp.eq.f32.partialorder %v10154_v7, inf  ;;  %v9234_v46 = vpop.eup %9233 }
 0x1be   :  { %v10525_v54 = vsel %vm1157_vm12, %v14463_v56, %v1156_v45  ;;  %v1363_v53 = vmul.f32 %v9226_v43, %v10365_v59  ;;  %9251 = vrcp.f32 %v1321_v31  ;;  %v1337_v58 = vmul.f32 %v10414_v41, %v1283_v12  ;;  %v9236_v45 = vpop.eup %9235 }
 0x1bf   :  { %v1222_v17 = vsel %vm1220_vm6, %v1221_v38, %v1219_v22  ;;  %vm1129_vm10 = vcmp.eq.f32.partialorder %v10169_v40, 0.0  ;;  %v1130_v52 = vand.u32 2147483648, %v10169_v40  ;;  %v1324_v62 = vmul.f32 %v10327_v25, %v1270_v37 }
 0x1c0   :  { %v1128_v57 = vsel %vm1127_vm7, %v10169_v40, %v1126_v16  ;;  %v1224_v59 = vmul.f32 %v9230_v19, %v10175_v30  ;;  %v1393_v50 = vmul.f32 %v9234_v46, %v873_v2  ;;  %1474 = vperm.xlu1 %9140, %v1363_v53   ;;  %v1334_v26 = vmul.f32 %v10414_v41, %v1280_v20  ;;  %v9238_v55 = vpop.eup %9237  ;;  %v876_v16 = vpop.xlane.xlu1 %875 }
 0x1c1   :  { %v14464_v10 = vand.u32 2147483648, %v10146_v61  ;;  %v1161_v42 = vmul.f32 %v10441_v49, %v10150_v1  ;;  %9253 = vrsqrt.f32 %v10166_v13  ;;  %vm1225_vm11 = vcmp.eq.f32.partialorder %v10175_v30, inf  ;;  %v9240_v20 = vpop.eup %9239  ;;  %v10562_v49 = vpop.xlane.xlu0 %863 }
 0x1c2   :  { %vm1227_vm12 = vcmp.eq.f32.partialorder %v10175_v30, 0.0  ;;  %v1314_v39 = vmul.f32 %v10297_v23, %v1260_v44  ;;  %v1375_v6 = vmul.f32 %v9232_v63, %v10308_v34  ;;  %1519 = vperm.xlu0 %9141, %v1393_v50   ;;  %9255 = vrcp.f32 %v1337_v58 }
 0x1c3   :  { %v1061_v48 = vsel %vm1059_vm2, %v14464_v10, %v1058_v5  ;;  %v1284_v31 = vmax.f32 %v1222_v17, 1e-08  ;;  %v1131_v61 = vsel %vm1129_vm10, %v1130_v52, %v1128_v57  ;;  %v1228_v43 = vand.u32 2147483648, %v10175_v30 }
 0x1c4   :  { %9257 = vrcp.f32 %v1324_v62  ;;  %v1226_v38 = vsel %vm1225_vm11, %v10175_v30, %v1224_v59  ;;  %v1231_v12 = vmul.f32 %v9236_v45, %v10184_v14  ;;  %v1367_v44 = vmul.f32 %v9238_v55, %v10384_v29  ;;  %1492 = vperm.xlu1 %9140, %v1375_v6  }
 0x1c5   :  { %9259 = vrcp.f32 %v1334_v26  ;;  %v1275_v34 = vmax.f32 %v10525_v54, 1e-08  ;;  %v1163_v40 = vsel %vm1162_vm5, %v10150_v1, %v1161_v42  ;;  %v1063_v22 = vmul.f32 %v9228_v24, %v10154_v7  ;;  %v9242_v19 = vpop.eup %9241  ;;  %v10591_v45 = vpop.xlane.xlu0 %866 }
 0x1c6   :  { %vm1232_vm13 = vcmp.eq.f32.partialorder %v10184_v14, inf  ;;  %v1271_v56 = vmax.f32 %v1131_v61, 1e-08  ;;  %9261 = vrcp.f32 %v1314_v39  ;;  %v1377_v37 = vmul.f32 %v9240_v20, %v10392_v51  ;;  %1480 = vperm.xlu0 %9141, %v1367_v44   ;;  %v9244_v2 = vpop.eup %9243  ;;  %v879_v39 = vpop.xlane.xlu1 %878 }
 0x1c7   :  { %v1338_v29 = vmul.f32 %v10414_v41, %v1284_v31  ;;  %v1261_v63 = vmax.f32 %v1061_v48, 1e-08  ;;  %9263 = vrsqrt.f32 %v10172_v27  ;;  %v1229_v54 = vsel %vm1227_vm12, %v1228_v43, %v1226_v38  ;;  %v9246_v5 = vpop.eup %9245 }
 0x1c8   :  { %v1235_v24 = vand.u32 2147483648, %v10184_v14  ;;  %v1233_v53 = vsel %vm1232_vm13, %v10184_v14, %v1231_v12  ;;  %vm1234_vm14 = vcmp.eq.f32.partialorder %v10184_v14, 0.0  ;;  %v1329_v58 = vmul.f32 %v10352_v4, %v1275_v34  ;;  %1495 = vperm.xlu1 %9140, %v1377_v37  }
 0x1c9   :  { %v1395_v51 = vmul.f32 %v9244_v2, %v876_v16  ;;  %v9248_v46 = vpop.eup %9247  ;;  %v14465_v17 = vand.u32 2147483648, %v10150_v1  ;;  %v1065_v30 = vsel %vm1064_vm8, %v10154_v7, %v1063_v22  ;;  %vm1066_vm15 = vcmp.eq.f32.partialorder %v10154_v7, 0.0  ;;  %v870_v61 = vpop.xlane.xlu0 %869 }
 0x1ca   :  { %v1315_v62 = vmul.f32 %v10297_v23, %v1261_v63  ;;  %v9250_v57 = vpop.eup %9249  ;;  %v1285_v59 = vmax.f32 %v1229_v54, 1e-08  ;;  %v1349_v50 = vmul.f32 %v9242_v19, %v10250_v9  ;;  %v1325_v26 = vmul.f32 %v10327_v25, %v1271_v56 }
 0x1cb   :  { %v1166_v52 = vsel %vm1164_vm9, %v14465_v17, %v1163_v40  ;;  %1522 = vperm.xlu0 %9141, %v1395_v51   ;;  %9265 = vrcp.f32 %v1338_v29  ;;  %v9252_v1 = vpop.eup %9251  ;;  %vm1169_vm2 = vcmp.eq.f32.partialorder %v10158_v8, inf  ;;  %v1236_v55 = vsel %vm1234_vm14, %v1235_v24, %v1233_v53 }
 0x1cc   :  { %9267 = vrsqrt.f32 %v10178_v18  ;;  %v1068_v10 = vsel %vm1066_vm15, %v1067_v11, %v1065_v30  ;;  %v1168_v48 = vmul.f32 %v9246_v5, %v10158_v8  ;;  %v1369_v42 = vmul.f32 %v9248_v46, %v10422_v47  ;;  %1453 = vperm.xlu1 %9140, %v1349_v50  }
 0x1cd   :  { %9269 = vrcp.f32 %v1329_v58  ;;  %v1276_v9 = vmax.f32 %v1166_v52, 1e-08  ;;  %v1070_v25 = vmul.f32 %v9250_v57, %v10162_v60  ;;  %vm1071_vm3 = vcmp.eq.f32.partialorder %v10162_v60, inf }
 0x1ce   :  { %9271 = vrcp.f32 %v1315_v62  ;;  %v9254_v6 = vpop.eup %9253  ;;  %v1286_v20 = vmax.f32 %v1236_v55, 1e-08  ;;  %v1365_v14 = vmul.f32 %v9252_v1, %v10424_v21  ;;  %v1339_v7 = vmul.f32 %v10414_v41, %v1285_v59 }
 0x1cf   :  { %9273 = vrcp.f32 %v1325_v26  ;;  %1483 = vperm.xlu0 %9141, %v1369_v42   ;;  %v9256_v11 = vpop.eup %9255  ;;  %v1262_v31 = vmax.f32 %v1068_v10, 1e-08  ;;  %vm1171_vm4 = vcmp.eq.f32.partialorder %v10158_v8, 0.0  ;;  %v1172_v47 = vand.u32 2147483648, %v10158_v8 }
 0x1d0   :  { %v1170_v38 = vsel %vm1169_vm2, %v10158_v8, %v1168_v48  ;;  %v1074_v12 = vand.u32 2147483648, %v10162_v60  ;;  %v1330_v21 = vmul.f32 %v10352_v4, %v1276_v9  ;;  %v1397_v44 = vmul.f32 %v9256_v11, %v879_v39  ;;  %1477 = vperm.xlu1 %9140, %v1365_v14  }
 0x1d1   :  { %v9258_v43 = vpop.eup %9257  ;;  %v1072_v40 = vsel %vm1071_vm3, %v10162_v60, %v1070_v25  ;;  %vm1073_vm5 = vcmp.eq.f32.partialorder %v10162_v60, 0.0  ;;  %v1316_v22 = vmul.f32 %v10297_v23, %v1262_v31  ;;  %9275 = vrcp.f32 %v1339_v7  ;;  %v882_v60 = vpop.xlane.xlu1 %881 }
 0x1d2   :  { %v9260_v34 = vpop.eup %9259  ;;  %v1340_v19 = vmul.f32 %v10414_v41, %v1286_v20  ;;  %v1173_v37 = vsel %vm1171_vm4, %v1172_v47, %v1170_v38  ;;  %v1075_v2 = vsel %vm1073_vm5, %v1074_v12, %v1072_v40  ;;  %v1175_v63 = vmul.f32 %v9254_v6, %v10166_v13 }
 0x1d3   :  { %v1391_v16 = vmul.f32 %v9260_v34, %v870_v61  ;;  %1525 = vperm.xlu0 %9141, %v1397_v44   ;;  %v9262_v56 = vpop.eup %9261  ;;  %v1371_v54 = vmul.f32 %v9258_v43, %v10460_v3  ;;  %9277 = vrcp.f32 %v1330_v21  ;;  %vm1176_vm6 = vcmp.eq.f32.partialorder %v10166_v13, inf  ;;  %v14467_v21 = vld [vmem:[#allocation5_spill] sm:$0xff] }
 0x1d4   :  { %v9264_v29 = vpop.eup %9263  ;;  %9279 = vrcp.f32 %v1316_v22  ;;  %v1277_v24 = vmax.f32 %v1173_v37, 1e-08  ;;  %v1351_v5 = vmul.f32 %v9262_v56, %v10221_v35  ;;  %v1263_v8 = vmax.f32 %v1075_v2, 1e-08  ;;  %v891_v37 = vpop.xlane.xlu0 %890 }
 0x1d5   :  { %1516 = vperm.xlu1 %9140, %v1391_v16   ;;  %9281 = vrcp.f32 %v1340_v19  ;;  %vm1178_vm7 = vcmp.eq.f32.partialorder %v10166_v13, 0.0  ;;  %v1179_v58 = vand.u32 2147483648, %v10166_v13  ;;  %v1177_v3 = vsel %vm1176_vm6, %v10166_v13, %v1175_v63  ;;  %v885_v26 = vpop.xlane.xlu1 %884 }
 0x1d6   :  { %v1182_v46 = vmul.f32 %v9264_v29, %v10172_v27  ;;  %v1331_v17 = vmul.f32 %v10352_v4, %v1277_v24  ;;  %vm1183_vm9 = vcmp.eq.f32.partialorder %v10172_v27, inf  ;;  %v1317_v62 = vmul.f32 %v10297_v23, %v1263_v8 }
 0x1d7   :  { %1486 = vperm.xlu0 %9141, %v1371_v54   ;;  %v1180_v50 = vsel %vm1178_vm7, %v1179_v58, %v1177_v3  ;;  %vm1185_vm8 = vcmp.eq.f32.partialorder %v10172_v27, 0.0  ;;  %v1186_v13 = vand.u32 2147483648, %v10172_v27  ;;  %vm1239_vm10 = vcmp.eq.f32.partialorder %v10178_v18, inf }
 0x1d8   :  { %v9266_v53 = vpop.eup %9265  ;;  %v1184_v1 = vsel %vm1183_vm9, %v10172_v27, %v1182_v46  ;;  %9283 = vrcp.f32 %v1331_v17  ;;  %v1278_v23 = vmax.f32 %v1180_v50, 1e-08  ;;  %v1242_v9 = vand.u32 2147483648, %v10178_v18 }
 0x1d9   :  { %v9268_v51 = vpop.eup %9267  ;;  %v1399_v52 = vmul.f32 %v9266_v53, %v882_v60  ;;  %1456 = vperm.xlu1 %9140, %v1351_v5   ;;  %9285 = vrcp.f32 %v1317_v62  ;;  %v1187_v42 = vsel %vm1185_vm8, %v1186_v13, %v1184_v1  ;;  %vm1241_vm11 = vcmp.eq.f32.partialorder %v10178_v18, 0.0  ;;  %v888_v6 = vpop.xlane.xlu1 %887 }
 0x1da   :  { %v9270_v30 = vpop.eup %9269  ;;  %v1238_v55 = vmul.f32 %v9268_v51, %v10178_v18  ;;  %v1332_v27 = vmul.f32 %v10352_v4, %v1278_v23  ;;  %v1279_v14 = vmax.f32 %v1187_v42, 1e-08  ;;  %v14269_v44 = vmax.f32 %v14467_v21, 0.0 }
 0x1db   :  { %v9272_v35 = vpop.eup %9271  ;;  %v1381_v57 = vmul.f32 %v9270_v30, %v10462_v33  ;;  %1528 = vperm.xlu0 %9141, %v1399_v52   ;;  %v9516_v34 = vmov 96   ;;  %v9517_v2 = vmov 97   ;;  %vm14283_vm12 = vcmask 130112  }
 0x1dc   :  { %v9274_v59 = vpop.eup %9273  ;;  %v1353_v33 = vmul.f32 %v9272_v35, %v10248_v28  ;;  %v1240_v25 = vsel %vm1239_vm10, %v10178_v18, %v1238_v55  ;;  %9287 = vrcp.f32 %v1332_v27  ;;  %v1333_v31 = vmul.f32 %v10352_v4, %v1279_v14  ;;  %v14466_v18 = vld [vmem:[#allocation16_spill] sm:$0xff]  ;;  %v14468_v4 = vld [vmem:[#allocation17_spill] sm:$0xff] }
 0x1dd   :  { %v1373_v10 = vmul.f32 %v9274_v59, %v10495_v0  ;;  %1501 = vperm.xlu1 %9140, %v1381_v57   ;;  %v1243_v11 = vsel %vm1241_vm11, %v1242_v9, %v1240_v25  ;;  %v14469_v59 = vlaneseq  ;;  %v1729_v9 = vsub.f32 0.0, %v14467_v21 }
 0x1de   :  { %v9276_v48 = vpop.eup %9275  ;;  %v1287_v61 = vmax.f32 %v1243_v11, 1e-08  ;;  %9289 = vrcp.f32 %v1333_v31  ;;  %vm14282_vm13 = vcmask 195712   ;;  %vm14281_vm14 = vcmask 261312  }
 0x1df   :  { %1489 = vperm.xlu0 %9141, %v1373_v10   ;;  %v1401_v0 = vmul.f32 %v9276_v48, %v885_v26  ;;  %v10681_v50 = vand.u32 127, %v14469_v59  ;;  %v14470_v48 = vld [vmem:[#allocation6_spill] sm:$0xff]  ;;  %v1730_v31 = vmul.f32 1.442695, %v1729_v9  ;;  %vm14270_vm15 = vcmask 326912  }
 0x1e0   :  { %v9278_v39 = vpop.eup %9277  ;;  %v1341_v38 = vmul.f32 %v10414_v41, %v1287_v61  ;;  %vm14268_vm2 = vcmask 392512   ;;  %vm14267_vm3 = vcmask 458112   ;;  %vm14266_vm4 = vcmask 523712  }
 0x1e1   :  { %1459 = vperm.xlu1 %9140, %v1353_v33   ;;  %v9280_v20 = vpop.eup %9279  ;;  %v1383_v28 = vmul.f32 %v9278_v39, %v10497_v32  ;;  %v1543_v1 = vadd.s32 4294967288, %v10681_v50  ;;  %v1550_v55 = vadd.s32 4294967280, %v10681_v50  ;;  %v1557_v10 = vadd.s32 4294967272, %v10681_v50 }
 0x1e2   :  { %v9282_v7 = vpop.eup %9281  ;;  %v1355_v43 = vmul.f32 %v9280_v20, %v14466_v18  ;;  %9291 = vrcp.f32 %v1341_v38  ;;  %v1564_v27 = vadd.s32 4294967264, %v10681_v50  ;;  %v1578_v38 = vadd.s32 4294967248, %v10681_v50 }
 0x1e3   :  { %1531 = vperm.xlu0 %9141, %v1401_v0   ;;  %v1403_v47 = vmul.f32 %v9282_v7, %v888_v6  ;;  %v10695_v42 = vsub.s32 %v1543_v1, %v14470_v48  ;;  %v10699_v25 = vsub.s32 %v1550_v55, %v14470_v48  ;;  %v10704_v0 = vsub.s32 %v10681_v50, %v14470_v48 }
 0x1e4   :  { %v1571_v6 = vadd.s32 4294967256, %v10681_v50  ;;  %v10709_v20 = vsub.s32 %v1557_v10, %v14470_v48  ;;  %9293 = vpow2.f32 %v1730_v31  ;;  %vm14265_vm5 = vcmask 1041409  }
 0x1e5   :  { %1504 = vperm.xlu1 %9140, %v1383_v28   ;;  %v9284_v12 = vpop.eup %9283  ;;  %14471 = vst [vmem:[#allocation16_spill] sm:$0xff] %v10704_v0  ;;  %vm14264_vm6 = vcmask 1042434   ;;  %vm14263_vm7 = vcmask 1043459   ;;  %vm14286_vm9 = vcmask 519168   ;;  %vm1749_vm8 = vcmask 823056  }
 0x1e6   :  { %v1385_v32 = vmul.f32 %v9284_v12, %v10529_v36  ;;  %v9286_v40 = vpop.eup %9285  ;;  %14472 = vst [vmem:[#allocation5_spill] sm:$0xff] %v10709_v20  ;;  %vm641_vm10 = vcmp.eq.s32.totalorder %v10681_v50, 0  ;;  %vm684_vm1 = vcmp.eq.s32.totalorder %v14470_v48, 0 }
 0x1e7   :  { %1534 = vperm.xlu0 %9141, %v1403_v47   ;;  %v1357_v22 = vmul.f32 %v9286_v40, %v14468_v4  ;;  %v10717_v47 = vsub.s32 %v1564_v27, %v14470_v48 }
 0x1e9   :  { %1462 = vperm.xlu1 %9140, %v1355_v43   ;;  %v9288_v16 = vpop.eup %9287  ;;  %14473 = vst [vmem:[#allocation17_spill] sm:$0xff] %v10717_v47  ;;  %v10723_v43 = vsub.s32 %v1571_v6, %v14470_v48 }
 0x1ea   :  { %v1387_v41 = vmul.f32 %v9288_v16, %v10562_v49  ;;  %v1585_v16 = vadd.s32 4294967240, %v10681_v50 }
 0x1eb   :  { %9142 = vset.pattern.permute.xlu0 %v9516_v34  ;;  %v9290_v19 = vpop.eup %9289  ;;  %14474 = vst [vmem:[#allocation6_spill] sm:$0xff] %v10723_v43 }
 0x1ec   :  { %1408 = vperm.xlu0 %9142, %v14269_v44   ;;  %v1389_v56 = vmul.f32 %v9290_v19, %v10591_v45 }
 0x1ed   :  { %1507 = vperm.xlu1 %9140, %v1385_v32  }
 0x1ef   :  { %v9292_v36 = vpop.eup %9291 }
 0x1f0   :  { %v1405_v29 = vmul.f32 %v9292_v36, %v891_v37  ;;  %9144 = vset.pattern.permute.xlu0 %v9517_v2  ;;  %v10743_v36 = vsub.s32 %v1578_v38, %v14470_v48 }
 0x1f1   :  { %1465 = vperm.xlu1 %9140, %v1357_v22  }
 0x1f2   :  { %14475 = vst [vmem:[#allocation18_spill] sm:$0xff] %v10743_v36 }
 0x1f5   :  { %1510 = vperm.xlu1 %9140, %v1387_v41  }
 0x1f9   :  { %1513 = vperm.xlu1 %9140, %v1389_v56  }
 0x1fd   :  { %1537 = vperm.xlu1 %9140, %v1405_v29  }
 0x201   :  { %9143 = vset.pattern.permute.xlu1 %v9517_v2 }
 0x229   :  { %v10658_v60 = vpop.permute.xlu0 %1447 }
 0x22a   :  { %v10656_v63 = vpop.permute.xlu1 %1444  ;;  %v1547_v4 = vrot.slane %v10658_v60, %v10695_v42 }
 0x22b   :  { %v1542_v40 = vrot.slane %v10656_v63, %v10704_v0 }
 0x22f   :  { %v1469_v54 = vpop.permute.xlu1 %1468 }
 0x230   :  { %v1595_v7 = vrot.slane %v1469_v54, %v10704_v0 }
 0x232   :  { %v10660_v5 = vpop.permute.xlu0 %1498 }
 0x233   :  { %v1472_v24 = vpop.permute.xlu1 %1471 }
 0x234   :  { %v1599_v39 = vrot.slane %v1472_v24, %v10695_v42  ;;  %v1549_v24 = vsel %vm14283_vm12, %v1547_v4, %v1542_v40 }
 0x236   :  { %v1600_v18 = vsel %vm14283_vm12, %v1599_v39, %v1595_v7 }
 0x237   :  { %v10662_v49 = vpop.permute.xlu1 %1450 }
 0x238   :  { %v1554_v19 = vrot.slane %v10662_v49, %v10699_v25 }
 0x23b   :  { %v1475_v53 = vpop.permute.xlu1 %1474 }
 0x23c   :  { %v1604_v28 = vrot.slane %v1475_v53, %v10699_v25 }
 0x23d   :  { %v1520_v45 = vpop.permute.xlu0 %1519 }
 0x23e   :  { %v1605_v32 = vsel %vm14282_vm13, %v1604_v28, %v1600_v18  ;;  %v1677_v41 = vrot.slane %v1520_v45, %v10695_v42 }
 0x23f   :  { %v10664_v8 = vpop.permute.xlu1 %1492 }
 0x240   :  { %v1634_v2 = vrot.slane %v10664_v8, %v10704_v0  ;;  %v1643_v8 = vrot.slane %v10660_v5, %v10699_v25 }
 0x241   :  { %v1481_v58 = vpop.permute.xlu0 %1480 }
 0x242   :  { %v1614_v56 = vrot.slane %v1481_v58, %v10717_v47  ;;  %v1556_v58 = vsel %vm14282_vm13, %v1554_v19, %v1549_v24 }
 0x243   :  { %v10666_v51 = vpop.permute.xlu1 %1495 }
 0x244   :  { %v1638_v37 = vrot.slane %v10666_v51, %v10695_v42 }
 0x246   :  { %v10670_v46 = vpop.permute.xlu0 %1522  ;;  %v1639_v51 = vsel %vm14283_vm12, %v1638_v37, %v1634_v2 }
 0x247   :  { %v10668_v3 = vpop.permute.xlu1 %1453  ;;  %v1682_v49 = vrot.slane %v10670_v46, %v10699_v25 }
 0x248   :  { %v1561_v45 = vrot.slane %v10668_v3, %v10709_v20 }
 0x24a   :  { %v10672_v52 = vpop.permute.xlu0 %1483  ;;  %v1563_v9 = vsel %vm14281_vm14, %v1561_v45, %v1556_v58  ;;  %v1750_v58 = vsel %vm1749_vm8, %v14467_v21, -inf }
 0x24b   :  { %v1478_v17 = vpop.permute.xlu1 %1477  ;;  %v1619_v53 = vrot.slane %v10672_v52, %v10723_v43 }
 0x24c   :  { %v1609_v11 = vrot.slane %v1478_v17, %v10709_v20  ;;  %v10761_v17 = vsub.s32 %v1585_v16, %v14470_v48 }
 0x24e   :  { %v10676_v62 = vpop.permute.xlu0 %1525  ;;  %v1610_v22 = vsel %vm14281_vm14, %v1609_v11, %v1605_v32  ;;  %14476 = vst [vmem:[#allocation19_spill] sm:$0xff] %v10761_v17 }
 0x24f   :  { %v1615_v63 = vsel %vm14270_vm15, %v1614_v56, %v1610_v22  ;;  %v1687_v5 = vrot.slane %v10676_v62, %v10709_v20 }
 0x250   :  { %v1517_v30 = vpop.permute.xlu1 %1516  ;;  %v1620_v46 = vsel %vm14268_vm2, %v1619_v53, %v1615_v63 }
 0x251   :  { %v1673_v34 = vrot.slane %v1517_v30, %v10704_v0 }
 0x252   :  { %v10683_v13 = vpop.permute.xlu0 %1486 }
 0x253   :  { %v1678_v54 = vsel %vm14283_vm12, %v1677_v41, %v1673_v34  ;;  %v1624_v1 = vrot.slane %v10683_v13, %v10743_v36  ;;  %v9294_v41 = vpop.eup %9293 }
 0x254   :  { %v10674_v35 = vpop.permute.xlu1 %1456  ;;  %v1683_v30 = vsel %vm14282_vm13, %v1682_v49, %v1678_v54  ;;  %v1732_v53 = vadd.f32 1.0, %v9294_v41 }
 0x255   :  { %v1568_v52 = vrot.slane %v10674_v35, %v10717_v47  ;;  %v1644_v35 = vsel %vm14282_vm13, %v1643_v8, %v1639_v51  ;;  %v1625_v62 = vsel %vm14267_vm3, %v1624_v1, %v1620_v46  ;;  %v1688_v13 = vsel %vm14281_vm14, %v1687_v5, %v1683_v30 }
 0x256   :  { %v10692_v33 = vpop.permute.xlu0 %1528  ;;  %9295 = vrcp.f32 %v1732_v53  ;;  %v7676_v5 = vadd.s32 4294967295, %v10681_v50 }
 0x258   :  { %v10678_v57 = vpop.permute.xlu1 %1501 }
 0x259   :  { %v1648_v3 = vrot.slane %v10678_v57, %v10709_v20 }
 0x25a   :  { %v10719_v61 = vpop.permute.xlu0 %1489 }
 0x25b   :  { %v1629_v28 = vrot.slane %v10719_v61, %v10761_v17  ;;  %v1649_v7 = vsel %vm14281_vm14, %v1648_v3, %v1644_v35 }
 0x25c   :  { %v10685_v26 = vpop.permute.xlu1 %1459 }
 0x25d   :  { %v1575_v55 = vrot.slane %v10685_v26, %v10723_v43  ;;  %v1630_v19 = vsel %vm14266_vm4, %v1629_v28, %v1625_v62  ;;  %v10853_v28 = vadd.s32 32, %v14470_v48 }
 0x25e   :  { %v1532_v60 = vpop.permute.xlu0 %1531 }
 0x25f   :  { %v1697_v31 = vrot.slane %v1532_v60, %v10723_v43 }
 0x260   :  { %v10690_v23 = vpop.permute.xlu1 %1504 }
 0x261   :  { %v1653_v10 = vrot.slane %v10690_v23, %v10717_v47  ;;  %v1692_v23 = vrot.slane %v10692_v33, %v10717_v47 }
 0x262   :  { %v1535_v39 = vpop.permute.xlu0 %1534 }
 0x263   :  { %v1654_v38 = vsel %vm14270_vm15, %v1653_v10, %v1649_v7  ;;  %v1693_v32 = vsel %vm14270_vm15, %v1692_v23, %v1688_v13  ;;  %v1702_v33 = vrot.slane %v1535_v39, %v10743_v36  ;;  %v9296_v8 = vpop.eup %9295  ;;  %v14482_v13 = vmov 0  }
 0x264   :  { %v10711_v14 = vpop.permute.xlu1 %1462  ;;  %v1698_v56 = vsel %vm14268_vm2, %v1697_v31, %v1693_v32  ;;  %v10850_v23 = vadd.s32 40, %v14470_v48  ;;  %v14271_v7 = vmov 1.0   ;;  %v10863_v31 = vadd.s32 16, %v14470_v48 }
 0x265   :  { %v1582_v57 = vrot.slane %v10711_v14, %v10743_v36  ;;  %v1570_v14 = vsel %vm14270_vm15, %v1568_v52, %v1563_v9  ;;  %v14487_v32 = vmov 0  ;;  %vm14279_vm15 = vcmask 523264  }
 0x266   :  { %v1577_v18 = vsel %vm14268_vm2, %v1575_v55, %v1570_v14  ;;  %v14479_v55 = vmov 0.0  }
 0x267   :  { %v1584_v34 = vsel %vm14267_vm3, %v1582_v57, %v1577_v18  ;;  %v1409_v60 = vpop.permute.xlu0 %1408  ;;  %v1741_v57 = vsub.f32 1.0, %v9296_v8  ;;  %v10866_v18 = vadd.s32 8, %v14470_v48 }
 0x268   :  { %v10726_v12 = vpop.permute.xlu1 %1507 }
 0x269   :  { %v1658_v27 = vrot.slane %v10726_v12, %v10723_v43  ;;  %v14515_v43 = vmov 1.0  }
 0x26b   :  { %v1659_v61 = vsel %vm14268_vm2, %v1658_v27, %v1654_v38  ;;  %vm14288_vm2 = vmmov 0  }
 0x26c   :  { %v1466_v29 = vpop.permute.xlu1 %1465  ;;  %8240 = vmatprep.mubr.msk.f32.mxu1 %vm14288_vm2, %v14479_v55  ;;  %8221 = vmatprep.mubr.msk.f32.mxu0 %vm14288_vm2, %v14479_v55 }
 0x26d   :  { %v1589_v26 = vrot.slane %v1466_v29, %v10761_v17  ;;  %v1703_v29 = vsel %vm14267_vm3, %v1702_v33, %v1698_v56  ;;  %v14489_v33 = vmov 0 }
 0x26f   :  { %v1591_v40 = vsel %vm14266_vm4, %v1589_v26, %v1584_v34 }
 0x270   :  { %v1511_v59 = vpop.permute.xlu1 %1510  ;;  %v1710_v2 = vsel %vm14265_vm5, %v1630_v19, %v1591_v40  ;;  %v14495_v19 = vmov 0 }
 0x271   :  { %v1663_v6 = vrot.slane %v1511_v59, %v10743_v36  ;;  %v10819_v59 = vadd.s32 56, %v14470_v48 }
 0x273   :  { %v1664_v4 = vsel %vm14267_vm3, %v1663_v6, %v1659_v61  ;;  %vm640_vm11 = vcmp.eq.s32.totalorder %v10819_v59, %v7676_v5  ;;  %vm649_vm8 = vcmp.eq.s32.totalorder %v10819_v59, 63  ;;  %v10847_v6 = vadd.s32 48, %v14470_v48 }
 0x274   :  { %v1514_v11 = vpop.permute.xlu1 %1513  ;;  %vm10925_vm3 = vcmp.eq.s32.totalorder %v10866_v18, %v7676_v5 }
 0x275   :  { %v1668_v12 = vrot.slane %v1514_v11, %v10761_v17  ;;  %v10860_v11 = vadd.s32 24, %v14470_v48 }
 0x277   :  { %v1669_v22 = vsel %vm14266_vm4, %v1668_v12, %v1664_v4  ;;  %v14485_v12 = vmov 0  ;;  %vm10908_vm5 = vcmp.eq.s32.totalorder %v10860_v11, %v7676_v5 }
 0x278   :  { %v1538_v16 = vpop.permute.xlu1 %1537  ;;  %v1712_v54 = vsel %vm14264_vm6, %v1669_v22, %v1710_v2  ;;  %v14496_v19 = vsel %vm10908_vm5, 4294967295, %v14495_v19  ;;  %v669_v56 = vsel %vm10908_vm5, 1.0, %v14479_v55 }
 0x279   :  { %v1707_v37 = vrot.slane %v1538_v16, %v10761_v17  ;;  %14497 = vst [vmem:[#allocation26_spill] sm:$0xff] %v14496_v19 }
 0x27b   :  { %v1708_v63 = vsel %vm14266_vm4, %v1707_v37, %v1703_v29  ;;  %vm10917_vm4 = vcmp.eq.s32.totalorder %v10863_v31, %v7676_v5  ;;  %v14498_v37 = vmov 0  ;;  %v14501_v29 = vmov 0 }
 0x27c   :  { %v1714_v24 = vsel %vm14263_vm7, %v1708_v63, %v1712_v54  ;;  %vm657_vm7 = vmand %vm641_vm10, %vm649_vm8  ;;  %vm10874_vm10 = vcmp.eq.s32.totalorder %v10850_v23, %v7676_v5  ;;  %vm10885_vm8 = vcmp.eq.s32.totalorder %v14470_v48, %v7676_v5  ;;  %v14499_v37 = vsel %vm10917_vm4, 4294967295, %v14498_v37 }
 0x27d   :  { %v1716_v49 = vmul.f32 %v1714_v24, %v1409_v60  ;;  %vm10825_vm6 = vmor %vm640_vm11, %vm657_vm7  ;;  %vm10869_vm7 = vcmp.eq.s32.totalorder %v10847_v6, %v7676_v5  ;;  %v14486_v12 = vsel %vm10874_vm10, 4294967295, %v14485_v12  ;;  %vm10879_vm11 = vcmp.eq.s32.totalorder %v10853_v28, %v7676_v5  ;;  %14500 = vst [vmem:[#allocation27_spill] sm:$0xff] %v14499_v37 }
 0x27e   :  { %v673_v10 = vsel %vm10825_vm6, 1.0, %v14479_v55  ;;  %8206 = vmatpush3.msk.msra.mxu0 %vm10825_vm6, %v14271_v7  ;;  %v14488_v32 = vsel %vm10879_vm11, 4294967295, %v14487_v32  ;;  %v14490_v33 = vsel %vm10885_vm8, 4294967295, %v14489_v33  ;;  %v672_v61 = vsel %vm10869_vm7, 1.0, %v14479_v55 }
 0x27f   :  { %v1718_v45 = vsel %vm14286_vm9, %v1716_v49, -inf  ;;  %v10832_v9 = vsub.f32 %v673_v10, %v673_v10  ;;  %8207 = vmatprep.subr.mxu0 %v14479_v55  ;;  %14491 = vst [vmem:[#allocation22_spill] sm:$0xff] %v14490_v33  ;;  %v671_v40 = vsel %vm10874_vm10, 1.0, %v14479_v55  ;;  %v670_v4 = vsel %vm10879_vm11, 1.0, %v14479_v55  ;;  %v9460_v33 = vld [vmem:[%s14234_s1 + $0x40] sm:$0xff] }
 0x280   :  { %1719 = vmax.xlane.f32.xlu1 %v1718_v45  ;;  %8208 = vmatpush3.msk.msra.mxu0 %vm10869_vm7, %v14271_v7  ;;  %v10901_v22 = vsub.f32 %v672_v61, %v672_v61  ;;  %v10903_v16 = vsub.f32 %v671_v40, %v671_v40  ;;  %v10905_v41 = vsub.f32 %v670_v4, %v670_v4  ;;  %v14502_v29 = vsel %vm10925_vm3, 4294967295, %v14501_v29 }
 0x281   :  { %14480 = vst [vmem:[#allocation20_spill] sm:$0xff] %v10832_v9  ;;  %v10835_v35 = vand.u32 4294901760, %v10832_v9  ;;  %8209 = vmatprep.subr.mxu0 %v14479_v55  ;;  %14503 = vst [vmem:[#allocation28_spill] sm:$0xff] %v14502_v29  ;;  %v10938_v60 = vsub.f32 %v669_v56, %v669_v56  ;;  %v668_v24 = vsel %vm10917_vm4, 1.0, %v14479_v55  ;;  %v666_v53 = vsel %vm10885_vm8, 1.0, %v14479_v55 }
 0x282   :  { %14492 = vst [vmem:[#allocation23_spill] sm:$0xff] %v10901_v22  ;;  %14493 = vst [vmem:[#allocation24_spill] sm:$0xff] %v10903_v16  ;;  %8210 = vmatpush3.msk.msra.mxu0 %vm10874_vm10, %v14271_v7  ;;  %v10930_v2 = vand.u32 4294901760, %v10901_v22  ;;  %v10933_v63 = vand.u32 4294901760, %v10903_v16  ;;  %v10936_v54 = vand.u32 4294901760, %v10905_v41 }
 0x283   :  { %14481 = vst [vmem:[#allocation21_spill] sm:$0xff] %v10835_v35  ;;  %v1864_v27 = vsub.f32 %v10832_v9, %v10835_v35  ;;  %14494 = vst [vmem:[#allocation25_spill] sm:$0xff] %v10905_v41  ;;  %8211 = vmatprep.subr.mxu0 %v14479_v55 }
 0x284   :  { %14504 = vst [vmem:[#allocation29_spill] sm:$0xff] %v10930_v2  ;;  %14505 = vst [vmem:[#allocation30_spill] sm:$0xff] %v10933_v63  ;;  %8212 = vmatpush3.msk.msra.mxu0 %vm10879_vm11, %v14271_v7  ;;  %v1870_v45 = vsub.f32 %v10901_v22, %v10930_v2 }
 0x285   :  { %v10839_v62 = vand.u32 4294901760, %v1864_v27  ;;  %14506 = vst [vmem:[#allocation31_spill] sm:$0xff] %v10936_v54  ;;  %14507 = vst [vmem:[#allocation32_spill] sm:$0xff] %v10938_v60  ;;  %8213 = vmatprep.subr.mxu0 %v14479_v55 }
 0x286   :  { %8214 = vmatpush3.msk.msra.mxu0 %vm10908_vm5, %v14271_v7  ;;  %v10976_v5 = vand.u32 4294901760, %v1870_v45 }
 0x287   :  { %8225 = vmatpush3.msra.mxu1 %v10839_v62  ;;  %8215 = vmatprep.subr.mxu0 %v14479_v55 }
 0x288   :  { %8226 = vmatprep.subr.mxu1 %v14479_v55  ;;  %8216 = vmatpush3.msk.msra.mxu0 %vm10917_vm4, %v14271_v7 }
 0x289   :  { %8227 = vmatpush3.msra.mxu1 %v10976_v5  ;;  %8217 = vmatprep.subr.mxu0 %v14479_v55 }
 0x28a   :  { %8228 = vmatprep.subr.mxu1 %v14479_v55  ;;  %8218 = vmatpush3.msk.msra.mxu0 %vm10925_vm3, %v14271_v7  ;;  %v14784_v38 = vld [vmem:[#allocation21_spill] sm:$0xff] }
 0x28b   :  { %8219 = vmatprep.subr.mxu0 %v14479_v55 }
 0x28c   :  { %8220 = vmatpush3.msk.msra.mxu0 %vm10885_vm8, %v14271_v7 }
 0x28d   :  { %8243 = vmatprep.subr.mxu0 %v14479_v55 }
 0x291   :  { %1737 = vperm.xlu1 %9143, %v9296_v8   ;;  %v1876_v8 = vsub.f32 %v10903_v16, %v10933_v63 }
 0x293   :  { %v10978_v10 = vand.u32 4294901760, %v1876_v8 }
 0x295   :  { %8229 = vmatpush3.msra.mxu1 %v10978_v10 }
 0x296   :  { %8230 = vmatprep.subr.mxu1 %v14479_v55 }
 0x2b5   :  { %1751 = vmax.xlane.f32.xlu1 %v1750_v58  ;;  %v1882_v58 = vsub.f32 %v10905_v41, %v10936_v54 }
 0x309   :  { %v1720_v51 = vpop.xlane.xlu1 %1719 }
 0x30a   :  { %v1721_v30 = vsub.f32 %v1716_v49, %v1720_v51  ;;  %v667_v49 = vsel %vm10925_vm3, 1.0, %v14479_v55  ;;  %v10960_v51 = vand.u32 4294901760, %v10938_v60 }
 0x30c   :  { %v1722_v46 = vmul.f32 1.442695, %v1721_v30  ;;  %14508 = vst [vmem:[#allocation33_spill] sm:$0xff] %v10960_v51  ;;  %v10965_v30 = vsub.f32 %v668_v24, %v668_v24 }
 0x30d   :  { %v10844_v39 = vpop.permute.xlu1 %1737 }
 0x30e   :  { %9297 = vpow2.f32 %v1722_v46  ;;  %14509 = vst [vmem:[#allocation34_spill] sm:$0xff] %v10965_v30  ;;  %v10967_v46 = vsub.f32 %v667_v49, %v667_v49  ;;  %v10984_v27 = vand.u32 4294901760, %v10965_v30 }
 0x310   :  { %14510 = vst [vmem:[#allocation35_spill] sm:$0xff] %v10967_v46  ;;  %14512 = vst [vmem:[#allocation37_spill] sm:$0xff] %v10984_v27  ;;  %v1894_v61 = vsub.f32 %v10965_v30, %v10984_v27 }
 0x312   :  { %v11016_v56 = vand.u32 4294901760, %v1894_v61 }
 0x31b   :  { %v10814_v52 = vpop.eup %9297 }
 0x31c   :  { %v1724_v3 = vsel %vm14286_vm9, %v10814_v52, 0.0  ;;  %vm683_vm9 = vcmp.eq.s32.totalorder %v10681_v50, 63 }
 0x31d   :  { %1725 = vadd.xlane.f32.xlu0 %v1724_v3  ;;  %v10969_v3 = vsub.f32 %v666_v53, %v666_v53 }
 0x31f   :  { %14511 = vst [vmem:[#allocation36_spill] sm:$0xff] %v10969_v3 }
 0x326   :  { %v14783_v1 = vld [vmem:[#allocation36_spill] sm:$0xff] }
 0x333   :  { %1744 = vperm.xlu0 %9144, %v1741_v57   ;;  %v1888_v57 = vsub.f32 %v10938_v60, %v10960_v51 }
 0x335   :  { %v11006_v40 = vand.u32 4294901760, %v1888_v57  ;;  %v716_v57 = vld [vmem:[%s14235_s2] sm:$0xf]  ;;  %s9521_s2 = smov 26  }
 0x337   :  { %9150 = vset.pattern.permute.xlu0 %v14482_v13 }
 0x33e   :  { %v1752_v26 = vpop.xlane.xlu1 %1751 }
 0x33f   :  { %v1753_v14 = vsub.f32 %v14467_v21, %v1752_v26  ;;  %v10987_v26 = vand.u32 4294901760, %v10967_v46 }
 0x341   :  { %v1754_v34 = vmul.f32 1.442695, %v1753_v14  ;;  %14513 = vst [vmem:[#allocation38_spill] sm:$0xff] %v10987_v26  ;;  %v10993_v14 = vand.u32 4294901760, %v1882_v58  ;;  %v1900_v4 = vsub.f32 %v10967_v46, %v10987_v26 }
 0x343   :  { %9299 = vpow2.f32 %v1754_v34  ;;  %v10996_v34 = vand.u32 4294901760, %v10969_v3  ;;  %8231 = vmatpush3.msra.mxu1 %v10993_v14  ;;  %v11025_v53 = vand.u32 4294901760, %v1900_v4 }
 0x344   :  { %8232 = vmatprep.subr.mxu1 %v14479_v55 }
 0x345   :  { %14514 = vst [vmem:[#allocation39_spill] sm:$0xff] %v10996_v34  ;;  %v1906_v24 = vsub.f32 %v10969_v3, %v10996_v34  ;;  %8233 = vmatpush3.msra.mxu1 %v11006_v40 }
 0x346   :  { %8234 = vmatprep.subr.mxu1 %v14479_v55 }
 0x347   :  { %8235 = vmatpush3.msra.mxu1 %v11016_v56  ;;  %v11030_v45 = vand.u32 4294901760, %v1906_v24 }
 0x348   :  { %8236 = vmatprep.subr.mxu1 %v14479_v55 }
 0x349   :  { %8237 = vmatpush3.msra.mxu1 %v11025_v53 }
 0x34a   :  { %8238 = vmatprep.subr.mxu1 %v14479_v55 }
 0x34b   :  { %8239 = vmatpush3.msra.mxu1 %v11030_v45 }
 0x34c   :  { %8262 = vmatprep.subr.mxu1 %v14479_v55 }
 0x350   :  { %v11022_v49 = vpop.eup %9299 }
 0x351   :  { %1757 = vrot.lane.b32.xlu0 %v11022_v49, %s9520_s4 }
 0x3a6   :  { %v1726_v8 = vpop.xlane.xlu0 %1725 }
 0x3a7   :  { %9301 = vrcp.f32 %v1726_v8 }
 0x3ae   :  { %v1745_v61 = vpop.permute.xlu0 %1744 }
 0x3af   :  { %v1747_v44 = vmul.f32 %v1745_v61, %v716_v57  ;;  %v11086_v57 = vadd.s32 1, %v10681_v50  ;;  %v14516_v61 = vmov 0  ;;  %v14536_v50 = vmov 0 }
 0x3b1   :  { %vm11119_vm14 = vcmp.eq.s32.totalorder %v10847_v6, %v11086_v57  ;;  %vm11131_vm13 = vcmp.eq.s32.totalorder %v10850_v23, %v11086_v57  ;;  %vm11155_vm12 = vcmp.eq.s32.totalorder %v10853_v28, %v11086_v57  ;;  %vm11173_vm0 = vcmp.eq.s32.totalorder %v10860_v11, %v11086_v57 }
 0x3b2   :  { %v713_v23 = vsel %vm11131_vm13, 1.0, %v14479_v55  ;;  %v14531_v28 = vmov 0 }
 0x3b3   :  { %v14532_v28 = vsel %vm11173_vm0, 4294967295, %v14531_v28 }
 0x3b4   :  { %v9302_v58 = vpop.eup %9301  ;;  %14533 = vst [vmem:[#allocation47_spill] sm:$0xff] %v14532_v28 }
 0x3b5   :  { %v1728_v4 = vmul.f32 %v9302_v58, %v10814_v52 }
 0x3b7   :  { %v1740_v24 = vmul.f32 %v10844_v39, %v1728_v4  ;;  %v14519_v4 = vmov 0 }
 0x3b8   :  { %v14520_v4 = vsel %vm11119_vm14, 4294967295, %v14519_v4 }
 0x3b9   :  { %v11042_v7 = vadd.f32 %v1747_v44, %v1740_v24  ;;  %14521 = vst [vmem:[#allocation41_spill] sm:$0xff] %v14520_v4  ;;  %v14522_v24 = vmov 0 }
 0x3ba   :  { %v14523_v24 = vsel %vm11131_vm13, 4294967295, %v14522_v24 }
 0x3bb   :  { %v1768_v17 = vsel %vm14279_vm15, %v11042_v7, 0  ;;  %vm14280_vm15 = vcmask 19456   ;;  %14524 = vst [vmem:[#allocation42_spill] sm:$0xff] %v14523_v24 }
 0x3bc   :  { %v11046_v36 = vand.u32 4294901760, %v1768_v17 }
 0x3be   :  { %v11049_v8 = vsub.f32 %v1768_v17, %v11046_v36  ;;  %8241 = vmatmul.mubr.f32.vlgmr.msra.gmra.mxu1 %v11046_v36 }
 0x3bf   :  { %8263 = vmatpush3.msk.msra.mxu1 %vm10825_vm6, %v14515_v43  ;;  %8278 = vmatprep.mubr.msk.f32.mxu1 %vm14288_vm2, %v14479_v55 }
 0x3c0   :  { %8264 = vmatprep.subr.mxu1 %v14479_v55  ;;  %v11059_v44 = vand.u32 4294901760, %v11049_v8 }
 0x3c1   :  { %8265 = vmatpush3.msk.msra.mxu1 %vm10869_vm7, %v14515_v43 }
 0x3c2   :  { %8266 = vmatprep.subr.mxu1 %v14479_v55  ;;  %v1838_v17 = vsub.f32 %v11049_v8, %v11059_v44 }
 0x3c3   :  { %8267 = vmatpush3.msk.msra.mxu1 %vm10874_vm10, %v14515_v43  ;;  %v1758_v52 = vpop.permute.xlu0 %1757 }
 0x3c4   :  { %8268 = vmatprep.subr.mxu1 %v14479_v55  ;;  %v1761_v39 = vsel %vm14280_vm15, %v1758_v52, 0.0  ;;  %v11072_v58 = vand.u32 4294901760, %v1838_v17  ;;  %vm11102_vm15 = vcmp.eq.s32.totalorder %v10819_v59, %v11086_v57  ;;  %v714_v17 = vsel %vm11119_vm14, 1.0, %v14479_v55 }
 0x3c5   :  { %8269 = vmatpush3.msk.msra.mxu1 %vm10879_vm11, %v14515_v43  ;;  %1762 = vadd.xlane.f32.xlu0 %v1761_v39  ;;  %v14517_v61 = vsel %vm11102_vm15, 4294967295, %v14516_v61  ;;  %v715_v59 = vsel %vm11102_vm15, 1.0, %v14479_v55  ;;  %v14526_v52 = vmov 0  ;;  %v11161_v39 = vsub.f32 %v714_v17, %v714_v17 }
 0x3c6   :  { %8270 = vmatprep.subr.mxu1 %v14479_v55  ;;  %8222 = vmatmul.mubr.f32.vlgmr.msra.gmra.mxu0 %v11072_v58  ;;  %14518 = vst [vmem:[#allocation40_spill] sm:$0xff] %v14517_v61  ;;  %v11139_v6 = vsub.f32 %v715_v59, %v715_v59  ;;  %v14527_v52 = vsel %vm11155_vm12, 4294967295, %v14526_v52  ;;  %v11179_v17 = vsub.f32 %v713_v23, %v713_v23  ;;  %v711_v23 = vsel %vm11173_vm0, 1.0, %v14479_v55 }
 0x3c7   :  { %8244 = vmatpush3.msra.mxu0 %v10832_v9  ;;  %8271 = vmatpush3.msk.msra.mxu1 %vm10908_vm5, %v14515_v43  ;;  %14528 = vst [vmem:[#allocation44_spill] sm:$0xff] %v14527_v52  ;;  %14529 = vst [vmem:[#allocation45_spill] sm:$0xff] %v11161_v39  ;;  %v11193_v11 = vand.u32 4294901760, %v11161_v39  ;;  %v14557_v9 = vld [vmem:[#allocation12_spill] sm:$0xff] }
 0x3c8   :  { %8245 = vmatprep.subr.mxu0 %v14479_v55  ;;  %8272 = vmatprep.subr.mxu1 %v14479_v55  ;;  %14525 = vst [vmem:[#allocation43_spill] sm:$0xff] %v11139_v6  ;;  %v11169_v59 = vand.u32 4294901760, %v11139_v6  ;;  %14534 = vst [vmem:[#allocation48_spill] sm:$0xff] %v11179_v17 }
 0x3c9   :  { %8246 = vmatpush3.msra.mxu0 %v10901_v22  ;;  %8273 = vmatpush3.msk.msra.mxu1 %vm10917_vm4, %v14515_v43  ;;  %14535 = vst [vmem:[#allocation49_spill] sm:$0xff] %v11193_v11  ;;  %v14556_v22 = vld [vmem:[#allocation9_spill] sm:$0xff] }
 0x3ca   :  { %8247 = vmatprep.subr.mxu0 %v14479_v55  ;;  %8274 = vmatprep.subr.mxu1 %v14479_v55  ;;  %14530 = vst [vmem:[#allocation46_spill] sm:$0xff] %v11169_v59  ;;  %v3424_v47 = vrot.slane %v14557_v9, %v14556_v22 }
 0x3cb   :  { %8248 = vmatpush3.msra.mxu0 %v10903_v16  ;;  %8275 = vmatpush3.msk.msra.mxu1 %vm10925_vm3, %v14515_v43 }
 0x3cc   :  { %8249 = vmatprep.subr.mxu0 %v14479_v55  ;;  %8276 = vmatprep.subr.mxu1 %v14479_v55 }
 0x3cd   :  { %8250 = vmatpush3.msra.mxu0 %v10905_v41  ;;  %8277 = vmatpush3.msk.msra.mxu1 %vm10885_vm8, %v14515_v43 }
 0x3ce   :  { %8251 = vmatprep.subr.mxu0 %v14479_v55  ;;  %8279 = vmatmul.mubr.f32.vlgmr.msra.gmra.mxu1 %v11059_v44 }
 0x3cf   :  { %8300 = vmatprep.subr.mxu1 %v14479_v55  ;;  %8252 = vmatpush3.msra.mxu0 %v10938_v60 }
 0x3d0   :  { %8301 = vmatpush3.msk.msra.mxu1 %vm10825_vm6, %v14515_v43  ;;  %8253 = vmatprep.subr.mxu0 %v14479_v55 }
 0x3d1   :  { %8302 = vmatprep.subr.mxu1 %v14479_v55  ;;  %8254 = vmatpush3.msra.mxu0 %v10965_v30  ;;  %v11229_v30 = vsub.f32 %v711_v23, %v711_v23 }
 0x3d2   :  { %8303 = vmatpush3.msk.msra.mxu1 %vm10869_vm7, %v14515_v43  ;;  %8255 = vmatprep.subr.mxu0 %v14479_v55 }
 0x3d3   :  { %8304 = vmatprep.subr.mxu1 %v14479_v55  ;;  %8256 = vmatpush3.msra.mxu0 %v10967_v46 }
 0x3d4   :  { %8305 = vmatpush3.msk.msra.mxu1 %vm10874_vm10, %v14515_v43  ;;  %8257 = vmatprep.subr.mxu0 %v14479_v55  ;;  %vm11221_vm10 = vcmp.eq.s32.totalorder %v10866_v18, %v11086_v57  ;;  %v2359_v18 = vsub.f32 %v11161_v39, %v11193_v11 }
 0x3d5   :  { %8306 = vmatprep.subr.mxu1 %v14479_v55  ;;  %8258 = vmatpush3.msra.mxu0 %v10969_v3  ;;  %v712_v3 = vsel %vm11155_vm12, 1.0, %v14479_v55 }
 0x3d6   :  { %8259 = vmatprep.mubr.msk.f32.mxu0 %vm14288_vm2, %v14479_v55  ;;  %8307 = vmatpush3.msk.msra.mxu1 %vm10879_vm11, %v14515_v43  ;;  %vm11200_vm2 = vcmp.eq.s32.totalorder %v10863_v31, %v11086_v57  ;;  %v11208_v46 = vsub.f32 %v712_v3, %v712_v3  ;;  %vm692_vm11 = vmand %vm683_vm9, %vm684_vm1  ;;  %v11217_v31 = vand.u32 4294901760, %v11179_v17  ;;  %vm14569_vm9 = vnez %v14486_v12  ;;  %v14785_v12 = vld [vmem:[#allocation29_spill] sm:$0xff] }
 0x3d7   :  { %8260 = vmatmul.mubr.f32.vlgmr.msra.gmra.mxu0 %v11049_v8  ;;  %8281 = vmatprep.subr.mxu0 %v14479_v55  ;;  %v14537_v50 = vsel %vm11200_vm2, 4294967295, %v14536_v50  ;;  %v710_v60 = vsel %vm11200_vm2, 1.0, %v14479_v55 }
 0x3d8   :  { %8308 = vmatprep.subr.mxu1 %v14479_v55  ;;  %8282 = vmatpush3.msra.mxu0 %v10835_v35  ;;  %14538 = vst [vmem:[#allocation50_spill] sm:$0xff] %v14537_v50  ;;  %v2353_v35 = vsub.f32 %v11139_v6, %v11169_v59  ;;  %14539 = vst [vmem:[#allocation51_spill] sm:$0xff] %v11208_v46  ;;  %v2365_v41 = vsub.f32 %v11179_v17, %v11217_v31 }
 0x3d9   :  { %8309 = vmatpush3.msk.msra.mxu1 %vm10908_vm5, %v14515_v43  ;;  %8283 = vmatprep.subr.mxu0 %v14479_v55  ;;  %vm675_vm5 = vcmp.eq.s32.totalorder %v14470_v48, %v11086_v57  ;;  %14540 = vst [vmem:[#allocation52_spill] sm:$0xff] %v11217_v31  ;;  %v14544_v48 = vld [vmem:[#allocation11_spill] sm:$0xff]  ;;  %v14546_v57 = vmov 0  ;;  %v11260_v16 = vsub.f32 %v710_v60, %v710_v60 }
 0x3da   :  { %8310 = vmatprep.subr.mxu1 %v14479_v55  ;;  %8284 = vmatpush3.msra.mxu0 %v10930_v2  ;;  %v14541_v2 = vmov 0  ;;  %v3958_v3 = vmul.f32 %v14544_v48, %v14544_v48  ;;  %14545 = vst [vmem:[#allocation11_spill] sm:$0xff] %v11229_v30  ;;  %vm11240_vm1 = vmor %vm675_vm5, %vm692_vm11  ;;  %v11246_v23 = vand.u32 4294901760, %v2353_v35  ;;  %v11249_v48 = vand.u32 4294901760, %v11208_v46 }
 0x3db   :  { %8311 = vmatpush3.msk.msra.mxu1 %vm10917_vm4, %v14515_v43  ;;  %8285 = vmatprep.subr.mxu0 %v14479_v55  ;;  %v14542_v2 = vsel %vm11221_vm10, 4294967295, %v14541_v2  ;;  %v14547_v57 = vsel %vm11240_vm1, 4294967295, %v14546_v57  ;;  %14551 = vst [vmem:[#allocation57_spill] sm:$0xff] %v11260_v16  ;;  %vm14552_vm5 = vmmov 0   ;;  %v11266_v35 = vand.u32 4294901760, %v11229_v30 }
 0x3dc   :  { %14543 = vst [vmem:[#allocation53_spill] sm:$0xff] %v14542_v2  ;;  %8312 = vmatprep.subr.mxu1 %v14479_v55  ;;  %8286 = vmatpush3.msra.mxu0 %v10933_v63  ;;  %14548 = vst [vmem:[#allocation54_spill] sm:$0xff] %v14547_v57  ;;  %v709_v63 = vsel %vm11221_vm10, 1.0, %v14479_v55  ;;  %v2371_v20 = vsub.f32 %v11208_v46, %v11249_v48  ;;  %v11285_v0 = vand.u32 4294901760, %v2365_v41  ;;  %v14562_v41 = vld [vmem:[#allocation13_spill] sm:$0xff]  ;;  %vm14570_vm11 = vnez %v14488_v32  ;;  %v14786_v32 = vld [vmem:[#allocation30_spill] sm:$0xff] }
 0x3dd   :  { %8313 = vmatpush3.msk.msra.mxu1 %vm10925_vm3, %v14515_v43  ;;  %8287 = vmatprep.subr.mxu0 %v14479_v55  ;;  %14549 = vst [vmem:[#allocation55_spill] sm:$0xff] %v11246_v23  ;;  %14550 = vst [vmem:[#allocation56_spill] sm:$0xff] %v11249_v48  ;;  %v11275_v60 = vsub.f32 %v709_v63, %v709_v63 }
 0x3de   :  { %8314 = vmatprep.subr.mxu1 %v14479_v55  ;;  %3963 = vrot.lane.b32.xlu0 %v3958_v3, %s9521_s2  ;;  %14553 = vst [vmem:[#allocation58_spill] sm:$0xff] %v11266_v35  ;;  %v708_v3 = vsel %vm11240_vm1, 1.0, %v14479_v55  ;;  %14558 = vst [vmem:[#allocation9_spill] sm:$0xff] %v11285_v0 }
 0x3df   :  { %8288 = vmatpush3.msra.mxu0 %v10936_v54  ;;  %8315 = vmatpush3.msk.msra.mxu1 %vm10885_vm8, %v14515_v43  ;;  %v11273_v54 = vand.u32 4294901760, %v2359_v18  ;;  %14555 = vst [vmem:[#allocation60_spill] sm:$0xff] %v11275_v60  ;;  %v11288_v18 = vand.u32 4294901760, %v11260_v16  ;;  %v11290_v63 = vsub.f32 %v708_v3, %v708_v3  ;;  %v3432_v3 = vrot.slane %v14562_v41, %v14556_v22 }
 0x3e0   :  { %8316 = vmatprep.mubr.msk.f32.mxu1 %vm14552_vm5, %v14479_v55  ;;  %8289 = vmatprep.subr.mxu0 %v14479_v55 }
 0x3e1   :  { %8317 = vmatmul.mubr.f32.vlgmr.msra.gmra.mxu1 %v11046_v36  ;;  %8338 = vmatprep.subr.mxu1 %v14479_v55  ;;  %14554 = vst [vmem:[#allocation59_spill] sm:$0xff] %v11273_v54  ;;  %14559 = vst [vmem:[#allocation12_spill] sm:$0xff] %v11288_v18 }
 0x3e2   :  { %8290 = vmatpush3.msra.mxu0 %v10960_v51  ;;  %8339 = vmatpush3.msra.mxu1 %v11246_v23  ;;  %14560 = vst [vmem:[#allocation61_spill] sm:$0xff] %v11290_v63  ;;  %v2377_v23 = vsub.f32 %v11229_v30, %v11266_v35  ;;  %v11299_v51 = vand.u32 4294901760, %v11275_v60 }
 0x3e3   :  { %8291 = vmatprep.subr.mxu0 %v14479_v55  ;;  %8340 = vmatprep.subr.mxu1 %v14479_v55 }
 0x3e4   :  { %3453 = vrot.lane.b32.xlu0 %v3424_v47, %s9521_s2  ;;  %8292 = vmatpush3.msra.mxu0 %v10984_v27  ;;  %14561 = vst [vmem:[#allocation62_spill] sm:$0xff] %v11299_v51  ;;  %v11305_v47 = vand.u32 4294901760, %v2371_v20  ;;  %v11312_v27 = vand.u32 4294901760, %v11290_v63  ;;  %v11320_v20 = vcombine.high %v14557_v9, %v14557_v9 }
 0x3e5   :  { %8341 = vmatpush3.msra.mxu1 %v11273_v54  ;;  %8293 = vmatprep.subr.mxu0 %v14479_v55  ;;  %v2383_v54 = vsub.f32 %v11260_v16, %v11288_v18 }
 0x3e6   :  { %8342 = vmatprep.subr.mxu1 %v14479_v55  ;;  %8294 = vmatpush3.msra.mxu0 %v10987_v26  ;;  %14563 = vst [vmem:[#allocation13_spill] sm:$0xff] %v11305_v47  ;;  %14564 = vst [vmem:[#allocation63_spill] sm:$0xff] %v11312_v27  ;;  %v11316_v26 = vand.u32 4294901760, %v2377_v23 }
 0x3e7   :  { %8343 = vmatpush3.msra.mxu1 %v11285_v0  ;;  %8295 = vmatprep.subr.mxu0 %v14479_v55  ;;  %v2389_v0 = vsub.f32 %v11275_v60, %v11299_v51  ;;  %v11331_v23 = vand.u32 4294901760, %v2383_v54 }
 0x3e8   :  { %8344 = vmatprep.subr.mxu1 %v14479_v55  ;;  %3457 = vrot.lane.b32.xlu0 %v3432_v3, %s9521_s2  ;;  %14565 = vst [vmem:[#allocation64_spill] sm:$0xff] %v11316_v26  ;;  %v2395_v3 = vsub.f32 %v11290_v63, %v11312_v27 }
 0x3e9   :  { %8296 = vmatpush3.msra.mxu0 %v10996_v34  ;;  %8297 = vmatprep.mubr.msk.f32.mxu0 %vm14552_vm5, %v14479_v55  ;;  %14566 = vst [vmem:[#allocation65_spill] sm:$0xff] %v11331_v23  ;;  %v11343_v34 = vcombine.high %v14562_v41, %v14562_v41  ;;  %v11347_v54 = vand.u32 4294901760, %v2389_v0 }
 0x3ea   :  { %8345 = vmatpush3.msra.mxu1 %v11305_v47  ;;  %8298 = vmatmul.mubr.f32.vlgmr.msra.gmra.mxu0 %v11046_v36  ;;  %v3440_v47 = vrot.slane %v11320_v20, %v14556_v22 }
 0x3eb   :  { %8319 = vmatprep.subr.mxu0 %v14479_v55  ;;  %8346 = vmatprep.subr.mxu1 %v14479_v55  ;;  %14567 = vst [vmem:[#allocation66_spill] sm:$0xff] %v11347_v54  ;;  %v3448_v0 = vrot.slane %v11343_v34, %v14556_v22 }
 0x3ec   :  { %8320 = vmatpush3.msk.msra.mxu0 %vm11102_vm15, %v14515_v43  ;;  %8347 = vmatpush3.msra.mxu1 %v11316_v26  ;;  %v11355_v26 = vand.u32 4294901760, %v2395_v3 }
 0x3ed   :  { %8321 = vmatprep.subr.mxu0 %v14479_v55  ;;  %8348 = vmatprep.subr.mxu1 %v14479_v55 }
 0x3ee   :  { %3461 = vrot.lane.b32.xlu0 %v3440_v47, %s9521_s2  ;;  %8322 = vmatpush3.msk.msra.mxu0 %vm11119_vm14, %v14515_v43  ;;  %14568 = vst [vmem:[#allocation67_spill] sm:$0xff] %v11355_v26 }
 0x3ef   :  { %8349 = vmatpush3.msra.mxu1 %v11331_v23  ;;  %8323 = vmatprep.subr.mxu0 %v14479_v55 }
 0x3f0   :  { %8350 = vmatprep.subr.mxu1 %v14479_v55  ;;  %8324 = vmatpush3.msk.msra.mxu0 %vm11131_vm13, %v14515_v43 }
 0x3f1   :  { %8351 = vmatpush3.msra.mxu1 %v11347_v54  ;;  %8325 = vmatprep.subr.mxu0 %v14479_v55 }
 0x3f2   :  { %8352 = vmatprep.subr.mxu1 %v14479_v55  ;;  %3465 = vrot.lane.b32.xlu0 %v3448_v0, %s9521_s2 }
 0x3f3   :  { %8326 = vmatpush3.msk.msra.mxu0 %vm11155_vm12, %v14515_v43  ;;  %8353 = vmatpush3.msra.mxu1 %v11355_v26 }
 0x3f4   :  { %8354 = vmatprep.mubr.msk.f32.mxu1 %vm14552_vm5, %v14479_v55  ;;  %8327 = vmatprep.subr.mxu0 %v14479_v55 }
 0x3f5   :  { %8355 = vmatmul.mubr.f32.vlgmr.msra.gmra.mxu1 %v11046_v36  ;;  %8376 = vmatprep.subr.mxu1 %v14479_v55 }
 0x3f6   :  { %8328 = vmatpush3.msk.msra.mxu0 %vm11173_vm0, %v14515_v43  ;;  %8377 = vmatpush3.msk.msra.mxu1 %vm11102_vm15, %v14515_v43 }
 0x3f7   :  { %8329 = vmatprep.subr.mxu0 %v14479_v55  ;;  %8378 = vmatprep.subr.mxu1 %v14479_v55 }
 0x3f8   :  { %8330 = vmatpush3.msk.msra.mxu0 %vm11200_vm2, %v14515_v43  ;;  %8379 = vmatpush3.msk.msra.mxu1 %vm11119_vm14, %v14515_v43 }
 0x3f9   :  { %8331 = vmatprep.subr.mxu0 %v14479_v55  ;;  %8380 = vmatprep.subr.mxu1 %v14479_v55 }
 0x3fa   :  { %8332 = vmatpush3.msk.msra.mxu0 %vm11221_vm10, %v14515_v43  ;;  %8381 = vmatpush3.msk.msra.mxu1 %vm11131_vm13, %v14515_v43 }
 0x3fb   :  { %8333 = vmatprep.subr.mxu0 %v14479_v55  ;;  %8382 = vmatprep.subr.mxu1 %v14479_v55 }
 0x3fc   :  { %8334 = vmatpush3.msk.msra.mxu0 %vm11240_vm1, %v14515_v43  ;;  %8335 = vmatprep.mubr.msk.f32.mxu0 %vm14552_vm5, %v14479_v55 }
 0x3fd   :  { %8383 = vmatpush3.msk.msra.mxu1 %vm11155_vm12, %v14515_v43  ;;  %8336 = vmatmul.mubr.f32.vlgmr.msra.gmra.mxu0 %v11072_v58 }
 0x3fe   :  { %8357 = vmatprep.subr.mxu0 %v14479_v55  ;;  %8384 = vmatprep.subr.mxu1 %v14479_v55 }
 0x3ff   :  { %8358 = vmatpush3.msra.mxu0 %v11139_v6  ;;  %8385 = vmatpush3.msk.msra.mxu1 %vm11173_vm0, %v14515_v43 }
 0x400   :  { %8359 = vmatprep.subr.mxu0 %v14479_v55  ;;  %8386 = vmatprep.subr.mxu1 %v14479_v55 }
 0x401   :  { %8360 = vmatpush3.msra.mxu0 %v11161_v39  ;;  %8387 = vmatpush3.msk.msra.mxu1 %vm11200_vm2, %v14515_v43 }
 0x402   :  { %8361 = vmatprep.subr.mxu0 %v14479_v55  ;;  %8388 = vmatprep.subr.mxu1 %v14479_v55 }
 0x403   :  { %8362 = vmatpush3.msra.mxu0 %v11179_v17  ;;  %8389 = vmatpush3.msk.msra.mxu1 %vm11221_vm10, %v14515_v43 }
 0x404   :  { %8363 = vmatprep.subr.mxu0 %v14479_v55  ;;  %8390 = vmatprep.subr.mxu1 %v14479_v55 }
 0x405   :  { %8364 = vmatpush3.msra.mxu0 %v11208_v46  ;;  %8391 = vmatpush3.msk.msra.mxu1 %vm11240_vm1, %v14515_v43 }
 0x406   :  { %8392 = vmatprep.mubr.msk.f32.mxu1 %vm14552_vm5, %v14479_v55  ;;  %8365 = vmatprep.subr.mxu0 %v14479_v55 }
 0x407   :  { %8393 = vmatmul.mubr.f32.vlgmr.msra.gmra.mxu1 %v11059_v44  ;;  %8414 = vmatprep.subr.mxu1 %v14479_v55  ;;  %v14574_v44 = vld [vmem:[#allocation14_spill] sm:$0xff] }
 0x408   :  { %8366 = vmatpush3.msra.mxu0 %v11229_v30  ;;  %8415 = vmatpush3.msk.msra.mxu1 %vm11102_vm15, %v14515_v43  ;;  %v3436_v58 = vrot.slane %v14562_v41, %v14574_v44  ;;  %v3444_v47 = vrot.slane %v11320_v20, %v14574_v44 }
 0x409   :  { %8367 = vmatprep.subr.mxu0 %v14479_v55  ;;  %8416 = vmatprep.subr.mxu1 %v14479_v55 }
 0x40a   :  { %8368 = vmatpush3.msra.mxu0 %v11260_v16  ;;  %8417 = vmatpush3.msk.msra.mxu1 %vm11119_vm14, %v14515_v43 }
 0x40b   :  { %8369 = vmatprep.subr.mxu0 %v14479_v55  ;;  %8418 = vmatprep.subr.mxu1 %v14479_v55 }
 0x40c   :  { %8370 = vmatpush3.msra.mxu0 %v11275_v60  ;;  %8419 = vmatpush3.msk.msra.mxu1 %vm11131_vm13, %v14515_v43 }
 0x40d   :  { %8371 = vmatprep.subr.mxu0 %v14479_v55  ;;  %8420 = vmatprep.subr.mxu1 %v14479_v55 }
 0x40e   :  { %8372 = vmatpush3.msra.mxu0 %v11290_v63  ;;  %8373 = vmatprep.mubr.msk.f32.mxu0 %vm14552_vm5, %v14479_v55 }
 0x40f   :  { %8421 = vmatpush3.msk.msra.mxu1 %vm11155_vm12, %v14515_v43  ;;  %8374 = vmatmul.mubr.f32.vlgmr.msra.gmra.mxu0 %v11049_v8  ;;  %v9522_v8 = vmov 98  }
 0x410   :  { %8395 = vmatprep.subr.mxu0 %v14479_v55  ;;  %8422 = vmatprep.subr.mxu1 %v14479_v55 }
 0x411   :  { %8396 = vmatpush3.msra.mxu0 %v11169_v59  ;;  %8423 = vmatpush3.msk.msra.mxu1 %vm11173_vm0, %v14515_v43  ;;  %vm14576_vm0 = vcmask 519168  }
 0x412   :  { %8397 = vmatprep.subr.mxu0 %v14479_v55  ;;  %8424 = vmatprep.subr.mxu1 %v14479_v55 }
 0x413   :  { %8398 = vmatpush3.msra.mxu0 %v11193_v11  ;;  %8425 = vmatpush3.msk.msra.mxu1 %vm11200_vm2, %v14515_v43  ;;  %vm14575_vm2 = vcmask 257024  }
 0x414   :  { %8399 = vmatprep.subr.mxu0 %v14479_v55  ;;  %8426 = vmatprep.subr.mxu1 %v14479_v55 }
 0x415   :  { %8400 = vmatpush3.msra.mxu0 %v11217_v31  ;;  %8427 = vmatpush3.msk.msra.mxu1 %vm11221_vm10, %v14515_v43  ;;  %vm3469_vm10 = vcmask 211968  }
 0x416   :  { %8401 = vmatprep.subr.mxu0 %v14479_v55  ;;  %8428 = vmatprep.subr.mxu1 %v14479_v55 }
 0x417   :  { %8402 = vmatpush3.msra.mxu0 %v11249_v48  ;;  %8429 = vmatpush3.msk.msra.mxu1 %vm11240_vm1, %v14515_v43  ;;  %vm14571_vm1 = vnez %v14496_v19 }
 0x418   :  { %8430 = vmatprep.mubr.msk.f32.mxu1 %vm14552_vm5, %v14479_v55  ;;  %8403 = vmatprep.subr.mxu0 %v14479_v55 }
 0x419   :  { %8431 = vmatmul.mubr.f32.vlgmr.msra.gmra.mxu1 %v11046_v36  ;;  %8404 = vmatpush3.msra.mxu0 %v11266_v35 }
 0x41a   :  { %8405 = vmatprep.subr.mxu0 %v14479_v55  ;;  %8411 = vmatprep.mubr.msk.f32.mxu0 %vm14552_vm5, %v14479_v55 }
 0x41b   :  { %8406 = vmatpush3.msra.mxu0 %v11288_v18  ;;  %9145 = vset.pattern.permute.xlu1 %v9522_v8 }
 0x41c   :  { %8407 = vmatprep.subr.mxu0 %v14479_v55  ;;  %8452 = vmatprep.subr.mxu1 %v14479_v55 }
 0x41d   :  { %8408 = vmatpush3.msra.mxu0 %v11299_v51  ;;  %8453 = vmatpush3.msra.mxu1 %v10839_v62 }
 0x41e   :  { %8409 = vmatprep.subr.mxu0 %v14479_v55  ;;  %8454 = vmatprep.subr.mxu1 %v14479_v55 }
 0x41f   :  { %8410 = vmatpush3.msra.mxu0 %v11312_v27  ;;  %8455 = vmatpush3.msra.mxu1 %v10976_v5 }
 0x420   :  { %8412 = vmatmul.mubr.f32.vlgmr.msra.gmra.mxu0 %v11046_v36  ;;  %8456 = vmatprep.subr.mxu1 %v14479_v55 }
 0x421   :  { %8457 = vmatpush3.msra.mxu1 %v10978_v10  ;;  %8433 = vmatprep.subr.mxu0 %v14479_v55  ;;  %v9523_v10 = vmov 99  }
 0x422   :  { %8458 = vmatprep.subr.mxu1 %v14479_v55  ;;  %8434 = vmatpush3.msk.msra.mxu0 %vm10825_vm6, %v14515_v43 }
 0x423   :  { %8459 = vmatpush3.msra.mxu1 %v10993_v14  ;;  %8435 = vmatprep.subr.mxu0 %v14479_v55  ;;  %v9524_v14 = vmov 100  }
 0x424   :  { %8460 = vmatprep.subr.mxu1 %v14479_v55  ;;  %8436 = vmatpush3.msk.msra.mxu0 %vm10869_vm7, %v14515_v43 }
 0x425   :  { %8461 = vmatpush3.msra.mxu1 %v11006_v40  ;;  %8437 = vmatprep.subr.mxu0 %v14479_v55  ;;  %v14572_v40 = vmax.f32 %v14467_v21, 0.0 }
 0x426   :  { %8462 = vmatprep.subr.mxu1 %v14479_v55  ;;  %8438 = vmatpush3.msk.msra.mxu0 %vm14569_vm9, %v14515_v43 }
 0x427   :  { %8463 = vmatpush3.msra.mxu1 %v11016_v56  ;;  %8439 = vmatprep.subr.mxu0 %v14479_v55  ;;  %v2766_v56 = vadd.f32 1.0, %v14572_v40 }
 0x428   :  { %8464 = vmatprep.subr.mxu1 %v14479_v55  ;;  %8440 = vmatpush3.msk.msra.mxu0 %vm14570_vm11, %v14515_v43 }
 0x429   :  { %8465 = vmatpush3.msra.mxu1 %v11025_v53  ;;  %8441 = vmatprep.subr.mxu0 %v14479_v55  ;;  %v9525_v53 = vmov 101  }
 0x42a   :  { %8466 = vmatprep.subr.mxu1 %v14479_v55  ;;  %8468 = vmatprep.mubr.msk.f32.mxu1 %vm14552_vm5, %v14479_v55 }
 0x42b   :  { %8467 = vmatpush3.msra.mxu1 %v11030_v45  ;;  %8442 = vmatpush3.msk.msra.mxu0 %vm14571_vm1, %v14515_v43  ;;  %v14573_v45 = vld [vmem:[#allocation8_spill] sm:$0xff] }
 0x42c   :  { %8490 = vmatprep.subr.mxu1 %v14479_v55  ;;  %8443 = vmatprep.subr.mxu0 %v14479_v55 }
 0x42d   :  { %8444 = vmatpush3.msk.msra.mxu0 %vm10917_vm4, %v14515_v43  ;;  %8449 = vmatprep.mubr.msk.f32.mxu0 %vm14552_vm5, %v14479_v55 }
 0x42e   :  { %8445 = vmatprep.subr.mxu0 %v14479_v55 }
 0x42f   :  { %8446 = vmatpush3.msk.msra.mxu0 %vm10925_vm3, %v14515_v43  ;;  %vm14764_vm3 = vcmask 1042434  }
 0x430   :  { %8447 = vmatprep.subr.mxu0 %v14479_v55 }
 0x431   :  { %8448 = vmatpush3.msk.msra.mxu0 %vm10885_vm8, %v14515_v43 }
 0x432   :  { %8471 = vmatprep.subr.mxu0 %v14479_v55 }
 0x44e   :  { %v1763_v36 = vpop.xlane.xlu0 %1762 }
 0x44f   :  { %9303 = vrcp.f32 %v1763_v36 }
 0x45c   :  { %v9304_v62 = vpop.eup %9303 }
 0x45d   :  { %v1765_v5 = vmul.f32 %v9304_v62, %v11022_v49  ;;  %v3428_v49 = vrot.slane %v14557_v9, %v14574_v44 }
 0x45f   :  { %2750 = vperm.xlu1 %9145, %v1765_v5  }
 0x463   :  { %9146 = vset.pattern.permute.xlu1 %v9523_v10 }
 0x464   :  { %2755 = vperm.xlu1 %9146, %v1765_v5  }
 0x468   :  { %9147 = vset.pattern.permute.xlu1 %v9524_v14 }
 0x469   :  { %2761 = vperm.xlu1 %9147, %v1765_v5  }
 0x46d   :  { %9148 = vset.pattern.permute.xlu1 %v9525_v53 }
 0x46e   :  { %2772 = vperm.xlu1 %9148, %v2766_v56  }
 0x472   :  { %3961 = vrot.lane.b32.xlu1 %v14573_v45, %s9521_s2 }
 0x473   :  { %9149 = vset.pattern.permute.xlu1 %v14482_v13  ;;  %v3452_v13 = vrot.slane %v11343_v34, %v14574_v44 }
 0x476   :  { %3455 = vrot.lane.b32.xlu1 %v3428_v49, %s9521_s2 }
 0x47a   :  { %3459 = vrot.lane.b32.xlu1 %v3436_v58, %s9521_s2 }
 0x47e   :  { %v1944_v3 = vpop.f32.mrf.mxu1  ;;  %3463 = vrot.lane.b32.xlu1 %v3444_v47, %s9521_s2 }
 0x480   :  { %v8242_v0 = vpop.f32.mrf.mxu1 }
 0x482   :  { %3467 = vrot.lane.b32.xlu1 %v3452_v13, %s9521_s2 }
 0x486   :  { %v1841_v9 = vpop.f32.mrf.mxu0 }
 0x487   :  { %v1945_v8 = vadd.f32 %v1944_v3, %v1841_v9 }
 0x488   :  { %v8223_v36 = vpop.f32.mrf.mxu0 }
 0x48e   :  { %v2097_v62 = vpop.f32.mrf.mxu1 }
 0x490   :  { %v8280_v5 = vpop.f32.mrf.mxu1 }
 0x497   :  { %v2024_v41 = vpop.f32.mrf.mxu0 }
 0x498   :  { %v2025_v10 = vadd.f32 %v2024_v41, %v1945_v8 }
 0x499   :  { %v8261_v14 = vpop.f32.mrf.mxu0 }
 0x49a   :  { %v2098_v40 = vadd.f32 %v2097_v62, %v2025_v10 }
 0x4a1   :  { %v2255_v56 = vpop.f32.mrf.mxu1 }
 0x4a3   :  { %v8318_v20 = vpop.f32.mrf.mxu1 }
 0x4aa   :  { %v2184_v53 = vpop.f32.mrf.mxu0 }
 0x4ab   :  { %v2185_v8 = vadd.f32 %v2184_v53, %v2098_v40 }
 0x4ac   :  { %v8299_v45 = vpop.f32.mrf.mxu0 }
 0x4ad   :  { %v2256_v14 = vadd.f32 %v2255_v56, %v2185_v8 }
 0x4b5   :  { %v2433_v49 = vpop.f32.mrf.mxu1 }
 0x4b7   :  { %v8356_v58 = vpop.f32.mrf.mxu1 }
 0x4bd   :  { %v2330_v47 = vpop.f32.mrf.mxu0 }
 0x4be   :  { %v2434_v3 = vadd.f32 %v2433_v49, %v2330_v47 }
 0x4bf   :  { %v8337_v0 = vpop.f32.mrf.mxu0 }
 0x4c7   :  { %v2586_v34 = vpop.f32.mrf.mxu1 }
 0x4c9   :  { %v8394_v27 = vpop.f32.mrf.mxu1 }
 0x4cf   :  { %v2513_v13 = vpop.f32.mrf.mxu0 }
 0x4d0   :  { %v2514_v5 = vadd.f32 %v2513_v13, %v2434_v3 }
 0x4d1   :  { %v8375_v51 = vpop.f32.mrf.mxu0 }
 0x4d2   :  { %v2587_v41 = vadd.f32 %v2586_v34, %v2514_v5 }
 0x4d9   :  { %v2744_v9 = vpop.f32.mrf.mxu1 }
 0x4da   :  { %v2751_v36 = vpop.permute.xlu1 %2750 }
 0x4db   :  { %v8432_v18 = vpop.f32.mrf.mxu1  ;;  %v2753_v0 = vmul.f32 %v2751_v36, %v2256_v14 }
 0x4dc   :  { %v3964_v18 = vpop.permute.xlu0 %3963 }
 0x4df   :  { %v2756_v62 = vpop.permute.xlu1 %2755 }
 0x4e0   :  { %v2673_v10 = vpop.f32.mrf.mxu0  ;;  %v2758_v45 = vmul.f32 %v2756_v62, %v11042_v7 }
 0x4e1   :  { %v2674_v20 = vadd.f32 %v2673_v10, %v2587_v41 }
 0x4e2   :  { %v8413_v58 = vpop.f32.mrf.mxu0  ;;  %v2759_v27 = vadd.f32 %v2758_v45, %v2753_v0 }
 0x4e3   :  { %v2745_v35 = vadd.f32 %v2744_v9, %v2674_v20 }
 0x4e4   :  { %v2762_v48 = vpop.permute.xlu1 %2761 }
 0x4e5   :  { %v2764_v31 = vmul.f32 %v2762_v48, %v2745_v35 }
 0x4e7   :  { %v2765_v51 = vadd.f32 %v2764_v31, %v2759_v27  ;;  %v11577_v31 = vpop.permute.xlu0 %3453 }
 0x4e9   :  { %v2767_v49 = vmax.f32 %v2765_v51, 1e-30  ;;  %v2773_v47 = vpop.permute.xlu1 %2772 }
 0x4eb   :  { %9305 = vlog2.f32 %v2767_v49  ;;  %v11579_v35 = vpop.permute.xlu0 %3457 }
 0x4ed   :  { %v3962_v40 = vpop.permute.xlu1 %3961 }
 0x4ee   :  { %v3965_v53 = vsel %vm3469_vm10, %v3962_v40, %v3964_v18  ;;  %v14577_v18 = vld [vmem:[#allocation15_spill] sm:$0xff] }
 0x4ef   :  { %v3967_v56 = vsel %vm14575_vm2, %v3965_v53, 0.0  ;;  %v11581_v36 = vpop.permute.xlu0 %3461  ;;  %vm14373_vm2 = vcmask 1043456  }
 0x4f0   :  { %3968 = vadd.xlane.f32.xlu0 %v3967_v56 }
 0x4f1   :  { %v11592_v56 = vpop.permute.xlu1 %3455 }
 0x4f2   :  { %v11894_v61 = vsel %vm3469_vm10, %v11577_v31, %v11592_v56 }
 0x4f3   :  { %v11583_v5 = vpop.permute.xlu0 %3465 }
 0x4f8   :  { %v9306_v34 = vpop.eup %9305 }
 0x4f9   :  { %v2769_v7 = vmul.f32 0.6931472, %v9306_v34  ;;  %v11594_v34 = vpop.permute.xlu1 %3459 }
 0x4fb   :  { %v2775_v13 = vmul.f32 %v2773_v47, %v2769_v7 }
 0x4fd   :  { %v2776_v3 = vmul.f32 1.442695, %v2775_v13  ;;  %v11596_v7 = vpop.permute.xlu1 %3463  ;;  %v14578_v13 = vld [vmem:[#allocation7_spill] sm:$0xff] }
 0x4ff   :  { %9307 = vpow2.f32 %v2776_v3  ;;  %v2938_v3 = vrot.slane %v14467_v21, %v14578_v13 }
 0x50c   :  { %v9308_v9 = vpop.eup %9307 }
 0x50d   :  { %v2778_v48 = vsel %vm14576_vm0, %v9308_v9, 0.0  ;;  %vm14580_vm0 = vcmask 261120  }
 0x50e   :  { %2779 = vadd.xlane.f32.xlu0 %v2778_v48  ;;  %v2946_v48 = vrot.slane %v2938_v3, %v14578_v13  ;;  %vm14584_vm12 = vmmov %vm14580_vm0 }
 0x50f   :  { %vm14593_vm13 = vmmov %vm14580_vm0 }
 0x510   :  { %vm14661_vm14 = vmmov %vm14580_vm0 }
 0x579   :  { %v11585_v8 = vpop.xlane.xlu0 %3968 }
 0x597   :  { %v2780_v41 = vpop.xlane.xlu0 %2779 }
 0x598   :  { %v2782_v62 = vsel %vm14373_vm2, %v2780_v41, 0.0  ;;  %v11601_v41 = vpop.permute.xlu1 %3467  ;;  %vm14583_vm2 = vmmov %vm14580_vm0 }
 0x599   :  { %v2783_v10 = vrot.slane %v2782_v62, 4 }
 0x59b   :  { %v2784_v14 = vadd.f32 %v2783_v10, %v2782_v62  ;;  %v11605_v10 = vrot.slane %v2946_v48, %v14556_v22 }
 0x59d   :  { %v2785_v20 = vrot.slane %v2784_v14, 2 }
 0x59f   :  { %v2786_v45 = vadd.f32 %v2785_v20, %v2784_v14 }
 0x5a1   :  { %v2787_v58 = vrot.slane %v2786_v45, 1 }
 0x5a3   :  { %v2788_v0 = vadd.f32 %v2787_v58, %v2786_v45 }
 0x5a5   :  { %9309 = vrcp.f32 %v2788_v0 }
 0x5a6   :  { %9311 = vrsqrt.f32 %v11585_v8 }
 0x5b2   :  { %v9310_v27 = vpop.eup %9309 }
 0x5b3   :  { %v2790_v51 = vmul.f32 %v9310_v27, %v9308_v9  ;;  %v2939_v9 = vcombine.high %v2938_v3, %v2938_v3 }
 0x5b5   :  { %v2794_v49 = vrot.slane %v2790_v51, %v14556_v22  ;;  %v2829_v47 = vrot.slane %v2790_v51, %v14574_v44  ;;  %v2864_v40 = vrot.slane %v2790_v51, %v14577_v18  ;;  %v2899_v53 = vrot.slane %v2790_v51, %v10214_v15 }
 0x5b6   :  { %v2953_v62 = vrot.slane %v2939_v9, %v14578_v13  ;;  %v2954_v9 = vcombine.high %v2946_v48, %v2946_v48 }
 0x5b7   :  { %2800 = vbcast.lane.b32.xlu0 %v2794_v49, 264  ;;  %2796 = vbcast.lane.b32.xlu1 %v2794_v49, 256 }
 0x5b8   :  { %v11614_v21 = vrot.slane %v2953_v62, %v14556_v22 }
 0x5bb   :  { %2808 = vbcast.lane.b32.xlu0 %v2794_v49, 280  ;;  %2831 = vbcast.lane.b32.xlu1 %v2829_v47, 256 }
 0x5bf   :  { %2874 = vbcast.lane.b32.xlu0 %v2864_v40, 272  ;;  %2835 = vbcast.lane.b32.xlu1 %v2829_v47, 264 }
 0x5c3   :  { %2905 = vbcast.lane.b32.xlu0 %v2899_v53, 264  ;;  %2804 = vbcast.lane.b32.xlu1 %v2794_v49, 272 }
 0x5c7   :  { %2847 = vbcast.lane.b32.xlu0 %v2829_v47, 288  ;;  %2839 = vbcast.lane.b32.xlu1 %v2829_v47, 272 }
 0x5cb   :  { %2909 = vbcast.lane.b32.xlu0 %v2899_v53, 272  ;;  %2866 = vbcast.lane.b32.xlu1 %v2864_v40, 256 }
 0x5cf   :  { %2851 = vbcast.lane.b32.xlu0 %v2829_v47, 296  ;;  %2870 = vbcast.lane.b32.xlu1 %v2864_v40, 264 }
 0x5d3   :  { %2913 = vbcast.lane.b32.xlu0 %v2899_v53, 280  ;;  %2843 = vbcast.lane.b32.xlu1 %v2829_v47, 280 }
 0x5d7   :  { %2855 = vbcast.lane.b32.xlu0 %v2829_v47, 304  ;;  %2901 = vbcast.lane.b32.xlu1 %v2899_v53, 256 }
 0x5db   :  { %2917 = vbcast.lane.b32.xlu0 %v2899_v53, 288  ;;  %2812 = vbcast.lane.b32.xlu1 %v2794_v49, 288 }
 0x5df   :  { %2859 = vbcast.lane.b32.xlu0 %v2829_v47, 312  ;;  %2878 = vbcast.lane.b32.xlu1 %v2864_v40, 280 }
 0x5e3   :  { %2921 = vbcast.lane.b32.xlu0 %v2899_v53, 296  ;;  %2816 = vbcast.lane.b32.xlu1 %v2794_v49, 296 }
 0x5e7   :  { %2925 = vbcast.lane.b32.xlu0 %v2899_v53, 304  ;;  %2882 = vbcast.lane.b32.xlu1 %v2864_v40, 288 }
 0x5eb   :  { %2820 = vbcast.lane.b32.xlu1 %v2794_v49, 304 }
 0x5ef   :  { %2886 = vbcast.lane.b32.xlu1 %v2864_v40, 296 }
 0x5f3   :  { %2824 = vbcast.lane.b32.xlu1 %v2794_v49, 312 }
 0x5f7   :  { %2890 = vbcast.lane.b32.xlu1 %v2864_v40, 304 }
 0x5fb   :  { %2894 = vbcast.lane.b32.xlu1 %v2864_v40, 312 }
 0x5ff   :  { %2929 = vbcast.lane.b32.xlu1 %v2899_v53, 312 }
 0x629   :  { %v2801_v14 = vpop.permute.xlu0 %2800  ;;  %v2797_v20 = vpop.permute.xlu1 %2796 }
 0x62a   :  { %v11608_v45 = vmul.f32 %v11605_v10, %v2801_v14  ;;  %v11611_v58 = vmul.f32 %v11605_v10, %v2797_v20 }
 0x62c   :  { %3234 = vrot.lane.b32.xlu0 %v11608_v45, %s9526_s10  ;;  %3232 = vrot.lane.b32.xlu1 %v11611_v58, %s9526_s10 }
 0x62d   :  { %v2809_v0 = vpop.permute.xlu0 %2808  ;;  %v2832_v27 = vpop.permute.xlu1 %2831 }
 0x62e   :  { %v11621_v51 = vmul.f32 %v11614_v21, %v2832_v27  ;;  %v11649_v63 = vmul.f32 %v11605_v10, %v2809_v0 }
 0x630   :  { %3248 = vrot.lane.b32.xlu1 %v11621_v51, %s9526_s10 }
 0x631   :  { %v2875_v49 = vpop.permute.xlu0 %2874  ;;  %v2836_v47 = vpop.permute.xlu1 %2835 }
 0x632   :  { %v11626_v40 = vmul.f32 %v11614_v21, %v2836_v47  ;;  %v11639_v47 = vrot.slane %v2954_v9, %v14556_v22  ;;  %v2955_v9 = vcombine.high %v2953_v62, %v2953_v62 }
 0x634   :  { %3250 = vrot.lane.b32.xlu0 %v11626_v40, %s9526_s10  ;;  %v11659_v60 = vmul.f32 %v11639_v47, %v2875_v49  ;;  %v2971_v0 = vrot.slane %v2955_v9, %v14556_v22 }
 0x635   :  { %v2906_v53 = vpop.permute.xlu0 %2905  ;;  %v2805_v13 = vpop.permute.xlu1 %2804 }
 0x636   :  { %v11631_v3 = vmul.f32 %v11605_v10, %v2805_v13 }
 0x638   :  { %3236 = vrot.lane.b32.xlu1 %v11631_v3, %s9526_s10 }
 0x639   :  { %v2840_v14 = vpop.permute.xlu1 %2839  ;;  %v2848_v27 = vpop.permute.xlu0 %2847 }
 0x63a   :  { %v11636_v20 = vmul.f32 %v11614_v21, %v2840_v14  ;;  %v11678_v9 = vmul.f32 %v11614_v21, %v2848_v27 }
 0x63c   :  { %3252 = vrot.lane.b32.xlu0 %v11636_v20, %s9526_s10 }
 0x63d   :  { %v2867_v11 = vpop.permute.xlu1 %2866  ;;  %v2910_v48 = vpop.permute.xlu0 %2909 }
 0x63e   :  { %v11644_v59 = vmul.f32 %v11639_v47, %v2867_v11 }
 0x640   :  { %3264 = vrot.lane.b32.xlu1 %v11644_v59, %s9526_s10 }
 0x641   :  { %v2871_v13 = vpop.permute.xlu1 %2870  ;;  %v2852_v30 = vpop.permute.xlu0 %2851 }
 0x642   :  { %v11652_v14 = vmul.f32 %v11639_v47, %v2871_v13  ;;  %v11669_v13 = vmul.f32 %v2971_v0, %v2906_v53 }
 0x644   :  { %3238 = vrot.lane.b32.xlu1 %v11649_v63, %s9526_s10  ;;  %3266 = vrot.lane.b32.xlu0 %v11652_v14, %s9526_s10 }
 0x645   :  { %v2844_v11 = vpop.permute.xlu1 %2843  ;;  %v2914_v49 = vpop.permute.xlu0 %2913 }
 0x646   :  { %v11662_v16 = vmul.f32 %v11614_v21, %v2844_v11  ;;  %v11706_v2 = vmul.f32 %v2971_v0, %v2914_v49 }
 0x648   :  { %3268 = vrot.lane.b32.xlu1 %v11659_v60, %s9526_s10  ;;  %3254 = vrot.lane.b32.xlu0 %v11662_v16, %s9526_s10 }
 0x649   :  { %v2902_v62 = vpop.permute.xlu1 %2901  ;;  %v2856_v6 = vpop.permute.xlu0 %2855 }
 0x64a   :  { %v11671_v46 = vmul.f32 %v2971_v0, %v2902_v62  ;;  %v11687_v62 = vmul.f32 %v2971_v0, %v2910_v48 }
 0x64c   :  { %3282 = vrot.lane.b32.xlu1 %v11669_v13, %s9526_s10  ;;  %3280 = vrot.lane.b32.xlu0 %v11671_v46, %s9526_s10 }
 0x64d   :  { %v2813_v11 = vpop.permute.xlu1 %2812  ;;  %v2918_v48 = vpop.permute.xlu0 %2917 }
 0x64e   :  { %v11681_v17 = vmul.f32 %v11605_v10, %v2813_v11  ;;  %v11697_v11 = vmul.f32 %v11614_v21, %v2852_v30 }
 0x650   :  { %3256 = vrot.lane.b32.xlu1 %v11678_v9, %s9526_s10  ;;  %3240 = vrot.lane.b32.xlu0 %v11681_v17, %s9526_s10 }
 0x651   :  { %v2879_v53 = vpop.permute.xlu1 %2878  ;;  %v2860_v26 = vpop.permute.xlu0 %2859 }
 0x652   :  { %v11690_v39 = vmul.f32 %v11639_v47, %v2879_v53  ;;  %v11735_v54 = vmul.f32 %v11614_v21, %v2860_v26 }
 0x654   :  { %3284 = vrot.lane.b32.xlu1 %v11687_v62, %s9526_s10  ;;  %3270 = vrot.lane.b32.xlu0 %v11690_v39, %s9526_s10 }
 0x655   :  { %v2817_v27 = vpop.permute.xlu1 %2816 }
 0x656   :  { %v11700_v57 = vmul.f32 %v11605_v10, %v2817_v27  ;;  %v11716_v27 = vmul.f32 %v11614_v21, %v2856_v6  ;;  %v2922_v6 = vpop.permute.xlu0 %2921 }
 0x658   :  { %3258 = vrot.lane.b32.xlu1 %v11697_v11, %s9526_s10  ;;  %3242 = vrot.lane.b32.xlu0 %v11700_v57, %s9526_s10 }
 0x659   :  { %v2883_v53 = vpop.permute.xlu1 %2882 }
 0x65a   :  { %v11709_v50 = vmul.f32 %v11639_v47, %v2883_v53  ;;  %v11725_v53 = vmul.f32 %v2971_v0, %v2918_v48  ;;  %v2926_v4 = vpop.permute.xlu0 %2925 }
 0x65c   :  { %3286 = vrot.lane.b32.xlu1 %v11706_v2, %s9526_s10  ;;  %3272 = vrot.lane.b32.xlu0 %v11709_v50, %s9526_s10 }
 0x65d   :  { %v2821_v30 = vpop.permute.xlu1 %2820 }
 0x65e   :  { %v11719_v28 = vmul.f32 %v11605_v10, %v2821_v30 }
 0x660   :  { %3260 = vrot.lane.b32.xlu1 %v11716_v27, %s9526_s10  ;;  %3244 = vrot.lane.b32.xlu0 %v11719_v28, %s9526_s10 }
 0x661   :  { %v2887_v49 = vpop.permute.xlu1 %2886 }
 0x662   :  { %v11728_v52 = vmul.f32 %v11639_v47, %v2887_v49  ;;  %v11744_v49 = vmul.f32 %v2971_v0, %v2922_v6 }
 0x664   :  { %3288 = vrot.lane.b32.xlu1 %v11725_v53, %s9526_s10  ;;  %3274 = vrot.lane.b32.xlu0 %v11728_v52, %s9526_s10 }
 0x665   :  { %v2825_v30 = vpop.permute.xlu1 %2824 }
 0x666   :  { %v11738_v24 = vmul.f32 %v11605_v10, %v2825_v30  ;;  %v11753_v10 = vmul.f32 %v2971_v0, %v2926_v4  ;;  %v3008_v30 = vsub.f32 1.0, %v11611_v58  ;;  %v3009_v4 = vsub.f32 1.0, %v11608_v45 }
 0x667   :  { %v3010_v58 = vsub.f32 1.0, %v11631_v3  ;;  %v3011_v45 = vsub.f32 1.0, %v11649_v63  ;;  %v3019_v3 = vsub.f32 1.0, %v11662_v16  ;;  %v3020_v63 = vsub.f32 1.0, %v11678_v9 }
 0x668   :  { %3262 = vrot.lane.b32.xlu0 %v11735_v54, %s9526_s10  ;;  %3246 = vrot.lane.b32.xlu1 %v11738_v24, %s9526_s10  ;;  %v3034_v16 = vsub.f32 1.0, %v11687_v62  ;;  %v3028_v9 = vsub.f32 1.0, %v11709_v50  ;;  %v3014_v62 = vsub.f32 1.0, %v11719_v28  ;;  %v3015_v50 = vsub.f32 1.0, %v11738_v24 }
 0x669   :  { %v2891_v48 = vpop.permute.xlu1 %2890  ;;  %v3037_v28 = vsub.f32 1.0, %v11744_v49 }
 0x66a   :  { %v11747_v23 = vmul.f32 %v11639_v47, %v2891_v48 }
 0x66c   :  { %3290 = vrot.lane.b32.xlu0 %v11744_v49, %s9526_s10  ;;  %3276 = vrot.lane.b32.xlu1 %v11747_v23, %s9526_s10 }
 0x66d   :  { %v2895_v26 = vpop.permute.xlu1 %2894 }
 0x66e   :  { %v11756_v21 = vmul.f32 %v11639_v47, %v2895_v26  ;;  %v3016_v47 = vsub.f32 1.0, %v11621_v51  ;;  %v3017_v26 = vsub.f32 1.0, %v11626_v40  ;;  %v3025_v51 = vsub.f32 1.0, %v11652_v14 }
 0x66f   :  { %v3026_v40 = vsub.f32 1.0, %v11659_v60  ;;  %v3012_v14 = vsub.f32 1.0, %v11681_v17  ;;  %v3027_v60 = vsub.f32 1.0, %v11690_v39  ;;  %v3035_v17 = vsub.f32 1.0, %v11706_v2 }
 0x670   :  { %3292 = vrot.lane.b32.xlu0 %v11753_v10, %s9526_s10  ;;  %3278 = vrot.lane.b32.xlu1 %v11756_v21, %s9526_s10  ;;  %v3022_v39 = vsub.f32 1.0, %v11716_v27  ;;  %v3023_v2 = vsub.f32 1.0, %v11735_v54  ;;  %v3030_v27 = vsub.f32 1.0, %v11747_v23  ;;  %v3031_v54 = vsub.f32 1.0, %v11756_v21 }
 0x671   :  { %v2930_v6 = vpop.permute.xlu1 %2929 }
 0x672   :  { %v11763_v48 = vmul.f32 %v2971_v0, %v2930_v6  ;;  %v3018_v0 = vsub.f32 1.0, %v11636_v20  ;;  %v3024_v6 = vsub.f32 1.0, %v11644_v59  ;;  %v3033_v59 = vsub.f32 1.0, %v11669_v13 }
 0x673   :  { %v3032_v20 = vsub.f32 1.0, %v11671_v46  ;;  %v3021_v46 = vsub.f32 1.0, %v11697_v11  ;;  %v3013_v13 = vsub.f32 1.0, %v11700_v57  ;;  %v3036_v57 = vsub.f32 1.0, %v11725_v53 }
 0x674   :  { %3072 = vrot.lane.b32.xlu0 %v3008_v30, %s9527_s11  ;;  %3294 = vrot.lane.b32.xlu1 %v11763_v48, %s9526_s10  ;;  %v3029_v11 = vsub.f32 1.0, %v11728_v52  ;;  %v3038_v52 = vsub.f32 1.0, %v11753_v10  ;;  %v3039_v49 = vsub.f32 1.0, %v11763_v48 }
 0x678   :  { %3088 = vrot.lane.b32.xlu0 %v3016_v47, %s9527_s11  ;;  %3074 = vrot.lane.b32.xlu1 %v3009_v4, %s9527_s11 }
 0x67c   :  { %3076 = vrot.lane.b32.xlu0 %v3010_v58, %s9527_s11  ;;  %3090 = vrot.lane.b32.xlu1 %v3017_v26, %s9527_s11 }
 0x680   :  { %3104 = vrot.lane.b32.xlu0 %v3024_v6, %s9527_s11  ;;  %3092 = vrot.lane.b32.xlu1 %v3018_v0, %s9527_s11 }
 0x684   :  { %3078 = vrot.lane.b32.xlu0 %v3011_v45, %s9527_s11  ;;  %3106 = vrot.lane.b32.xlu1 %v3025_v51, %s9527_s11 }
 0x688   :  { %3108 = vrot.lane.b32.xlu0 %v3026_v40, %s9527_s11  ;;  %3094 = vrot.lane.b32.xlu1 %v3019_v3, %s9527_s11 }
 0x68c   :  { %3122 = vrot.lane.b32.xlu0 %v3033_v59, %s9527_s11  ;;  %3120 = vrot.lane.b32.xlu1 %v3032_v20, %s9527_s11 }
 0x690   :  { %3096 = vrot.lane.b32.xlu0 %v3020_v63, %s9527_s11  ;;  %3080 = vrot.lane.b32.xlu1 %v3012_v14, %s9527_s11 }
 0x694   :  { %3124 = vrot.lane.b32.xlu0 %v3034_v16, %s9527_s11  ;;  %3110 = vrot.lane.b32.xlu1 %v3027_v60, %s9527_s11 }
 0x698   :  { %3098 = vrot.lane.b32.xlu0 %v3021_v46, %s9527_s11  ;;  %3082 = vrot.lane.b32.xlu1 %v3013_v13, %s9527_s11 }
 0x69c   :  { %3126 = vrot.lane.b32.xlu0 %v3035_v17, %s9527_s11  ;;  %3112 = vrot.lane.b32.xlu1 %v3028_v9, %s9527_s11 }
 0x69e   :  { %v3233_v30 = vpop.permute.xlu1 %3232  ;;  %v3235_v53 = vpop.permute.xlu0 %3234 }
 0x6a0   :  { %3084 = vrot.lane.b32.xlu0 %v3014_v62, %s9527_s11  ;;  %3100 = vrot.lane.b32.xlu1 %v3022_v39, %s9527_s11 }
 0x6a2   :  { %v3249_v4 = vpop.permute.xlu1 %3248 }
 0x6a4   :  { %3114 = vrot.lane.b32.xlu0 %v3029_v11, %s9527_s11  ;;  %3128 = vrot.lane.b32.xlu1 %v3036_v57, %s9527_s11 }
 0x6a6   :  { %v11826_v47 = vpop.permute.xlu0 %3250 }
 0x6a8   :  { %3086 = vrot.lane.b32.xlu0 %v3015_v50, %s9527_s11  ;;  %3102 = vrot.lane.b32.xlu1 %v3023_v2, %s9527_s11 }
 0x6aa   :  { %v3237_v24 = vpop.permute.xlu1 %3236 }
 0x6ac   :  { %3116 = vrot.lane.b32.xlu0 %v3030_v27, %s9527_s11  ;;  %3130 = vrot.lane.b32.xlu1 %v3037_v28, %s9527_s11  ;;  %v9459_v28 = vld [vmem:[%s14234_s1] sm:$0xff] }
 0x6ae   :  { %v11831_v23 = vpop.permute.xlu0 %3252 }
 0x6b0   :  { %3118 = vrot.lane.b32.xlu0 %v3031_v54, %s9527_s11  ;;  %3132 = vrot.lane.b32.xlu1 %v3038_v52, %s9527_s11 }
 0x6b2   :  { %v11833_v26 = vpop.permute.xlu1 %3264 }
 0x6b4   :  { %3134 = vrot.lane.b32.xlu0 %v3039_v49, %s9527_s11 }
 0x6b6   :  { %v11836_v58 = vpop.permute.xlu0 %3266  ;;  %v11838_v10 = vpop.permute.xlu1 %3238 }
 0x6ba   :  { %v11840_v21 = vpop.permute.xlu0 %3254  ;;  %v11842_v0 = vpop.permute.xlu1 %3268 }
 0x6be   :  { %v11844_v6 = vpop.permute.xlu0 %3280  ;;  %v11846_v45 = vpop.permute.xlu1 %3282 }
 0x6c2   :  { %v11848_v51 = vpop.permute.xlu0 %3240  ;;  %v11850_v48 = vpop.permute.xlu1 %3256 }
 0x6c6   :  { %v11852_v40 = vpop.permute.xlu0 %3270  ;;  %v11854_v3 = vpop.permute.xlu1 %3284 }
 0x6ca   :  { %v11856_v59 = vpop.permute.xlu0 %3242  ;;  %v11858_v20 = vpop.permute.xlu1 %3258 }
 0x6ce   :  { %v11860_v63 = vpop.permute.xlu0 %3272  ;;  %v11862_v14 = vpop.permute.xlu1 %3286 }
 0x6d2   :  { %v11864_v16 = vpop.permute.xlu0 %3244  ;;  %v11866_v60 = vpop.permute.xlu1 %3260 }
 0x6d6   :  { %v11868_v46 = vpop.permute.xlu0 %3274  ;;  %v11870_v13 = vpop.permute.xlu1 %3288 }
 0x6da   :  { %v11872_v17 = vpop.permute.xlu0 %3262  ;;  %v11874_v9 = vpop.permute.xlu1 %3246 }
 0x6de   :  { %v11876_v39 = vpop.permute.xlu0 %3290  ;;  %v11878_v62 = vpop.permute.xlu1 %3276 }
 0x6e2   :  { %v11880_v57 = vpop.permute.xlu0 %3292  ;;  %v11882_v11 = vpop.permute.xlu1 %3278 }
 0x6e6   :  { %v3073_v2 = vpop.permute.xlu0 %3072  ;;  %v11884_v50 = vpop.permute.xlu1 %3294 }
 0x6e7   :  { %v3168_v27 = vmul.f32 %v9459_v28, %v3073_v2 }
 0x6e9   :  { %v11889_v52 = vadd.f32 %v3233_v30, %v3168_v27  ;;  %v9461_v30 = vld [vmem:[%s14234_s1 + $0x8] sm:$0xff] }
 0x6ea   :  { %v3089_v54 = vpop.permute.xlu0 %3088  ;;  %v3075_v49 = vpop.permute.xlu1 %3074 }
 0x6eb   :  { %14579 = vst [vmem:[#allocation8_spill] sm:$0xff] %v11889_v52  ;;  %3360 = vst.msk [vmem:[%s14238_s5] sm:$0xff] %vm14580_vm0, %v11889_v52  ;;  %v3176_v2 = vmul.f32 %v9460_v33, %v3089_v54  ;;  %v3169_v28 = vmul.f32 %v9461_v30, %v3075_v49  ;;  %v3606_v31 = vmul.f32 %v11889_v52, %v11889_v52 }
 0x6ec   :  { %v11911_v56 = vmul.f32 %v11894_v61, %v11889_v52  ;;  %v11921_v54 = vsel %vm3469_vm10, %v11579_v35, %v11594_v34  ;;  %v9463_v35 = vld [vmem:[%s14234_s1 + $0x48] sm:$0xff] }
 0x6ed   :  { %v11913_v27 = vadd.f32 %v3249_v4, %v3176_v2  ;;  %v11915_v29 = vadd.f32 %v3235_v53, %v3169_v28  ;;  %v3638_v37 = vsel %vm14580_vm0, %v3606_v31, 0.0 }
 0x6ee   :  { %v3077_v19 = vpop.permute.xlu0 %3076  ;;  %3639 = vadd.xlane.f32.xlu1 %v3638_v37  ;;  %v3091_v33 = vpop.permute.xlu1 %3090  ;;  %v9462_v37 = vld [vmem:[%s14234_s1 + $0x10] sm:$0xff] }
 0x6ef   :  { %14581 = vst [vmem:[#allocation14_spill] sm:$0xff] %v11913_v27  ;;  %14582 = vst [vmem:[#allocation15_spill] sm:$0xff] %v11915_v29  ;;  %v3170_v53 = vmul.f32 %v9462_v37, %v3077_v19  ;;  %v3177_v34 = vmul.f32 %v9463_v35, %v3091_v33  ;;  %v3607_v4 = vmul.f32 %v11915_v29, %v11915_v29 }
 0x6f0   :  { %3368 = vst.msk [vmem:[%s14238_s5 + $0x40] sm:$0xff] %vm14583_vm2, %v11913_v27  ;;  %v11943_v49 = vmul.f32 %v11921_v54, %v11913_v27  ;;  %v11947_v2 = vmul.f32 %v11894_v61, %v11915_v29  ;;  %v3614_v37 = vmul.f32 %v11913_v27, %v11913_v27  ;;  %vm14588_vm2 = vmmov %vm14580_vm0 }
 0x6f1   :  { %3361 = vst.msk [vmem:[%s14238_s5 + $0x8] sm:$0xff] %vm14584_vm12, %v11915_v29  ;;  %v11949_v30 = vadd.f32 %v3237_v24, %v3170_v53  ;;  %v11952_v19 = vadd.f32 %v11826_v47, %v3177_v34  ;;  %vm14587_vm12 = vmmov %vm14580_vm0  ;;  %v9464_v47 = vld [vmem:[%s14234_s1 + $0x80] sm:$0xff]  ;;  %v9465_v53 = vld [vmem:[%s14234_s1 + $0x50] sm:$0xff] }
 0x6f2   :  { %v3105_v28 = vpop.permute.xlu0 %3104  ;;  %v3641_v31 = vsel %vm14587_vm12, %v3607_v4, 0.0  ;;  %v3093_v33 = vpop.permute.xlu1 %3092  ;;  %vm14591_vm12 = vmmov %vm14580_vm0 }
 0x6f3   :  { %14585 = vst [vmem:[#allocation7_spill] sm:$0xff] %v11949_v30  ;;  %14586 = vst [vmem:[#allocation68_spill] sm:$0xff] %v11952_v19  ;;  %v3184_v24 = vmul.f32 %v9464_v47, %v3105_v28  ;;  %3642 = vadd.xlane.f32.xlu0 %v3641_v31  ;;  %v3178_v35 = vmul.f32 %v9465_v53, %v3093_v33  ;;  %v3608_v34 = vmul.f32 %v11949_v30, %v11949_v30 }
 0x6f4   :  { %3362 = vst.msk [vmem:[%s14238_s5 + $0x10] sm:$0xff] %vm14588_vm2, %v11949_v30  ;;  %v11977_v4 = vmul.f32 %v11894_v61, %v11949_v30  ;;  %v11981_v27 = vmul.f32 %v11921_v54, %v11952_v19  ;;  %vm14592_vm2 = vmmov %vm14580_vm0  ;;  %v3615_v29 = vmul.f32 %v11952_v19, %v11952_v19  ;;  %v11996_v30 = vsel %vm3469_vm10, %v11581_v36, %v11596_v7  ;;  %v9467_v36 = vld [vmem:[%s14234_s1 + $0x88] sm:$0xff] }
 0x6f5   :  { %3369 = vst.msk [vmem:[%s14238_s5 + $0x48] sm:$0xff] %vm14580_vm0, %v11952_v19  ;;  %v11984_v52 = vadd.f32 %v11833_v26, %v3184_v24  ;;  %v11987_v28 = vadd.f32 %v11831_v23, %v3178_v35  ;;  %v3644_v33 = vsel %vm14591_vm12, %v3608_v34, 0.0  ;;  %v3662_v47 = vsel %vm14592_vm2, %v3614_v37, 0.0  ;;  %v9466_v23 = vld [vmem:[%s14234_s1 + $0x18] sm:$0xff]  ;;  %vm14597_vm12 = vmmov %vm14580_vm0 }
 0x6f6   :  { %v3079_v31 = vpop.permute.xlu0 %3078  ;;  %v3107_v53 = vpop.permute.xlu1 %3106  ;;  %3645 = vadd.xlane.f32.xlu1 %v3644_v33  ;;  %vm14598_vm2 = vmmov %vm14580_vm0 }
 0x6f7   :  { %14589 = vst [vmem:[#allocation69_spill] sm:$0xff] %v11984_v52  ;;  %14590 = vst [vmem:[#allocation70_spill] sm:$0xff] %v11987_v28  ;;  %v3171_v26 = vmul.f32 %v9466_v23, %v3079_v31  ;;  %3663 = vadd.xlane.f32.xlu0 %v3662_v47  ;;  %v3185_v7 = vmul.f32 %v9467_v36, %v3107_v53  ;;  %v3622_v37 = vmul.f32 %v11984_v52, %v11984_v52 }
 0x6f8   :  { %3376 = vst.msk [vmem:[%s14238_s5 + $0x80] sm:$0xff] %vm14580_vm0, %v11984_v52  ;;  %v12018_v24 = vmul.f32 %v11996_v30, %v11984_v52  ;;  %v12022_v35 = vmul.f32 %v11921_v54, %v11987_v28  ;;  %v3665_v53 = vsel %vm14597_vm12, %v3615_v29, 0.0  ;;  %v3616_v36 = vmul.f32 %v11987_v28, %v11987_v28  ;;  %v9468_v29 = vld [vmem:[%s14234_s1 + $0x90] sm:$0xff]  ;;  %vm14602_vm12 = vmmov %vm14580_vm0 }
 0x6f9   :  { %3370 = vst.msk [vmem:[%s14238_s5 + $0x50] sm:$0xff] %vm14593_vm13, %v11987_v28  ;;  %v12025_v34 = vadd.f32 %v11838_v10, %v3171_v26  ;;  %v12028_v31 = vadd.f32 %v11836_v58, %v3185_v7  ;;  %vm14596_vm13 = vmmov %vm14580_vm0  ;;  %v9469_v10 = vld [vmem:[%s14234_s1 + $0x58] sm:$0xff]  ;;  %v12109_v28 = vsel %vm3469_vm10, %v11583_v5, %v11601_v41  ;;  %v9473_v5 = vld [vmem:[%s14234_s1 + $0x20] sm:$0xff] }
 0x6fa   :  { %v3109_v33 = vpop.permute.xlu0 %3108  ;;  %v3686_v47 = vsel %vm14596_vm13, %v3622_v37, 0.0  ;;  %v3095_v23 = vpop.permute.xlu1 %3094  ;;  %vm14601_vm13 = vmmov %vm14580_vm0 }
 0x6fb   :  { %14594 = vst [vmem:[#allocation71_spill] sm:$0xff] %v12025_v34  ;;  %14595 = vst [vmem:[#allocation72_spill] sm:$0xff] %v12028_v31  ;;  %v3186_v58 = vmul.f32 %v9468_v29, %v3109_v33  ;;  %3687 = vadd.xlane.f32.xlu1 %v3686_v47  ;;  %3666 = vadd.xlane.f32.xlu0 %v3665_v53  ;;  %v3179_v26 = vmul.f32 %v9469_v10, %v3095_v23  ;;  %v3668_v29 = vsel %vm14602_vm12, %v3616_v36, 0.0  ;;  %v9471_v36 = vld [vmem:[%s14234_s1 + $0xc0] sm:$0xff] }
 0x6fc   :  { %3363 = vst.msk [vmem:[%s14238_s5 + $0x18] sm:$0xff] %vm14598_vm2, %v12025_v34  ;;  %v3609_v7 = vmul.f32 %v12025_v34, %v12025_v34  ;;  %v12054_v37 = vmul.f32 %v11894_v61, %v12025_v34  ;;  %v12058_v52 = vmul.f32 %v11996_v30, %v12028_v31  ;;  %v3623_v19 = vmul.f32 %v12028_v31, %v12028_v31  ;;  %vm14603_vm2 = vmmov %vm14580_vm0 }
 0x6fd   :  { %3377 = vst.msk [vmem:[%s14238_s5 + $0x88] sm:$0xff] %vm14580_vm0, %v12028_v31  ;;  %v12061_v33 = vadd.f32 %v11842_v0, %v3186_v58  ;;  %v12064_v47 = vadd.f32 %v11840_v21, %v3179_v26  ;;  %v9470_v21 = vld [vmem:[%s14234_s1 + $0xc8] sm:$0xff]  ;;  %vm14607_vm12 = vmmov %vm14580_vm0 }
 0x6fe   :  { %v3123_v53 = vpop.permute.xlu0 %3122  ;;  %v3647_v23 = vsel %vm14601_vm13, %v3609_v7, 0.0  ;;  %v3121_v10 = vpop.permute.xlu1 %3120  ;;  %vm14606_vm13 = vmmov %vm14580_vm0 }
 0x6ff   :  { %14599 = vst [vmem:[#allocation73_spill] sm:$0xff] %v12061_v33  ;;  %14600 = vst [vmem:[#allocation74_spill] sm:$0xff] %v12064_v47  ;;  %v3193_v0 = vmul.f32 %v9470_v21, %v3123_v53  ;;  %3648 = vadd.xlane.f32.xlu1 %v3647_v23  ;;  %3669 = vadd.xlane.f32.xlu0 %v3668_v29  ;;  %v3192_v58 = vmul.f32 %v9471_v36, %v3121_v10  ;;  %v3689_v21 = vsel %vm14607_vm12, %v3623_v19, 0.0 }
 0x700   :  { %3378 = vst.msk [vmem:[%s14238_s5 + $0x90] sm:$0xff] %vm14603_vm2, %v12061_v33  ;;  %v3624_v26 = vmul.f32 %v12061_v33, %v12061_v33  ;;  %v12090_v7 = vmul.f32 %v11996_v30, %v12061_v33  ;;  %v12094_v31 = vmul.f32 %v11921_v54, %v12064_v47  ;;  %v3617_v33 = vmul.f32 %v12064_v47, %v12064_v47  ;;  %vm14608_vm2 = vmmov %vm14580_vm0 }
 0x701   :  { %3371 = vst.msk [vmem:[%s14238_s5 + $0x58] sm:$0xff] %vm14580_vm0, %v12064_v47  ;;  %v12097_v53 = vadd.f32 %v11846_v45, %v3193_v0  ;;  %v12100_v23 = vadd.f32 %v11844_v6, %v3192_v58  ;;  %v9472_v6 = vld [vmem:[%s14234_s1 + $0x60] sm:$0xff]  ;;  %vm14610_vm10 = vmmov %vm14580_vm0 }
 0x702   :  { %v3097_v29 = vpop.permute.xlu0 %3096  ;;  %v3692_v10 = vsel %vm14606_vm13, %v3624_v26, 0.0  ;;  %v3081_v36 = vpop.permute.xlu1 %3080  ;;  %vm14611_vm13 = vmmov %vm14580_vm0 }
 0x703   :  { %14604 = vst [vmem:[#allocation75_spill] sm:$0xff] %v12097_v53  ;;  %14605 = vst [vmem:[#allocation76_spill] sm:$0xff] %v12100_v23  ;;  %v3180_v45 = vmul.f32 %v9472_v6, %v3097_v29  ;;  %3693 = vadd.xlane.f32.xlu1 %v3692_v10  ;;  %3690 = vadd.xlane.f32.xlu0 %v3689_v21  ;;  %v3172_v41 = vmul.f32 %v9473_v5, %v3081_v36  ;;  %v3671_v36 = vsel %vm14611_vm13, %v3617_v33, 0.0  ;;  %v9475_v33 = vld [vmem:[%s14234_s1 + $0x98] sm:$0xff] }
 0x704   :  { %3385 = vst.msk [vmem:[%s14238_s5 + $0xc8] sm:$0xff] %vm14608_vm2, %v12097_v53  ;;  %v3631_v19 = vmul.f32 %v12097_v53, %v12097_v53  ;;  %v12131_v0 = vmul.f32 %v12109_v28, %v12097_v53  ;;  %v12135_v58 = vmul.f32 %v12109_v28, %v12100_v23  ;;  %v3630_v5 = vmul.f32 %v12100_v23, %v12100_v23  ;;  %vm14612_vm12 = vmmov %vm14580_vm0 }
 0x705   :  { %3384 = vst.msk [vmem:[%s14238_s5 + $0xc0] sm:$0xff] %vm14580_vm0, %v12100_v23  ;;  %v12138_v26 = vadd.f32 %v11850_v48, %v3180_v45  ;;  %v12141_v29 = vadd.f32 %v11848_v51, %v3172_v41  ;;  %vm14613_vm2 = vmmov %vm14580_vm0  ;;  %v9474_v51 = vld [vmem:[%s14234_s1 + $0xd0] sm:$0xff] }
 0x706   :  { %v3125_v10 = vpop.permute.xlu0 %3124  ;;  %v3713_v21 = vsel %vm14610_vm10, %v3631_v19, 0.0  ;;  %v3111_v6 = vpop.permute.xlu1 %3110  ;;  %vm14616_vm10 = vmmov %vm14580_vm0 }
 0x707   :  { %14609 = vst [vmem:[#allocation77_spill] sm:$0xff] %v12138_v26  ;;  %3372 = vst.msk [vmem:[%s14238_s5 + $0x60] sm:$0xff] %vm14612_vm12, %v12138_v26  ;;  %v3194_v48 = vmul.f32 %v9474_v51, %v3125_v10  ;;  %3714 = vadd.xlane.f32.xlu1 %v3713_v21  ;;  %3672 = vadd.xlane.f32.xlu0 %v3671_v36  ;;  %v3187_v45 = vmul.f32 %v9475_v33, %v3111_v6  ;;  %v3710_v51 = vsel %vm14616_vm10, %v3630_v5, 0.0  ;;  %v9477_v5 = vld [vmem:[%s14234_s1 + $0x28] sm:$0xff] }
 0x708   :  { %3364 = vst.msk [vmem:[%s14238_s5 + $0x20] sm:$0xff] %vm14613_vm2, %v12141_v29  ;;  %v3618_v41 = vmul.f32 %v12138_v26, %v12138_v26  ;;  %v12167_v19 = vmul.f32 %v11921_v54, %v12138_v26  ;;  %v12171_v23 = vmul.f32 %v11894_v61, %v12141_v29  ;;  %v3610_v53 = vmul.f32 %v12141_v29, %v12141_v29  ;;  %vm14617_vm13 = vmmov %vm14580_vm0 }
 0x709   :  { %v12174_v10 = vadd.f32 %v11854_v3, %v3194_v48  ;;  %v12177_v21 = vadd.f32 %v11852_v40, %v3187_v45  ;;  %vm14618_vm12 = vmmov %vm14580_vm0  ;;  %v9476_v40 = vld [vmem:[%s14234_s1 + $0x68] sm:$0xff] }
 0x70a   :  { %v3099_v36 = vpop.permute.xlu0 %3098  ;;  %v3674_v6 = vsel %vm14580_vm0, %v3618_v41, 0.0  ;;  %v3083_v33 = vpop.permute.xlu1 %3082  ;;  %vm14620_vm2 = vmmov %vm14580_vm0 }
 0x70b   :  { %14614 = vst [vmem:[#allocation78_spill] sm:$0xff] %v12174_v10  ;;  %14615 = vst [vmem:[#allocation79_spill] sm:$0xff] %v12177_v21  ;;  %v3181_v3 = vmul.f32 %v9476_v40, %v3099_v36  ;;  %3675 = vadd.xlane.f32.xlu1 %v3674_v6  ;;  %3711 = vadd.xlane.f32.xlu0 %v3710_v51  ;;  %v3173_v48 = vmul.f32 %v9477_v5, %v3083_v33  ;;  %v3650_v40 = vsel %vm14580_vm0, %v3610_v53, 0.0  ;;  %v9479_v53 = vld [vmem:[%s14234_s1 + $0xa0] sm:$0xff] }
 0x70c   :  { %3386 = vst.msk [vmem:[%s14238_s5 + $0xd0] sm:$0xff] %vm14617_vm13, %v12174_v10  ;;  %v3632_v45 = vmul.f32 %v12174_v10, %v12174_v10  ;;  %v12203_v41 = vmul.f32 %v12109_v28, %v12174_v10  ;;  %v12207_v47 = vmul.f32 %v11996_v30, %v12177_v21  ;;  %v3625_v10 = vmul.f32 %v12177_v21, %v12177_v21  ;;  %vm14621_vm10 = vmmov %vm14580_vm0 }
 0x70d   :  { %3379 = vst.msk [vmem:[%s14238_s5 + $0x98] sm:$0xff] %vm14618_vm12, %v12177_v21  ;;  %v12210_v36 = vadd.f32 %v11858_v20, %v3181_v3  ;;  %v12213_v6 = vadd.f32 %v11856_v59, %v3173_v48  ;;  %vm14622_vm13 = vmmov %vm14580_vm0  ;;  %v9478_v59 = vld [vmem:[%s14234_s1 + $0xd8] sm:$0xff] }
 0x70e   :  { %v3127_v51 = vpop.permute.xlu0 %3126  ;;  %v3716_v33 = vsel %vm14620_vm2, %v3632_v45, 0.0  ;;  %v3113_v5 = vpop.permute.xlu1 %3112  ;;  %vm14625_vm12 = vmmov %vm14580_vm0 }
 0x70f   :  { %14619 = vst [vmem:[#allocation80_spill] sm:$0xff] %v12210_v36  ;;  %3373 = vst.msk [vmem:[%s14238_s5 + $0x68] sm:$0xff] %vm14621_vm10, %v12210_v36  ;;  %v3195_v20 = vmul.f32 %v9478_v59, %v3127_v51  ;;  %3717 = vadd.xlane.f32.xlu1 %v3716_v33  ;;  %3651 = vadd.xlane.f32.xlu0 %v3650_v40  ;;  %v3188_v3 = vmul.f32 %v9479_v53, %v3113_v5 }
 0x710   :  { %3365 = vst.msk [vmem:[%s14238_s5 + $0x28] sm:$0xff] %vm14622_vm13, %v12213_v6  ;;  %v3619_v48 = vmul.f32 %v12210_v36, %v12210_v36  ;;  %v12239_v45 = vmul.f32 %v11921_v54, %v12210_v36  ;;  %v12243_v21 = vmul.f32 %v11894_v61, %v12213_v6  ;;  %vm14626_vm2 = vmmov %vm14580_vm0  ;;  %v3611_v26 = vmul.f32 %v12213_v6, %v12213_v6 }
 0x711   :  { %v12246_v51 = vadd.f32 %v11862_v14, %v3195_v20  ;;  %v12249_v33 = vadd.f32 %v11860_v63, %v3188_v3  ;;  %v3695_v59 = vsel %vm14626_vm2, %v3625_v10, 0.0  ;;  %vm14627_vm10 = vmmov %vm14580_vm0  ;;  %v9480_v63 = vld [vmem:[%s14234_s1 + $0x30] sm:$0xff] }
 0x712   :  { %v3085_v40 = vpop.permute.xlu0 %3084  ;;  %v3677_v5 = vsel %vm14625_vm12, %v3619_v48, 0.0  ;;  %v3101_v53 = vpop.permute.xlu1 %3100  ;;  %v9481_v10 = vld [vmem:[%s14234_s1 + $0x70] sm:$0xff]  ;;  %vm14629_vm13 = vmmov %vm14580_vm0 }
 0x713   :  { %14623 = vst [vmem:[#allocation81_spill] sm:$0xff] %v12246_v51  ;;  %14624 = vst [vmem:[#allocation82_spill] sm:$0xff] %v12249_v33  ;;  %v3174_v14 = vmul.f32 %v9480_v63, %v3085_v40  ;;  %3678 = vadd.xlane.f32.xlu1 %v3677_v5  ;;  %3696 = vadd.xlane.f32.xlu0 %v3695_v59  ;;  %v3182_v20 = vmul.f32 %v9481_v10, %v3101_v53 }
 0x714   :  { %3387 = vst.msk [vmem:[%s14238_s5 + $0xd8] sm:$0xff] %vm14580_vm0, %v12246_v51  ;;  %v3633_v3 = vmul.f32 %v12246_v51, %v12246_v51  ;;  %v12275_v48 = vmul.f32 %v12109_v28, %v12246_v51  ;;  %v12279_v36 = vmul.f32 %v11996_v30, %v12249_v33  ;;  %vm14630_vm12 = vmmov %vm14580_vm0  ;;  %v3626_v51 = vmul.f32 %v12249_v33, %v12249_v33 }
 0x715   :  { %3380 = vst.msk [vmem:[%s14238_s5 + $0xa0] sm:$0xff] %vm14627_vm10, %v12249_v33  ;;  %v12282_v40 = vadd.f32 %v11864_v16, %v3174_v14  ;;  %v12285_v5 = vadd.f32 %v11866_v60, %v3182_v20  ;;  %v3653_v63 = vsel %vm14630_vm12, %v3611_v26, 0.0  ;;  %vm14631_vm2 = vmmov %vm14580_vm0  ;;  %v9482_v16 = vld [vmem:[%s14234_s1 + $0xa8] sm:$0xff]  ;;  %v9483_v26 = vld [vmem:[%s14234_s1 + $0xe0] sm:$0xff] }
 0x716   :  { %v3115_v59 = vpop.permute.xlu0 %3114  ;;  %v3719_v53 = vsel %vm14629_vm13, %v3633_v3, 0.0  ;;  %v3129_v10 = vpop.permute.xlu1 %3128  ;;  %vm14634_vm10 = vmmov %vm14580_vm0 }
 0x717   :  { %14628 = vst [vmem:[#allocation83_spill] sm:$0xff] %v12285_v5  ;;  %3366 = vst.msk [vmem:[%s14238_s5 + $0x30] sm:$0xff] %vm14631_vm2, %v12282_v40  ;;  %v3189_v60 = vmul.f32 %v9482_v16, %v3115_v59  ;;  %3720 = vadd.xlane.f32.xlu1 %v3719_v53  ;;  %3654 = vadd.xlane.f32.xlu0 %v3653_v63  ;;  %v3196_v14 = vmul.f32 %v9483_v26, %v3129_v10  ;;  %v3698_v10 = vsel %vm14634_vm10, %v3626_v51, 0.0  ;;  %v9485_v51 = vld [vmem:[%s14234_s1 + $0x78] sm:$0xff] }
 0x718   :  { %3374 = vst.msk [vmem:[%s14238_s5 + $0x70] sm:$0xff] %vm14580_vm0, %v12285_v5  ;;  %v3620_v20 = vmul.f32 %v12285_v5, %v12285_v5  ;;  %v12311_v3 = vmul.f32 %v11921_v54, %v12285_v5  ;;  %v12315_v33 = vmul.f32 %v11894_v61, %v12282_v40  ;;  %vm14635_vm13 = vmmov %vm14580_vm0  ;;  %v3612_v5 = vmul.f32 %v12282_v40, %v12282_v40 }
 0x719   :  { %v12318_v59 = vadd.f32 %v11868_v46, %v3189_v60  ;;  %v12321_v53 = vadd.f32 %v11870_v13, %v3196_v14  ;;  %vm14636_vm12 = vmmov %vm14580_vm0  ;;  %v9484_v46 = vld [vmem:[%s14234_s1 + $0x38] sm:$0xff] }
 0x71a   :  { %v3087_v63 = vpop.permute.xlu0 %3086  ;;  %v3680_v16 = vsel %vm14635_vm13, %v3620_v20, 0.0  ;;  %v3103_v26 = vpop.permute.xlu1 %3102  ;;  %vm14637_vm2 = vmmov %vm14580_vm0 }
 0x71b   :  { %14632 = vst [vmem:[#allocation84_spill] sm:$0xff] %v12318_v59  ;;  %14633 = vst [vmem:[#allocation85_spill] sm:$0xff] %v12321_v53  ;;  %v3175_v13 = vmul.f32 %v9484_v46, %v3087_v63  ;;  %3699 = vadd.xlane.f32.xlu0 %v3698_v10  ;;  %3681 = vadd.xlane.f32.xlu1 %v3680_v16  ;;  %v3183_v60 = vmul.f32 %v9485_v51, %v3103_v26  ;;  %v3656_v26 = vsel %vm14580_vm0, %v3612_v5, 0.0  ;;  %v9487_v5 = vld [vmem:[%s14234_s1 + $0xe8] sm:$0xff] }
 0x71c   :  { %3381 = vst.msk [vmem:[%s14238_s5 + $0xa8] sm:$0xff] %vm14636_vm12, %v12318_v59  ;;  %v3634_v14 = vmul.f32 %v12321_v53, %v12321_v53  ;;  %v12347_v20 = vmul.f32 %v12109_v28, %v12321_v53  ;;  %v12351_v34 = vmul.f32 %v11996_v30, %v12318_v59  ;;  %vm14639_vm10 = vmmov %vm14580_vm0 }
 0x71d   :  { %3388 = vst.msk [vmem:[%s14238_s5 + $0xe0] sm:$0xff] %vm14637_vm2, %v12321_v53  ;;  %v12354_v63 = vadd.f32 %v11874_v9, %v3175_v13  ;;  %v12357_v10 = vadd.f32 %v11872_v17, %v3183_v60  ;;  %v3627_v53 = vmul.f32 %v12318_v59, %v12318_v59  ;;  %vm14640_vm13 = vmmov %vm14580_vm0  ;;  %v9486_v17 = vld [vmem:[%s14234_s1 + $0xb0] sm:$0xff] }
 0x71e   :  { %v3117_v16 = vpop.permute.xlu0 %3116  ;;  %v3722_v46 = vsel %vm14639_vm10, %v3634_v14, 0.0  ;;  %v3131_v51 = vpop.permute.xlu1 %3130  ;;  %vm14641_vm12 = vmmov %vm14580_vm0 }
 0x71f   :  { %14638 = vst [vmem:[#allocation86_spill] sm:$0xff] %v12357_v10  ;;  %3367 = vst.msk [vmem:[%s14238_s5 + $0x38] sm:$0xff] %vm14640_vm13, %v12354_v63  ;;  %v3190_v9 = vmul.f32 %v9486_v17, %v3117_v16  ;;  %3657 = vadd.xlane.f32.xlu0 %v3656_v26  ;;  %3723 = vadd.xlane.f32.xlu1 %v3722_v46  ;;  %v3197_v13 = vmul.f32 %v9487_v5, %v3131_v51 }
 0x720   :  { %3375 = vst.msk [vmem:[%s14238_s5 + $0x78] sm:$0xff] %vm14641_vm12, %v12357_v10  ;;  %v3621_v60 = vmul.f32 %v12357_v10, %v12357_v10  ;;  %v12383_v14 = vmul.f32 %v11921_v54, %v12357_v10  ;;  %v12387_v59 = vmul.f32 %v11894_v61, %v12354_v63  ;;  %vm14644_vm2 = vmmov %vm14580_vm0  ;;  %v3613_v54 = vmul.f32 %v12354_v63, %v12354_v63  ;;  %v9488_v61 = vld [vmem:[%s14234_s1 + $0xb8] sm:$0xff] }
 0x721   :  { %v12390_v16 = vadd.f32 %v11878_v62, %v3190_v9  ;;  %v12393_v26 = vadd.f32 %v11876_v39, %v3197_v13  ;;  %v3701_v51 = vsel %vm14644_vm2, %v3627_v53, 0.0  ;;  %vm14645_vm10 = vmmov %vm14580_vm0  ;;  %v9489_v62 = vld [vmem:[%s14234_s1 + $0xf0] sm:$0xff] }
 0x722   :  { %v3119_v46 = vpop.permute.xlu0 %3118  ;;  %v3683_v17 = vsel %vm14580_vm0, %v3621_v60, 0.0  ;;  %v3133_v5 = vpop.permute.xlu1 %3132  ;;  %vm14646_vm13 = vmmov %vm14580_vm0 }
 0x723   :  { %14642 = vst [vmem:[#allocation87_spill] sm:$0xff] %v12390_v16  ;;  %14643 = vst [vmem:[#allocation88_spill] sm:$0xff] %v12393_v26  ;;  %v3191_v39 = vmul.f32 %v9488_v61, %v3119_v46  ;;  %3702 = vadd.xlane.f32.xlu0 %v3701_v51  ;;  %3684 = vadd.xlane.f32.xlu1 %v3683_v17  ;;  %v3198_v53 = vmul.f32 %v9489_v62, %v3133_v5 }
 0x724   :  { %3382 = vst.msk [vmem:[%s14238_s5 + $0xb0] sm:$0xff] %vm14645_vm10, %v12390_v16  ;;  %v3635_v9 = vmul.f32 %v12393_v26, %v12393_v26  ;;  %v12419_v13 = vmul.f32 %v12109_v28, %v12393_v26  ;;  %v12423_v60 = vmul.f32 %v11996_v30, %v12390_v16  ;;  %vm14649_vm12 = vmmov %vm14580_vm0  ;;  %v3628_v62 = vmul.f32 %v12390_v16, %v12390_v16 }
 0x725   :  { %3389 = vst.msk [vmem:[%s14238_s5 + $0xe8] sm:$0xff] %vm14646_vm13, %v12393_v26  ;;  %v12426_v46 = vadd.f32 %v11882_v11, %v3191_v39  ;;  %v12429_v51 = vadd.f32 %v11880_v57, %v3198_v53  ;;  %v3659_v5 = vsel %vm14649_vm12, %v3613_v54, 0.0  ;;  %vm14650_vm2 = vmmov %vm14580_vm0  ;;  %v9490_v57 = vld [vmem:[%s14234_s1 + $0xf8] sm:$0xff] }
 0x726   :  { %v3135_v17 = vpop.permute.xlu0 %3134  ;;  %v3725_v61 = vsel %vm14650_vm2, %v3635_v9, 0.0  ;;  %vm14651_vm10 = vmmov %vm14580_vm0 }
 0x727   :  { %14647 = vst [vmem:[#allocation89_spill] sm:$0xff] %v12426_v46  ;;  %14648 = vst [vmem:[#allocation90_spill] sm:$0xff] %v12429_v51  ;;  %v3199_v11 = vmul.f32 %v9490_v57, %v3135_v17  ;;  %3660 = vadd.xlane.f32.xlu0 %v3659_v5  ;;  %3726 = vadd.xlane.f32.xlu1 %v3725_v61  ;;  %v3636_v54 = vmul.f32 %v12429_v51, %v12429_v51 }
 0x728   :  { %3383 = vst.msk [vmem:[%s14238_s5 + $0xb8] sm:$0xff] %vm14580_vm0, %v12426_v46  ;;  %v12452_v39 = vmul.f32 %v12109_v28, %v12429_v51  ;;  %v12456_v53 = vmul.f32 %v11996_v30, %v12426_v46  ;;  %vm14653_vm13 = vmmov %vm14580_vm0  ;;  %v3629_v5 = vmul.f32 %v12426_v46, %v12426_v46 }
 0x729   :  { %3390 = vst.msk [vmem:[%s14238_s5 + $0xf0] sm:$0xff] %vm14651_vm10, %v12429_v51  ;;  %v12459_v9 = vadd.f32 %v11884_v50, %v3199_v11  ;;  %v3728_v26 = vsel %vm14653_vm13, %v3636_v54, 0.0  ;;  %vm14654_vm12 = vmmov %vm14580_vm0  ;;  %v3558_v54 = vsel %vm14661_vm14, %v12018_v24, 0.0 }
 0x72a   :  { %v3704_v17 = vsel %vm14654_vm12, %v3628_v62, 0.0  ;;  %vm14655_vm2 = vmmov %vm14580_vm0  ;;  %v3707_v50 = vsel %vm14580_vm0, %v3629_v5, 0.0 }
 0x72b   :  { %14652 = vst [vmem:[#allocation91_spill] sm:$0xff] %v12459_v9  ;;  %3391 = vst.msk [vmem:[%s14238_s5 + $0xf8] sm:$0xff] %vm14655_vm2, %v12459_v9  ;;  %3705 = vadd.xlane.f32.xlu0 %v3704_v17  ;;  %3729 = vadd.xlane.f32.xlu1 %v3728_v26  ;;  %v12472_v30 = vmul.f32 %v12109_v28, %v12459_v9  ;;  %v3637_v62 = vmul.f32 %v12459_v9, %v12459_v9  ;;  %v3516_v26 = vsel %vm14580_vm0, %v11977_v4, 0.0  ;;  %s9530_s5 = smov 120  }
 0x72c   :  { %vm14656_vm10 = vmmov %vm14580_vm0  ;;  %v3564_v4 = vsel %vm14580_vm0, %v12090_v7, 0.0  ;;  %v3588_v7 = vsel %vm14580_vm0, %v12203_v41, 0.0  ;;  %v3552_v41 = vsel %vm14580_vm0, %v12311_v3, 0.0  ;;  %v3597_v3 = vsel %vm14580_vm0, %v12419_v13, 0.0 }
 0x72d   :  { %v3510_v61 = vsel %vm14656_vm10, %v11911_v56, 0.0  ;;  %vm14657_vm13 = vmmov %vm14580_vm0 }
 0x72e   :  { %v3731_v57 = vsel %vm14657_vm13, %v3637_v62, 0.0  ;;  %vm14658_vm12 = vmmov %vm14580_vm0 }
 0x72f   :  { %3708 = vadd.xlane.f32.xlu0 %v3707_v50  ;;  %3511 = vadd.xlane.f32.xlu1 %v3510_v61  ;;  %v3534_v11 = vsel %vm14658_vm12, %v11943_v49, 0.0  ;;  %vm14659_vm2 = vmmov %vm14580_vm0 }
 0x730   :  { %v3513_v28 = vsel %vm14659_vm2, %v11947_v2, 0.0  ;;  %vm14660_vm10 = vmmov %vm14580_vm0 }
 0x731   :  { %v3537_v56 = vsel %vm14660_vm10, %v11981_v27, 0.0  ;;  %vm14662_vm13 = vmmov %vm14580_vm0 }
 0x732   :  { %v3540_v49 = vsel %vm14662_vm13, %v12022_v35, 0.0  ;;  %vm14663_vm12 = vmmov %vm14580_vm0 }
 0x733   :  { %3732 = vadd.xlane.f32.xlu0 %v3731_v57  ;;  %3535 = vadd.xlane.f32.xlu1 %v3534_v11  ;;  %v3519_v17 = vsel %vm14663_vm12, %v12054_v37, 0.0  ;;  %vm14664_vm2 = vmmov %vm14580_vm0 }
 0x734   :  { %v3561_v2 = vsel %vm14664_vm2, %v12058_v52, 0.0  ;;  %vm14665_vm14 = vmmov %vm14580_vm0 }
 0x735   :  { %v3543_v27 = vsel %vm14665_vm14, %v12094_v31, 0.0  ;;  %vm14666_vm10 = vmmov %vm14580_vm0 }
 0x736   :  { %v3585_v24 = vsel %vm14666_vm10, %v12131_v0, 0.0  ;;  %vm14667_vm13 = vmmov %vm14580_vm0 }
 0x737   :  { %3514 = vadd.xlane.f32.xlu0 %v3513_v28  ;;  %3517 = vadd.xlane.f32.xlu1 %v3516_v26  ;;  %v3582_v35 = vsel %vm14667_vm13, %v12135_v58, 0.0  ;;  %vm14668_vm12 = vmmov %vm14580_vm0  ;;  %v9312_v28 = vpop.eup %9311 }
 0x738   :  { %v3546_v37 = vsel %vm14668_vm12, %v12167_v19, 0.0  ;;  %vm14669_vm2 = vmmov %vm14580_vm0 }
 0x739   :  { %v3522_v52 = vsel %vm14669_vm2, %v12171_v23, 0.0  ;;  %vm14670_vm14 = vmmov %vm14580_vm0 }
 0x73a   :  { %v3567_v31 = vsel %vm14670_vm14, %v12207_v47, 0.0  ;;  %vm14671_vm10 = vmmov %vm14580_vm0 }
 0x73b   :  { %3538 = vadd.xlane.f32.xlu0 %v3537_v56  ;;  %3559 = vadd.xlane.f32.xlu1 %v3558_v54  ;;  %v3549_v0 = vsel %vm14671_vm10, %v12239_v45, 0.0  ;;  %vm14672_vm13 = vmmov %vm14580_vm0 }
 0x73c   :  { %v3525_v58 = vsel %vm14672_vm13, %v12243_v21, 0.0  ;;  %vm14673_vm12 = vmmov %vm14580_vm0 }
 0x73d   :  { %v3591_v19 = vsel %vm14673_vm12, %v12275_v48, 0.0  ;;  %vm14674_vm2 = vmmov %vm14580_vm0 }
 0x73e   :  { %v3570_v23 = vsel %vm14674_vm2, %v12279_v36, 0.0  ;;  %vm14675_vm14 = vmmov %vm14580_vm0 }
 0x73f   :  { %3541 = vadd.xlane.f32.xlu0 %v3540_v49  ;;  %3520 = vadd.xlane.f32.xlu1 %v3519_v17  ;;  %v3528_v47 = vsel %vm14675_vm14, %v12315_v33, 0.0  ;;  %vm14676_vm10 = vmmov %vm14580_vm0  ;;  %v3971_v49 = vmul.f32 %v9312_v28, %v11585_v8 }
 0x740   :  { %v3594_v45 = vsel %vm14676_vm10, %v12347_v20, 0.0  ;;  %vm14677_vm13 = vmmov %vm14580_vm0 }
 0x741   :  { %v3573_v21 = vsel %vm14677_vm13, %v12351_v34, 0.0  ;;  %vm14678_vm12 = vmmov %vm14580_vm0 }
 0x742   :  { %v3555_v48 = vsel %vm14678_vm12, %v12383_v14, 0.0  ;;  %vm14679_vm2 = vmmov %vm14580_vm0 }
 0x743   :  { %3562 = vadd.xlane.f32.xlu0 %v3561_v2  ;;  %3565 = vadd.xlane.f32.xlu1 %v3564_v4  ;;  %v3531_v36 = vsel %vm14679_vm2, %v12387_v59, 0.0  ;;  %vm14680_vm14 = vmmov %vm14580_vm0  ;;  %vm3972_vm2 = vcmp.eq.f32.partialorder %v11585_v8, inf }
 0x744   :  { %v3576_v33 = vsel %vm14680_vm14, %v12423_v60, 0.0  ;;  %vm14681_vm10 = vmmov %vm14580_vm0  ;;  %vm3974_vm14 = vcmp.eq.f32.partialorder %v11585_v8, 0.0 }
 0x745   :  { %v3600_v20 = vsel %vm14681_vm10, %v12452_v39, 0.0  ;;  %vm14682_vm13 = vmmov %vm14580_vm0 }
 0x746   :  { %v3579_v34 = vsel %vm14682_vm13, %v12456_v53, 0.0  ;;  %vm14683_vm12 = vmmov %vm14580_vm0 }
 0x747   :  { %3544 = vadd.xlane.f32.xlu0 %v3543_v27  ;;  %3586 = vadd.xlane.f32.xlu1 %v3585_v24  ;;  %v3603_v59 = vsel %vm14683_vm12, %v12472_v30, 0.0  ;;  %v3973_v24 = vsel %vm3972_vm2, %v11585_v8, %v3971_v49 }
 0x74b   :  { %3583 = vadd.xlane.f32.xlu0 %v3582_v35  ;;  %3547 = vadd.xlane.f32.xlu1 %v3546_v37  ;;  %v3975_v35 = vand.u32 2147483648, %v11585_v8 }
 0x74f   :  { %3523 = vadd.xlane.f32.xlu0 %v3522_v52  ;;  %3589 = vadd.xlane.f32.xlu1 %v3588_v7 }
 0x753   :  { %3568 = vadd.xlane.f32.xlu0 %v3567_v31  ;;  %3550 = vadd.xlane.f32.xlu1 %v3549_v0  ;;  %v3976_v0 = vsel %vm3974_vm14, %v3975_v35, %v3973_v24 }
 0x757   :  { %3526 = vadd.xlane.f32.xlu0 %v3525_v58  ;;  %3592 = vadd.xlane.f32.xlu1 %v3591_v19 }
 0x75b   :  { %3571 = vadd.xlane.f32.xlu0 %v3570_v23  ;;  %3553 = vadd.xlane.f32.xlu1 %v3552_v41 }
 0x75f   :  { %3529 = vadd.xlane.f32.xlu0 %v3528_v47  ;;  %3595 = vadd.xlane.f32.xlu1 %v3594_v45  ;;  %v4009_v45 = vmax.f32 %v3976_v0, 1e-08 }
 0x761   :  { %v12623_v0 = vrot.slane %v4009_v45, %v10214_v15 }
 0x763   :  { %3574 = vadd.xlane.f32.xlu0 %v3573_v21  ;;  %3556 = vadd.xlane.f32.xlu1 %v3555_v48 }
 0x767   :  { %3532 = vadd.xlane.f32.xlu0 %v3531_v36  ;;  %3598 = vadd.xlane.f32.xlu1 %v3597_v3 }
 0x76b   :  { %3577 = vadd.xlane.f32.xlu0 %v3576_v33  ;;  %3601 = vadd.xlane.f32.xlu1 %v3600_v20 }
 0x76f   :  { %3580 = vadd.xlane.f32.xlu0 %v3579_v34  ;;  %v12599_v34 = vrot.slane %v4009_v45, %v14556_v22 }
 0x773   :  { %3604 = vadd.xlane.f32.xlu0 %v3603_v59 }
 0x777   :  { %v3640_v14 = vpop.xlane.xlu1 %3639 }
 0x778   :  { %9313 = vrsqrt.f32 %v3640_v14  ;;  %vm3736_vm0 = vcmp.eq.f32.partialorder %v3640_v14, inf  ;;  %v3739_v58 = vand.u32 2147483648, %v3640_v14  ;;  %vm3738_vm10 = vcmp.eq.f32.partialorder %v3640_v14, 0.0 }
 0x77c   :  { %v12542_v13 = vpop.xlane.xlu0 %3642 }
 0x77d   :  { %vm3743_vm12 = vcmp.eq.f32.partialorder %v12542_v13, inf  ;;  %v3746_v49 = vand.u32 2147483648, %v12542_v13 }
 0x77f   :  { %v12544_v50 = vpop.xlane.xlu1 %3645 }
 0x780   :  { %v3664_v5 = vpop.xlane.xlu0 %3663 }
 0x781   :  { %9315 = vrsqrt.f32 %v3664_v5  ;;  %vm3792_vm13 = vcmp.eq.f32.partialorder %v3664_v5, inf  ;;  %v3795_v36 = vand.u32 2147483648, %v3664_v5  ;;  %vm3794_vm2 = vcmp.eq.f32.partialorder %v3664_v5, 0.0 }
 0x782   :  { %9317 = vrsqrt.f32 %v12542_v13 }
 0x784   :  { %v12546_v60 = vpop.xlane.xlu0 %3666  ;;  %v12548_v61 = vpop.xlane.xlu1 %3687 }
 0x785   :  { %9319 = vrsqrt.f32 %v12546_v60  ;;  %v9314_v54 = vpop.eup %9313  ;;  %vm3799_vm14 = vcmp.eq.f32.partialorder %v12546_v60, inf }
 0x786   :  { %v3735_v4 = vmul.f32 %v9314_v54, %v3640_v14  ;;  %9321 = vrsqrt.f32 %v12544_v50 }
 0x788   :  { %v12551_v39 = vpop.xlane.xlu0 %3669  ;;  %v12553_v53 = vpop.xlane.xlu1 %3648  ;;  %v3737_v7 = vsel %vm3736_vm0, %v3640_v14, %v3735_v4  ;;  %vm3745_vm0 = vcmp.eq.f32.partialorder %v12542_v13, 0.0 }
 0x789   :  { %9323 = vrsqrt.f32 %v12551_v39  ;;  %v3740_v47 = vsel %vm3738_vm10, %v3739_v58, %v3737_v7  ;;  %v12617_v7 = vrot.slane %v4009_v45, %v14577_v18  ;;  %vm3750_vm10 = vcmp.eq.f32.partialorder %v12544_v50, inf }
 0x78a   :  { %9325 = vrsqrt.f32 %v12548_v61  ;;  %v3977_v3 = vmax.f32 %v3740_v47, 1e-08  ;;  %v3802_v58 = vand.u32 2147483648, %v12546_v60 }
 0x78c   :  { %v12555_v62 = vpop.xlane.xlu0 %3690  ;;  %v12557_v30 = vpop.xlane.xlu1 %3693  ;;  %v4031_v4 = vmul.f32 %v12599_v34, %v3977_v3  ;;  %v3809_v3 = vand.u32 2147483648, %v12551_v39 }
 0x78d   :  { %9327 = vrsqrt.f32 %v12555_v62 }
 0x78e   :  { %v9316_v27 = vpop.eup %9315  ;;  %9329 = vrsqrt.f32 %v12553_v53 }
 0x78f   :  { %v9318_v31 = vpop.eup %9317  ;;  %v3791_v19 = vmul.f32 %v9316_v27, %v3664_v5 }
 0x790   :  { %v12559_v57 = vpop.xlane.xlu0 %3672  ;;  %v12561_v11 = vpop.xlane.xlu1 %3714  ;;  %v3742_v21 = vmul.f32 %v9318_v31, %v12542_v13 }
 0x791   :  { %v3793_v48 = vsel %vm3792_vm13, %v3664_v5, %v3791_v19  ;;  %9331 = vrsqrt.f32 %v12559_v57  ;;  %v12606_v5 = vrot.slane %v4009_v45, %v14574_v44  ;;  %vm3752_vm13 = vcmp.eq.f32.partialorder %v12544_v50, 0.0 }
 0x792   :  { %v9320_v8 = vpop.eup %9319  ;;  %v3744_v59 = vsel %vm3743_vm12, %v12542_v13, %v3742_v21  ;;  %v3796_v28 = vsel %vm3794_vm2, %v3795_v36, %v3793_v48  ;;  %9333 = vrsqrt.f32 %v12557_v30  ;;  %v3753_v19 = vand.u32 2147483648, %v12544_v50 }
 0x793   :  { %v3798_v14 = vmul.f32 %v9320_v8, %v12546_v60  ;;  %v9322_v54 = vpop.eup %9321  ;;  %v3985_v24 = vmax.f32 %v3796_v28, 1e-08  ;;  %v3747_v35 = vsel %vm3745_vm0, %v3746_v49, %v3744_v59  ;;  %vm3801_vm12 = vcmp.eq.f32.partialorder %v12546_v60, 0.0 }
 0x794   :  { %v12564_v26 = vpop.xlane.xlu0 %3711  ;;  %v12566_v56 = vpop.xlane.xlu1 %3675  ;;  %v3749_v44 = vmul.f32 %v9322_v54, %v12544_v50  ;;  %v3978_v18 = vmax.f32 %v3747_v35, 1e-08  ;;  %vm3813_vm0 = vcmp.eq.f32.partialorder %v12559_v57, inf  ;;  %vm14686_vm2 = vcmp.eq.f32.partialorder %v12555_v62, inf }
 0x795   :  { %9335 = vrsqrt.f32 %v12564_v26  ;;  %v3800_v31 = vsel %vm3799_vm14, %v12546_v60, %v3798_v14  ;;  %v4039_v45 = vmul.f32 %v12606_v5, %v3985_v24  ;;  %vm3808_vm14 = vcmp.eq.f32.partialorder %v12551_v39, 0.0 }
 0x796   :  { %9337 = vrsqrt.f32 %v12561_v11  ;;  %v9324_v13 = vpop.eup %9323  ;;  %v3803_v47 = vsel %vm3801_vm12, %v3802_v58, %v3800_v31  ;;  %v3751_v8 = vsel %vm3750_vm10, %v12544_v50, %v3749_v44  ;;  %v4032_v54 = vmul.f32 %v12599_v34, %v3978_v18 }
 0x797   :  { %9339 = vrcp.f32 %v4031_v4  ;;  %v3805_v36 = vmul.f32 %v9324_v13, %v12551_v39  ;;  %v9326_v60 = vpop.eup %9325  ;;  %v3986_v28 = vmax.f32 %v3803_v47, 1e-08  ;;  %v3858_v4 = vand.u32 2147483648, %v12555_v62 }
 0x798   :  { %v12570_v17 = vpop.xlane.xlu0 %3651  ;;  %v12572_v2 = vpop.xlane.xlu1 %3717  ;;  %9341 = vrsqrt.f32 %v12566_v56  ;;  %v3754_v44 = vsel %vm3752_vm13, %v3753_v19, %v3751_v8  ;;  %v3847_v13 = vmul.f32 %v9326_v60, %v12548_v61  ;;  %vm14684_vm12 = vcmp.eq.f32.partialorder %v12551_v39, inf }
 0x799   :  { %9343 = vrsqrt.f32 %v12570_v17  ;;  %v3807_v58 = vsel %vm14684_vm12, %v12551_v39, %v3805_v36  ;;  %v3816_v19 = vand.u32 2147483648, %v12559_v57  ;;  %v4040_v8 = vmul.f32 %v12606_v5, %v3986_v28 }
 0x79a   :  { %v9328_v14 = vpop.eup %9327  ;;  %9345 = vrsqrt.f32 %v12572_v2  ;;  %v3810_v36 = vsel %vm3808_vm14, %v3809_v3, %v3807_v58  ;;  %vm14685_vm13 = vcmp.eq.f32.partialorder %v12548_v61, inf  ;;  %vm3906_vm10 = vcmp.eq.f32.partialorder %v12564_v26, 0.0 }
 0x79b   :  { %v9330_v49 = vpop.eup %9329  ;;  %9347 = vrcp.f32 %v4039_v45  ;;  %v3854_v18 = vmul.f32 %v9328_v14, %v12555_v62  ;;  %v3979_v45 = vmax.f32 %v3754_v44, 1e-08  ;;  %v3907_v44 = vand.u32 2147483648, %v12564_v26 }
 0x79c   :  { %v12578_v37 = vpop.xlane.xlu0 %3696  ;;  %v12580_v52 = vpop.xlane.xlu1 %3678  ;;  %v3756_v60 = vmul.f32 %v9330_v49, %v12553_v53  ;;  %vm14690_vm14 = vcmp.eq.f32.partialorder %v12555_v62, 0.0  ;;  %v3921_v10 = vand.u32 2147483648, %v12572_v2  ;;  %vm14693_vm12 = vcmp.eq.f32.partialorder %v12564_v26, inf }
 0x79d   :  { %9349 = vrsqrt.f32 %v12578_v37  ;;  %v3856_v28 = vsel %vm14686_vm2, %v12555_v62, %v3854_v18  ;;  %v4033_v58 = vmul.f32 %v12599_v34, %v3979_v45  ;;  %vm14687_vm2 = vcmp.eq.f32.partialorder %v12553_v53, inf }
 0x79e   :  { %v9332_v31 = vpop.eup %9331  ;;  %9351 = vrcp.f32 %v4032_v54  ;;  %v3849_v54 = vsel %vm14685_vm13, %v12548_v61, %v3847_v13  ;;  %v14688_v13 = vand.u32 2147483648, %v12548_v61  ;;  %vm14689_vm13 = vcmp.eq.f32.partialorder %v12548_v61, 0.0 }
 0x79f   :  { %v9334_v50 = vpop.eup %9333  ;;  %v3812_v14 = vmul.f32 %v9332_v31, %v12559_v57  ;;  %9353 = vrsqrt.f32 %v12580_v52  ;;  %v3987_v31 = vmax.f32 %v3810_v36, 1e-08 }
 0x7a0   :  { %v12584_v23 = vpop.xlane.xlu0 %3654  ;;  %v12586_v41 = vpop.xlane.xlu1 %3720  ;;  %v3861_v49 = vmul.f32 %v9334_v50, %v12557_v30  ;;  %v3758_v50 = vsel %vm14687_vm2, %v12553_v53, %v3756_v60  ;;  %v3852_v45 = vsel %vm14689_vm13, %v14688_v13, %v3849_v54  ;;  %v12713_v60 = vsel %vm14690_vm14, %v3858_v4, %v3856_v28 }
 0x7a1   :  { %9355 = vrsqrt.f32 %v12586_v41  ;;  %v3814_v36 = vsel %vm3813_vm0, %v12559_v57, %v3812_v14  ;;  %v3767_v14 = vand.u32 2147483648, %v12570_v17  ;;  %vm14691_vm0 = vcmp.eq.f32.partialorder %v12557_v30, inf }
 0x7a2   :  { %v9336_v48 = vpop.eup %9335  ;;  %9357 = vrcp.f32 %v4040_v8  ;;  %v3863_v46 = vsel %vm14691_vm0, %v12557_v30, %v3861_v49  ;;  %vm14692_vm13 = vcmp.eq.f32.partialorder %v12559_v57, 0.0  ;;  %vm3766_vm14 = vcmp.eq.f32.partialorder %v12570_v17, 0.0 }
 0x7a3   :  { %v9338_v3 = vpop.eup %9337  ;;  %v3903_v39 = vmul.f32 %v9336_v48, %v12564_v26  ;;  %9359 = vrsqrt.f32 %v12584_v23  ;;  %v12725_v62 = vsel %vm14692_vm13, %v3816_v19, %v3814_v36  ;;  %v3993_v4 = vmax.f32 %v3852_v45, 1e-08 }
 0x7a4   :  { %v12594_v33 = vpop.xlane.xlu0 %3699  ;;  %v12596_v20 = vpop.xlane.xlu1 %3681  ;;  %v3910_v16 = vmul.f32 %v9338_v3, %v12561_v11  ;;  %v4041_v54 = vmul.f32 %v12606_v5, %v3987_v31  ;;  %v3994_v28 = vmax.f32 %v12713_v60, 1e-08  ;;  %v3872_v19 = vand.u32 2147483648, %v12578_v37 }
 0x7a5   :  { %v9340_v18 = vpop.eup %9339  ;;  %9361 = vrsqrt.f32 %v12596_v20  ;;  %vm14694_vm2 = vcmp.eq.f32.partialorder %v12561_v11, inf  ;;  %v3988_v45 = vmax.f32 %v12725_v62, 1e-08  ;;  %vm14695_vm0 = vcmp.eq.f32.partialorder %v12566_v56, inf }
 0x7a6   :  { %v9342_v8 = vpop.eup %9341  ;;  %9363 = vrcp.f32 %v4033_v58  ;;  %v3912_v58 = vsel %vm14694_vm2, %v12561_v11, %v3910_v16  ;;  %vm3925_vm2 = vcmp.eq.f32.partialorder %v12586_v41, inf  ;;  %v14712_v62 = vand.u32 2147483648, %v12586_v41 }
 0x7a7   :  { %v9344_v48 = vpop.eup %9343  ;;  %v3819_v57 = vmul.f32 %v9342_v8, %v12566_v56  ;;  %9365 = vrsqrt.f32 %v12594_v33  ;;  %vm14714_vm13 = vcmp.eq.f32.partialorder %v12596_v20, inf }
 0x7a8   :  { %v12612_v22 = vpop.xlane.xlu0 %3657  ;;  %v12614_v27 = vpop.xlane.xlu1 %3723 }
 0x7a9   :  { %v9346_v3 = vpop.eup %9345  ;;  %9367 = vrsqrt.f32 %v12614_v27  ;;  %v3821_v8 = vsel %vm14695_vm0, %v12566_v56, %v3819_v57  ;;  %vm14700_vm0 = vcmp.eq.f32.partialorder %v12570_v17, inf }
 0x7aa   :  { %v9348_v31 = vpop.eup %9347  ;;  %9369 = vrcp.f32 %v4041_v54 }
 0x7ab   :  { %9371 = vrsqrt.f32 %v12612_v22 }
 0x7ac   :  { %v12632_v21 = vpop.xlane.xlu0 %3702  ;;  %v12634_v15 = vpop.xlane.xlu1 %3684 }
 0x7ad   :  { %9373 = vrsqrt.f32 %v12634_v15 }
 0x7b0   :  { %v12652_v24 = vpop.xlane.xlu0 %3660  ;;  %v12654_v35 = vpop.xlane.xlu1 %3726 }
 0x7b4   :  { %v12675_v47 = vpop.xlane.xlu0 %3705  ;;  %v12677_v59 = vpop.xlane.xlu1 %3729 }
 0x7b8   :  { %v12705_v51 = vpop.xlane.xlu0 %3708  ;;  %v3512_v9 = vpop.xlane.xlu1 %3511 }
 0x7b9   :  { %v4064_v61 = vmul.f32 %v9340_v18, %v3512_v9  ;;  %v3905_v9 = vsel %vm14693_vm12, %v12564_v26, %v3903_v39  ;;  %v3763_v18 = vmul.f32 %v9344_v48, %v12570_v17  ;;  %v9350_v39 = vpop.eup %9349  ;;  %v4047_v48 = vmul.f32 %v12617_v7, %v3993_v4 }
 0x7ba   :  { %v9352_v36 = vpop.eup %9351  ;;  %v14698_v4 = vand.u32 2147483648, %v12557_v30  ;;  %vm14699_vm12 = vcmp.eq.f32.partialorder %v12557_v30, 0.0  ;;  %v3868_v57 = vmul.f32 %v9350_v39, %v12578_v37 }
 0x7bb   :  { %4165 = vperm.xlu1 %9149, %v4064_v61   ;;  %v12751_v61 = vsel %vm3906_vm10, %v3907_v44, %v3905_v9  ;;  %v14696_v9 = vand.u32 2147483648, %v12553_v53  ;;  %vm14697_vm10 = vcmp.eq.f32.partialorder %v12553_v53, 0.0  ;;  %v9354_v16 = vpop.eup %9353  ;;  %9375 = vrcp.f32 %v4047_v48 }
 0x7bc   :  { %v12738_v49 = vpop.xlane.xlu0 %3732  ;;  %v3536_v13 = vpop.xlane.xlu1 %3535  ;;  %v3866_v54 = vsel %vm14699_vm12, %v14698_v4, %v3863_v46  ;;  %vm14702_vm12 = vcmp.eq.f32.partialorder %v12578_v37, inf  ;;  %9377 = vrsqrt.f32 %v12654_v35 }
 0x7bd   :  { %v4080_v60 = vmul.f32 %v9348_v31, %v3536_v13  ;;  %v3917_v13 = vmul.f32 %v9346_v3, %v12572_v2  ;;  %v3761_v31 = vsel %vm14697_vm10, %v14696_v9, %v3758_v50  ;;  %v3765_v3 = vsel %vm14700_vm0, %v12570_v17, %v3763_v18  ;;  %v9356_v30 = vpop.eup %9355 }
 0x7be   :  { %v3995_v46 = vmax.f32 %v3866_v54, 1e-08  ;;  %v3980_v39 = vmax.f32 %v3761_v31, 1e-08  ;;  %v4048_v9 = vmul.f32 %v12617_v7, %v3994_v28  ;;  %v9358_v4 = vpop.eup %9357  ;;  %vm14701_vm10 = vcmp.eq.f32.partialorder %v12572_v2, inf }
 0x7bf   :  { %4189 = vperm.xlu1 %9149, %v4080_v60   ;;  %v3826_v54 = vmul.f32 %v9354_v16, %v12580_v52  ;;  %v3870_v31 = vsel %vm14702_vm12, %v12578_v37, %v3868_v57  ;;  %v3935_v50 = vand.u32 2147483648, %v12614_v27  ;;  %vm14705_vm12 = vcmp.eq.f32.partialorder %v12578_v37, 0.0 }
 0x7c0   :  { %v3515_v26 = vpop.xlane.xlu0 %3514  ;;  %v3518_v44 = vpop.xlane.xlu1 %3517  ;;  %v4049_v28 = vmul.f32 %v12617_v7, %v3995_v46  ;;  %v3781_v46 = vand.u32 2147483648, %v12612_v22  ;;  %vm14707_vm0 = vcmp.eq.f32.partialorder %v12566_v56, 0.0 }
 0x7c1   :  { %v4066_v53 = vmul.f32 %v9352_v36, %v3515_v26  ;;  %v12787_v36 = vsel %vm3766_vm14, %v3767_v14, %v3765_v3  ;;  %v3919_v26 = vsel %vm14701_vm10, %v12572_v2, %v3917_v13  ;;  %v14703_v14 = vand.u32 2147483648, %v12561_v11  ;;  %v9360_v13 = vpop.eup %9359 }
 0x7c2   :  { %vm14704_vm10 = vcmp.eq.f32.partialorder %v12561_v11, 0.0  ;;  %v3924_v3 = vmul.f32 %v9356_v30, %v12586_v41  ;;  %9379 = vrcp.f32 %v4049_v28  ;;  %v9362_v57 = vpop.eup %9361  ;;  %v3981_v18 = vmax.f32 %v12787_v36, 1e-08 }
 0x7c3   :  { %4168 = vperm.xlu0 %9150, %v4066_v53   ;;  %v3915_v16 = vsel %vm14704_vm10, %v14703_v14, %v3912_v58  ;;  %9381 = vrcp.f32 %v4048_v9  ;;  %v9364_v11 = vpop.eup %9363  ;;  %v12816_v58 = vsel %vm14705_vm12, %v3872_v19, %v3870_v31  ;;  %vm14708_vm14 = vcmp.eq.f32.partialorder %v12580_v52, inf }
 0x7c4   :  { %v3539_v53 = vpop.xlane.xlu0 %3538  ;;  %v12794_v48 = vpop.xlane.xlu1 %3559  ;;  %v4002_v60 = vmax.f32 %v3915_v16, 1e-08  ;;  %9383 = vrsqrt.f32 %v12632_v21  ;;  %v3828_v37 = vsel %vm14708_vm14, %v12580_v52, %v3826_v54  ;;  %vm3773_vm12 = vcmp.eq.f32.partialorder %v12584_v23, 0.0 }
 0x7c5   :  { %v4082_v17 = vmul.f32 %v9358_v4, %v3539_v53  ;;  %v4034_v4 = vmul.f32 %v12599_v34, %v3980_v39  ;;  %9385 = vrsqrt.f32 %v12677_v59  ;;  %v4068_v19 = vmul.f32 %v9364_v11, %v3518_v44  ;;  %v9366_v31 = vpop.eup %9365 }
 0x7c6   :  { %v4056_v28 = vmul.f32 %v12623_v0, %v4002_v60  ;;  %v3926_v60 = vsel %vm3925_vm2, %v12586_v41, %v3924_v3  ;;  %v9368_v54 = vpop.eup %9367  ;;  %v3770_v14 = vmul.f32 %v9360_v13, %v12584_v23  ;;  %v4042_v44 = vmul.f32 %v12606_v5, %v3988_v45 }
 0x7c7   :  { %4192 = vperm.xlu1 %9149, %v4082_v17   ;;  %v14706_v17 = vand.u32 2147483648, %v12566_v56  ;;  %v3833_v56 = vmul.f32 %v9362_v57, %v12596_v20  ;;  %v9370_v3 = vpop.eup %9369  ;;  %v3886_v57 = vand.u32 2147483648, %v12632_v21  ;;  %v14710_v13 = vand.u32 2147483648, %v12580_v52 }
 0x7c8   :  { %v3542_v30 = vpop.xlane.xlu0 %3541  ;;  %v12820_v53 = vpop.xlane.xlu1 %3520  ;;  %9387 = vrcp.f32 %v4056_v28  ;;  %vm14711_vm14 = vcmp.eq.f32.partialorder %v12580_v52, 0.0  ;;  %vm3878_vm2 = vcmp.eq.f32.partialorder %v12594_v33, 0.0  ;;  %v3931_v52 = vmul.f32 %v9368_v54, %v12614_v27 }
 0x7c9   :  { %v3824_v39 = vsel %vm14707_vm0, %v14706_v17, %v3821_v8  ;;  %vm14709_vm0 = vcmp.eq.f32.partialorder %v12572_v2, 0.0  ;;  %9389 = vrcp.f32 %v4034_v4  ;;  %v3831_v4 = vsel %vm14711_vm14, %v14710_v13, %v3828_v37  ;;  %v9372_v17 = vpop.eup %9371 }
 0x7ca   :  { %v3989_v9 = vmax.f32 %v3824_v39, 1e-08  ;;  %v3922_v8 = vsel %vm14709_vm0, %v3921_v10, %v3919_v26  ;;  %9391 = vrsqrt.f32 %v12652_v24  ;;  %vm14713_vm0 = vcmp.eq.f32.partialorder %v12586_v41, 0.0  ;;  %v9374_v41 = vpop.eup %9373 }
 0x7cb   :  { %4171 = vperm.xlu1 %9149, %v4068_v19   ;;  %v4003_v26 = vmax.f32 %v3922_v8, 1e-08  ;;  %v3929_v45 = vsel %vm14713_vm0, %v14712_v62, %v3926_v60  ;;  %v4084_v11 = vmul.f32 %v9370_v3, %v3542_v30  ;;  %v3990_v28 = vmax.f32 %v3831_v4, 1e-08 }
 0x7cc   :  { %v4043_v16 = vmul.f32 %v12606_v5, %v3989_v9  ;;  %v3563_v2 = vpop.xlane.xlu0 %3562  ;;  %v3566_v10 = vpop.xlane.xlu1 %3565  ;;  %v3996_v39 = vmax.f32 %v12816_v58, 1e-08  ;;  %v3835_v19 = vsel %vm14714_vm13, %v12596_v20, %v3833_v56  ;;  %vm14715_vm14 = vcmp.eq.f32.partialorder %v12584_v23, inf }
 0x7cd   :  { %v4057_v37 = vmul.f32 %v12623_v0, %v4003_v26  ;;  %v3772_v30 = vsel %vm14715_vm14, %v12584_v23, %v3770_v14  ;;  %v3875_v9 = vmul.f32 %v9366_v31, %v12594_v33  ;;  %v14716_v58 = vmax.f32 %v12751_v61, 1e-08  ;;  %v9376_v56 = vpop.eup %9375 }
 0x7ce   :  { %9393 = vrcp.f32 %v4043_v16  ;;  %v4004_v8 = vmax.f32 %v3929_v45, 1e-08  ;;  %vm3841_vm13 = vcmp.eq.f32.partialorder %v12634_v15, inf  ;;  %v4044_v3 = vmul.f32 %v12606_v5, %v3990_v28 }
 0x7cf   :  { %4195 = vperm.xlu1 %9149, %v4084_v11   ;;  %9395 = vrcp.f32 %v4042_v44  ;;  %v4055_v60 = vmul.f32 %v12623_v0, %v14716_v58  ;;  %v14717_v14 = vand.u32 2147483648, %v12596_v20  ;;  %vm14718_vm0 = vcmp.eq.f32.partialorder %v12596_v20, 0.0  ;;  %v9378_v44 = vpop.eup %9377 }
 0x7d0   :  { %v12874_v54 = vpop.xlane.xlu0 %3544  ;;  %v3587_v16 = vpop.xlane.xlu1 %3586  ;;  %9397 = vrcp.f32 %v4057_v37  ;;  %v4096_v61 = vmul.f32 %v9376_v56, %v12794_v48  ;;  %v14719_v26 = vand.u32 2147483648, %v12584_v23  ;;  %vm14720_vm10 = vcmp.eq.f32.partialorder %v12614_v27, inf }
 0x7d1   :  { %v3838_v31 = vsel %vm14718_vm0, %v14717_v14, %v3835_v19  ;;  %9399 = vrsqrt.f32 %v12675_v47  ;;  %v3933_v4 = vsel %vm14720_vm10, %v12614_v27, %v3931_v52  ;;  %v3840_v62 = vmul.f32 %v9374_v41, %v12634_v15  ;;  %v9380_v45 = vpop.eup %9379 }
 0x7d2   :  { %v3775_v13 = vsel %vm3773_vm12, %v14719_v26, %v3772_v30  ;;  %v3844_v20 = vand.u32 2147483648, %v12634_v15  ;;  %vm14721_vm0 = vcmp.eq.f32.partialorder %v12594_v33, inf  ;;  %v3777_v48 = vmul.f32 %v9372_v17, %v12612_v22  ;;  %v9382_v28 = vpop.eup %9381 }
 0x7d3   :  { %v3877_v11 = vsel %vm14721_vm0, %v12594_v33, %v3875_v9  ;;  %4213 = vperm.xlu1 %9149, %v4096_v61   ;;  %9401 = vrcp.f32 %v4055_v60  ;;  %v4035_v23 = vmul.f32 %v12599_v34, %v3981_v18  ;;  %v3991_v19 = vmax.f32 %v3838_v31, 1e-08  ;;  %v9384_v17 = vpop.eup %9383 }
 0x7d4   :  { %v4100_v52 = vmul.f32 %v9380_v45, %v3566_v10  ;;  %v12902_v37 = vpop.xlane.xlu0 %3583  ;;  %v3548_v41 = vpop.xlane.xlu1 %3547  ;;  %9403 = vrcp.f32 %v4044_v3  ;;  %v4058_v30 = vmul.f32 %v12623_v0, %v4004_v8  ;;  %v3982_v9 = vmax.f32 %v3775_v13, 1e-08 }
 0x7d5   :  { %vm14722_vm12 = vcmp.eq.f32.partialorder %v12614_v27, 0.0  ;;  %9405 = vrsqrt.f32 %v12705_v51  ;;  %v4098_v18 = vmul.f32 %v9382_v28, %v3563_v2  ;;  %v9386_v58 = vpop.eup %9385  ;;  %v3842_v10 = vsel %vm3841_vm13, %v12634_v15, %v3840_v62 }
 0x7d6   :  { %v3936_v36 = vsel %vm14722_vm12, %v3935_v50, %v3933_v4  ;;  %v3938_v60 = vmul.f32 %v9378_v44, %v12654_v35  ;;  %vm3939_vm0 = vcmp.eq.f32.partialorder %v12654_v35, inf  ;;  %vm3941_vm10 = vcmp.eq.f32.partialorder %v12654_v35, 0.0  ;;  %4219 = vperm.xlu0 %9150, %v4100_v52   ;;  %v9388_v56 = vpop.eup %9387 }
 0x7d7   :  { %v14723_v8 = vand.u32 2147483648, %v12594_v33  ;;  %vm14724_vm12 = vcmp.eq.f32.partialorder %v12612_v22, inf  ;;  %vm3885_vm14 = vcmp.eq.f32.partialorder %v12632_v21, 0.0  ;;  %4216 = vperm.xlu1 %9149, %v4098_v18   ;;  %9407 = vrcp.f32 %v4035_v23  ;;  %v9390_v3 = vpop.eup %9389 }
 0x7d8   :  { %v3779_v50 = vsel %vm14724_vm12, %v12612_v22, %v3777_v48  ;;  %v4050_v2 = vmul.f32 %v12617_v7, %v3996_v39  ;;  %v4005_v14 = vmax.f32 %v3936_v36, 1e-08  ;;  %v4114_v31 = vmul.f32 %v9388_v56, %v3587_v16  ;;  %v12925_v61 = vpop.xlane.xlu0 %3523  ;;  %v3590_v44 = vpop.xlane.xlu1 %3589 }
 0x7d9   :  { %v3880_v27 = vsel %vm3878_vm2, %v14723_v8, %v3877_v11  ;;  %9409 = vrcp.f32 %v4058_v30  ;;  %v4045_v33 = vmul.f32 %v12606_v5, %v3991_v19  ;;  %v9392_v26 = vpop.eup %9391  ;;  %v3882_v13 = vmul.f32 %v9384_v17, %v12632_v21 }
 0x7da   :  { %vm14725_vm2 = vcmp.eq.f32.partialorder %v12634_v15, 0.0  ;;  %9411 = vrsqrt.f32 %v12738_v49  ;;  %v4070_v62 = vmul.f32 %v9390_v3, %v12820_v53  ;;  %v3997_v45 = vmax.f32 %v3880_v27, 1e-08  ;;  %4240 = vperm.xlu0 %9150, %v4114_v31  }
 0x7db   :  { %v3845_v4 = vsel %vm14725_vm2, %v3844_v20, %v3842_v10  ;;  %v9394_v39 = vpop.eup %9393  ;;  %v3940_v16 = vsel %vm3939_vm0, %v12654_v35, %v3938_v60  ;;  %v3942_v11 = vand.u32 2147483648, %v12654_v35  ;;  %v3945_v48 = vmul.f32 %v9386_v58, %v12677_v59 }
 0x7dc   :  { %vm3946_vm13 = vcmp.eq.f32.partialorder %v12677_v59, inf  ;;  %v4088_v23 = vmul.f32 %v9394_v39, %v3548_v41  ;;  %4174 = vperm.xlu1 %9149, %v4070_v62   ;;  %9413 = vrcp.f32 %v4050_v2  ;;  %v4036_v15 = vmul.f32 %v12599_v34, %v3982_v9  ;;  %v9396_v20 = vpop.eup %9395  ;;  %v12944_v19 = vpop.xlane.xlu0 %3568 }
 0x7dd   :  { %vm14726_vm12 = vcmp.eq.f32.partialorder %v12612_v22, 0.0  ;;  %v3992_v28 = vmax.f32 %v3845_v4, 1e-08  ;;  %v3551_v52 = vpop.xlane.xlu1 %3550  ;;  %9415 = vrcp.f32 %v4045_v33  ;;  %v4059_v30 = vmul.f32 %v12623_v0, %v4005_v14  ;;  %v9398_v17 = vpop.eup %9397 }
 0x7de   :  { %v3782_v53 = vsel %vm14726_vm12, %v3781_v46, %v3779_v50  ;;  %vm14727_vm0 = vcmp.eq.f32.partialorder %v12632_v21, inf  ;;  %v3784_v9 = vmul.f32 %v9392_v26, %v12652_v24  ;;  %v3943_v36 = vsel %vm3941_vm10, %v3942_v11, %v3940_v16  ;;  %v9400_v46 = vpop.eup %9399  ;;  %4201 = vperm.xlu0 %9150, %v4088_v23  }
 0x7df   :  { %v3884_v41 = vsel %vm14727_vm0, %v12632_v21, %v3882_v13  ;;  %v4086_v22 = vmul.f32 %v9396_v20, %v12874_v54  ;;  %vm3785_vm2 = vcmp.eq.f32.partialorder %v12652_v24, inf  ;;  %v3947_v18 = vsel %vm3946_vm13, %v12677_v59, %v3945_v48 }
 0x7e0   :  { %vm3948_vm12 = vcmp.eq.f32.partialorder %v12677_v59, 0.0  ;;  %v4116_v58 = vmul.f32 %v9398_v17, %v3590_v44  ;;  %v3983_v10 = vmax.f32 %v3782_v53, 1e-08  ;;  %v3949_v60 = vand.u32 2147483648, %v12677_v59  ;;  %v9402_v56 = vpop.eup %9401  ;;  %v12965_v27 = vpop.xlane.xlu0 %3526 }
 0x7e1   :  { %4198 = vperm.xlu1 %9149, %v4086_v22   ;;  %9417 = vrcp.f32 %v4036_v15  ;;  %v4051_v35 = vmul.f32 %v12617_v7, %v3997_v45  ;;  %v3887_v54 = vsel %vm3885_vm14, %v3886_v57, %v3884_v41  ;;  %v4006_v8 = vmax.f32 %v3943_v36, 1e-08  ;;  %v3593_v50 = vpop.xlane.xlu1 %3592  ;;  %v9404_v3 = vpop.eup %9403 }
 0x7e2   :  { %9419 = vrcp.f32 %v4059_v30  ;;  %v4046_v2 = vmul.f32 %v12606_v5, %v3992_v28  ;;  %v3786_v14 = vsel %vm3785_vm2, %v12652_v24, %v3784_v9  ;;  %v3889_v31 = vmul.f32 %v9400_v46, %v12675_v47  ;;  %v9406_v57 = vpop.eup %9405  ;;  %4243 = vperm.xlu0 %9150, %v4116_v58  }
 0x7e3   :  { %v3950_v44 = vsel %vm3948_vm12, %v3949_v60, %v3947_v18  ;;  %v4112_v21 = vmul.f32 %v9402_v56, %v12902_v37  ;;  %vm3787_vm14 = vcmp.eq.f32.partialorder %v12652_v24, 0.0  ;;  %v3788_v33 = vand.u32 2147483648, %v12652_v24 }
 0x7e4   :  { %v4090_v26 = vmul.f32 %v9404_v3, %v3551_v52  ;;  %v3998_v5 = vmax.f32 %v3887_v54, 1e-08  ;;  %vm3890_vm10 = vcmp.eq.f32.partialorder %v12675_v47, inf  ;;  %9421 = vrcp.f32 %v4051_v35  ;;  %v9408_v4 = vpop.eup %9407  ;;  %v3572_v39 = vpop.xlane.xlu0 %3571 }
 0x7e5   :  { %4237 = vperm.xlu1 %9149, %v4112_v21   ;;  %v4037_v13 = vmul.f32 %v12599_v34, %v3983_v10  ;;  %v3789_v62 = vsel %vm3787_vm14, %v3788_v33, %v3786_v14  ;;  %v4007_v59 = vmax.f32 %v3950_v44, 1e-08  ;;  %v3554_v45 = vpop.xlane.xlu1 %3553  ;;  %9423 = vrcp.f32 %v4046_v2 }
 0x7e6   :  { %v4060_v37 = vmul.f32 %v12623_v0, %v4006_v8  ;;  %v9410_v16 = vpop.eup %9409  ;;  %v3891_v24 = vsel %vm3890_vm10, %v12675_v47, %v3889_v31  ;;  %v3896_v11 = vmul.f32 %v9406_v57, %v12705_v51  ;;  %v4072_v48 = vmul.f32 %v9408_v4, %v12925_v61  ;;  %4204 = vperm.xlu0 %9150, %v4090_v26  }
 0x7e7   :  { %v9412_v23 = vpop.eup %9411  ;;  %v3893_v15 = vand.u32 2147483648, %v12675_v47  ;;  %v4118_v20 = vmul.f32 %v9410_v16, %v3593_v50  ;;  %v3984_v53 = vmax.f32 %v3789_v62, 1e-08  ;;  %vm3892_vm13 = vcmp.eq.f32.partialorder %v12675_v47, 0.0 }
 0x7e8   :  { %9425 = vrcp.f32 %v4037_v13  ;;  %v4052_v28 = vmul.f32 %v12617_v7, %v3998_v5  ;;  %vm3897_vm0 = vcmp.eq.f32.partialorder %v12705_v51, inf  ;;  %v3530_v17 = vpop.xlane.xlu0 %3529  ;;  %v4061_v61 = vmul.f32 %v12623_v0, %v4007_v59 }
 0x7e9   :  { %4177 = vperm.xlu1 %9149, %v4072_v48   ;;  %v9414_v52 = vpop.eup %9413  ;;  %v3894_v30 = vsel %vm3892_vm13, %v3893_v15, %v3891_v24  ;;  %v3596_v41 = vpop.xlane.xlu1 %3595  ;;  %9427 = vrcp.f32 %v4060_v37  ;;  %v3898_v36 = vsel %vm3897_vm0, %v12705_v51, %v3896_v11  ;;  %v3952_v22 = vmul.f32 %v9412_v23, %v12738_v49 }
 0x7ea   :  { %v9416_v9 = vpop.eup %9415  ;;  %v4102_v47 = vmul.f32 %v9414_v52, %v12944_v19  ;;  %v3900_v46 = vand.u32 2147483648, %v12705_v51  ;;  %4246 = vperm.xlu0 %9150, %v4118_v20   ;;  %v3999_v58 = vmax.f32 %v3894_v30, 1e-08  ;;  %vm3899_vm2 = vcmp.eq.f32.partialorder %v12705_v51, 0.0 }
 0x7eb   :  { %v4092_v18 = vmul.f32 %v9416_v9, %v3554_v45  ;;  %9429 = vrcp.f32 %v4052_v28  ;;  %v4038_v10 = vmul.f32 %v12599_v34, %v3984_v53  ;;  %vm3953_vm12 = vcmp.eq.f32.partialorder %v12738_v49, inf  ;;  %v14728_v53 = vld [vmem:[#allocation10_spill] sm:$0xff] }
 0x7ec   :  { %v3901_v35 = vsel %vm3899_vm2, %v3900_v46, %v3898_v36  ;;  %9431 = vrcp.f32 %v4061_v61  ;;  %v3954_v19 = vsel %vm3953_vm12, %v12738_v49, %v3952_v22  ;;  %v3956_v50 = vand.u32 2147483648, %v12738_v49  ;;  %v3575_v51 = vpop.xlane.xlu0 %3574 }
 0x7ed   :  { %4222 = vperm.xlu1 %9149, %v4102_v47   ;;  %v3557_v56 = vpop.xlane.xlu1 %3556  ;;  %v4000_v3 = vmax.f32 %v3901_v35, 1e-08  ;;  %vm3955_vm14 = vcmp.eq.f32.partialorder %v12738_v49, 0.0  ;;  %9433 = vrcp.f32 %v4038_v10  ;;  %v4053_v34 = vmul.f32 %v12617_v7, %v3999_v58 }
 0x7ee   :  { %v9418_v60 = vpop.eup %9417  ;;  %4207 = vperm.xlu0 %9150, %v4092_v18   ;;  %v3957_v31 = vsel %vm3955_vm14, %v3956_v50, %v3954_v19  ;;  %v3394_v28 = vmax.f32 %v14728_v53, 0.0  ;;  %v9528_v52 = vmov 6   ;;  %v9529_v9 = vmov 7  }
 0x7ef   :  { %v9420_v54 = vpop.eup %9419  ;;  %v4074_v8 = vmul.f32 %v9418_v60, %v12965_v27  ;;  %v4008_v27 = vmax.f32 %v3957_v31, 1e-08  ;;  %9435 = vrcp.f32 %v4053_v34  ;;  %v4054_v26 = vmul.f32 %v12617_v7, %v4000_v3 }
 0x7f0   :  { %v4120_v2 = vmul.f32 %v9420_v54, %v3596_v41  ;;  %v3533_v13 = vpop.xlane.xlu0 %3532  ;;  %vm14731_vm10 = vcmask 130112   ;;  %vm14732_vm13 = vcmask 195712   ;;  %vm14733_vm0 = vcmask 261312  }
 0x7f1   :  { %4180 = vperm.xlu1 %9149, %v4074_v8   ;;  %v9422_v14 = vpop.eup %9421  ;;  %v3599_v57 = vpop.xlane.xlu1 %3598  ;;  %9437 = vrcp.f32 %v4054_v26  ;;  %v4062_v45 = vmul.f32 %v12623_v0, %v4008_v27  ;;  %v14729_v26 = vld [vmem:[#allocation16_spill] sm:$0xff]  ;;  %vm14735_vm2 = vmmov %vm14731_vm10  ;;  %vm14738_vm14 = vcmask 326912  }
 0x7f2   :  { %v9424_v44 = vpop.eup %9423  ;;  %v4104_v21 = vmul.f32 %v9422_v14, %v3572_v39  ;;  %4249 = vperm.xlu0 %9150, %v4120_v2   ;;  %vm14737_vm12 = vmmov %vm14732_vm13 }
 0x7f3   :  { %v4094_v33 = vmul.f32 %v9424_v44, %v3557_v56  ;;  %9439 = vrcp.f32 %v4062_v45 }
 0x7f4   :  { %v3578_v24 = vpop.xlane.xlu0 %3577 }
 0x7f5   :  { %4225 = vperm.xlu1 %9149, %v4104_v21   ;;  %v9426_v5 = vpop.eup %9425  ;;  %v3602_v59 = vpop.xlane.xlu1 %3601 }
 0x7f6   :  { %v9428_v4 = vpop.eup %9427  ;;  %v4076_v49 = vmul.f32 %v9426_v5, %v3530_v17  ;;  %4210 = vperm.xlu0 %9150, %v4094_v33  }
 0x7f7   :  { %v4122_v62 = vmul.f32 %v9428_v4, %v3599_v57 }
 0x7f8   :  { %v9430_v39 = vpop.eup %9429  ;;  %v3581_v15 = vpop.xlane.xlu0 %3580 }
 0x7f9   :  { %4183 = vperm.xlu1 %9149, %v4076_v49   ;;  %v9432_v37 = vpop.eup %9431  ;;  %v4106_v16 = vmul.f32 %v9430_v39, %v3575_v51 }
 0x7fa   :  { %4252 = vperm.xlu0 %9150, %v4122_v62   ;;  %v4124_v11 = vmul.f32 %v9432_v37, %v3602_v59  ;;  %v9434_v7 = vpop.eup %9433  ;;  %v4432_v37 = vsub.f32 0.0, %v14728_v53 }
 0x7fb   :  { %v4078_v48 = vmul.f32 %v9434_v7, %v3533_v13  ;;  %v14730_v13 = vld [vmem:[#allocation5_spill] sm:$0xff] }
 0x7fc   :  { %v9436_v23 = vpop.eup %9435  ;;  %v3605_v17 = vpop.xlane.xlu0 %3604 }
 0x7fd   :  { %4228 = vperm.xlu1 %9149, %v4106_v16   ;;  %v4108_v20 = vmul.f32 %v9436_v23, %v3578_v24 }
 0x7fe   :  { %4255 = vperm.xlu0 %9150, %v4124_v11   ;;  %v9438_v0 = vpop.eup %9437 }
 0x7ff   :  { %v4110_v30 = vmul.f32 %v9438_v0, %v3581_v15  ;;  %v14736_v0 = vld [vmem:[#allocation6_spill] sm:$0xff] }
 0x800   :  { %v9440_v41 = vpop.eup %9439 }
 0x801   :  { %4186 = vperm.xlu1 %9149, %v4078_v48   ;;  %v4126_v61 = vmul.f32 %v9440_v41, %v3605_v17  ;;  %v14734_v48 = vld [vmem:[#allocation17_spill] sm:$0xff] }
 0x802   :  { %9151 = vset.pattern.permute.xlu0 %v9528_v52 }
 0x803   :  { %4129 = vperm.xlu0 %9151, %v3394_v28  }
 0x805   :  { %4231 = vperm.xlu1 %9149, %v4108_v20  }
 0x807   :  { %9153 = vset.pattern.permute.xlu0 %v9529_v9 }
 0x809   :  { %4234 = vperm.xlu1 %9149, %v4110_v30  }
 0x80d   :  { %4258 = vperm.xlu1 %9149, %v4126_v61   ;;  %v14739_v61 = vld [vmem:[#allocation18_spill] sm:$0xff] }
 0x811   :  { %9152 = vset.pattern.permute.xlu1 %v9529_v9 }
 0x836   :  { %v4166_v36 = vpop.permute.xlu1 %4165 }
 0x837   :  { %v4263_v16 = vrot.slane %v4166_v36, %v14729_v26 }
 0x83a   :  { %v4190_v22 = vpop.permute.xlu1 %4189 }
 0x83b   :  { %v4302_v5 = vrot.slane %v4190_v22, %v14729_v26  ;;  %v4433_v22 = vmul.f32 1.442695, %v4432_v37 }
 0x83d   :  { %9441 = vpow2.f32 %v4433_v22 }
 0x83e   :  { %v4169_v58 = vpop.permute.xlu0 %4168 }
 0x83f   :  { %v4267_v62 = vrot.slane %v4169_v58, %v10695_v42 }
 0x841   :  { %v4268_v52 = vsel %vm14735_vm2, %v4267_v62, %v4263_v16 }
 0x842   :  { %v4193_v47 = vpop.permute.xlu1 %4192 }
 0x843   :  { %v4306_v57 = vrot.slane %v4193_v47, %v10695_v42 }
 0x845   :  { %v4307_v59 = vsel %vm14731_vm10, %v4306_v57, %v4302_v5  ;;  %vm14740_vm10 = vmmov %vm14733_vm0 }
 0x846   :  { %v4172_v46 = vpop.permute.xlu1 %4171 }
 0x847   :  { %v4272_v45 = vrot.slane %v4172_v46, %v10699_v25 }
 0x849   :  { %v4273_v17 = vsel %vm14737_vm12, %v4272_v45, %v4268_v52  ;;  %vm14745_vm12 = vcmask 458112  }
 0x84a   :  { %v4196_v18 = vpop.permute.xlu1 %4195 }
 0x84b   :  { %v4311_v27 = vrot.slane %v4196_v18, %v10699_v25  ;;  %v14741_v18 = vld [vmem:[#allocation19_spill] sm:$0xff] }
 0x84d   :  { %v4312_v39 = vsel %vm14732_vm13, %v4311_v27, %v4307_v59  ;;  %vm14742_vm13 = vmmov %vm14738_vm14 }
 0x84e   :  { %v4214_v10 = vpop.permute.xlu1 %4213 }
 0x84f   :  { %v4341_v5 = vrot.slane %v4214_v10, %v14729_v26 }
 0x851   :  { %v13005_v60 = vpop.permute.xlu0 %4219 }
 0x852   :  { %v4217_v35 = vpop.permute.xlu1 %4216 }
 0x855   :  { %v13007_v56 = vpop.permute.xlu0 %4240 }
 0x857   :  { %v4175_v54 = vpop.permute.xlu1 %4174 }
 0x858   :  { %v4277_v24 = vrot.slane %v4175_v54, %v14730_v13  ;;  %v4345_v54 = vrot.slane %v4217_v35, %v10695_v42  ;;  %v4384_v35 = vrot.slane %v13007_v56, %v10695_v42 }
 0x859   :  { %v4202_v19 = vpop.permute.xlu0 %4201 }
 0x85a   :  { %v4321_v23 = vrot.slane %v4202_v19, %v14734_v48  ;;  %v4278_v47 = vsel %vm14740_vm10, %v4277_v24, %v4273_v17  ;;  %vm14747_vm10 = vcmask 523712  }
 0x85c   :  { %v4199_v8 = vpop.permute.xlu1 %4198 }
 0x85d   :  { %v13009_v50 = vpop.permute.xlu0 %4243  ;;  %v4316_v4 = vrot.slane %v4199_v8, %v14730_v13 }
 0x85e   :  { %v4389_v56 = vrot.slane %v13009_v50, %v10699_v25 }
 0x85f   :  { %v4317_v11 = vsel %vm14733_vm0, %v4316_v4, %v4312_v39  ;;  %vm14743_vm0 = vcmask 392512  }
 0x860   :  { %v4238_v2 = vpop.permute.xlu1 %4237  ;;  %v4322_v41 = vsel %vm14738_vm14, %v4321_v23, %v4317_v11  ;;  %vm14744_vm2 = vmmov %vm14743_vm0 }
 0x861   :  { %v4205_v51 = vpop.permute.xlu0 %4204  ;;  %vm14746_vm14 = vmmov %vm14745_vm12 }
 0x862   :  { %v4326_v46 = vrot.slane %v4205_v51, %v14736_v0 }
 0x864   :  { %v4178_v3 = vpop.permute.xlu1 %4177 }
 0x865   :  { %v13011_v34 = vpop.permute.xlu0 %4246  ;;  %v4282_v15 = vrot.slane %v4178_v3, %v14734_v48  ;;  %v4380_v3 = vrot.slane %v4238_v2, %v14729_v26  ;;  %v4350_v26 = vrot.slane %v13005_v60, %v10699_v25 }
 0x867   :  { %v4283_v19 = vsel %vm14742_vm13, %v4282_v15, %v4278_v47  ;;  %vm14748_vm13 = vmmov %vm14747_vm10 }
 0x868   :  { %v13013_v14 = vpop.permute.xlu1 %4222 }
 0x869   :  { %v4208_v31 = vpop.permute.xlu0 %4207  ;;  %v4355_v59 = vrot.slane %v13013_v14, %v14730_v13 }
 0x86a   :  { %v4331_v9 = vrot.slane %v4208_v31, %v14739_v61 }
 0x86c   :  { %v4181_v44 = vpop.permute.xlu1 %4180 }
 0x86d   :  { %v13018_v33 = vpop.permute.xlu0 %4249  ;;  %v4287_v30 = vrot.slane %v4181_v44, %v14736_v0  ;;  %v4327_v44 = vsel %vm14743_vm0, %v4326_v46, %v4322_v41  ;;  %vm14749_vm0 = vcmask 130112  }
 0x86e   :  { %v4332_v51 = vsel %vm14745_vm12, %v4331_v9, %v4327_v44  ;;  %v4346_v62 = vsel %vm14749_vm0, %v4345_v54, %v4341_v5  ;;  %vm14751_vm12 = vmmov %vm14749_vm0  ;;  %v4399_v60 = vrot.slane %v13018_v33, %v14734_v48  ;;  %vm14755_vm0 = vcmask 326912  }
 0x86f   :  { %v4288_v31 = vsel %vm14744_vm2, %v4287_v30, %v4283_v19  ;;  %vm14750_vm2 = vcmask 1041409   ;;  %v4385_v39 = vsel %vm14751_vm12, %v4384_v35, %v4380_v3 }
 0x870   :  { %v13015_v21 = vpop.permute.xlu1 %4225 }
 0x871   :  { %v4211_v7 = vpop.permute.xlu0 %4210  ;;  %v4360_v42 = vrot.slane %v13015_v21, %v14734_v48  ;;  %v4394_v21 = vrot.slane %v13011_v34, %v14730_v13 }
 0x872   :  { %v4336_v58 = vrot.slane %v4211_v7, %v14741_v18 }
 0x874   :  { %v4184_v49 = vpop.permute.xlu1 %4183 }
 0x875   :  { %v4292_v36 = vrot.slane %v4184_v49, %v14739_v61  ;;  %v4253_v57 = vpop.permute.xlu0 %4252  ;;  %v4337_v49 = vsel %vm14747_vm10, %v4336_v58, %v4332_v51 }
 0x876   :  { %v4404_v25 = vrot.slane %v4253_v57, %v14736_v0 }
 0x877   :  { %v4293_v4 = vsel %vm14746_vm14, %v4292_v36, %v4288_v31  ;;  %vm14752_vm14 = vcmask 195712   ;;  %v9442_v36 = vpop.eup %9441 }
 0x878   :  { %v4229_v20 = vpop.permute.xlu1 %4228  ;;  %v4351_v16 = vsel %vm14752_vm14, %v4350_v26, %v4346_v62  ;;  %vm14753_vm10 = vmmov %vm14752_vm14  ;;  %vm14758_vm14 = vcmask 458112   ;;  %v4435_v58 = vadd.f32 1.0, %v9442_v36  ;;  %v14793_v36 = vld [vmem:[#allocation9_spill] sm:$0xff] }
 0x879   :  { %v4365_v37 = vrot.slane %v4229_v20, %v14736_v0  ;;  %v4256_v24 = vpop.permute.xlu0 %4255  ;;  %v4390_v11 = vsel %vm14753_vm10, %v4389_v56, %v4385_v39  ;;  %vm14759_vm10 = vmmov %vm14755_vm0 }
 0x87a   :  { %v4409_v20 = vrot.slane %v4256_v24, %v14739_v61  ;;  %9443 = vrcp.f32 %v4435_v58  ;;  %v14798_v58 = vld [vmem:[#allocation64_spill] sm:$0xff] }
 0x87c   :  { %v4187_v8 = vpop.permute.xlu1 %4186 }
 0x87d   :  { %v4297_v27 = vrot.slane %v4187_v8, %v14741_v18 }
 0x87e   :  { %v4130_v22 = vpop.permute.xlu0 %4129 }
 0x87f   :  { %v4298_v2 = vsel %vm14748_vm13, %v4297_v27, %v4293_v4  ;;  %vm14754_vm13 = vcmask 261312  }
 0x880   :  { %v4416_v45 = vsel %vm14750_vm2, %v4337_v49, %v4298_v2  ;;  %v4232_v10 = vpop.permute.xlu1 %4231  ;;  %v4356_v7 = vsel %vm14754_vm13, %v4355_v59, %v4351_v16  ;;  %vm14756_vm2 = vcmask 392512   ;;  %vm14757_vm12 = vmmov %vm14754_vm13  ;;  %vm14760_vm13 = vcmask 523712   ;;  %v3392_v59 = vld [vmem:[%s14236_s3] sm:$0xf]  ;;  %s9535_s3 = smov [#allocation2]  }
 0x881   :  { %v4370_v14 = vrot.slane %v4232_v10, %v14739_v61  ;;  %v4361_v50 = vsel %vm14755_vm0, %v4360_v42, %v4356_v7  ;;  %v4395_v30 = vsel %vm14757_vm12, %v4394_v21, %v4390_v11  ;;  %vm14761_vm15 = vmmov %vm14756_vm2  ;;  %vm14766_vm12 = vcmask 519168   ;;  %s7664_s4 = sshll.u32 %s9535_s3, 4  ;;  %s7665_s4 = int_to_ptr.vmem [resolvable:$true] %s7664_s4 }
 0x882   :  { %v4366_v52 = vsel %vm14756_vm2, %v4365_v37, %v4361_v50  ;;  %v4400_v48 = vsel %vm14759_vm10, %v4399_v60, %v4395_v30  ;;  %vm14762_vm0 = vmmov %vm14758_vm14  ;;  %vm14765_vm2 = vcmask 1043459   ;;  %v14778_v30 = vld [vmem:[#allocation22_spill] sm:$0xff]  ;;  %s9491_s8 = scalar_lea.vmem %s7665_s4, 64  ;;  %p9496_p1 = scmp.lt.s32.totalorder %s7665_s4, %s7665_s4 }
 0x883   :  { %v4371_v33 = vsel %vm14758_vm14, %v4370_v14, %v4366_v52  ;;  %v4405_v34 = vsel %vm14761_vm15, %v4404_v25, %v4400_v48  ;;  %vm14763_vm8 = vmmov %vm14760_vm13  ;;  %vm4452_vm15 = vcmask 85056   ;;  %vm14769_vm14 = vcmask 19456   ;;  %v14772_v25 = vld [vmem:[#allocation23_spill] sm:$0xff]  ;;  %v14777_v52 = vld [vmem:[#allocation25_spill] sm:$0xff]  ;;  %p9492_p0 = scmp.ne.s32.totalorder %s7665_s4, %s9491_s8  ;;  %p9497_p2 = scmp.lt.s32.totalorder %s9491_s8, %s9491_s8 }
 0x884   :  { %v4235_v23 = vpop.permute.xlu1 %4234  ;;  %v4410_v0 = vsel %vm14762_vm0, %v4409_v20, %v4405_v34  ;;  %v14775_v20 = vld [vmem:[#allocation28_spill] sm:$0xff]  ;;  %v14781_v48 = vld [vmem:[#allocation34_spill] sm:$0xff]  ;;  %v14788_v34 = vld [vmem:[#allocation33_spill] sm:$0xff] }
 0x885   :  { %v4375_v15 = vrot.slane %v4235_v23, %v14741_v18  ;;  %v14770_v23 = vld [vmem:[#allocation20_spill] sm:$0xff]  ;;  %vm14776_vm10 = vnez %v14775_v20  ;;  %p9498_p3 = por %p9497_p2, %p9496_p1 }
 0x887   :  { %v4376_v17 = vsel %vm14760_vm13, %v4375_v15, %v4371_v33  ;;  %v9444_v19 = vpop.eup %9443  ;;  %v14774_v15 = vld [vmem:[#allocation24_spill] sm:$0xff]  ;;  %vm14779_vm13 = vnez %v14778_v30  ;;  %p9499_p4 = pnand %p9498_p3, %p9492_p0 }
 0x888   :  { %v4259_v41 = vpop.permute.xlu1 %4258  ;;  %v4417_v61 = vsel %vm14764_vm3, %v4376_v17, %v4416_v45  ;;  %vm14767_vm3 = vmmov %vm14766_vm12  ;;  %v4444_v27 = vsub.f32 1.0, %v9444_v19  ;;  %v14780_v33 = vld [vmem:[#allocation32_spill] sm:$0xff]  ;;  %v14782_v17 = vld [vmem:[#allocation35_spill] sm:$0xff] }
 0x889   :  { %v4414_v13 = vrot.slane %v4259_v41, %v14741_v18  ;;  %v4453_v18 = vsel %vm4452_vm15, %v14728_v53, -inf  ;;  %v14787_v41 = vld [vmem:[#allocation31_spill] sm:$0xff]  ;;  %vm14837_vm15 = vcmask 1043456  }
 0x88b   :  { %v4415_v9 = vsel %vm14763_vm8, %v4414_v13, %v4410_v0  ;;  %vm14768_vm8 = vcmask 523264   ;;  %v14789_v13 = vld [vmem:[#allocation55_spill] sm:$0xff]  ;;  %v14790_v0 = vld [vmem:[#allocation37_spill] sm:$0xff] }
 0x88c   :  { %v4418_v47 = vsel %vm14765_vm2, %v4415_v9, %v4417_v61  ;;  %v14791_v9 = vld [vmem:[#allocation59_spill] sm:$0xff]  ;;  %v14792_v61 = vld [vmem:[#allocation38_spill] sm:$0xff] }
 0x88d   :  { %v4420_v46 = vmul.f32 %v4418_v47, %v4130_v22  ;;  %v14794_v22 = vld [vmem:[#allocation39_spill] sm:$0xff]  ;;  %v14795_v47 = vld [vmem:[#allocation13_spill] sm:$0xff] }
 0x88f   :  { %v4421_v54 = vsel %vm14766_vm12, %v4420_v46, -inf  ;;  %vm14836_vm12 = vmmov %vm14767_vm3 }
 0x890   :  { %4422 = vmax.xlane.f32.xlu1 %v4421_v54  ;;  %v14799_v54 = vld [vmem:[#allocation41_spill] sm:$0xff] }
 0x8a1   :  { %4440 = vperm.xlu1 %9152, %v9444_v19   ;;  %v14801_v19 = vld [vmem:[#allocation65_spill] sm:$0xff] }
 0x8c5   :  { %4454 = vmax.xlane.f32.xlu1 %v4453_v18  ;;  %v14802_v18 = vld [vmem:[#allocation42_spill] sm:$0xff] }
 0x919   :  { %v4423_v8 = vpop.xlane.xlu1 %4422 }
 0x91a   :  { %v4424_v3 = vsub.f32 %v4420_v46, %v4423_v8  ;;  %v14796_v46 = vld [vmem:[#allocation40_spill] sm:$0xff]  ;;  %v14804_v8 = vld [vmem:[#allocation66_spill] sm:$0xff] }
 0x91c   :  { %v4425_v44 = vmul.f32 1.442695, %v4424_v3  ;;  %v14805_v3 = vld [vmem:[#allocation44_spill] sm:$0xff] }
 0x91d   :  { %v4441_v5 = vpop.permute.xlu1 %4440 }
 0x91e   :  { %9445 = vpow2.f32 %v4425_v44  ;;  %v14807_v44 = vld [vmem:[#allocation67_spill] sm:$0xff] }
 0x92b   :  { %v9446_v31 = vpop.eup %9445 }
 0x92c   :  { %v4427_v57 = vsel %vm14767_vm3, %v9446_v31, 0.0  ;;  %vm14838_vm3 = vmmov %vm14768_vm8 }
 0x92d   :  { %4428 = vadd.xlane.f32.xlu0 %v4427_v57  ;;  %v14810_v57 = vld [vmem:[#allocation50_spill] sm:$0xff] }
 0x943   :  { %4447 = vperm.xlu0 %9153, %v4444_v27   ;;  %v14812_v27 = vld [vmem:[#allocation53_spill] sm:$0xff] }
 0x944   :  { %vm14813_vm0 = vnez %v14812_v27 }
 0x94e   :  { %v4455_v51 = vpop.xlane.xlu1 %4454 }
 0x94f   :  { %v4456_v4 = vsub.f32 %v14728_v53, %v4455_v51  ;;  %v14816_v51 = vld [vmem:[#allocation43_spill] sm:$0xff] }
 0x951   :  { %v4457_v35 = vmul.f32 1.442695, %v4456_v4  ;;  %v14817_v4 = vld [vmem:[#allocation45_spill] sm:$0xff] }
 0x953   :  { %9447 = vpow2.f32 %v4457_v35  ;;  %v14818_v35 = vld [vmem:[#allocation48_spill] sm:$0xff] }
 0x960   :  { %v13094_v49 = vpop.eup %9447 }
 0x961   :  { %4460 = vrot.lane.b32.xlu0 %v13094_v49, %s9530_s5 }
 0x9b6   :  { %v4429_v2 = vpop.xlane.xlu0 %4428 }
 0x9b7   :  { %9449 = vrcp.f32 %v4429_v2  ;;  %v14819_v2 = vld [vmem:[#allocation51_spill] sm:$0xff] }
 0x9be   :  { %v4448_v45 = vpop.permute.xlu0 %4447 }
 0x9bf   :  { %v4450_v39 = vmul.f32 %v4448_v45, %v3392_v59  ;;  %v13326_v59 = vand.u32 4294901760, %v12354_v63  ;;  %v14821_v45 = vld [vmem:[#allocation57_spill] sm:$0xff] }
 0x9c4   :  { %v9450_v62 = vpop.eup %9449 }
 0x9c5   :  { %v4431_v10 = vmul.f32 %v9450_v62, %v9446_v31  ;;  %v14808_v31 = vld [vmem:[#allocation47_spill] sm:$0xff] }
 0x9c6   :  { %v14820_v62 = vld [vmem:[#allocation11_spill] sm:$0xff] }
 0x9c7   :  { %v4443_v26 = vmul.f32 %v4441_v5, %v4431_v10  ;;  %v14814_v5 = vld [vmem:[#allocation54_spill] sm:$0xff]  ;;  %v13335_v10 = vand.u32 4294901760, %v12282_v40 }
 0x9c8   :  { %vm14815_vm2 = vnez %v14814_v5 }
 0x9c9   :  { %v13100_v42 = vadd.f32 %v4450_v39, %v4443_v26  ;;  %v14822_v26 = vld [vmem:[#allocation60_spill] sm:$0xff]  ;;  %v13344_v39 = vand.u32 4294901760, %v12213_v6 }
 0x9cb   :  { %v4469_v56 = vsel %vm14768_vm8, %v13100_v42, 0  ;;  %vm14847_vm8 = vmmov %vm14838_vm3 }
 0x9cc   :  { %v13104_v37 = vand.u32 4294901760, %v4469_v56 }
 0x9ce   :  { %v13107_v16 = vsub.f32 %v4469_v56, %v13104_v37  ;;  %8469 = vmatmul.mubr.f32.vlgmr.msra.gmra.mxu1 %v13104_v37  ;;  %v13352_v56 = vsub.f32 %v12354_v63, %v13326_v59  ;;  %v14824_v63 = vld [vmem:[#allocation46_spill] sm:$0xff] }
 0x9cf   :  { %8491 = vmatpush3.msk.msra.mxu1 %vm10825_vm6, %v14515_v43  ;;  %8506 = vmatprep.mubr.msk.f32.mxu1 %vm14552_vm5, %v14479_v55 }
 0x9d0   :  { %8492 = vmatprep.subr.mxu1 %v14479_v55  ;;  %v13117_v24 = vand.u32 4294901760, %v13107_v16 }
 0x9d1   :  { %8493 = vmatpush3.msk.msra.mxu1 %vm10869_vm7, %v14515_v43 }
 0x9d2   :  { %8494 = vmatprep.subr.mxu1 %v14479_v55  ;;  %v4539_v14 = vsub.f32 %v13107_v16, %v13117_v24 }
 0x9d3   :  { %8495 = vmatpush3.msk.msra.mxu1 %vm14569_vm9, %v14515_v43  ;;  %v4461_v11 = vpop.permute.xlu0 %4460 }
 0x9d4   :  { %8496 = vmatprep.subr.mxu1 %v14479_v55  ;;  %v4463_v60 = vsel %vm14769_vm14, %v4461_v11, 0.0  ;;  %v13130_v7 = vand.u32 4294901760, %v4539_v14  ;;  %v13357_v14 = vand.u32 4294901760, %v12141_v29  ;;  %v13366_v11 = vsub.f32 %v12282_v40, %v13335_v10  ;;  %v14826_v40 = vld [vmem:[#allocation49_spill] sm:$0xff]  ;;  %vm14856_vm14 = vmmov %vm14838_vm3 }
 0x9d5   :  { %8497 = vmatpush3.msk.msra.mxu1 %vm14570_vm11, %v14515_v43  ;;  %4464 = vadd.xlane.f32.xlu0 %v4463_v60  ;;  %v5596_v60 = vand.u32 4294901760, %v13352_v56 }
 0x9d6   :  { %8498 = vmatprep.subr.mxu1 %v14479_v55  ;;  %8450 = vmatmul.mubr.f32.vlgmr.msra.gmra.mxu0 %v13130_v7 }
 0x9d7   :  { %8472 = vmatpush3.msra.mxu0 %v14770_v23  ;;  %8499 = vmatpush3.msk.msra.mxu1 %vm14571_vm1, %v14515_v43  ;;  %v14825_v23 = vld [vmem:[#allocation71_spill] sm:$0xff]  ;;  %v5597_v20 = vsub.f32 %v13352_v56, %v5596_v60 }
 0x9d8   :  { %8473 = vmatprep.subr.mxu0 %v14479_v55  ;;  %8500 = vmatprep.subr.mxu1 %v14479_v55  ;;  %v13378_v21 = vand.u32 4294901760, %v14825_v23 }
 0x9d9   :  { %8474 = vmatpush3.msra.mxu0 %v14772_v25  ;;  %8501 = vmatpush3.msk.msra.mxu1 %vm10917_vm4, %v14515_v43  ;;  %v13389_v25 = vsub.f32 %v12141_v29, %v13357_v14 }
 0x9da   :  { %8475 = vmatprep.subr.mxu0 %v14479_v55  ;;  %8502 = vmatprep.subr.mxu1 %v14479_v55 }
 0x9db   :  { %8476 = vmatpush3.msra.mxu0 %v14774_v15  ;;  %8503 = vmatpush3.msk.msra.mxu1 %vm14776_vm10, %v14515_v43  ;;  %v14828_v15 = vld [vmem:[#allocation52_spill] sm:$0xff] }
 0x9dc   :  { %8477 = vmatprep.subr.mxu0 %v14479_v55  ;;  %8504 = vmatprep.subr.mxu1 %v14479_v55 }
 0x9dd   :  { %8478 = vmatpush3.msra.mxu0 %v14777_v52  ;;  %8505 = vmatpush3.msk.msra.mxu1 %vm14779_vm13, %v14515_v43  ;;  %v14829_v52 = vld [vmem:[#allocation15_spill] sm:$0xff] }
 0x9de   :  { %8479 = vmatprep.subr.mxu0 %v14479_v55  ;;  %8507 = vmatmul.mubr.f32.vlgmr.msra.gmra.mxu1 %v13117_v24  ;;  %v13405_v30 = vand.u32 4294901760, %v14829_v52 }
 0x9df   :  { %8528 = vmatprep.subr.mxu1 %v14479_v55  ;;  %8480 = vmatpush3.msra.mxu0 %v14780_v33  ;;  %v13413_v33 = vsub.f32 %v14825_v23, %v13378_v21 }
 0x9e0   :  { %8529 = vmatpush3.msk.msra.mxu1 %vm10825_vm6, %v14515_v43  ;;  %8481 = vmatprep.subr.mxu0 %v14479_v55  ;;  %vm14800_vm6 = vnez %v14799_v54 }
 0x9e1   :  { %8530 = vmatprep.subr.mxu1 %v14479_v55  ;;  %8482 = vmatpush3.msra.mxu0 %v14781_v48  ;;  %v14830_v48 = vld [vmem:[#allocation56_spill] sm:$0xff] }
 0x9e2   :  { %8531 = vmatpush3.msk.msra.mxu1 %vm10869_vm7, %v14515_v43  ;;  %8483 = vmatprep.subr.mxu0 %v14479_v55  ;;  %vm14803_vm7 = vnez %v14802_v18 }
 0x9e3   :  { %8532 = vmatprep.subr.mxu1 %v14479_v55  ;;  %8484 = vmatpush3.msra.mxu0 %v14782_v17 }
 0x9e4   :  { %8533 = vmatpush3.msk.msra.mxu1 %vm14569_vm9, %v14515_v43  ;;  %8485 = vmatprep.subr.mxu0 %v14479_v55  ;;  %vm14809_vm9 = vnez %v14808_v31 }
 0x9e5   :  { %8534 = vmatprep.subr.mxu1 %v14479_v55  ;;  %8486 = vmatpush3.msra.mxu0 %v14783_v1  ;;  %v5617_v1 = vand.u32 4294901760, %v13389_v25 }
 0x9e6   :  { %8487 = vmatprep.mubr.msk.f32.mxu0 %vm14552_vm5, %v14479_v55  ;;  %8535 = vmatpush3.msk.msra.mxu1 %vm14570_vm11, %v14515_v43  ;;  %vm14811_vm11 = vnez %v14810_v57 }
 0x9e7   :  { %8488 = vmatmul.mubr.f32.vlgmr.msra.gmra.mxu0 %v13107_v16  ;;  %8509 = vmatprep.subr.mxu0 %v14479_v55 }
 0x9e8   :  { %8536 = vmatprep.subr.mxu1 %v14479_v55  ;;  %8510 = vmatpush3.msra.mxu0 %v14784_v38  ;;  %v14831_v38 = vld [vmem:[#allocation8_spill] sm:$0xff] }
 0x9e9   :  { %8537 = vmatpush3.msk.msra.mxu1 %vm14571_vm1, %v14515_v43  ;;  %8511 = vmatprep.subr.mxu0 %v14479_v55  ;;  %vm14806_vm1 = vnez %v14805_v3 }
 0x9ea   :  { %8538 = vmatprep.subr.mxu1 %v14479_v55  ;;  %8512 = vmatpush3.msra.mxu0 %v14785_v12  ;;  %v13422_v12 = vand.u32 4294901760, %v14831_v38 }
 0x9eb   :  { %8539 = vmatpush3.msk.msra.mxu1 %vm10917_vm4, %v14515_v43  ;;  %8513 = vmatprep.subr.mxu0 %v14479_v55  ;;  %vm14797_vm4 = vnez %v14796_v46 }
 0x9ec   :  { %8540 = vmatprep.subr.mxu1 %v14479_v55  ;;  %8514 = vmatpush3.msra.mxu0 %v14786_v32 }
 0x9ed   :  { %8541 = vmatpush3.msk.msra.mxu1 %vm14776_vm10, %v14515_v43  ;;  %8515 = vmatprep.subr.mxu0 %v14479_v55  ;;  %vm14865_vm10 = vmmov %vm14838_vm3 }
 0x9ee   :  { %8542 = vmatprep.subr.mxu1 %v14479_v55  ;;  %8516 = vmatpush3.msra.mxu0 %v14787_v41  ;;  %v5598_v41 = vand.u32 4294901760, %v5597_v20 }
 0x9ef   :  { %8543 = vmatpush3.msk.msra.mxu1 %vm14779_vm13, %v14515_v43  ;;  %8544 = vmatprep.mubr.msk.f32.mxu1 %vm14552_vm5, %v14479_v55 }
 0x9f0   :  { %8517 = vmatprep.subr.mxu0 %v14479_v55  ;;  %8545 = vmatmul.mubr.f32.vlgmr.msra.gmra.mxu1 %v13104_v37 }
 0x9f1   :  { %8566 = vmatprep.subr.mxu1 %v14479_v55  ;;  %8518 = vmatpush3.msra.mxu0 %v14788_v34 }
 0x9f2   :  { %8567 = vmatpush3.msra.mxu1 %v14789_v13  ;;  %8519 = vmatprep.subr.mxu0 %v14479_v55  ;;  %v14832_v13 = vld [vmem:[#allocation58_spill] sm:$0xff] }
 0x9f3   :  { %8568 = vmatprep.subr.mxu1 %v14479_v55  ;;  %8520 = vmatpush3.msra.mxu0 %v14790_v0  ;;  %v13443_v0 = vsub.f32 %v14829_v52, %v13405_v30 }
 0x9f4   :  { %8569 = vmatpush3.msra.mxu1 %v14791_v9  ;;  %8521 = vmatprep.subr.mxu0 %v14479_v55 }
 0x9f5   :  { %8570 = vmatprep.subr.mxu1 %v14479_v55  ;;  %8522 = vmatpush3.msra.mxu0 %v14792_v61  ;;  %v5618_v61 = vsub.f32 %v13389_v25, %v5617_v1 }
 0x9f6   :  { %8571 = vmatpush3.msra.mxu1 %v14793_v36  ;;  %8523 = vmatprep.subr.mxu0 %v14479_v55  ;;  %v14833_v36 = vld [vmem:[#allocation12_spill] sm:$0xff] }
 0x9f7   :  { %8572 = vmatprep.subr.mxu1 %v14479_v55  ;;  %8524 = vmatpush3.msra.mxu0 %v14794_v22  ;;  %v5619_v18 = vand.u32 4294901760, %v5618_v61 }
 0x9f8   :  { %8525 = vmatprep.mubr.msk.f32.mxu0 %vm14552_vm5, %v14479_v55  ;;  %8573 = vmatpush3.msra.mxu1 %v14795_v47  ;;  %v13454_v47 = vsub.f32 %v14831_v38, %v13422_v12 }
 0x9f9   :  { %8526 = vmatmul.mubr.f32.vlgmr.msra.gmra.mxu0 %v13104_v37  ;;  %8547 = vmatprep.subr.mxu0 %v14479_v55 }
 0x9fa   :  { %8574 = vmatprep.subr.mxu1 %v14479_v55  ;;  %8548 = vmatpush3.msk.msra.mxu0 %vm14797_vm4, %v14515_v43 }
 0x9fb   :  { %8575 = vmatpush3.msra.mxu1 %v14798_v58  ;;  %8549 = vmatprep.subr.mxu0 %v14479_v55  ;;  %v14834_v58 = vld [vmem:[#allocation62_spill] sm:$0xff] }
 0x9fc   :  { %8576 = vmatprep.subr.mxu1 %v14479_v55  ;;  %8550 = vmatpush3.msk.msra.mxu0 %vm14800_vm6, %v14515_v43 }
 0x9fd   :  { %8577 = vmatpush3.msra.mxu1 %v14801_v19  ;;  %8551 = vmatprep.subr.mxu0 %v14479_v55  ;;  %v5638_v19 = vand.u32 4294901760, %v13443_v0 }
 0x9fe   :  { %8578 = vmatprep.subr.mxu1 %v14479_v55  ;;  %8552 = vmatpush3.msk.msra.mxu0 %vm14803_vm7, %v14515_v43 }
 0x9ff   :  { %8579 = vmatpush3.msra.mxu1 %v14804_v8  ;;  %8553 = vmatprep.subr.mxu0 %v14479_v55  ;;  %v14835_v8 = vld [vmem:[#allocation63_spill] sm:$0xff]  ;;  %v5639_v57 = vsub.f32 %v13443_v0, %v5638_v19 }
 0xa00   :  { %8580 = vmatprep.subr.mxu1 %v14479_v55  ;;  %8554 = vmatpush3.msk.msra.mxu0 %vm14806_vm1, %v14515_v43 }
 0xa01   :  { %8581 = vmatpush3.msra.mxu1 %v14807_v44  ;;  %8582 = vmatprep.mubr.msk.f32.mxu1 %vm14552_vm5, %v14479_v55  ;;  %v5645_v44 = vand.u32 4294901760, %v13454_v47 }
 0xa02   :  { %8555 = vmatprep.subr.mxu0 %v14479_v55  ;;  %8583 = vmatmul.mubr.f32.vlgmr.msra.gmra.mxu1 %v13104_v37 }
 0xa03   :  { %8604 = vmatprep.subr.mxu1 %v14479_v55  ;;  %8556 = vmatpush3.msk.msra.mxu0 %vm14809_vm9, %v14515_v43  ;;  %v5646_v5 = vsub.f32 %v13454_v47, %v5645_v44 }
 0xa04   :  { %8605 = vmatpush3.msk.msra.mxu1 %vm14797_vm4, %v14515_v43  ;;  %8557 = vmatprep.subr.mxu0 %v14479_v55 }
 0xa05   :  { %8606 = vmatprep.subr.mxu1 %v14479_v55  ;;  %8558 = vmatpush3.msk.msra.mxu0 %vm14811_vm11, %v14515_v43 }
 0xa06   :  { %8607 = vmatpush3.msk.msra.mxu1 %vm14800_vm6, %v14515_v43  ;;  %8559 = vmatprep.subr.mxu0 %v14479_v55 }
 0xa07   :  { %8608 = vmatprep.subr.mxu1 %v14479_v55  ;;  %8560 = vmatpush3.msk.msra.mxu0 %vm14813_vm0, %v14515_v43 }
 0xa08   :  { %8609 = vmatpush3.msk.msra.mxu1 %vm14803_vm7, %v14515_v43  ;;  %8561 = vmatprep.subr.mxu0 %v14479_v55 }
 0xa09   :  { %8610 = vmatprep.subr.mxu1 %v14479_v55  ;;  %8562 = vmatpush3.msk.msra.mxu0 %vm14815_vm2, %v14515_v43 }
 0xa0a   :  { %8563 = vmatprep.mubr.msk.f32.mxu0 %vm14552_vm5, %v14479_v55  ;;  %8611 = vmatpush3.msk.msra.mxu1 %vm14806_vm1, %v14515_v43 }
 0xa0b   :  { %8564 = vmatmul.mubr.f32.vlgmr.msra.gmra.mxu0 %v13130_v7  ;;  %8585 = vmatprep.subr.mxu0 %v14479_v55  ;;  %v13375_v7 = vsub.f32 %v12213_v6, %v13344_v39  ;;  %v14827_v6 = vld [vmem:[#allocation7_spill] sm:$0xff] }
 0xa0c   :  { %8612 = vmatprep.subr.mxu1 %v14479_v55  ;;  %8586 = vmatpush3.msra.mxu0 %v14816_v51  ;;  %v13392_v50 = vand.u32 4294901760, %v14827_v6  ;;  %v5647_v51 = vand.u32 4294901760, %v5646_v5 }
 0xa0d   :  { %8613 = vmatpush3.msk.msra.mxu1 %vm14809_vm9, %v14515_v43  ;;  %8587 = vmatprep.subr.mxu0 %v14479_v55  ;;  %v5610_v29 = vand.u32 4294901760, %v13375_v7 }
 0xa0e   :  { %8614 = vmatprep.subr.mxu1 %v14479_v55  ;;  %8588 = vmatpush3.msra.mxu0 %v14817_v4  ;;  %v13431_v32 = vsub.f32 %v14827_v6, %v13392_v50  ;;  %v9531_v4 = vmov 8  }
 0xa0f   :  { %8615 = vmatpush3.msk.msra.mxu1 %vm14811_vm11, %v14515_v43  ;;  %8589 = vmatprep.subr.mxu0 %v14479_v55  ;;  %v5611_v34 = vsub.f32 %v13375_v7, %v5610_v29 }
 0xa10   :  { %8616 = vmatprep.subr.mxu1 %v14479_v55  ;;  %8590 = vmatpush3.msra.mxu0 %v14818_v35  ;;  %v5631_v22 = vand.u32 4294901760, %v13431_v32  ;;  %v9532_v35 = vmov 11  }
 0xa11   :  { %8617 = vmatpush3.msk.msra.mxu1 %vm14813_vm0, %v14515_v43  ;;  %8591 = vmatprep.subr.mxu0 %v14479_v55  ;;  %v5612_v46 = vand.u32 4294901760, %v5611_v34 }
 0xa12   :  { %8618 = vmatprep.subr.mxu1 %v14479_v55  ;;  %8592 = vmatpush3.msra.mxu0 %v14819_v2  ;;  %v5632_v3 = vsub.f32 %v13431_v32, %v5631_v22 }
 0xa13   :  { %8619 = vmatpush3.msk.msra.mxu1 %vm14815_vm2, %v14515_v43  ;;  %8620 = vmatprep.mubr.msk.f32.mxu1 %vm14552_vm5, %v14479_v55 }
 0xa14   :  { %8593 = vmatprep.subr.mxu0 %v14479_v55  ;;  %8621 = vmatmul.mubr.f32.vlgmr.msra.gmra.mxu1 %v13117_v24  ;;  %v14823_v24 = vld [vmem:[#allocation61_spill] sm:$0xff]  ;;  %v5633_v27 = vand.u32 4294901760, %v5632_v3 }
 0xa15   :  { %8642 = vmatprep.subr.mxu1 %v14479_v55  ;;  %8594 = vmatpush3.msra.mxu0 %v14820_v62 }
 0xa16   :  { %8643 = vmatpush3.msk.msra.mxu1 %vm14797_vm4, %v14515_v43  ;;  %8595 = vmatprep.subr.mxu0 %v14479_v55 }
 0xa17   :  { %8644 = vmatprep.subr.mxu1 %v14479_v55  ;;  %8596 = vmatpush3.msra.mxu0 %v14821_v45 }
 0xa18   :  { %8645 = vmatpush3.msk.msra.mxu1 %vm14800_vm6, %v14515_v43  ;;  %8597 = vmatprep.subr.mxu0 %v14479_v55 }
 0xa19   :  { %8646 = vmatprep.subr.mxu1 %v14479_v55  ;;  %8598 = vmatpush3.msra.mxu0 %v14822_v26  ;;  %v9533_v26 = vmov 9  }
 0xa1a   :  { %8647 = vmatpush3.msk.msra.mxu1 %vm14803_vm7, %v14515_v43  ;;  %8599 = vmatprep.subr.mxu0 %v14479_v55 }
 0xa1b   :  { %8648 = vmatprep.subr.mxu1 %v14479_v55  ;;  %8600 = vmatpush3.msra.mxu0 %v14823_v24  ;;  %v9534_v24 = vmov 10  }
 0xa1c   :  { %8601 = vmatprep.mubr.msk.f32.mxu0 %vm14552_vm5, %v14479_v55  ;;  %8649 = vmatpush3.msk.msra.mxu1 %vm14806_vm1, %v14515_v43 }
 0xa1d   :  { %8602 = vmatmul.mubr.f32.vlgmr.msra.gmra.mxu0 %v13107_v16  ;;  %8623 = vmatprep.subr.mxu0 %v14479_v55  ;;  %v5603_v16 = vand.u32 4294901760, %v13366_v11 }
 0xa1e   :  { %8650 = vmatprep.subr.mxu1 %v14479_v55  ;;  %8624 = vmatpush3.msra.mxu0 %v14824_v63  ;;  %v5467_v63 = vadd.f32 1.0, %v3394_v28 }
 0xa1f   :  { %8651 = vmatpush3.msk.msra.mxu1 %vm14809_vm9, %v14515_v43  ;;  %8625 = vmatprep.subr.mxu0 %v14479_v55  ;;  %v5604_v17 = vsub.f32 %v13366_v11, %v5603_v16 }
 0xa20   :  { %8652 = vmatprep.subr.mxu1 %v14479_v55  ;;  %8626 = vmatpush3.msra.mxu0 %v14826_v40 }
 0xa21   :  { %8653 = vmatpush3.msk.msra.mxu1 %vm14811_vm11, %v14515_v43  ;;  %8627 = vmatprep.subr.mxu0 %v14479_v55  ;;  %v5605_v9 = vand.u32 4294901760, %v5604_v17 }
 0xa22   :  { %8654 = vmatprep.subr.mxu1 %v14479_v55  ;;  %8628 = vmatpush3.msra.mxu0 %v14828_v15 }
 0xa23   :  { %8655 = vmatpush3.msk.msra.mxu1 %vm14813_vm0, %v14515_v43  ;;  %8629 = vmatprep.subr.mxu0 %v14479_v55 }
 0xa24   :  { %8656 = vmatprep.subr.mxu1 %v14479_v55  ;;  %8630 = vmatpush3.msra.mxu0 %v14830_v48 }
 0xa25   :  { %8657 = vmatpush3.msk.msra.mxu1 %vm14815_vm2, %v14515_v43  ;;  %8658 = vmatprep.mubr.msk.f32.mxu1 %vm14552_vm5, %v14479_v55  ;;  %v5624_v43 = vand.u32 4294901760, %v13413_v33 }
 0xa26   :  { %8631 = vmatprep.subr.mxu0 %v14479_v55  ;;  %8659 = vmatmul.mubr.f32.vlgmr.msra.gmra.mxu1 %v13104_v37 }
 0xa27   :  { %8680 = vmatprep.subr.mxu1 %v14479_v55  ;;  %8632 = vmatpush3.msra.mxu0 %v14832_v13  ;;  %v5625_v54 = vsub.f32 %v13413_v33, %v5624_v43 }
 0xa28   :  { %8681 = vmatpush3.msra.mxu1 %v5598_v41  ;;  %8633 = vmatprep.subr.mxu0 %v14479_v55 }
 0xa29   :  { %8682 = vmatprep.subr.mxu1 %v14479_v55  ;;  %8634 = vmatpush3.msra.mxu0 %v14833_v36  ;;  %v5626_v31 = vand.u32 4294901760, %v5625_v54 }
 0xa2a   :  { %8683 = vmatpush3.msra.mxu1 %v5605_v9  ;;  %8635 = vmatprep.subr.mxu0 %v14479_v55 }
 0xa2b   :  { %8684 = vmatprep.subr.mxu1 %v14479_v55  ;;  %8636 = vmatpush3.msra.mxu0 %v14834_v58 }
 0xa2c   :  { %8685 = vmatpush3.msra.mxu1 %v5612_v46  ;;  %8637 = vmatprep.subr.mxu0 %v14479_v55 }
 0xa2d   :  { %8686 = vmatprep.subr.mxu1 %v14479_v55  ;;  %8638 = vmatpush3.msra.mxu0 %v14835_v8 }
 0xa2e   :  { %8639 = vmatprep.mubr.msk.f32.mxu0 %vm14552_vm5, %v14479_v55  ;;  %8687 = vmatpush3.msra.mxu1 %v5619_v18 }
 0xa2f   :  { %8640 = vmatmul.mubr.f32.vlgmr.msra.gmra.mxu0 %v13104_v37  ;;  %8661 = vmatprep.subr.mxu0 %v14479_v55  ;;  %v5640_v37 = vand.u32 4294901760, %v5639_v57 }
 0xa30   :  { %8688 = vmatprep.subr.mxu1 %v14479_v55  ;;  %8662 = vmatpush3.msra.mxu0 %v13326_v59 }
 0xa31   :  { %8689 = vmatpush3.msra.mxu1 %v5626_v31  ;;  %8663 = vmatprep.subr.mxu0 %v14479_v55 }
 0xa32   :  { %8690 = vmatprep.subr.mxu1 %v14479_v55  ;;  %8664 = vmatpush3.msra.mxu0 %v13335_v10 }
 0xa33   :  { %8691 = vmatpush3.msra.mxu1 %v5633_v27  ;;  %8665 = vmatprep.subr.mxu0 %v14479_v55 }
 0xa34   :  { %8692 = vmatprep.subr.mxu1 %v14479_v55  ;;  %8666 = vmatpush3.msra.mxu0 %v13344_v39 }
 0xa35   :  { %8693 = vmatpush3.msra.mxu1 %v5640_v37  ;;  %8667 = vmatprep.subr.mxu0 %v14479_v55 }
 0xa36   :  { %8694 = vmatprep.subr.mxu1 %v14479_v55  ;;  %8668 = vmatpush3.msra.mxu0 %v13357_v14 }
 0xa37   :  { %8695 = vmatpush3.msra.mxu1 %v5647_v51  ;;  %8669 = vmatprep.subr.mxu0 %v14479_v55 }
 0xa38   :  { %8670 = vmatpush3.msra.mxu0 %v13378_v21  ;;  %9154 = vset.pattern.permute.xlu1 %v9531_v4 }
 0xa39   :  { %8671 = vmatprep.subr.mxu0 %v14479_v55  ;;  %8696 = vmatprep.mubr.msk.f32.mxu1 %vm14552_vm5, %v14479_v55 }
 0xa3a   :  { %8672 = vmatpush3.msra.mxu0 %v13392_v50  ;;  %8718 = vmatprep.subr.mxu1 %v14479_v55 }
 0xa3b   :  { %8673 = vmatprep.subr.mxu0 %v14479_v55  ;;  %8677 = vmatprep.mubr.msk.f32.mxu0 %vm14552_vm5, %v14479_v55 }
 0xa3c   :  { %8674 = vmatpush3.msra.mxu0 %v13405_v30  ;;  %9158 = vset.pattern.permute.xlu0 %v9532_v35 }
 0xa3d   :  { %8675 = vmatprep.subr.mxu0 %v14479_v55 }
 0xa3e   :  { %8676 = vmatpush3.msra.mxu0 %v13422_v12 }
 0xa3f   :  { %8699 = vmatprep.subr.mxu0 %v14479_v55 }
 0xa5e   :  { %v4465_v2 = vpop.xlane.xlu0 %4464 }
 0xa5f   :  { %9451 = vrcp.f32 %v4465_v2 }
 0xa6c   :  { %v9452_v62 = vpop.eup %9451 }
 0xa6d   :  { %v4467_v45 = vmul.f32 %v9452_v62, %v13094_v49 }
 0xa6f   :  { %5451 = vperm.xlu1 %9154, %v4467_v45  }
 0xa73   :  { %9155 = vset.pattern.permute.xlu1 %v9533_v26 }
 0xa74   :  { %5456 = vperm.xlu1 %9155, %v4467_v45  }
 0xa78   :  { %9156 = vset.pattern.permute.xlu1 %v9534_v24 }
 0xa79   :  { %5462 = vperm.xlu1 %9156, %v4467_v45  }
 0xa7d   :  { %9157 = vset.pattern.permute.xlu1 %v9532_v35 }
 0xa7e   :  { %5473 = vperm.xlu1 %9157, %v5467_v63  }
 0xa8e   :  { %v4645_v23 = vpop.f32.mrf.mxu1 }
 0xa90   :  { %v8470_v40 = vpop.f32.mrf.mxu1 }
 0xa96   :  { %v4542_v6 = vpop.f32.mrf.mxu0 }
 0xa97   :  { %v4646_v15 = vadd.f32 %v4645_v23, %v4542_v6 }
 0xa98   :  { %v8451_v20 = vpop.f32.mrf.mxu0 }
 0xa9e   :  { %v4798_v52 = vpop.f32.mrf.mxu1 }
 0xaa0   :  { %v8508_v48 = vpop.f32.mrf.mxu1 }
 0xaa7   :  { %v4725_v49 = vpop.f32.mrf.mxu0 }
 0xaa8   :  { %v4726_v17 = vadd.f32 %v4725_v49, %v4646_v15 }
 0xaa9   :  { %v8489_v38 = vpop.f32.mrf.mxu0 }
 0xaaa   :  { %v4799_v41 = vadd.f32 %v4798_v52, %v4726_v17 }
 0xab0   :  { %v4956_v34 = vpop.f32.mrf.mxu1 }
 0xab2   :  { %v8546_v13 = vpop.f32.mrf.mxu1 }
 0xab9   :  { %v4885_v9 = vpop.f32.mrf.mxu0 }
 0xaba   :  { %v4886_v61 = vadd.f32 %v4885_v9, %v4799_v41 }
 0xabb   :  { %v8527_v36 = vpop.f32.mrf.mxu0 }
 0xabc   :  { %v4957_v53 = vadd.f32 %v4956_v34, %v4886_v61 }
 0xac2   :  { %v5134_v28 = vpop.f32.mrf.mxu1 }
 0xac4   :  { %v8584_v46 = vpop.f32.mrf.mxu1 }
 0xacb   :  { %v5031_v58 = vpop.f32.mrf.mxu0 }
 0xacc   :  { %v5135_v27 = vadd.f32 %v5134_v28, %v5031_v58 }
 0xacd   :  { %v8565_v54 = vpop.f32.mrf.mxu0 }
 0xad4   :  { %v5287_v18 = vpop.f32.mrf.mxu1 }
 0xad6   :  { %v8622_v8 = vpop.f32.mrf.mxu1 }
 0xadd   :  { %v5214_v3 = vpop.f32.mrf.mxu0 }
 0xade   :  { %v5215_v37 = vadd.f32 %v5214_v3, %v5135_v27 }
 0xadf   :  { %v8603_v31 = vpop.f32.mrf.mxu0 }
 0xae0   :  { %v5288_v4 = vadd.f32 %v5287_v18, %v5215_v37 }
 0xae6   :  { %v5445_v57 = vpop.f32.mrf.mxu1 }
 0xae8   :  { %v8660_v5 = vpop.f32.mrf.mxu1 }
 0xae9   :  { %v14839_v5 = vld [vmem:[#allocation86_spill] sm:$0xff] }
 0xaea   :  { %v5452_v51 = vpop.permute.xlu1 %5451  ;;  %v13547_v37 = vand.u32 4294901760, %v14839_v5 }
 0xaeb   :  { %v5454_v24 = vmul.f32 %v5452_v51, %v4957_v53  ;;  %v14840_v51 = vld [vmem:[#allocation83_spill] sm:$0xff] }
 0xaef   :  { %v5374_v35 = vpop.f32.mrf.mxu0  ;;  %v5457_v2 = vpop.permute.xlu1 %5456 }
 0xaf0   :  { %v5375_v62 = vadd.f32 %v5374_v35, %v5288_v4  ;;  %v5459_v26 = vmul.f32 %v5457_v2, %v13100_v42  ;;  %v13554_v4 = vand.u32 4294901760, %v14840_v51  ;;  %v14841_v35 = vld [vmem:[#allocation80_spill] sm:$0xff] }
 0xaf1   :  { %v8641_v45 = vpop.f32.mrf.mxu0  ;;  %v13561_v2 = vand.u32 4294901760, %v14841_v35 }
 0xaf2   :  { %v5446_v63 = vadd.f32 %v5445_v57, %v5375_v62  ;;  %v5460_v40 = vadd.f32 %v5459_v26, %v5454_v24  ;;  %v14843_v24 = vld [vmem:[#allocation74_spill] sm:$0xff] }
 0xaf3   :  { %v13588_v26 = vsub.f32 %v14841_v35, %v13561_v2 }
 0xaf4   :  { %v5463_v23 = vpop.permute.xlu1 %5462 }
 0xaf5   :  { %v5465_v6 = vmul.f32 %v5463_v23, %v5446_v63  ;;  %v14844_v63 = vld [vmem:[#allocation70_spill] sm:$0xff] }
 0xaf6   :  { %v13604_v23 = vand.u32 4294901760, %v14844_v63 }
 0xaf7   :  { %v5466_v15 = vadd.f32 %v5465_v6, %v5460_v40  ;;  %v14846_v6 = vld [vmem:[#allocation14_spill] sm:$0xff] }
 0xaf9   :  { %v5468_v20 = vmax.f32 %v5466_v15, 1e-30  ;;  %v5474_v49 = vpop.permute.xlu1 %5473  ;;  %v13632_v15 = vand.u32 4294901760, %v14846_v6 }
 0xafb   :  { %9453 = vlog2.f32 %v5468_v20 }
 0xb08   :  { %v9454_v52 = vpop.eup %9453 }
 0xb09   :  { %v5470_v48 = vmul.f32 0.6931472, %v9454_v52 }
 0xb0b   :  { %v5476_v17 = vmul.f32 %v5474_v49, %v5470_v48 }
 0xb0d   :  { %v5477_v38 = vmul.f32 1.442695, %v5476_v17 }
 0xb0f   :  { %9455 = vpow2.f32 %v5477_v38 }
 0xb1c   :  { %v9456_v41 = vpop.eup %9455 }
 0xb1d   :  { %v5479_v34 = vsel %vm14836_vm12, %v9456_v41, 0.0 }
 0xb1e   :  { %5480 = vadd.xlane.f32.xlu0 %v5479_v34 }
 0xba7   :  { %v5481_v13 = vpop.xlane.xlu0 %5480 }
 0xba8   :  { %v5482_v42 = vsel %vm14837_vm15, %v5481_v13, 0.0 }
 0xba9   :  { %v5483_v9 = vrot.slane %v5482_v42, 4 }
 0xbab   :  { %v5484_v61 = vadd.f32 %v5483_v9, %v5482_v42 }
 0xbad   :  { %v5485_v36 = vrot.slane %v5484_v61, 2 }
 0xbaf   :  { %v5486_v53 = vadd.f32 %v5485_v36, %v5484_v61 }
 0xbb1   :  { %v5487_v28 = vrot.slane %v5486_v53, 1 }
 0xbb3   :  { %v5488_v46 = vadd.f32 %v5487_v28, %v5486_v53 }
 0xbb5   :  { %9457 = vrcp.f32 %v5488_v46 }
 0xbc2   :  { %v9458_v58 = vpop.eup %9457 }
 0xbc3   :  { %v13511_v54 = vmul.f32 %v9458_v58, %v9456_v41  ;;  %v14848_v58 = vld [vmem:[#allocation89_spill] sm:$0xff] }
 0xbc5   :  { %v5492_v18 = vsel %vm14838_vm3, %v13511_v54, 0  ;;  %v6033_v49 = vrot.slane %v13511_v54, 1 }
 0xbc6   :  { %v13515_v8 = vand.u32 4294901760, %v5492_v18 }
 0xbc7   :  { %v6034_v41 = vsel %vm14847_vm8, %v6033_v49, 0 }
 0xbc8   :  { %v5568_v3 = vsub.f32 %v5492_v18, %v13515_v8  ;;  %8697 = vmatmul.mubr.f32.vlgmr.msra.gmra.mxu1 %v13515_v8  ;;  %v13755_v18 = vand.u32 4294901760, %v14848_v58 }
 0xbc9   :  { %8719 = vmatpush3.msra.mxu1 %v13326_v59  ;;  %8734 = vmatprep.mubr.msk.f32.mxu1 %vm14552_vm5, %v14479_v55 }
 0xbca   :  { %8720 = vmatprep.subr.mxu1 %v14479_v55  ;;  %v5569_v31 = vand.u32 4294901760, %v5568_v3 }
 0xbcb   :  { %8721 = vmatpush3.msra.mxu1 %v13335_v10 }
 0xbcc   :  { %8722 = vmatprep.subr.mxu1 %v14479_v55  ;;  %v5570_v57 = vsub.f32 %v5568_v3, %v5569_v31 }
 0xbcd   :  { %8723 = vmatpush3.msra.mxu1 %v13344_v39 }
 0xbce   :  { %8724 = vmatprep.subr.mxu1 %v14479_v55  ;;  %v5571_v27 = vand.u32 4294901760, %v5570_v57 }
 0xbcf   :  { %8725 = vmatpush3.msra.mxu1 %v13357_v14 }
 0xbd0   :  { %8726 = vmatprep.subr.mxu1 %v14479_v55  ;;  %8678 = vmatmul.mubr.f32.vlgmr.msra.gmra.mxu0 %v5571_v27  ;;  %v13775_v27 = vsub.f32 %v14848_v58, %v13755_v18  ;;  %v14860_v58 = vld [vmem:[#allocation85_spill] sm:$0xff] }
 0xbd1   :  { %8700 = vmatpush3.msra.mxu0 %v13352_v56  ;;  %8727 = vmatpush3.msra.mxu1 %v13378_v21 }
 0xbd2   :  { %8701 = vmatprep.subr.mxu0 %v14479_v55  ;;  %8728 = vmatprep.subr.mxu1 %v14479_v55 }
 0xbd3   :  { %8702 = vmatpush3.msra.mxu0 %v13366_v11  ;;  %8729 = vmatpush3.msra.mxu1 %v13392_v50 }
 0xbd4   :  { %8703 = vmatprep.subr.mxu0 %v14479_v55  ;;  %8730 = vmatprep.subr.mxu1 %v14479_v55 }
 0xbd5   :  { %8704 = vmatpush3.msra.mxu0 %v13375_v7  ;;  %8731 = vmatpush3.msra.mxu1 %v13405_v30 }
 0xbd6   :  { %8705 = vmatprep.subr.mxu0 %v14479_v55  ;;  %8732 = vmatprep.subr.mxu1 %v14479_v55 }
 0xbd7   :  { %8706 = vmatpush3.msra.mxu0 %v13389_v25  ;;  %8733 = vmatpush3.msra.mxu1 %v13422_v12 }
 0xbd8   :  { %8707 = vmatprep.subr.mxu0 %v14479_v55  ;;  %8735 = vmatmul.mubr.f32.vlgmr.msra.gmra.mxu1 %v5569_v31  ;;  %v14850_v31 = vld [vmem:[#allocation84_spill] sm:$0xff] }
 0xbd9   :  { %8756 = vmatprep.subr.mxu1 %v14479_v55  ;;  %8708 = vmatpush3.msra.mxu0 %v13413_v33  ;;  %v13769_v57 = vand.u32 4294901760, %v14850_v31 }
 0xbda   :  { %8757 = vmatpush3.msra.mxu1 %v13326_v59  ;;  %8709 = vmatprep.subr.mxu0 %v14479_v55  ;;  %v13567_v59 = vsub.f32 %v14839_v5, %v13547_v37  ;;  %v14851_v5 = vld [vmem:[#allocation82_spill] sm:$0xff] }
 0xbdb   :  { %8758 = vmatprep.subr.mxu1 %v14479_v55  ;;  %8710 = vmatpush3.msra.mxu0 %v13431_v32  ;;  %v13797_v35 = vsub.f32 %v14850_v31, %v13769_v57 }
 0xbdc   :  { %8759 = vmatpush3.msra.mxu1 %v13335_v10  ;;  %8711 = vmatprep.subr.mxu0 %v14479_v55  ;;  %v14842_v10 = vld [vmem:[#allocation77_spill] sm:$0xff]  ;;  %v6138_v45 = vand.u32 4294901760, %v13567_v59 }
 0xbdd   :  { %8760 = vmatprep.subr.mxu1 %v14479_v55  ;;  %8712 = vmatpush3.msra.mxu0 %v13443_v0  ;;  %v13572_v62 = vand.u32 4294901760, %v14842_v10 }
 0xbde   :  { %8761 = vmatpush3.msra.mxu1 %v13344_v39  ;;  %8713 = vmatprep.subr.mxu0 %v14479_v55  ;;  %v13579_v39 = vsub.f32 %v14840_v51, %v13554_v4  ;;  %v6139_v11 = vsub.f32 %v13567_v59, %v6138_v45 }
 0xbdf   :  { %8762 = vmatprep.subr.mxu1 %v14479_v55  ;;  %8714 = vmatpush3.msra.mxu0 %v13454_v47 }
 0xbe0   :  { %8715 = vmatprep.mubr.msk.f32.mxu0 %vm14552_vm5, %v14479_v55  ;;  %8763 = vmatpush3.msra.mxu1 %v13357_v14  ;;  %v13591_v14 = vand.u32 4294901760, %v14843_v24  ;;  %v6145_v56 = vand.u32 4294901760, %v13579_v39  ;;  %v6140_v25 = vand.u32 4294901760, %v6139_v11 }
 0xbe1   :  { %8716 = vmatmul.mubr.f32.vlgmr.msra.gmra.mxu0 %v5568_v3  ;;  %8737 = vmatprep.subr.mxu0 %v14479_v55 }
 0xbe2   :  { %8764 = vmatprep.subr.mxu1 %v14479_v55  ;;  %8738 = vmatpush3.msra.mxu0 %v5596_v60  ;;  %v13601_v60 = vsub.f32 %v14842_v10, %v13572_v62  ;;  %v6146_v7 = vsub.f32 %v13579_v39, %v6145_v56 }
 0xbe3   :  { %8765 = vmatpush3.msra.mxu1 %v13378_v21  ;;  %8739 = vmatprep.subr.mxu0 %v14479_v55  ;;  %v6152_v21 = vand.u32 4294901760, %v13588_v26 }
 0xbe4   :  { %8766 = vmatprep.subr.mxu1 %v14479_v55  ;;  %8740 = vmatpush3.msra.mxu0 %v5603_v16  ;;  %v14845_v16 = vld [vmem:[#allocation68_spill] sm:$0xff]  ;;  %v6147_v52 = vand.u32 4294901760, %v6146_v7 }
 0xbe5   :  { %8767 = vmatpush3.msra.mxu1 %v13392_v50  ;;  %8741 = vmatprep.subr.mxu0 %v14479_v55  ;;  %v13616_v40 = vand.u32 4294901760, %v14845_v16  ;;  %v13622_v50 = vsub.f32 %v14843_v24, %v13591_v14 }
 0xbe6   :  { %8768 = vmatprep.subr.mxu1 %v14479_v55  ;;  %8742 = vmatpush3.msra.mxu0 %v5610_v29  ;;  %v6159_v29 = vand.u32 4294901760, %v13601_v60 }
 0xbe7   :  { %8769 = vmatpush3.msra.mxu1 %v13405_v30  ;;  %8743 = vmatprep.subr.mxu0 %v14479_v55  ;;  %v13639_v30 = vsub.f32 %v14844_v63, %v13604_v23  ;;  %v13652_v20 = vsub.f32 %v14845_v16, %v13616_v40 }
 0xbe8   :  { %8770 = vmatprep.subr.mxu1 %v14479_v55  ;;  %8744 = vmatpush3.msra.mxu0 %v5617_v1  ;;  %v6153_v1 = vsub.f32 %v13588_v26, %v6152_v21  ;;  %v6160_v48 = vsub.f32 %v13601_v60, %v6159_v29 }
 0xbe9   :  { %8771 = vmatpush3.msra.mxu1 %v13422_v12  ;;  %8772 = vmatprep.mubr.msk.f32.mxu1 %vm14552_vm5, %v14479_v55  ;;  %v6166_v12 = vand.u32 4294901760, %v13622_v50  ;;  %v6173_v33 = vand.u32 4294901760, %v13639_v30 }
 0xbea   :  { %8745 = vmatprep.subr.mxu0 %v14479_v55  ;;  %8773 = vmatmul.mubr.f32.vlgmr.msra.gmra.mxu1 %v13515_v8  ;;  %v6154_v17 = vand.u32 4294901760, %v6153_v1  ;;  %v6161_v38 = vand.u32 4294901760, %v6160_v48  ;;  %v6574_v1 = vrot.slane %v13511_v54, 2 }
 0xbeb   :  { %8794 = vmatprep.subr.mxu1 %v14479_v55  ;;  %8746 = vmatpush3.msra.mxu0 %v5624_v43  ;;  %v13665_v43 = vsub.f32 %v14846_v6, %v13632_v15  ;;  %v6167_v32 = vsub.f32 %v13622_v50, %v6166_v12  ;;  %v6174_v0 = vsub.f32 %v13639_v30, %v6173_v33 }
 0xbec   :  { %8795 = vmatpush3.msra.mxu1 %v6140_v25  ;;  %8747 = vmatprep.subr.mxu0 %v14479_v55 }
 0xbed   :  { %8796 = vmatprep.subr.mxu1 %v14479_v55  ;;  %8748 = vmatpush3.msra.mxu0 %v5631_v22  ;;  %v6180_v22 = vand.u32 4294901760, %v13652_v20  ;;  %v6168_v34 = vand.u32 4294901760, %v6167_v32  ;;  %v6175_v13 = vand.u32 4294901760, %v6174_v0 }
 0xbee   :  { %8797 = vmatpush3.msra.mxu1 %v6147_v52  ;;  %8749 = vmatprep.subr.mxu0 %v14479_v55 }
 0xbef   :  { %8798 = vmatprep.subr.mxu1 %v14479_v55  ;;  %8750 = vmatpush3.msra.mxu0 %v5638_v19  ;;  %v6187_v19 = vand.u32 4294901760, %v13665_v43  ;;  %v6181_v47 = vsub.f32 %v13652_v20, %v6180_v22 }
 0xbf0   :  { %8799 = vmatpush3.msra.mxu1 %v6154_v17  ;;  %8751 = vmatprep.subr.mxu0 %v14479_v55 }
 0xbf1   :  { %8800 = vmatprep.subr.mxu1 %v14479_v55  ;;  %8752 = vmatpush3.msra.mxu0 %v5645_v44  ;;  %v13691_v44 = vand.u32 4294901760, %v6034_v41  ;;  %v6188_v42 = vsub.f32 %v13665_v43, %v6187_v19  ;;  %v6182_v9 = vand.u32 4294901760, %v6181_v47 }
 0xbf2   :  { %8753 = vmatprep.mubr.msk.f32.mxu0 %vm14552_vm5, %v14479_v55  ;;  %8801 = vmatpush3.msra.mxu1 %v6161_v38 }
 0xbf3   :  { %8754 = vmatmul.mubr.f32.vlgmr.msra.gmra.mxu0 %v13515_v8  ;;  %8775 = vmatprep.subr.mxu0 %v14479_v55  ;;  %v13703_v61 = vsub.f32 %v6034_v41, %v13691_v44  ;;  %v6189_v36 = vand.u32 4294901760, %v6188_v42  ;;  %v14849_v8 = vld [vmem:[#allocation87_spill] sm:$0xff] }
 0xbf4   :  { %8802 = vmatprep.subr.mxu1 %v14479_v55  ;;  %8776 = vmatpush3.msra.mxu0 %v13547_v37  ;;  %v13762_v3 = vand.u32 4294901760, %v14849_v8  ;;  %v14857_v42 = vld [vmem:[#allocation91_spill] sm:$0xff] }
 0xbf5   :  { %8803 = vmatpush3.msra.mxu1 %v6168_v34  ;;  %8777 = vmatprep.subr.mxu0 %v14479_v55  ;;  %v6111_v53 = vand.u32 4294901760, %v13703_v61 }
 0xbf6   :  { %8804 = vmatprep.subr.mxu1 %v14479_v55  ;;  %8778 = vmatpush3.msra.mxu0 %v13554_v4  ;;  %v13787_v51 = vsub.f32 %v14849_v8, %v13762_v3 }
 0xbf7   :  { %8805 = vmatpush3.msra.mxu1 %v6175_v13  ;;  %8779 = vmatprep.subr.mxu0 %v14479_v55  ;;  %v6112_v28 = vsub.f32 %v13703_v61, %v6111_v53 }
 0xbf8   :  { %8806 = vmatprep.subr.mxu1 %v14479_v55  ;;  %8780 = vmatpush3.msra.mxu0 %v13561_v2 }
 0xbf9   :  { %8807 = vmatpush3.msra.mxu1 %v6182_v9  ;;  %8781 = vmatprep.subr.mxu0 %v14479_v55  ;;  %v6113_v46 = vand.u32 4294901760, %v6112_v28  ;;  %v13964_v9 = vand.u32 4294901760, %v14857_v42 }
 0xbfa   :  { %8808 = vmatprep.subr.mxu1 %v14479_v55  ;;  %8782 = vmatpush3.msra.mxu0 %v13572_v62 }
 0xbfb   :  { %8809 = vmatpush3.msra.mxu1 %v6189_v36  ;;  %8810 = vmatprep.mubr.msk.f32.mxu1 %vm14552_vm5, %v14479_v55 }
 0xbfc   :  { %8783 = vmatprep.subr.mxu0 %v14479_v55  ;;  %8811 = vmatmul.mubr.f32.vlgmr.msra.gmra.mxu1 %v13691_v44 }
 0xbfd   :  { %8832 = vmatprep.subr.mxu1 %v14479_v55  ;;  %8784 = vmatpush3.msra.mxu0 %v13591_v14 }
 0xbfe   :  { %8833 = vmatpush3.msra.mxu1 %v13547_v37  ;;  %8785 = vmatprep.subr.mxu0 %v14479_v55 }
 0xbff   :  { %8834 = vmatprep.subr.mxu1 %v14479_v55  ;;  %8786 = vmatpush3.msra.mxu0 %v13604_v23 }
 0xc00   :  { %8835 = vmatpush3.msra.mxu1 %v13554_v4  ;;  %8787 = vmatprep.subr.mxu0 %v14479_v55 }
 0xc01   :  { %8836 = vmatprep.subr.mxu1 %v14479_v55  ;;  %8788 = vmatpush3.msra.mxu0 %v13616_v40 }
 0xc02   :  { %8837 = vmatpush3.msra.mxu1 %v13561_v2  ;;  %8789 = vmatprep.subr.mxu0 %v14479_v55 }
 0xc03   :  { %8838 = vmatprep.subr.mxu1 %v14479_v55  ;;  %8790 = vmatpush3.msra.mxu0 %v13632_v15 }
 0xc04   :  { %8791 = vmatprep.mubr.msk.f32.mxu0 %vm14552_vm5, %v14479_v55  ;;  %8839 = vmatpush3.msra.mxu1 %v13572_v62 }
 0xc05   :  { %8792 = vmatmul.mubr.f32.vlgmr.msra.gmra.mxu0 %v6113_v46  ;;  %8813 = vmatprep.subr.mxu0 %v14479_v55  ;;  %v13984_v46 = vsub.f32 %v14857_v42, %v13964_v9 }
 0xc06   :  { %8840 = vmatprep.subr.mxu1 %v14479_v55  ;;  %8814 = vmatpush3.msra.mxu0 %v13567_v59  ;;  %v6686_v59 = vand.u32 4294901760, %v13787_v51 }
 0xc07   :  { %8841 = vmatpush3.msra.mxu1 %v13591_v14  ;;  %8815 = vmatprep.subr.mxu0 %v14479_v55 }
 0xc08   :  { %8842 = vmatprep.subr.mxu1 %v14479_v55  ;;  %8816 = vmatpush3.msra.mxu0 %v13579_v39 }
 0xc09   :  { %8843 = vmatpush3.msra.mxu1 %v13604_v23  ;;  %8817 = vmatprep.subr.mxu0 %v14479_v55 }
 0xc0a   :  { %8844 = vmatprep.subr.mxu1 %v14479_v55  ;;  %8818 = vmatpush3.msra.mxu0 %v13588_v26  ;;  %v6687_v26 = vsub.f32 %v13787_v51, %v6686_v59 }
 0xc0b   :  { %8845 = vmatpush3.msra.mxu1 %v13616_v40  ;;  %8819 = vmatprep.subr.mxu0 %v14479_v55 }
 0xc0c   :  { %8846 = vmatprep.subr.mxu1 %v14479_v55  ;;  %8820 = vmatpush3.msra.mxu0 %v13601_v60 }
 0xc0d   :  { %8847 = vmatpush3.msra.mxu1 %v13632_v15  ;;  %8848 = vmatprep.mubr.msk.f32.mxu1 %vm14552_vm5, %v14479_v55 }
 0xc0e   :  { %8821 = vmatprep.subr.mxu0 %v14479_v55  ;;  %8849 = vmatmul.mubr.f32.vlgmr.msra.gmra.mxu1 %v6111_v53  ;;  %v14859_v53 = vld [vmem:[#allocation88_spill] sm:$0xff] }
 0xc0f   :  { %8870 = vmatprep.subr.mxu1 %v14479_v55  ;;  %8822 = vmatpush3.msra.mxu0 %v13622_v50  ;;  %v13978_v28 = vand.u32 4294901760, %v14859_v53 }
 0xc10   :  { %8871 = vmatpush3.msra.mxu1 %v13547_v37  ;;  %8823 = vmatprep.subr.mxu0 %v14479_v55  ;;  %v13780_v37 = vand.u32 4294901760, %v14851_v5 }
 0xc11   :  { %8872 = vmatprep.subr.mxu1 %v14479_v55  ;;  %8824 = vmatpush3.msra.mxu0 %v13639_v30  ;;  %v14006_v31 = vsub.f32 %v14859_v53, %v13978_v28 }
 0xc12   :  { %8873 = vmatpush3.msra.mxu1 %v13554_v4  ;;  %8825 = vmatprep.subr.mxu0 %v14479_v55  ;;  %v6679_v4 = vand.u32 4294901760, %v13775_v27 }
 0xc13   :  { %8874 = vmatprep.subr.mxu1 %v14479_v55  ;;  %8826 = vmatpush3.msra.mxu0 %v13652_v20 }
 0xc14   :  { %8875 = vmatpush3.msra.mxu1 %v13561_v2  ;;  %8827 = vmatprep.subr.mxu0 %v14479_v55  ;;  %v14852_v2 = vld [vmem:[#allocation79_spill] sm:$0xff]  ;;  %v6680_v39 = vsub.f32 %v13775_v27, %v6679_v4 }
 0xc15   :  { %8876 = vmatprep.subr.mxu1 %v14479_v55  ;;  %8828 = vmatpush3.msra.mxu0 %v13665_v43  ;;  %v13800_v10 = vand.u32 4294901760, %v14852_v2 }
 0xc16   :  { %8829 = vmatprep.mubr.msk.f32.mxu0 %vm14552_vm5, %v14479_v55  ;;  %8877 = vmatpush3.msra.mxu1 %v13572_v62  ;;  %v13810_v62 = vsub.f32 %v14851_v5, %v13780_v37  ;;  %v6681_v60 = vand.u32 4294901760, %v6680_v39 }
 0xc17   :  { %8830 = vmatmul.mubr.f32.vlgmr.msra.gmra.mxu0 %v13703_v61  ;;  %8851 = vmatprep.subr.mxu0 %v14479_v55  ;;  %v14858_v61 = vld [vmem:[#allocation90_spill] sm:$0xff] }
 0xc18   :  { %8878 = vmatprep.subr.mxu1 %v14479_v55  ;;  %8852 = vmatpush3.msra.mxu0 %v6138_v45  ;;  %v14853_v45 = vld [vmem:[#allocation73_spill] sm:$0xff]  ;;  %v6700_v11 = vand.u32 4294901760, %v13810_v62  ;;  %v13971_v36 = vand.u32 4294901760, %v14858_v61 }
 0xc19   :  { %8879 = vmatpush3.msra.mxu1 %v13591_v14  ;;  %8853 = vmatprep.subr.mxu0 %v14479_v55  ;;  %v13813_v24 = vand.u32 4294901760, %v14853_v45  ;;  %v6693_v14 = vand.u32 4294901760, %v13797_v35 }
 0xc1a   :  { %8880 = vmatprep.subr.mxu1 %v14479_v55  ;;  %8854 = vmatpush3.msra.mxu0 %v6145_v56  ;;  %v14854_v56 = vld [vmem:[#allocation72_spill] sm:$0xff]  ;;  %v6701_v25 = vsub.f32 %v13810_v62, %v6700_v11  ;;  %v13996_v8 = vsub.f32 %v14858_v61, %v13971_v36 }
 0xc1b   :  { %8881 = vmatpush3.msra.mxu1 %v13604_v23  ;;  %8855 = vmatprep.subr.mxu0 %v14479_v55  ;;  %v13825_v63 = vand.u32 4294901760, %v14854_v56  ;;  %v13831_v23 = vsub.f32 %v14852_v2, %v13800_v10  ;;  %v6694_v7 = vsub.f32 %v13797_v35, %v6693_v14 }
 0xc1c   :  { %8882 = vmatprep.subr.mxu1 %v14479_v55  ;;  %8856 = vmatpush3.msra.mxu0 %v6152_v21  ;;  %v14855_v21 = vld [vmem:[#allocation69_spill] sm:$0xff]  ;;  %v6702_v49 = vand.u32 4294901760, %v6701_v25 }
 0xc1d   :  { %8883 = vmatpush3.msra.mxu1 %v13616_v40  ;;  %8857 = vmatprep.subr.mxu0 %v14479_v55  ;;  %v13841_v16 = vand.u32 4294901760, %v14855_v21  ;;  %v13848_v40 = vsub.f32 %v14853_v45, %v13813_v24  ;;  %v13861_v6 = vsub.f32 %v14854_v56, %v13825_v63  ;;  %v6695_v52 = vand.u32 4294901760, %v6694_v7 }
 0xc1e   :  { %8884 = vmatprep.subr.mxu1 %v14479_v55  ;;  %8858 = vmatpush3.msra.mxu0 %v6159_v29  ;;  %v6707_v29 = vand.u32 4294901760, %v13831_v23  ;;  %v7115_v7 = vrot.slane %v13511_v54, 3 }
 0xc1f   :  { %8885 = vmatpush3.msra.mxu1 %v13632_v15  ;;  %8886 = vmatprep.mubr.msk.f32.mxu1 %vm14552_vm5, %v14479_v55  ;;  %v6688_v15 = vand.u32 4294901760, %v6687_v26  ;;  %v6714_v50 = vand.u32 4294901760, %v13848_v40  ;;  %v6721_v48 = vand.u32 4294901760, %v13861_v6 }
 0xc20   :  { %8859 = vmatprep.subr.mxu0 %v14479_v55  ;;  %8887 = vmatmul.mubr.f32.vlgmr.msra.gmra.mxu1 %v13691_v44  ;;  %v6708_v30 = vsub.f32 %v13831_v23, %v6707_v29 }
 0xc21   :  { %8908 = vmatprep.subr.mxu1 %v14479_v55  ;;  %8860 = vmatpush3.msra.mxu0 %v6166_v12  ;;  %v13874_v12 = vsub.f32 %v14855_v21, %v13841_v16  ;;  %v6715_v20 = vsub.f32 %v13848_v40, %v6714_v50  ;;  %v6722_v43 = vsub.f32 %v13861_v6, %v6721_v48 }
 0xc22   :  { %8909 = vmatpush3.msra.mxu1 %v6681_v60  ;;  %8861 = vmatprep.subr.mxu0 %v14479_v55  ;;  %v6709_v32 = vand.u32 4294901760, %v6708_v30 }
 0xc23   :  { %8910 = vmatprep.subr.mxu1 %v14479_v55  ;;  %8862 = vmatpush3.msra.mxu0 %v6173_v33  ;;  %v6575_v33 = vsel %vm14856_vm14, %v6574_v1, 0  ;;  %v6728_v17 = vand.u32 4294901760, %v13874_v12  ;;  %v6716_v38 = vand.u32 4294901760, %v6715_v20  ;;  %v6723_v0 = vand.u32 4294901760, %v6722_v43 }
 0xc24   :  { %8911 = vmatpush3.msra.mxu1 %v6688_v15  ;;  %8863 = vmatprep.subr.mxu0 %v14479_v55  ;;  %v7116_v1 = vsel %vm14865_vm10, %v7115_v7, 0 }
 0xc25   :  { %8912 = vmatprep.subr.mxu1 %v14479_v55  ;;  %8864 = vmatpush3.msra.mxu0 %v6180_v22  ;;  %v13900_v22 = vand.u32 4294901760, %v6575_v33  ;;  %v6729_v41 = vsub.f32 %v13874_v12, %v6728_v17  ;;  %v14109_v30 = vand.u32 4294901760, %v7116_v1 }
 0xc26   :  { %8913 = vmatpush3.msra.mxu1 %v6695_v52  ;;  %8865 = vmatprep.subr.mxu0 %v14479_v55 }
 0xc27   :  { %8914 = vmatprep.subr.mxu1 %v14479_v55  ;;  %8866 = vmatpush3.msra.mxu0 %v6187_v19  ;;  %v13912_v19 = vsub.f32 %v6575_v33, %v13900_v22  ;;  %v6730_v34 = vand.u32 4294901760, %v6729_v41  ;;  %v14121_v20 = vsub.f32 %v7116_v1, %v14109_v30 }
 0xc28   :  { %8867 = vmatprep.mubr.msk.f32.mxu0 %vm14552_vm5, %v14479_v55  ;;  %8915 = vmatpush3.msra.mxu1 %v6702_v49 }
 0xc29   :  { %8868 = vmatmul.mubr.f32.vlgmr.msra.gmra.mxu0 %v13691_v44  ;;  %8889 = vmatprep.subr.mxu0 %v14479_v55  ;;  %v6652_v47 = vand.u32 4294901760, %v13912_v19 }
 0xc2a   :  { %8916 = vmatprep.subr.mxu1 %v14479_v55  ;;  %8890 = vmatpush3.msra.mxu0 %v13755_v18 }
 0xc2b   :  { %8917 = vmatpush3.msra.mxu1 %v6709_v32  ;;  %8891 = vmatprep.subr.mxu0 %v14479_v55  ;;  %v6653_v44 = vsub.f32 %v13912_v19, %v6652_v47  ;;  %v7193_v32 = vand.u32 4294901760, %v14121_v20 }
 0xc2c   :  { %8918 = vmatprep.subr.mxu1 %v14479_v55  ;;  %8892 = vmatpush3.msra.mxu0 %v13762_v3 }
 0xc2d   :  { %8919 = vmatpush3.msra.mxu1 %v6716_v38  ;;  %8893 = vmatprep.subr.mxu0 %v14479_v55  ;;  %v6654_v13 = vand.u32 4294901760, %v6653_v44  ;;  %v7194_v43 = vsub.f32 %v14121_v20, %v7193_v32 }
 0xc2e   :  { %8920 = vmatprep.subr.mxu1 %v14479_v55  ;;  %8894 = vmatpush3.msra.mxu0 %v13769_v57 }
 0xc2f   :  { %8921 = vmatpush3.msra.mxu1 %v6723_v0  ;;  %8895 = vmatprep.subr.mxu0 %v14479_v55 }
 0xc30   :  { %8922 = vmatprep.subr.mxu1 %v14479_v55  ;;  %8896 = vmatpush3.msra.mxu0 %v13780_v37 }
 0xc31   :  { %8923 = vmatpush3.msra.mxu1 %v6730_v34  ;;  %8924 = vmatprep.mubr.msk.f32.mxu1 %vm14552_vm5, %v14479_v55 }
 0xc32   :  { %8897 = vmatprep.subr.mxu0 %v14479_v55  ;;  %8925 = vmatmul.mubr.f32.vlgmr.msra.gmra.mxu1 %v13900_v22 }
 0xc33   :  { %8946 = vmatprep.subr.mxu1 %v14479_v55  ;;  %8898 = vmatpush3.msra.mxu0 %v13800_v10 }
 0xc34   :  { %8947 = vmatpush3.msra.mxu1 %v13755_v18  ;;  %8899 = vmatprep.subr.mxu0 %v14479_v55 }
 0xc35   :  { %8948 = vmatprep.subr.mxu1 %v14479_v55  ;;  %8900 = vmatpush3.msra.mxu0 %v13813_v24 }
 0xc36   :  { %8949 = vmatpush3.msra.mxu1 %v13762_v3  ;;  %8901 = vmatprep.subr.mxu0 %v14479_v55 }
 0xc37   :  { %8950 = vmatprep.subr.mxu1 %v14479_v55  ;;  %8902 = vmatpush3.msra.mxu0 %v13825_v63 }
 0xc38   :  { %8951 = vmatpush3.msra.mxu1 %v13769_v57  ;;  %8903 = vmatprep.subr.mxu0 %v14479_v55 }
 0xc39   :  { %8952 = vmatprep.subr.mxu1 %v14479_v55  ;;  %8904 = vmatpush3.msra.mxu0 %v13841_v16 }
 0xc3a   :  { %8905 = vmatprep.mubr.msk.f32.mxu0 %vm14552_vm5, %v14479_v55  ;;  %8953 = vmatpush3.msra.mxu1 %v13780_v37 }
 0xc3b   :  { %8906 = vmatmul.mubr.f32.vlgmr.msra.gmra.mxu0 %v6654_v13  ;;  %8927 = vmatprep.subr.mxu0 %v14479_v55 }
 0xc3c   :  { %8954 = vmatprep.subr.mxu1 %v14479_v55  ;;  %8928 = vmatpush3.msra.mxu0 %v13775_v27  ;;  %v7227_v27 = vand.u32 4294901760, %v13996_v8 }
 0xc3d   :  { %8955 = vmatpush3.msra.mxu1 %v13800_v10  ;;  %8929 = vmatprep.subr.mxu0 %v14479_v55 }
 0xc3e   :  { %8956 = vmatprep.subr.mxu1 %v14479_v55  ;;  %8930 = vmatpush3.msra.mxu0 %v13787_v51 }
 0xc3f   :  { %8957 = vmatpush3.msra.mxu1 %v13813_v24  ;;  %8931 = vmatprep.subr.mxu0 %v14479_v55 }
 0xc40   :  { %8958 = vmatprep.subr.mxu1 %v14479_v55  ;;  %8932 = vmatpush3.msra.mxu0 %v13797_v35  ;;  %v7228_v35 = vsub.f32 %v13996_v8, %v7227_v27 }
 0xc41   :  { %8959 = vmatpush3.msra.mxu1 %v13825_v63  ;;  %8933 = vmatprep.subr.mxu0 %v14479_v55 }
 0xc42   :  { %8960 = vmatprep.subr.mxu1 %v14479_v55  ;;  %8934 = vmatpush3.msra.mxu0 %v13810_v62 }
 0xc43   :  { %8961 = vmatpush3.msra.mxu1 %v13841_v16  ;;  %8962 = vmatprep.mubr.msk.f32.mxu1 %vm14552_vm5, %v14479_v55 }
 0xc44   :  { %8935 = vmatprep.subr.mxu0 %v14479_v55  ;;  %8963 = vmatmul.mubr.f32.vlgmr.msra.gmra.mxu1 %v6652_v47 }
 0xc45   :  { %8984 = vmatprep.subr.mxu1 %v14479_v55  ;;  %8936 = vmatpush3.msra.mxu0 %v13831_v23 }
 0xc46   :  { %8985 = vmatpush3.msra.mxu1 %v13755_v18  ;;  %8937 = vmatprep.subr.mxu0 %v14479_v55  ;;  %v13989_v18 = vand.u32 4294901760, %v14860_v58 }
 0xc47   :  { %8986 = vmatprep.subr.mxu1 %v14479_v55  ;;  %8938 = vmatpush3.msra.mxu0 %v13848_v40 }
 0xc48   :  { %8987 = vmatpush3.msra.mxu1 %v13762_v3  ;;  %8939 = vmatprep.subr.mxu0 %v14479_v55  ;;  %v7220_v3 = vand.u32 4294901760, %v13984_v46 }
 0xc49   :  { %8988 = vmatprep.subr.mxu1 %v14479_v55  ;;  %8940 = vmatpush3.msra.mxu0 %v13861_v6 }
 0xc4a   :  { %8989 = vmatpush3.msra.mxu1 %v13769_v57  ;;  %8941 = vmatprep.subr.mxu0 %v14479_v55  ;;  %v14861_v57 = vld [vmem:[#allocation81_spill] sm:$0xff]  ;;  %v7221_v51 = vsub.f32 %v13984_v46, %v7220_v3 }
 0xc4b   :  { %8990 = vmatprep.subr.mxu1 %v14479_v55  ;;  %8942 = vmatpush3.msra.mxu0 %v13874_v12  ;;  %v14009_v5 = vand.u32 4294901760, %v14861_v57 }
 0xc4c   :  { %8943 = vmatprep.mubr.msk.f32.mxu0 %vm14552_vm5, %v14479_v55  ;;  %8991 = vmatpush3.msra.mxu1 %v13780_v37  ;;  %v14019_v37 = vsub.f32 %v14860_v58, %v13989_v18  ;;  %v7222_v62 = vand.u32 4294901760, %v7221_v51 }
 0xc4d   :  { %8944 = vmatmul.mubr.f32.vlgmr.msra.gmra.mxu0 %v13912_v19  ;;  %8965 = vmatprep.subr.mxu0 %v14479_v55 }
 0xc4e   :  { %8992 = vmatprep.subr.mxu1 %v14479_v55  ;;  %8966 = vmatpush3.msra.mxu0 %v6679_v4  ;;  %v14862_v4 = vld [vmem:[#allocation78_spill] sm:$0xff]  ;;  %v7241_v39 = vand.u32 4294901760, %v14019_v37 }
 0xc4f   :  { %8993 = vmatpush3.msra.mxu1 %v13800_v10  ;;  %8967 = vmatprep.subr.mxu0 %v14479_v55  ;;  %v14022_v2 = vand.u32 4294901760, %v14862_v4  ;;  %v7234_v10 = vand.u32 4294901760, %v14006_v31 }
 0xc50   :  { %8994 = vmatprep.subr.mxu1 %v14479_v55  ;;  %8968 = vmatpush3.msra.mxu0 %v6686_v59  ;;  %v14863_v59 = vld [vmem:[#allocation75_spill] sm:$0xff]  ;;  %v7242_v60 = vsub.f32 %v14019_v37, %v7241_v39 }
 0xc51   :  { %8995 = vmatpush3.msra.mxu1 %v13813_v24  ;;  %8969 = vmatprep.subr.mxu0 %v14479_v55  ;;  %v14034_v45 = vand.u32 4294901760, %v14863_v59  ;;  %v14040_v24 = vsub.f32 %v14861_v57, %v14009_v5  ;;  %v7235_v26 = vsub.f32 %v14006_v31, %v7234_v10 }
 0xc52   :  { %8996 = vmatprep.subr.mxu1 %v14479_v55  ;;  %8970 = vmatpush3.msra.mxu0 %v6693_v14  ;;  %v14864_v14 = vld [vmem:[#allocation76_spill] sm:$0xff]  ;;  %v7243_v25 = vand.u32 4294901760, %v7242_v60 }
 0xc53   :  { %8997 = vmatpush3.msra.mxu1 %v13825_v63  ;;  %8971 = vmatprep.subr.mxu0 %v14479_v55  ;;  %v14050_v56 = vand.u32 4294901760, %v14864_v14  ;;  %v14057_v63 = vsub.f32 %v14862_v4, %v14022_v2  ;;  %v14070_v21 = vsub.f32 %v14863_v59, %v14034_v45  ;;  %v7236_v15 = vand.u32 4294901760, %v7235_v26 }
 0xc54   :  { %8998 = vmatprep.subr.mxu1 %v14479_v55  ;;  %8972 = vmatpush3.msra.mxu0 %v6700_v11  ;;  %v7248_v11 = vand.u32 4294901760, %v14040_v24 }
 0xc55   :  { %8999 = vmatpush3.msra.mxu1 %v13841_v16  ;;  %9000 = vmatprep.mubr.msk.f32.mxu1 %vm14552_vm5, %v14479_v55  ;;  %v7229_v16 = vand.u32 4294901760, %v7228_v35  ;;  %v7255_v23 = vand.u32 4294901760, %v14057_v63  ;;  %v7262_v40 = vand.u32 4294901760, %v14070_v21 }
 0xc56   :  { %8973 = vmatprep.subr.mxu0 %v14479_v55  ;;  %9001 = vmatmul.mubr.f32.vlgmr.msra.gmra.mxu1 %v13900_v22  ;;  %v7249_v54 = vsub.f32 %v14040_v24, %v7248_v11 }
 0xc57   :  { %9022 = vmatprep.subr.mxu1 %v14479_v55  ;;  %8974 = vmatpush3.msra.mxu0 %v6707_v29  ;;  %v14083_v29 = vsub.f32 %v14864_v14, %v14050_v56  ;;  %v7256_v6 = vsub.f32 %v14057_v63, %v7255_v23  ;;  %v7263_v12 = vsub.f32 %v14070_v21, %v7262_v40 }
 0xc58   :  { %9023 = vmatpush3.msra.mxu1 %v7222_v62  ;;  %8975 = vmatprep.subr.mxu0 %v14479_v55  ;;  %v7250_v52 = vand.u32 4294901760, %v7249_v54 }
 0xc59   :  { %9024 = vmatprep.subr.mxu1 %v14479_v55  ;;  %8976 = vmatpush3.msra.mxu0 %v6714_v50  ;;  %v7269_v50 = vand.u32 4294901760, %v14083_v29  ;;  %v7264_v33 = vand.u32 4294901760, %v7263_v12 }
 0xc5a   :  { %9025 = vmatpush3.msra.mxu1 %v7229_v16  ;;  %8977 = vmatprep.subr.mxu0 %v14479_v55 }
 0xc5b   :  { %9026 = vmatprep.subr.mxu1 %v14479_v55  ;;  %8978 = vmatpush3.msra.mxu0 %v6721_v48  ;;  %v7257_v48 = vand.u32 4294901760, %v7256_v6  ;;  %v7270_v49 = vsub.f32 %v14083_v29, %v7269_v50 }
 0xc5c   :  { %9027 = vmatpush3.msra.mxu1 %v7236_v15  ;;  %8979 = vmatprep.subr.mxu0 %v14479_v55 }
 0xc5d   :  { %9028 = vmatprep.subr.mxu1 %v14479_v55  ;;  %8980 = vmatpush3.msra.mxu0 %v6728_v17  ;;  %v7271_v17 = vand.u32 4294901760, %v7270_v49 }
 0xc5e   :  { %8981 = vmatprep.mubr.msk.f32.mxu0 %vm14552_vm5, %v14479_v55  ;;  %9029 = vmatpush3.msra.mxu1 %v7243_v25 }
 0xc5f   :  { %8982 = vmatmul.mubr.f32.vlgmr.msra.gmra.mxu0 %v13900_v22  ;;  %9003 = vmatprep.subr.mxu0 %v14479_v55  ;;  %v7195_v22 = vand.u32 4294901760, %v7194_v43 }
 0xc60   :  { %9030 = vmatprep.subr.mxu1 %v14479_v55  ;;  %9004 = vmatpush3.msra.mxu0 %v13964_v9 }
 0xc61   :  { %9031 = vmatpush3.msra.mxu1 %v7250_v52  ;;  %9005 = vmatprep.subr.mxu0 %v14479_v55 }
 0xc62   :  { %9032 = vmatprep.subr.mxu1 %v14479_v55  ;;  %9006 = vmatpush3.msra.mxu0 %v13971_v36 }
 0xc63   :  { %9033 = vmatpush3.msra.mxu1 %v7257_v48  ;;  %9007 = vmatprep.subr.mxu0 %v14479_v55 }
 0xc64   :  { %9034 = vmatprep.subr.mxu1 %v14479_v55  ;;  %9008 = vmatpush3.msra.mxu0 %v13978_v28 }
 0xc65   :  { %9035 = vmatpush3.msra.mxu1 %v7264_v33  ;;  %9009 = vmatprep.subr.mxu0 %v14479_v55 }
 0xc66   :  { %9036 = vmatprep.subr.mxu1 %v14479_v55  ;;  %9010 = vmatpush3.msra.mxu0 %v13989_v18 }
 0xc67   :  { %9037 = vmatpush3.msra.mxu1 %v7271_v17  ;;  %9038 = vmatprep.mubr.msk.f32.mxu1 %vm14552_vm5, %v14479_v55 }
 0xc68   :  { %9011 = vmatprep.subr.mxu0 %v14479_v55  ;;  %9039 = vmatmul.mubr.f32.vlgmr.msra.gmra.mxu1 %v14109_v30 }
 0xc69   :  { %9060 = vmatprep.subr.mxu1 %v14479_v55  ;;  %9012 = vmatpush3.msra.mxu0 %v14009_v5 }
 0xc6a   :  { %9061 = vmatpush3.msra.mxu1 %v13964_v9  ;;  %9013 = vmatprep.subr.mxu0 %v14479_v55 }
 0xc6b   :  { %9062 = vmatprep.subr.mxu1 %v14479_v55  ;;  %9014 = vmatpush3.msra.mxu0 %v14022_v2 }
 0xc6c   :  { %9063 = vmatpush3.msra.mxu1 %v13971_v36  ;;  %9015 = vmatprep.subr.mxu0 %v14479_v55 }
 0xc6d   :  { %9064 = vmatprep.subr.mxu1 %v14479_v55  ;;  %9016 = vmatpush3.msra.mxu0 %v14034_v45 }
 0xc6e   :  { %9065 = vmatpush3.msra.mxu1 %v13978_v28  ;;  %9017 = vmatprep.subr.mxu0 %v14479_v55 }
 0xc6f   :  { %9066 = vmatprep.subr.mxu1 %v14479_v55  ;;  %9018 = vmatpush3.msra.mxu0 %v14050_v56 }
 0xc70   :  { %9019 = vmatprep.mubr.msk.f32.mxu0 %vm14552_vm5, %v14479_v55  ;;  %9067 = vmatpush3.msra.mxu1 %v13989_v18 }
 0xc71   :  { %9020 = vmatmul.mubr.f32.vlgmr.msra.gmra.mxu0 %v7195_v22  ;;  %9041 = vmatprep.subr.mxu0 %v14479_v55 }
 0xc72   :  { %9068 = vmatprep.subr.mxu1 %v14479_v55  ;;  %9042 = vmatpush3.msra.mxu0 %v13984_v46 }
 0xc73   :  { %9069 = vmatpush3.msra.mxu1 %v14009_v5  ;;  %9043 = vmatprep.subr.mxu0 %v14479_v55 }
 0xc74   :  { %9070 = vmatprep.subr.mxu1 %v14479_v55  ;;  %9044 = vmatpush3.msra.mxu0 %v13996_v8 }
 0xc75   :  { %9071 = vmatpush3.msra.mxu1 %v14022_v2  ;;  %9045 = vmatprep.subr.mxu0 %v14479_v55 }
 0xc76   :  { %9072 = vmatprep.subr.mxu1 %v14479_v55  ;;  %9046 = vmatpush3.msra.mxu0 %v14006_v31 }
 0xc77   :  { %9073 = vmatpush3.msra.mxu1 %v14034_v45  ;;  %9047 = vmatprep.subr.mxu0 %v14479_v55 }
 0xc78   :  { %9074 = vmatprep.subr.mxu1 %v14479_v55  ;;  %9048 = vmatpush3.msra.mxu0 %v14019_v37 }
 0xc79   :  { %9075 = vmatpush3.msra.mxu1 %v14050_v56  ;;  %9076 = vmatprep.mubr.msk.f32.mxu1 %vm14552_vm5, %v14479_v55 }
 0xc7a   :  { %9049 = vmatprep.subr.mxu0 %v14479_v55  ;;  %9077 = vmatmul.mubr.f32.vlgmr.msra.gmra.mxu1 %v7193_v32 }
 0xc7b   :  { %9098 = vmatprep.subr.mxu1 %v14479_v55  ;;  %9050 = vmatpush3.msra.mxu0 %v14040_v24 }
 0xc7c   :  { %9099 = vmatpush3.msra.mxu1 %v13964_v9  ;;  %9051 = vmatprep.subr.mxu0 %v14479_v55 }
 0xc7d   :  { %9100 = vmatprep.subr.mxu1 %v14479_v55  ;;  %9052 = vmatpush3.msra.mxu0 %v14057_v63 }
 0xc7e   :  { %9101 = vmatpush3.msra.mxu1 %v13971_v36  ;;  %9053 = vmatprep.subr.mxu0 %v14479_v55 }
 0xc7f   :  { %9102 = vmatprep.subr.mxu1 %v14479_v55  ;;  %9054 = vmatpush3.msra.mxu0 %v14070_v21 }
 0xc80   :  { %9103 = vmatpush3.msra.mxu1 %v13978_v28  ;;  %9055 = vmatprep.subr.mxu0 %v14479_v55 }
 0xc81   :  { %9104 = vmatprep.subr.mxu1 %v14479_v55  ;;  %9056 = vmatpush3.msra.mxu0 %v14083_v29 }
 0xc82   :  { %9057 = vmatprep.mubr.msk.f32.mxu0 %vm14552_vm5, %v14479_v55  ;;  %9105 = vmatpush3.msra.mxu1 %v13989_v18 }
 0xc83   :  { %9058 = vmatmul.mubr.f32.vlgmr.msra.gmra.mxu0 %v14121_v20  ;;  %9079 = vmatprep.subr.mxu0 %v14479_v55 }
 0xc84   :  { %9106 = vmatprep.subr.mxu1 %v14479_v55  ;;  %9080 = vmatpush3.msra.mxu0 %v7220_v3 }
 0xc85   :  { %9107 = vmatpush3.msra.mxu1 %v14009_v5  ;;  %9081 = vmatprep.subr.mxu0 %v14479_v55 }
 0xc86   :  { %9108 = vmatprep.subr.mxu1 %v14479_v55  ;;  %9082 = vmatpush3.msra.mxu0 %v7227_v27 }
 0xc87   :  { %9109 = vmatpush3.msra.mxu1 %v14022_v2  ;;  %9083 = vmatprep.subr.mxu0 %v14479_v55 }
 0xc88   :  { %9110 = vmatprep.subr.mxu1 %v14479_v55  ;;  %9084 = vmatpush3.msra.mxu0 %v7234_v10  ;;  %v5684_v38 = vpop.f32.mrf.mxu1 }
 0xc89   :  { %9111 = vmatpush3.msra.mxu1 %v14034_v45  ;;  %9085 = vmatprep.subr.mxu0 %v14479_v55 }
 0xc8a   :  { %9112 = vmatprep.subr.mxu1 %v14479_v55  ;;  %9086 = vmatpush3.msra.mxu0 %v7241_v39  ;;  %v8698_v41 = vpop.f32.mrf.mxu1 }
 0xc8b   :  { %9113 = vmatpush3.msra.mxu1 %v14050_v56  ;;  %9114 = vmatprep.mubr.msk.f32.mxu1 %vm14552_vm5, %v14479_v55 }
 0xc8c   :  { %9087 = vmatprep.subr.mxu0 %v14479_v55  ;;  %9115 = vmatmul.mubr.f32.vlgmr.msra.gmra.mxu1 %v14109_v30 }
 0xc8d   :  { %9088 = vmatpush3.msra.mxu0 %v7248_v11  ;;  %9095 = vmatprep.mubr.msk.f32.mxu0 %vm14552_vm5, %v14479_v55  ;;  %vm6031_vm5 = vcmask 253952  }
 0xc8e   :  { %9089 = vmatprep.subr.mxu0 %v14479_v55 }
 0xc8f   :  { %9090 = vmatpush3.msra.mxu0 %v7255_v23 }
 0xc90   :  { %9091 = vmatprep.subr.mxu0 %v14479_v55  ;;  %v5573_v0 = vpop.f32.mrf.mxu0 }
 0xc91   :  { %9092 = vmatpush3.msra.mxu0 %v7262_v40  ;;  %v5685_v9 = vadd.f32 %v5684_v38, %v5573_v0 }
 0xc92   :  { %9093 = vmatprep.subr.mxu0 %v14479_v55  ;;  %v8679_v19 = vpop.f32.mrf.mxu0 }
 0xc93   :  { %9094 = vmatpush3.msra.mxu0 %v7269_v50 }
 0xc94   :  { %9096 = vmatmul.mubr.f32.vlgmr.msra.gmra.mxu0 %v14109_v30 }
 0xc98   :  { %v5853_v34 = vpop.f32.mrf.mxu1 }
 0xc9a   :  { %v8736_v47 = vpop.f32.mrf.mxu1 }
 0xca1   :  { %v5772_v44 = vpop.f32.mrf.mxu0 }
 0xca2   :  { %v5773_v36 = vadd.f32 %v5772_v44, %v5685_v9 }
 0xca3   :  { %v8717_v13 = vpop.f32.mrf.mxu0 }
 0xca4   :  { %v5854_v53 = vadd.f32 %v5853_v34, %v5773_v36 }
 0xcaa   :  { %v6027_v42 = vpop.f32.mrf.mxu1 }
 0xcac   :  { %v8774_v61 = vpop.f32.mrf.mxu1 }
 0xcb3   :  { %v5948_v28 = vpop.f32.mrf.mxu0 }
 0xcb4   :  { %v5949_v46 = vadd.f32 %v5948_v28, %v5854_v53 }
 0xcb5   :  { %v8755_v58 = vpop.f32.mrf.mxu0 }
 0xcb6   :  { %v6028_v55 = vadd.f32 %v6027_v42, %v5949_v46 }
 0xcb8   :  { %6032 = vst.msk [vmem:[#allocation2] sm:$0x1] %vm6031_vm5, %v6028_v55 }
 0xcbc   :  { %v6226_v18 = vpop.f32.mrf.mxu1 }
 0xcbe   :  { %v8812_v8 = vpop.f32.mrf.mxu1 }
 0xcc5   :  { %v6115_v3 = vpop.f32.mrf.mxu0 }
 0xcc6   :  { %v6227_v2 = vadd.f32 %v6226_v18, %v6115_v3 }
 0xcc7   :  { %v8793_v31 = vpop.f32.mrf.mxu0 }
 0xcce   :  { %v6395_v57 = vpop.f32.mrf.mxu1 }
 0xcd0   :  { %v8850_v5 = vpop.f32.mrf.mxu1 }
 0xcd7   :  { %v6314_v27 = vpop.f32.mrf.mxu0 }
 0xcd8   :  { %v6315_v10 = vadd.f32 %v6314_v27, %v6227_v2 }
 0xcd9   :  { %v8831_v37 = vpop.f32.mrf.mxu0 }
 0xcda   :  { %v6396_v59 = vadd.f32 %v6395_v57, %v6315_v10 }
 0xce0   :  { %v6569_v4 = vpop.f32.mrf.mxu1 }
 0xce2   :  { %v8888_v51 = vpop.f32.mrf.mxu1 }
 0xce9   :  { %v6490_v45 = vpop.f32.mrf.mxu0 }
 0xcea   :  { %v6491_v24 = vadd.f32 %v6490_v45, %v6396_v59 }
 0xceb   :  { %v8869_v35 = vpop.f32.mrf.mxu0 }
 0xcec   :  { %v6570_v39 = vadd.f32 %v6569_v4, %v6491_v24 }
 0xcee   :  { %6573 = vst.msk [vmem:[#allocation2 + $0x1] sm:$0x1] %vm6031_vm5, %v6570_v39 }
 0xcf2   :  { %v6767_v14 = vpop.f32.mrf.mxu1 }
 0xcf4   :  { %v8926_v56 = vpop.f32.mrf.mxu1 }
 0xcfb   :  { %v6656_v63 = vpop.f32.mrf.mxu0 }
 0xcfc   :  { %v6768_v7 = vadd.f32 %v6767_v14, %v6656_v63 }
 0xcfd   :  { %v8907_v62 = vpop.f32.mrf.mxu0 }
 0xd04   :  { %v6936_v26 = vpop.f32.mrf.mxu1 }
 0xd06   :  { %v8964_v11 = vpop.f32.mrf.mxu1 }
 0xd0d   :  { %v6855_v21 = vpop.f32.mrf.mxu0 }
 0xd0e   :  { %v6856_v29 = vadd.f32 %v6855_v21, %v6768_v7 }
 0xd0f   :  { %v8945_v16 = vpop.f32.mrf.mxu0 }
 0xd10   :  { %v6937_v15 = vadd.f32 %v6936_v26, %v6856_v29 }
 0xd16   :  { %v7110_v60 = vpop.f32.mrf.mxu1 }
 0xd18   :  { %v9002_v23 = vpop.f32.mrf.mxu1 }
 0xd1f   :  { %v7031_v54 = vpop.f32.mrf.mxu0 }
 0xd20   :  { %v7032_v40 = vadd.f32 %v7031_v54, %v6937_v15 }
 0xd21   :  { %v8983_v25 = vpop.f32.mrf.mxu0 }
 0xd22   :  { %v7111_v1 = vadd.f32 %v7110_v60, %v7032_v40 }
 0xd24   :  { %7114 = vst.msk [vmem:[#allocation2 + $0x2] sm:$0x1] %vm6031_vm5, %v7111_v1 }
 0xd28   :  { %v7308_v6 = vpop.f32.mrf.mxu1 }
 0xd2a   :  { %v9040_v50 = vpop.f32.mrf.mxu1 }
 0xd31   :  { %v7197_v52 = vpop.f32.mrf.mxu0 }
 0xd32   :  { %v7309_v17 = vadd.f32 %v7308_v6, %v7197_v52 }
 0xd33   :  { %v9021_v12 = vpop.f32.mrf.mxu0 }
 0xd3a   :  { %v7477_v30 = vpop.f32.mrf.mxu1 }
 0xd3c   :  { %v9078_v48 = vpop.f32.mrf.mxu1 }
 0xd43   :  { %v7396_v49 = vpop.f32.mrf.mxu0 }
 0xd44   :  { %v7397_v43 = vadd.f32 %v7396_v49, %v7309_v17 }
 0xd45   :  { %v9059_v33 = vpop.f32.mrf.mxu0 }
 0xd46   :  { %v7478_v22 = vadd.f32 %v7477_v30, %v7397_v43 }
 0xd4c   :  { %v7651_v20 = vpop.f32.mrf.mxu1 }
 0xd4e   :  { %v9116_v32 = vpop.f32.mrf.mxu1 }
 0xd54   :  { %v7572_v38 = vpop.f32.mrf.mxu0 }
 0xd55   :  { %v7573_v41 = vadd.f32 %v7572_v38, %v7478_v22 }
 0xd56   :  { %v9097_v0 = vpop.f32.mrf.mxu0 }
 0xd57   :  { %v7652_v19 = vadd.f32 %v7651_v20, %v7573_v41 }
 0xd59   :  { %7655 = vst.msk [vmem:[#allocation2 + $0x3] sm:$0x1] %vm6031_vm5, %v7652_v19 }
 0xd5a   :  { %9502 = shalt.err (!%p9499_p4)
}
 0xd5b   :  { %7667 = dma.vmem_to_hbm [thread:$0]  %s7665_s4, 64, %s14239_s6, [#allocation3]  }
 0xd5c   :  { %9511 = dma.done.wait [#allocation3], 64  }
 0xd5d   :  { %9512 = vsyncadd [#allocation3], 4294967232 }
 0xd5e   :  { %7673 = vsyncpa [#allocation3], 1 }

</bundles_post_ra>
